<compile_context>
chip_gen: v6e
topology: v6e:2x2x1
jax: 0.10.0
libtpu: 0.0.40
codegen_flags: <defaults>
</compile_context>

<pallas_src>
import functools

import jax
import jax.numpy as jnp
from jax.experimental import pallas as pl
from jax.experimental.pallas import tpu as pltpu

F32 = jnp.float32
BF16 = jnp.bfloat16


def _vmem():
    return pl.BlockSpec(memory_space=pltpu.MemorySpace.VMEM)


def _apply_act(y, act):
    if act == "relu":
        return jnp.maximum(y, 0.0)
    if act == "lrelu":
        return jnp.where(y >= 0.0, y, 0.2 * y)
    if act == "tanh":
        return jnp.tanh(y)
    return y


# --------------- fused conv (+ bias + norm + activation) kernel --------------

def _conv_compute(w_ref, b_ref, g_ref, be_ref, x_ref, *, norm, act, eps):
    # w: (Cout, K) bf16, x: (K, TM) bf16, b/g/be: (Cout, 1) f32
    acc = jnp.dot(w_ref[...], x_ref[...], preferred_element_type=F32)
    acc = acc + b_ref[...]
    if norm in ("in", "adain"):
        mean = jnp.mean(acc, axis=-1, keepdims=True)
        var = jnp.mean(jnp.square(acc - mean), axis=-1, keepdims=True)
        acc = (acc - mean) * jax.lax.rsqrt(var + eps)
        acc = acc * g_ref[...] + be_ref[...]
    return _apply_act(acc, act)


def _conv_kernel(w_ref, b_ref, g_ref, be_ref, x_ref, o_ref, *, norm, act, eps):
    o_ref[...] = _conv_compute(w_ref, b_ref, g_ref, be_ref, x_ref,
                               norm=norm, act=act, eps=eps)


def _conv_pool_kernel(w_ref, b_ref, g_ref, be_ref, x_ref, o_ref, p_ref, *,
                      norm, act, eps):
    y = _conv_compute(w_ref, b_ref, g_ref, be_ref, x_ref,
                      norm=norm, act=act, eps=eps)
    o_ref[...] = y
    p_ref[...] = jnp.mean(y, axis=-1, keepdims=True)   # fused spatial pooling


def _pick_tile_m(m, allow_tiling):
    """Lane-aligned M tile (<=512) when tiling is allowed, else the full M."""
    if not allow_tiling or m % 128 != 0 or m <= 128:
        return m
    for t in (512, 256, 128):
        if t < m and m % t == 0:
            return t
    return m


def fused_conv(x, w, b, *, stride=1, pad=0, pad_mode="reflect",
               norm="none", act="none", gamma=None, beta=None,
               pooled=False, eps=1e-5):
    """PyTorch-semantics Conv2d (NCHW, weight (Cout,Cin,KH,KW)) with matmul +
    bias + InstanceNorm/AdaIN + activation fused in one Pallas call.

    Returns y (N, Cout, Ho, Wo) and, if pooled, the per-(n,c) spatial mean."""
    cout, cin, kh, kw = w.shape
    if pad > 0:
        x = jnp.pad(x, ((0, 0), (0, 0), (pad, pad), (pad, pad)), mode=pad_mode)
    n, _, hp_, wp_ = x.shape
    ho = (hp_ - kh) // stride + 1
    wo = (wp_ - kw) // stride + 1
    m = ho * wo
    k = cin * kh * kw

    # im2col in transposed (N, K, M) layout; K order (c, kh, kw) matches
    # weight.reshape(Cout, Cin*KH*KW).  No NCHW<->NHWC transposes needed.
    # TODO(synk): generate patches per M-tile inside the kernel (shifted pl.ds
    # loads from a padded activation tile) instead of materialising im2col.
    taps = []
    for i in range(kh):
        for j in range(kw):
            taps.append(x[:, :, i:i + stride * (ho - 1) + 1:stride,
                             j:j + stride * (wo - 1) + 1:stride])
    patches = jnp.stack(taps, axis=2).reshape(n, k, m).astype(BF16)

    wm = w.reshape(cout, k).astype(BF16)
    bm = b.reshape(cout, 1).astype(F32)
    if gamma is None:
        gamma = jnp.ones((n, cout), F32)
    if beta is None:
        beta = jnp.zeros((n, cout), F32)
    g3 = gamma.reshape(n, cout, 1).astype(F32)
    be3 = beta.reshape(n, cout, 1).astype(F32)

    allow_tiling = (norm == "none") and (not pooled)   # stats/pool need full M
    tm = _pick_tile_m(m, allow_tiling)
    mt = m // tm

    in_specs = [
        pl.BlockSpec((cout, k), lambda ni, mi: (0, 0)),            # weights
        pl.BlockSpec((cout, 1), lambda ni, mi: (0, 0)),            # bias
        pl.BlockSpec((None, cout, 1), lambda ni, mi: (ni, 0, 0)),  # gamma
        pl.BlockSpec((None, cout, 1), lambda ni, mi: (ni, 0, 0)),  # beta
        pl.BlockSpec((None, k, tm), lambda ni, mi: (ni, 0, mi)),   # patches
    ]
    out_spec = pl.BlockSpec((None, cout, tm), lambda ni, mi: (ni, 0, mi))
    cparams = pltpu.CompilerParams(
        dimension_semantics=("parallel", "parallel"))

    if pooled:
        kern = functools.partial(_conv_pool_kernel, norm=norm, act=act, eps=eps)
        y, pm = pl.pallas_call(
            kern,
            grid=(n, mt),
            in_specs=in_specs,
            out_specs=(out_spec,
                       pl.BlockSpec((None, cout, 1), lambda ni, mi: (ni, 0, 0))),
            out_shape=(jax.ShapeDtypeStruct((n, cout, m), F32),
                       jax.ShapeDtypeStruct((n, cout, 1), F32)),
            compiler_params=cparams,
        )(wm, bm, g3, be3, patches)
        return y.reshape(n, cout, ho, wo), pm.reshape(n, cout)

    kern = functools.partial(_conv_kernel, norm=norm, act=act, eps=eps)
    y = pl.pallas_call(
        kern,
        grid=(n, mt),
        in_specs=in_specs,
        out_specs=out_spec,
        out_shape=jax.ShapeDtypeStruct((n, cout, m), F32),
        compiler_params=cparams,
    )(wm, bm, g3, be3, patches)
    return y.reshape(n, cout, ho, wo)


# ------------------------- tiny dense / fused-MLP kernels --------------------

def _dense_kernel(x_ref, w_ref, b_ref, o_ref, *, act):
    y = jnp.dot(x_ref[...], w_ref[...], preferred_element_type=F32) + b_ref[...]
    o_ref[...] = _apply_act(y, act)


def pallas_dense(x, w, b, act="none"):
    m = x.shape[0]
    nout = w.shape[1]
    return pl.pallas_call(
        functools.partial(_dense_kernel, act=act),
        out_shape=jax.ShapeDtypeStruct((m, nout), F32),
        in_specs=[_vmem(), _vmem(), _vmem()],
        out_specs=_vmem(),
    )(x.astype(F32), w.astype(F32), b.reshape(1, nout).astype(F32))


def _mlp_kernel(z_ref, w0, b0, w1, b1, w2, b2, o_ref):
    h = jnp.dot(z_ref[...], w0[...], preferred_element_type=F32) + b0[...]
    h = jnp.maximum(h, 0.0)
    h = jnp.dot(h, w1[...], preferred_element_type=F32) + b1[...]
    h = jnp.maximum(h, 0.0)
    o_ref[...] = jnp.dot(h, w2[...], preferred_element_type=F32) + b2[...]


def pallas_mlp(z, p0, p1, p2):
    """3-layer AdaIN-parameter MLP fused into a single Pallas call."""
    n = z.shape[0]
    nout = p2[0].shape[1]
    args = [z.astype(F32)]
    for w, b in (p0, p1, p2):
        args += [w.astype(F32), b.reshape(1, -1).astype(F32)]
    return pl.pallas_call(
        _mlp_kernel,
        out_shape=jax.ShapeDtypeStruct((n, nout), F32),
        in_specs=[_vmem()] * 7,
        out_specs=_vmem(),
    )(*args)


# ------------------------------- loss kernels --------------------------------
# (Single-shot; the inputs here are at most a few KB.  TODO(synk): grid-tile
#  these reductions for production-size tensors.)

def _mean_abs_diff_kernel(a_ref, b_ref, o_ref):
    o_ref[...] = jnp.reshape(jnp.mean(jnp.abs(a_ref[...] - b_ref[...])), (1, 1))


def pallas_recon_criterion(a, b):
    a2 = a.reshape(a.shape[0], -1).astype(F32)
    b2 = b.reshape(b.shape[0], -1).astype(F32)
    out = pl.pallas_call(
        _mean_abs_diff_kernel,
        out_shape=jax.ShapeDtypeStruct((1, 1), F32),
        in_specs=[_vmem(), _vmem()],
        out_specs=_vmem(),
    )(a2, b2)
    return out[0, 0]


def _gan_gen_loss_kernel(r_ref, loss_ref, acc_ref):
    r = r_ref[...]
    loss_ref[...] = jnp.reshape(-jnp.mean(r), (1, 1))
    acc_ref[...] = jnp.reshape(jnp.mean((r >= 0.0).astype(F32)), (1, 1))


def pallas_calc_gen_loss(resp):
    """FUNIT calc_gen_loss: loss = -mean(resp), acc = mean(resp >= 0)."""
    r2 = resp.reshape(resp.shape[0], -1).astype(F32)
    loss, acc = pl.pallas_call(
        _gan_gen_loss_kernel,
        out_shape=(jax.ShapeDtypeStruct((1, 1), F32),
                   jax.ShapeDtypeStruct((1, 1), F32)),
        in_specs=[_vmem()],
        out_specs=(_vmem(), _vmem()),
    )(r2)
    return loss[0, 0], acc[0, 0]


# --------------------------------- misc glue ---------------------------------

def upsample_nearest2x(x):
    # TODO(synk): fuse the nearest-neighbour upsample into the consuming conv's
    # patch generation instead of a full HBM round trip.
    return jnp.repeat(jnp.repeat(x, 2, axis=2), 2, axis=3)


# ------------------------------ parameter init -------------------------------

def _conv_init(key, cout, cin, k):
    kw, kb = jax.random.split(key)
    scale = 1.0 / jnp.sqrt(float(cin * k * k))
    w = jax.random.normal(kw, (cout, cin, k, k), F32) * scale
    b = jax.random.normal(kb, (cout,), F32) * 0.01
    return w, b


def _fc_init(key, cin, cout):
    kw, kb = jax.random.split(key)
    scale = 1.0 / jnp.sqrt(float(cin))
    w = jax.random.normal(kw, (cin, cout), F32) * scale
    b = jax.random.normal(kb, (cout,), F32) * 0.01
    return w, b


def init_params(key, nf=8, latent=8, nf_mlp=16, num_classes=4):
    ks = jax.random.split(key, 32)
    p = {"nf": nf, "latent": latent}
    # FewShotGen: content encoder
    p["ce0"] = _conv_init(ks[0], nf, 3, 7)
    p["ce1"] = _conv_init(ks[1], 2 * nf, nf, 4)
    p["ce2"] = _conv_init(ks[2], 4 * nf, 2 * nf, 4)
    p["cr1"] = _conv_init(ks[3], 4 * nf, 4 * nf, 3)
    p["cr2"] = _conv_init(ks[4], 4 * nf, 4 * nf, 3)
    # FewShotGen: class-model encoder
    p["cl0"] = _conv_init(ks[5], nf, 3, 7)
    p["cl1"] = _conv_init(ks[6], 2 * nf, nf, 4)
    p["cl2"] = _conv_init(ks[7], 4 * nf, 2 * nf, 4)
    p["cl3"] = _conv_init(ks[8], 4 * nf, 4 * nf, 4)
    p["clo"] = _conv_init(ks[9], latent, 4 * nf, 1)
    # FewShotGen: decoder (MLP -> AdaIN resblock -> upsamples -> tanh)
    p["mlp0"] = _fc_init(ks[10], latent, nf_mlp)
    p["mlp1"] = _fc_init(ks[11], nf_mlp, nf_mlp)
    p["mlp2"] = _fc_init(ks[12], nf_mlp, 4 * (4 * nf))   # 2 AdaINs x (mean,std)
    p["dr1"] = _conv_init(ks[13], 4 * nf, 4 * nf, 3)
    p["dr2"] = _conv_init(ks[14], 4 * nf, 4 * nf, 3)
    p["du1"] = _conv_init(ks[15], 2 * nf, 4 * nf, 5)
    p["du2"] = _conv_init(ks[16], nf, 2 * nf, 5)
    p["dout"] = _conv_init(ks[17], 3, nf, 7)
    # GPPatchMcResDis
    p["d0"] = _conv_init(ks[18], nf, 3, 7)
    p["d1"] = _conv_init(ks[19], 2 * nf, nf, 4)
    p["d2"] = _conv_init(ks[20], 4 * nf, 2 * nf, 4)
    p["dcls"] = _conv_init(ks[21], num_classes, 4 * nf, 1)
    return p


# ------------------------------- sub-networks --------------------------------

def gen_enc_content(p, x):
    h = fused_conv(x, *p["ce0"], pad=3, norm="in", act="relu")
    h = fused_conv(h, *p["ce1"], stride=2, pad=1, norm="in", act="relu")
    h = fused_conv(h, *p["ce2"], stride=2, pad=1, norm="in", act="relu")
    r = fused_conv(h, *p["cr1"], pad=1, norm="in", act="relu")
    r = fused_conv(r, *p["cr2"], pad=1, norm="in", act="none")
    return h + r                                     # (N, 4nf, H/4, W/4)


def gen_enc_class_model(p, x):
    h = fused_conv(x, *p["cl0"], pad=3, act="relu")
    h = fused_conv(h, *p["cl1"], stride=2, pad=1, act="relu")
    h = fused_conv(h, *p["cl2"], stride=2, pad=1, act="relu")
    # global average pool fused into the last conv kernel as a pooled output
    _, hpool = fused_conv(h, *p["cl3"], stride=2, pad=1, act="relu", pooled=True)
    w, b = p["clo"]                                   # 1x1 conv on pooled feat
    s = pallas_dense(hpool, w.reshape(w.shape[0], -1).T, b, act="none")
    return s                                          # (N, latent)


def gen_decode(p, content, s):
    C = content.shape[1]
    ap = pallas_mlp(s, p["mlp0"], p["mlp1"], p["mlp2"])        # (N, 4C)
    mean1, std1 = ap[:, 0 * C:1 * C], ap[:, 1 * C:2 * C]
    mean2, std2 = ap[:, 2 * C:3 * C], ap[:, 3 * C:4 * C]
    # AdaIN residual block (y = std * IN(x) + mean)
    r = fused_conv(content, *p["dr1"], pad=1, norm="adain", act="relu",
                   gamma=std1, beta=mean1)
    r = fused_conv(r, *p["dr2"], pad=1, norm="adain", act="none",
                   gamma=std2, beta=mean2)
    x = content + r
    # upsampling path
    x = upsample_nearest2x(x)
    x = fused_conv(x, *p["du1"], pad=2, norm="in", act="relu")
    x = upsample_nearest2x(x)
    x = fused_conv(x, *p["du2"], pad=2, norm="in", act="relu")
    x = fused_conv(x, *p["dout"], pad=3, act="tanh")
    return x                                          # (N, 3, H, W) in [-1, 1]


def dis_forward(p, x, y):
    """GPPatchMcResDis.forward: per-sample-class patch response + pooled feat."""
    h = fused_conv(x, *p["d0"], pad=3, act="lrelu")
    h = fused_conv(h, *p["d1"], stride=2, pad=1, act="lrelu")
    feat, fpool = fused_conv(h, *p["d2"], stride=2, pad=1, act="lrelu",
                             pooled=True)             # feat (N,4nf,H/4,W/4)
    out = fused_conv(feat, *p["dcls"], pad=0, act="none")   # (N, ncls, H/4, W/4)
    n = out.shape[0]
    resp = out[jnp.arange(n), y, :, :]                # (N, H/4, W/4)
    return resp, fpool


# ------------------------------ FUNIT forward --------------------------------

def funit_forward_gen_update(params, xa, la, xb, lb, hp):
    """FUNITModel.forward(mode='gen_update') — forward losses only."""
    B = xa.shape[0]
    c_xa = gen_enc_content(params, xa)

    # class codes for xa and xb in one batched encoder pass
    s_all = gen_enc_class_model(params, jnp.concatenate([xa, xb], axis=0))
    s_xa, s_xb = s_all[:B], s_all[B:]

    # both decodes (xt from s_xb, xr from s_xa) in one batched decoder pass
    imgs = gen_decode(params,
                      jnp.concatenate([c_xa, c_xa], axis=0),
                      jnp.concatenate([s_xb, s_xa], axis=0))
    xt, xr = imgs[:B], imgs[B:]

    # all four discriminator passes in one batched call: [xt, xr, xb, xa]
    dis_in = jnp.concatenate([imgs, xb, xa], axis=0)
    y_cat = jnp.concatenate([lb, la, lb, la], axis=0)
    resp, feat_pool = dis_forward(params, dis_in, y_cat)

    # 0.5*(l_adv_t + l_adv_r) == -mean over the concatenated (equal-size) resps
    l_adv, acc = pallas_calc_gen_loss(resp[:2 * B])

    xt_p, xr_p = feat_pool[:B], feat_pool[B:2 * B]
    xb_p, xa_p = feat_pool[2 * B:3 * B], feat_pool[3 * B:]
    l_c_rec = pallas_recon_criterion(xr_p, xa_p)
    l_m_rec = pallas_recon_criterion(xt_p, xb_p)
    l_x_rec = pallas_recon_criterion(xr, xa)

    l_total = (hp["gan_w"] * l_adv + hp["r_w"] * l_x_rec
               + hp["fm_w"] * (l_c_rec + l_m_rec))
    # TODO(synk): l_total.backward() (parameter gradients) not implemented.
    return l_total, l_adv, l_x_rec, l_c_rec, l_m_rec, acc


# ----------------------------------- main ------------------------------------

if __name__ == "__main__":
    key = jax.random.PRNGKey(0)
    k_par, k_xa, k_xb = jax.random.split(key, 3)

    params = init_params(k_par, nf=8, latent=8, nf_mlp=16, num_classes=4)

    B, C, H, W = 2, 3, 16, 16
    xa = jax.random.normal(k_xa, (B, C, H, W), F32)
    xb = jax.random.normal(k_xb, (B, C, H, W), F32)
    la = jnp.array([0, 1], dtype=jnp.int32)
    lb = jnp.array([2, 3], dtype=jnp.int32)
    hp = {"gan_w": 1.0, "r_w": 0.1, "fm_w": 1.0}

    fwd = jax.jit(lambda a, al, b, bl: funit_forward_gen_update(
        params, a, al, b, bl, hp))
    outs = fwd(xa, la, xb, lb)
    outs = jax.block_until_ready(outs)

    assert all(bool(jnp.isfinite(o)) for o in outs)
    print("KERNEL_OK")
</pallas_src>

<mosaic_0001>
module attributes {stable_mosaic.version = 11 : i64} {
  func.func @_conv_kernel(%arg0: i32, %arg1: i32, %arg2: memref<8x147xbf16, #tpu.memory_space<vmem>>, %arg3: memref<8x1xf32, #tpu.memory_space<vmem>>, %arg4: memref<1x8x1xf32, #tpu.memory_space<vmem>>, %arg5: memref<1x8x1xf32, #tpu.memory_space<vmem>>, %arg6: memref<1x147x256xbf16, #tpu.memory_space<vmem>>, %arg7: memref<1x8x256xf32, #tpu.memory_space<vmem>>) attributes {dimension_semantics = [#tpu.dimension_semantics<parallel>, #tpu.dimension_semantics<parallel>], iteration_bounds = array<i64: 2, 1>, scalar_prefetch = 0 : i64, scratch_operands = 0 : i64, tpu.core_type = #tpu.core_type<tc>, window_params = [{pipeline_mode = #tpu.pipeline_mode<synchronous>, transform_indices = @transform_0, window_bounds = array<i64: 8, 147>}, {pipeline_mode = #tpu.pipeline_mode<synchronous>, transform_indices = @transform_1, window_bounds = array<i64: 8, 1>}, {transform_indices = @transform_2, window_bounds = array<i64: 1, 8, 1>}, {transform_indices = @transform_3, window_bounds = array<i64: 1, 8, 1>}, {transform_indices = @transform_4, window_bounds = array<i64: 1, 147, 256>}, {transform_indices = @transform_5, window_bounds = array<i64: 1, 8, 256>}]} {
    %c0 = arith.constant 0 : index
    %c0_0 = arith.constant 0 : index
    %0 = vector.load %arg2[%c0, %c0_0] : memref<8x147xbf16, #tpu.memory_space<vmem>>, vector<8x147xbf16>
    %c0_1 = arith.constant 0 : index
    %c0_2 = arith.constant 0 : index
    %c0_3 = arith.constant 0 : index
    %1 = vector.load %arg6[%c0_1, %c0_2, %c0_3] : memref<1x147x256xbf16, #tpu.memory_space<vmem>>, vector<1x147x256xbf16>
    %2 = vector.shape_cast %1 : vector<1x147x256xbf16> to vector<147x256xbf16>
    %cst = arith.constant dense<0.000000e+00> : vector<8x256xf32>
    %3 = tpu.matmul %0, %2, %cst {dimension_numbers = #tpu.dot_dimension_numbers<[1], [0], [0], [1], [0, 0, 1, 1], [], []>} : vector<8x147xbf16>, vector<147x256xbf16>, vector<8x256xf32> -> vector<8x256xf32>
    %c0_4 = arith.constant 0 : index
    %c0_5 = arith.constant 0 : index
    %4 = vector.load %arg3[%c0_4, %c0_5] : memref<8x1xf32, #tpu.memory_space<vmem>>, vector<8x1xf32>
    %5 = vector.broadcast %4 : vector<8x1xf32> to vector<8x256xf32>
    %6 = arith.addf %3, %5 : vector<8x256xf32>
    %cst_6 = arith.constant dense<0.000000e+00> : vector<8xf32>
    %7 = vector.multi_reduction <add>, %6, %cst_6 [1] : vector<8x256xf32> to vector<8xf32>
    %8 = vector.shape_cast %7 : vector<8xf32> to vector<8x1xf32>
    %cst_7 = arith.constant 2.560000e+02 : f32
    %9 = vector.broadcast %cst_7 : f32 to vector<8x1xf32>
    %10 = arith.divf %8, %9 : vector<8x1xf32>
    %11 = vector.broadcast %10 : vector<8x1xf32> to vector<8x256xf32>
    %12 = arith.subf %6, %11 : vector<8x256xf32>
    %13 = arith.mulf %12, %12 : vector<8x256xf32>
    %cst_8 = arith.constant dense<0.000000e+00> : vector<8xf32>
    %14 = vector.multi_reduction <add>, %13, %cst_8 [1] : vector<8x256xf32> to vector<8xf32>
    %15 = vector.shape_cast %14 : vector<8xf32> to vector<8x1xf32>
    %cst_9 = arith.constant 2.560000e+02 : f32
    %16 = vector.broadcast %cst_9 : f32 to vector<8x1xf32>
    %17 = arith.divf %15, %16 : vector<8x1xf32>
    %18 = vector.broadcast %10 : vector<8x1xf32> to vector<8x256xf32>
    %19 = arith.subf %6, %18 : vector<8x256xf32>
    %cst_10 = arith.constant 9.99999974E-6 : f32
    %20 = vector.broadcast %cst_10 : f32 to vector<8x1xf32>
    %21 = arith.addf %17, %20 : vector<8x1xf32>
    %22 = math.rsqrt %21 : vector<8x1xf32>
    %23 = vector.broadcast %22 : vector<8x1xf32> to vector<8x256xf32>
    %24 = arith.mulf %19, %23 : vector<8x256xf32>
    %c0_11 = arith.constant 0 : index
    %c0_12 = arith.constant 0 : index
    %c0_13 = arith.constant 0 : index
    %25 = vector.load %arg4[%c0_11, %c0_12, %c0_13] : memref<1x8x1xf32, #tpu.memory_space<vmem>>, vector<1x8x1xf32>
    %26 = vector.shape_cast %25 : vector<1x8x1xf32> to vector<8x1xf32>
    %27 = vector.broadcast %26 : vector<8x1xf32> to vector<8x256xf32>
    %28 = arith.mulf %24, %27 : vector<8x256xf32>
    %c0_14 = arith.constant 0 : index
    %c0_15 = arith.constant 0 : index
    %c0_16 = arith.constant 0 : index
    %29 = vector.load %arg5[%c0_14, %c0_15, %c0_16] : memref<1x8x1xf32, #tpu.memory_space<vmem>>, vector<1x8x1xf32>
    %30 = vector.shape_cast %29 : vector<1x8x1xf32> to vector<8x1xf32>
    %31 = vector.broadcast %30 : vector<8x1xf32> to vector<8x256xf32>
    %32 = arith.addf %28, %31 : vector<8x256xf32>
    %cst_17 = arith.constant 0.000000e+00 : f32
    %33 = vector.broadcast %cst_17 : f32 to vector<8x256xf32>
    %34 = arith.maximumf %32, %33 : vector<8x256xf32>
    %c0_18 = arith.constant 0 : index
    %c0_19 = arith.constant 0 : index
    %c0_20 = arith.constant 0 : index
    %35 = vector.load %arg7[%c0_18, %c0_19, %c0_20] : memref<1x8x256xf32, #tpu.memory_space<vmem>>, vector<1x8x256xf32>
    %36 = vector.shape_cast %35 : vector<1x8x256xf32> to vector<8x256xf32>
    %37 = vector.shape_cast %34 : vector<8x256xf32> to vector<1x8x256xf32>
    tpu.vector_store %arg7[%c0_18, %c0_19, %c0_20], %37 {strides = array<i32>} : memref<1x8x256xf32, #tpu.memory_space<vmem>>, vector<1x8x256xf32>,
    return
  }
  func.func @transform_0(%arg0: i32, %arg1: i32) -> (i32, i32) {
    %c0_i32 = arith.constant 0 : i32
    %c0_i32_0 = arith.constant 0 : i32
    %c0_i32_1 = arith.constant 0 : i32
    return %c0_i32, %c0_i32_0 : i32, i32
  }
  func.func @transform_1(%arg0: i32, %arg1: i32) -> (i32, i32) {
    %c0_i32 = arith.constant 0 : i32
    %c0_i32_0 = arith.constant 0 : i32
    %c0_i32_1 = arith.constant 0 : i32
    return %c0_i32, %c0_i32_0 : i32, i32
  }
  func.func @transform_2(%arg0: i32, %arg1: i32) -> (i32, i32, i32) {
    %c0_i32 = arith.constant 0 : i32
    %c0_i32_0 = arith.constant 0 : i32
    %c0_i32_1 = arith.constant 0 : i32
    return %arg0, %c0_i32, %c0_i32_0 : i32, i32, i32
  }
  func.func @transform_3(%arg0: i32, %arg1: i32) -> (i32, i32, i32) {
    %c0_i32 = arith.constant 0 : i32
    %c0_i32_0 = arith.constant 0 : i32
    %c0_i32_1 = arith.constant 0 : i32
    return %arg0, %c0_i32, %c0_i32_0 : i32, i32, i32
  }
  func.func @transform_4(%arg0: i32, %arg1: i32) -> (i32, i32, i32) {
    %c0_i32 = arith.constant 0 : i32
    %c0_i32_0 = arith.constant 0 : i32
    return %arg0, %c0_i32, %arg1 : i32, i32, i32
  }
  func.func @transform_5(%arg0: i32, %arg1: i32) -> (i32, i32, i32) {
    %c0_i32 = arith.constant 0 : i32
    %c0_i32_0 = arith.constant 0 : i32
    return %arg0, %c0_i32, %arg1 : i32, i32, i32
  }
}

module attributes {stable_mosaic.version = 11 : i64} {
  func.func @_conv_kernel(%arg0: i32, %arg1: i32, %arg2: memref<16x128xbf16, #tpu.memory_space<vmem>>, %arg3: memref<16x1xf32, #tpu.memory_space<vmem>>, %arg4: memref<1x16x1xf32, #tpu.memory_space<vmem>>, %arg5: memref<1x16x1xf32, #tpu.memory_space<vmem>>, %arg6: memref<1x128x64xbf16, #tpu.memory_space<vmem>>, %arg7: memref<1x16x64xf32, #tpu.memory_space<vmem>>) attributes {dimension_semantics = [#tpu.dimension_semantics<parallel>, #tpu.dimension_semantics<parallel>], iteration_bounds = array<i64: 2, 1>, scalar_prefetch = 0 : i64, scratch_operands = 0 : i64, tpu.core_type = #tpu.core_type<tc>, window_params = [{pipeline_mode = #tpu.pipeline_mode<synchronous>, transform_indices = @transform_0, window_bounds = array<i64: 16, 128>}, {pipeline_mode = #tpu.pipeline_mode<synchronous>, transform_indices = @transform_1, window_bounds = array<i64: 16, 1>}, {transform_indices = @transform_2, window_bounds = array<i64: 1, 16, 1>}, {transform_indices = @transform_3, window_bounds = array<i64: 1, 16, 1>}, {transform_indices = @transform_4, window_bounds = array<i64: 1, 128, 64>}, {transform_indices = @transform_5, window_bounds = array<i64: 1, 16, 64>}]} {
    %c0 = arith.constant 0 : index
    %c0_0 = arith.constant 0 : index
    %0 = vector.load %arg2[%c0, %c0_0] : memref<16x128xbf16, #tpu.memory_space<vmem>>, vector<16x128xbf16>
    %c0_1 = arith.constant 0 : index
    %c0_2 = arith.constant 0 : index
    %c0_3 = arith.constant 0 : index
    %1 = vector.load %arg6[%c0_1, %c0_2, %c0_3] : memref<1x128x64xbf16, #tpu.memory_space<vmem>>, vector<1x128x64xbf16>
    %2 = vector.shape_cast %1 : vector<1x128x64xbf16> to vector<128x64xbf16>
    %cst = arith.constant dense<0.000000e+00> : vector<16x64xf32>
    %3 = tpu.matmul %0, %2, %cst {dimension_numbers = #tpu.dot_dimension_numbers<[1], [0], [0], [1], [0, 0, 1, 1], [], []>} : vector<16x128xbf16>, vector<128x64xbf16>, vector<16x64xf32> -> vector<16x64xf32>
    %c0_4 = arith.constant 0 : index
    %c0_5 = arith.constant 0 : index
    %4 = vector.load %arg3[%c0_4, %c0_5] : memref<16x1xf32, #tpu.memory_space<vmem>>, vector<16x1xf32>
    %5 = vector.broadcast %4 : vector<16x1xf32> to vector<16x64xf32>
    %6 = arith.addf %3, %5 : vector<16x64xf32>
    %cst_6 = arith.constant dense<0.000000e+00> : vector<16xf32>
    %7 = vector.multi_reduction <add>, %6, %cst_6 [1] : vector<16x64xf32> to vector<16xf32>
    %8 = vector.shape_cast %7 : vector<16xf32> to vector<16x1xf32>
    %cst_7 = arith.constant 6.400000e+01 : f32
    %9 = vector.broadcast %cst_7 : f32 to vector<16x1xf32>
    %10 = arith.divf %8, %9 : vector<16x1xf32>
    %11 = vector.broadcast %10 : vector<16x1xf32> to vector<16x64xf32>
    %12 = arith.subf %6, %11 : vector<16x64xf32>
    %13 = arith.mulf %12, %12 : vector<16x64xf32>
    %cst_8 = arith.constant dense<0.000000e+00> : vector<16xf32>
    %14 = vector.multi_reduction <add>, %13, %cst_8 [1] : vector<16x64xf32> to vector<16xf32>
    %15 = vector.shape_cast %14 : vector<16xf32> to vector<16x1xf32>
    %cst_9 = arith.constant 6.400000e+01 : f32
    %16 = vector.broadcast %cst_9 : f32 to vector<16x1xf32>
    %17 = arith.divf %15, %16 : vector<16x1xf32>
    %18 = vector.broadcast %10 : vector<16x1xf32> to vector<16x64xf32>
    %19 = arith.subf %6, %18 : vector<16x64xf32>
    %cst_10 = arith.constant 9.99999974E-6 : f32
    %20 = vector.broadcast %cst_10 : f32 to vector<16x1xf32>
    %21 = arith.addf %17, %20 : vector<16x1xf32>
    %22 = math.rsqrt %21 : vector<16x1xf32>
    %23 = vector.broadcast %22 : vector<16x1xf32> to vector<16x64xf32>
    %24 = arith.mulf %19, %23 : vector<16x64xf32>
    %c0_11 = arith.constant 0 : index
    %c0_12 = arith.constant 0 : index
    %c0_13 = arith.constant 0 : index
    %25 = vector.load %arg4[%c0_11, %c0_12, %c0_13] : memref<1x16x1xf32, #tpu.memory_space<vmem>>, vector<1x16x1xf32>
    %26 = vector.shape_cast %25 : vector<1x16x1xf32> to vector<16x1xf32>
    %27 = vector.broadcast %26 : vector<16x1xf32> to vector<16x64xf32>
    %28 = arith.mulf %24, %27 : vector<16x64xf32>
    %c0_14 = arith.constant 0 : index
    %c0_15 = arith.constant 0 : index
    %c0_16 = arith.constant 0 : index
    %29 = vector.load %arg5[%c0_14, %c0_15, %c0_16] : memref<1x16x1xf32, #tpu.memory_space<vmem>>, vector<1x16x1xf32>
    %30 = vector.shape_cast %29 : vector<1x16x1xf32> to vector<16x1xf32>
    %31 = vector.broadcast %30 : vector<16x1xf32> to vector<16x64xf32>
    %32 = arith.addf %28, %31 : vector<16x64xf32>
    %cst_17 = arith.constant 0.000000e+00 : f32
    %33 = vector.broadcast %cst_17 : f32 to vector<16x64xf32>
    %34 = arith.maximumf %32, %33 : vector<16x64xf32>
    %c0_18 = arith.constant 0 : index
    %c0_19 = arith.constant 0 : index
    %c0_20 = arith.constant 0 : index
    %35 = vector.load %arg7[%c0_18, %c0_19, %c0_20] : memref<1x16x64xf32, #tpu.memory_space<vmem>>, vector<1x16x64xf32>
    %36 = vector.shape_cast %35 : vector<1x16x64xf32> to vector<16x64xf32>
    %37 = vector.shape_cast %34 : vector<16x64xf32> to vector<1x16x64xf32>
    tpu.vector_store %arg7[%c0_18, %c0_19, %c0_20], %37 {strides = array<i32>} : memref<1x16x64xf32, #tpu.memory_space<vmem>>, vector<1x16x64xf32>,
    return
  }
  func.func @transform_0(%arg0: i32, %arg1: i32) -> (i32, i32) {
    %c0_i32 = arith.constant 0 : i32
    %c0_i32_0 = arith.constant 0 : i32
    %c0_i32_1 = arith.constant 0 : i32
    return %c0_i32, %c0_i32_0 : i32, i32
  }
  func.func @transform_1(%arg0: i32, %arg1: i32) -> (i32, i32) {
    %c0_i32 = arith.constant 0 : i32
    %c0_i32_0 = arith.constant 0 : i32
    %c0_i32_1 = arith.constant 0 : i32
    return %c0_i32, %c0_i32_0 : i32, i32
  }
  func.func @transform_2(%arg0: i32, %arg1: i32) -> (i32, i32, i32) {
    %c0_i32 = arith.constant 0 : i32
    %c0_i32_0 = arith.constant 0 : i32
    %c0_i32_1 = arith.constant 0 : i32
    return %arg0, %c0_i32, %c0_i32_0 : i32, i32, i32
  }
  func.func @transform_3(%arg0: i32, %arg1: i32) -> (i32, i32, i32) {
    %c0_i32 = arith.constant 0 : i32
    %c0_i32_0 = arith.constant 0 : i32
    %c0_i32_1 = arith.constant 0 : i32
    return %arg0, %c0_i32, %c0_i32_0 : i32, i32, i32
  }
  func.func @transform_4(%arg0: i32, %arg1: i32) -> (i32, i32, i32) {
    %c0_i32 = arith.constant 0 : i32
    %c0_i32_0 = arith.constant 0 : i32
    return %arg0, %c0_i32, %arg1 : i32, i32, i32
  }
  func.func @transform_5(%arg0: i32, %arg1: i32) -> (i32, i32, i32) {
    %c0_i32 = arith.constant 0 : i32
    %c0_i32_0 = arith.constant 0 : i32
    return %arg0, %c0_i32, %arg1 : i32, i32, i32
  }
}

module attributes {stable_mosaic.version = 11 : i64} {
  func.func @_conv_kernel(%arg0: i32, %arg1: i32, %arg2: memref<32x256xbf16, #tpu.memory_space<vmem>>, %arg3: memref<32x1xf32, #tpu.memory_space<vmem>>, %arg4: memref<1x32x1xf32, #tpu.memory_space<vmem>>, %arg5: memref<1x32x1xf32, #tpu.memory_space<vmem>>, %arg6: memref<1x256x16xbf16, #tpu.memory_space<vmem>>, %arg7: memref<1x32x16xf32, #tpu.memory_space<vmem>>) attributes {dimension_semantics = [#tpu.dimension_semantics<parallel>, #tpu.dimension_semantics<parallel>], iteration_bounds = array<i64: 2, 1>, scalar_prefetch = 0 : i64, scratch_operands = 0 : i64, tpu.core_type = #tpu.core_type<tc>, window_params = [{pipeline_mode = #tpu.pipeline_mode<synchronous>, transform_indices = @transform_0, window_bounds = array<i64: 32, 256>}, {pipeline_mode = #tpu.pipeline_mode<synchronous>, transform_indices = @transform_1, window_bounds = array<i64: 32, 1>}, {transform_indices = @transform_2, window_bounds = array<i64: 1, 32, 1>}, {transform_indices = @transform_3, window_bounds = array<i64: 1, 32, 1>}, {transform_indices = @transform_4, window_bounds = array<i64: 1, 256, 16>}, {transform_indices = @transform_5, window_bounds = array<i64: 1, 32, 16>}]} {
    %c0 = arith.constant 0 : index
    %c0_0 = arith.constant 0 : index
    %0 = vector.load %arg2[%c0, %c0_0] : memref<32x256xbf16, #tpu.memory_space<vmem>>, vector<32x256xbf16>
    %c0_1 = arith.constant 0 : index
    %c0_2 = arith.constant 0 : index
    %c0_3 = arith.constant 0 : index
    %1 = vector.load %arg6[%c0_1, %c0_2, %c0_3] : memref<1x256x16xbf16, #tpu.memory_space<vmem>>, vector<1x256x16xbf16>
    %2 = vector.shape_cast %1 : vector<1x256x16xbf16> to vector<256x16xbf16>
    %cst = arith.constant dense<0.000000e+00> : vector<32x16xf32>
    %3 = tpu.matmul %0, %2, %cst {dimension_numbers = #tpu.dot_dimension_numbers<[1], [0], [0], [1], [0, 0, 1, 1], [], []>} : vector<32x256xbf16>, vector<256x16xbf16>, vector<32x16xf32> -> vector<32x16xf32>
    %c0_4 = arith.constant 0 : index
    %c0_5 = arith.constant 0 : index
    %4 = vector.load %arg3[%c0_4, %c0_5] : memref<32x1xf32, #tpu.memory_space<vmem>>, vector<32x1xf32>
    %5 = vector.broadcast %4 : vector<32x1xf32> to vector<32x16xf32>
    %6 = arith.addf %3, %5 : vector<32x16xf32>
    %cst_6 = arith.constant dense<0.000000e+00> : vector<32xf32>
    %7 = vector.multi_reduction <add>, %6, %cst_6 [1] : vector<32x16xf32> to vector<32xf32>
    %8 = vector.shape_cast %7 : vector<32xf32> to vector<32x1xf32>
    %cst_7 = arith.constant 1.600000e+01 : f32
    %9 = vector.broadcast %cst_7 : f32 to vector<32x1xf32>
    %10 = arith.divf %8, %9 : vector<32x1xf32>
    %11 = vector.broadcast %10 : vector<32x1xf32> to vector<32x16xf32>
    %12 = arith.subf %6, %11 : vector<32x16xf32>
    %13 = arith.mulf %12, %12 : vector<32x16xf32>
    %cst_8 = arith.constant dense<0.000000e+00> : vector<32xf32>
    %14 = vector.multi_reduction <add>, %13, %cst_8 [1] : vector<32x16xf32> to vector<32xf32>
    %15 = vector.shape_cast %14 : vector<32xf32> to vector<32x1xf32>
    %cst_9 = arith.constant 1.600000e+01 : f32
    %16 = vector.broadcast %cst_9 : f32 to vector<32x1xf32>
    %17 = arith.divf %15, %16 : vector<32x1xf32>
    %18 = vector.broadcast %10 : vector<32x1xf32> to vector<32x16xf32>
    %19 = arith.subf %6, %18 : vector<32x16xf32>
    %cst_10 = arith.constant 9.99999974E-6 : f32
    %20 = vector.broadcast %cst_10 : f32 to vector<32x1xf32>
    %21 = arith.addf %17, %20 : vector<32x1xf32>
    %22 = math.rsqrt %21 : vector<32x1xf32>
    %23 = vector.broadcast %22 : vector<32x1xf32> to vector<32x16xf32>
    %24 = arith.mulf %19, %23 : vector<32x16xf32>
    %c0_11 = arith.constant 0 : index
    %c0_12 = arith.constant 0 : index
    %c0_13 = arith.constant 0 : index
    %25 = vector.load %arg4[%c0_11, %c0_12, %c0_13] : memref<1x32x1xf32, #tpu.memory_space<vmem>>, vector<1x32x1xf32>
    %26 = vector.shape_cast %25 : vector<1x32x1xf32> to vector<32x1xf32>
    %27 = vector.broadcast %26 : vector<32x1xf32> to vector<32x16xf32>
    %28 = arith.mulf %24, %27 : vector<32x16xf32>
    %c0_14 = arith.constant 0 : index
    %c0_15 = arith.constant 0 : index
    %c0_16 = arith.constant 0 : index
    %29 = vector.load %arg5[%c0_14, %c0_15, %c0_16] : memref<1x32x1xf32, #tpu.memory_space<vmem>>, vector<1x32x1xf32>
    %30 = vector.shape_cast %29 : vector<1x32x1xf32> to vector<32x1xf32>
    %31 = vector.broadcast %30 : vector<32x1xf32> to vector<32x16xf32>
    %32 = arith.addf %28, %31 : vector<32x16xf32>
    %cst_17 = arith.constant 0.000000e+00 : f32
    %33 = vector.broadcast %cst_17 : f32 to vector<32x16xf32>
    %34 = arith.maximumf %32, %33 : vector<32x16xf32>
    %c0_18 = arith.constant 0 : index
    %c0_19 = arith.constant 0 : index
    %c0_20 = arith.constant 0 : index
    %35 = vector.load %arg7[%c0_18, %c0_19, %c0_20] : memref<1x32x16xf32, #tpu.memory_space<vmem>>, vector<1x32x16xf32>
    %36 = vector.shape_cast %35 : vector<1x32x16xf32> to vector<32x16xf32>
    %37 = vector.shape_cast %34 : vector<32x16xf32> to vector<1x32x16xf32>
    tpu.vector_store %arg7[%c0_18, %c0_19, %c0_20], %37 {strides = array<i32>} : memref<1x32x16xf32, #tpu.memory_space<vmem>>, vector<1x32x16xf32>,
    return
  }
  func.func @transform_0(%arg0: i32, %arg1: i32) -> (i32, i32) {
    %c0_i32 = arith.constant 0 : i32
    %c0_i32_0 = arith.constant 0 : i32
    %c0_i32_1 = arith.constant 0 : i32
    return %c0_i32, %c0_i32_0 : i32, i32
  }
  func.func @transform_1(%arg0: i32, %arg1: i32) -> (i32, i32) {
    %c0_i32 = arith.constant 0 : i32
    %c0_i32_0 = arith.constant 0 : i32
    %c0_i32_1 = arith.constant 0 : i32
    return %c0_i32, %c0_i32_0 : i32, i32
  }
  func.func @transform_2(%arg0: i32, %arg1: i32) -> (i32, i32, i32) {
    %c0_i32 = arith.constant 0 : i32
    %c0_i32_0 = arith.constant 0 : i32
    %c0_i32_1 = arith.constant 0 : i32
    return %arg0, %c0_i32, %c0_i32_0 : i32, i32, i32
  }
  func.func @transform_3(%arg0: i32, %arg1: i32) -> (i32, i32, i32) {
    %c0_i32 = arith.constant 0 : i32
    %c0_i32_0 = arith.constant 0 : i32
    %c0_i32_1 = arith.constant 0 : i32
    return %arg0, %c0_i32, %c0_i32_0 : i32, i32, i32
  }
  func.func @transform_4(%arg0: i32, %arg1: i32) -> (i32, i32, i32) {
    %c0_i32 = arith.constant 0 : i32
    %c0_i32_0 = arith.constant 0 : i32
    return %arg0, %c0_i32, %arg1 : i32, i32, i32
  }
  func.func @transform_5(%arg0: i32, %arg1: i32) -> (i32, i32, i32) {
    %c0_i32 = arith.constant 0 : i32
    %c0_i32_0 = arith.constant 0 : i32
    return %arg0, %c0_i32, %arg1 : i32, i32, i32
  }
}

module attributes {stable_mosaic.version = 11 : i64} {
  func.func @_conv_kernel(%arg0: i32, %arg1: i32, %arg2: memref<32x288xbf16, #tpu.memory_space<vmem>>, %arg3: memref<32x1xf32, #tpu.memory_space<vmem>>, %arg4: memref<1x32x1xf32, #tpu.memory_space<vmem>>, %arg5: memref<1x32x1xf32, #tpu.memory_space<vmem>>, %arg6: memref<1x288x16xbf16, #tpu.memory_space<vmem>>, %arg7: memref<1x32x16xf32, #tpu.memory_space<vmem>>) attributes {dimension_semantics = [#tpu.dimension_semantics<parallel>, #tpu.dimension_semantics<parallel>], iteration_bounds = array<i64: 2, 1>, scalar_prefetch = 0 : i64, scratch_operands = 0 : i64, tpu.core_type = #tpu.core_type<tc>, window_params = [{pipeline_mode = #tpu.pipeline_mode<synchronous>, transform_indices = @transform_0, window_bounds = array<i64: 32, 288>}, {pipeline_mode = #tpu.pipeline_mode<synchronous>, transform_indices = @transform_1, window_bounds = array<i64: 32, 1>}, {transform_indices = @transform_2, window_bounds = array<i64: 1, 32, 1>}, {transform_indices = @transform_3, window_bounds = array<i64: 1, 32, 1>}, {transform_indices = @transform_4, window_bounds = array<i64: 1, 288, 16>}, {transform_indices = @transform_5, window_bounds = array<i64: 1, 32, 16>}]} {
    %c0 = arith.constant 0 : index
    %c0_0 = arith.constant 0 : index
    %0 = vector.load %arg2[%c0, %c0_0] : memref<32x288xbf16, #tpu.memory_space<vmem>>, vector<32x288xbf16>
    %c0_1 = arith.constant 0 : index
    %c0_2 = arith.constant 0 : index
    %c0_3 = arith.constant 0 : index
    %1 = vector.load %arg6[%c0_1, %c0_2, %c0_3] : memref<1x288x16xbf16, #tpu.memory_space<vmem>>, vector<1x288x16xbf16>
    %2 = vector.shape_cast %1 : vector<1x288x16xbf16> to vector<288x16xbf16>
    %cst = arith.constant dense<0.000000e+00> : vector<32x16xf32>
    %3 = tpu.matmul %0, %2, %cst {dimension_numbers = #tpu.dot_dimension_numbers<[1], [0], [0], [1], [0, 0, 1, 1], [], []>} : vector<32x288xbf16>, vector<288x16xbf16>, vector<32x16xf32> -> vector<32x16xf32>
    %c0_4 = arith.constant 0 : index
    %c0_5 = arith.constant 0 : index
    %4 = vector.load %arg3[%c0_4, %c0_5] : memref<32x1xf32, #tpu.memory_space<vmem>>, vector<32x1xf32>
    %5 = vector.broadcast %4 : vector<32x1xf32> to vector<32x16xf32>
    %6 = arith.addf %3, %5 : vector<32x16xf32>
    %cst_6 = arith.constant dense<0.000000e+00> : vector<32xf32>
    %7 = vector.multi_reduction <add>, %6, %cst_6 [1] : vector<32x16xf32> to vector<32xf32>
    %8 = vector.shape_cast %7 : vector<32xf32> to vector<32x1xf32>
    %cst_7 = arith.constant 1.600000e+01 : f32
    %9 = vector.broadcast %cst_7 : f32 to vector<32x1xf32>
    %10 = arith.divf %8, %9 : vector<32x1xf32>
    %11 = vector.broadcast %10 : vector<32x1xf32> to vector<32x16xf32>
    %12 = arith.subf %6, %11 : vector<32x16xf32>
    %13 = arith.mulf %12, %12 : vector<32x16xf32>
    %cst_8 = arith.constant dense<0.000000e+00> : vector<32xf32>
    %14 = vector.multi_reduction <add>, %13, %cst_8 [1] : vector<32x16xf32> to vector<32xf32>
    %15 = vector.shape_cast %14 : vector<32xf32> to vector<32x1xf32>
    %cst_9 = arith.constant 1.600000e+01 : f32
    %16 = vector.broadcast %cst_9 : f32 to vector<32x1xf32>
    %17 = arith.divf %15, %16 : vector<32x1xf32>
    %18 = vector.broadcast %10 : vector<32x1xf32> to vector<32x16xf32>
    %19 = arith.subf %6, %18 : vector<32x16xf32>
    %cst_10 = arith.constant 9.99999974E-6 : f32
    %20 = vector.broadcast %cst_10 : f32 to vector<32x1xf32>
    %21 = arith.addf %17, %20 : vector<32x1xf32>
    %22 = math.rsqrt %21 : vector<32x1xf32>
    %23 = vector.broadcast %22 : vector<32x1xf32> to vector<32x16xf32>
    %24 = arith.mulf %19, %23 : vector<32x16xf32>
    %c0_11 = arith.constant 0 : index
    %c0_12 = arith.constant 0 : index
    %c0_13 = arith.constant 0 : index
    %25 = vector.load %arg4[%c0_11, %c0_12, %c0_13] : memref<1x32x1xf32, #tpu.memory_space<vmem>>, vector<1x32x1xf32>
    %26 = vector.shape_cast %25 : vector<1x32x1xf32> to vector<32x1xf32>
    %27 = vector.broadcast %26 : vector<32x1xf32> to vector<32x16xf32>
    %28 = arith.mulf %24, %27 : vector<32x16xf32>
    %c0_14 = arith.constant 0 : index
    %c0_15 = arith.constant 0 : index
    %c0_16 = arith.constant 0 : index
    %29 = vector.load %arg5[%c0_14, %c0_15, %c0_16] : memref<1x32x1xf32, #tpu.memory_space<vmem>>, vector<1x32x1xf32>
    %30 = vector.shape_cast %29 : vector<1x32x1xf32> to vector<32x1xf32>
    %31 = vector.broadcast %30 : vector<32x1xf32> to vector<32x16xf32>
    %32 = arith.addf %28, %31 : vector<32x16xf32>
    %cst_17 = arith.constant 0.000000e+00 : f32
    %33 = vector.broadcast %cst_17 : f32 to vector<32x16xf32>
    %34 = arith.maximumf %32, %33 : vector<32x16xf32>
    %c0_18 = arith.constant 0 : index
    %c0_19 = arith.constant 0 : index
    %c0_20 = arith.constant 0 : index
    %35 = vector.load %arg7[%c0_18, %c0_19, %c0_20] : memref<1x32x16xf32, #tpu.memory_space<vmem>>, vector<1x32x16xf32>
    %36 = vector.shape_cast %35 : vector<1x32x16xf32> to vector<32x16xf32>
    %37 = vector.shape_cast %34 : vector<32x16xf32> to vector<1x32x16xf32>
    tpu.vector_store %arg7[%c0_18, %c0_19, %c0_20], %37 {strides = array<i32>} : memref<1x32x16xf32, #tpu.memory_space<vmem>>, vector<1x32x16xf32>,
    return
  }
  func.func @transform_0(%arg0: i32, %arg1: i32) -> (i32, i32) {
    %c0_i32 = arith.constant 0 : i32
    %c0_i32_0 = arith.constant 0 : i32
    %c0_i32_1 = arith.constant 0 : i32
    return %c0_i32, %c0_i32_0 : i32, i32
  }
  func.func @transform_1(%arg0: i32, %arg1: i32) -> (i32, i32) {
    %c0_i32 = arith.constant 0 : i32
    %c0_i32_0 = arith.constant 0 : i32
    %c0_i32_1 = arith.constant 0 : i32
    return %c0_i32, %c0_i32_0 : i32, i32
  }
  func.func @transform_2(%arg0: i32, %arg1: i32) -> (i32, i32, i32) {
    %c0_i32 = arith.constant 0 : i32
    %c0_i32_0 = arith.constant 0 : i32
    %c0_i32_1 = arith.constant 0 : i32
    return %arg0, %c0_i32, %c0_i32_0 : i32, i32, i32
  }
  func.func @transform_3(%arg0: i32, %arg1: i32) -> (i32, i32, i32) {
    %c0_i32 = arith.constant 0 : i32
    %c0_i32_0 = arith.constant 0 : i32
    %c0_i32_1 = arith.constant 0 : i32
    return %arg0, %c0_i32, %c0_i32_0 : i32, i32, i32
  }
  func.func @transform_4(%arg0: i32, %arg1: i32) -> (i32, i32, i32) {
    %c0_i32 = arith.constant 0 : i32
    %c0_i32_0 = arith.constant 0 : i32
    return %arg0, %c0_i32, %arg1 : i32, i32, i32
  }
  func.func @transform_5(%arg0: i32, %arg1: i32) -> (i32, i32, i32) {
    %c0_i32 = arith.constant 0 : i32
    %c0_i32_0 = arith.constant 0 : i32
    return %arg0, %c0_i32, %arg1 : i32, i32, i32
  }
}

module attributes {stable_mosaic.version = 11 : i64} {
  func.func @_conv_kernel(%arg0: i32, %arg1: i32, %arg2: memref<32x288xbf16, #tpu.memory_space<vmem>>, %arg3: memref<32x1xf32, #tpu.memory_space<vmem>>, %arg4: memref<1x32x1xf32, #tpu.memory_space<vmem>>, %arg5: memref<1x32x1xf32, #tpu.memory_space<vmem>>, %arg6: memref<1x288x16xbf16, #tpu.memory_space<vmem>>, %arg7: memref<1x32x16xf32, #tpu.memory_space<vmem>>) attributes {dimension_semantics = [#tpu.dimension_semantics<parallel>, #tpu.dimension_semantics<parallel>], iteration_bounds = array<i64: 2, 1>, scalar_prefetch = 0 : i64, scratch_operands = 0 : i64, tpu.core_type = #tpu.core_type<tc>, window_params = [{pipeline_mode = #tpu.pipeline_mode<synchronous>, transform_indices = @transform_0, window_bounds = array<i64: 32, 288>}, {pipeline_mode = #tpu.pipeline_mode<synchronous>, transform_indices = @transform_1, window_bounds = array<i64: 32, 1>}, {transform_indices = @transform_2, window_bounds = array<i64: 1, 32, 1>}, {transform_indices = @transform_3, window_bounds = array<i64: 1, 32, 1>}, {transform_indices = @transform_4, window_bounds = array<i64: 1, 288, 16>}, {transform_indices = @transform_5, window_bounds = array<i64: 1, 32, 16>}]} {
    %c0 = arith.constant 0 : index
    %c0_0 = arith.constant 0 : index
    %0 = vector.load %arg2[%c0, %c0_0] : memref<32x288xbf16, #tpu.memory_space<vmem>>, vector<32x288xbf16>
    %c0_1 = arith.constant 0 : index
    %c0_2 = arith.constant 0 : index
    %c0_3 = arith.constant 0 : index
    %1 = vector.load %arg6[%c0_1, %c0_2, %c0_3] : memref<1x288x16xbf16, #tpu.memory_space<vmem>>, vector<1x288x16xbf16>
    %2 = vector.shape_cast %1 : vector<1x288x16xbf16> to vector<288x16xbf16>
    %cst = arith.constant dense<0.000000e+00> : vector<32x16xf32>
    %3 = tpu.matmul %0, %2, %cst {dimension_numbers = #tpu.dot_dimension_numbers<[1], [0], [0], [1], [0, 0, 1, 1], [], []>} : vector<32x288xbf16>, vector<288x16xbf16>, vector<32x16xf32> -> vector<32x16xf32>
    %c0_4 = arith.constant 0 : index
    %c0_5 = arith.constant 0 : index
    %4 = vector.load %arg3[%c0_4, %c0_5] : memref<32x1xf32, #tpu.memory_space<vmem>>, vector<32x1xf32>
    %5 = vector.broadcast %4 : vector<32x1xf32> to vector<32x16xf32>
    %6 = arith.addf %3, %5 : vector<32x16xf32>
    %cst_6 = arith.constant dense<0.000000e+00> : vector<32xf32>
    %7 = vector.multi_reduction <add>, %6, %cst_6 [1] : vector<32x16xf32> to vector<32xf32>
    %8 = vector.shape_cast %7 : vector<32xf32> to vector<32x1xf32>
    %cst_7 = arith.constant 1.600000e+01 : f32
    %9 = vector.broadcast %cst_7 : f32 to vector<32x1xf32>
    %10 = arith.divf %8, %9 : vector<32x1xf32>
    %11 = vector.broadcast %10 : vector<32x1xf32> to vector<32x16xf32>
    %12 = arith.subf %6, %11 : vector<32x16xf32>
    %13 = arith.mulf %12, %12 : vector<32x16xf32>
    %cst_8 = arith.constant dense<0.000000e+00> : vector<32xf32>
    %14 = vector.multi_reduction <add>, %13, %cst_8 [1] : vector<32x16xf32> to vector<32xf32>
    %15 = vector.shape_cast %14 : vector<32xf32> to vector<32x1xf32>
    %cst_9 = arith.constant 1.600000e+01 : f32
    %16 = vector.broadcast %cst_9 : f32 to vector<32x1xf32>
    %17 = arith.divf %15, %16 : vector<32x1xf32>
    %18 = vector.broadcast %10 : vector<32x1xf32> to vector<32x16xf32>
    %19 = arith.subf %6, %18 : vector<32x16xf32>
    %cst_10 = arith.constant 9.99999974E-6 : f32
    %20 = vector.broadcast %cst_10 : f32 to vector<32x1xf32>
    %21 = arith.addf %17, %20 : vector<32x1xf32>
    %22 = math.rsqrt %21 : vector<32x1xf32>
    %23 = vector.broadcast %22 : vector<32x1xf32> to vector<32x16xf32>
    %24 = arith.mulf %19, %23 : vector<32x16xf32>
    %c0_11 = arith.constant 0 : index
    %c0_12 = arith.constant 0 : index
    %c0_13 = arith.constant 0 : index
    %25 = vector.load %arg4[%c0_11, %c0_12, %c0_13] : memref<1x32x1xf32, #tpu.memory_space<vmem>>, vector<1x32x1xf32>
    %26 = vector.shape_cast %25 : vector<1x32x1xf32> to vector<32x1xf32>
    %27 = vector.broadcast %26 : vector<32x1xf32> to vector<32x16xf32>
    %28 = arith.mulf %24, %27 : vector<32x16xf32>
    %c0_14 = arith.constant 0 : index
    %c0_15 = arith.constant 0 : index
    %c0_16 = arith.constant 0 : index
    %29 = vector.load %arg5[%c0_14, %c0_15, %c0_16] : memref<1x32x1xf32, #tpu.memory_space<vmem>>, vector<1x32x1xf32>
    %30 = vector.shape_cast %29 : vector<1x32x1xf32> to vector<32x1xf32>
    %31 = vector.broadcast %30 : vector<32x1xf32> to vector<32x16xf32>
    %32 = arith.addf %28, %31 : vector<32x16xf32>
    %c0_17 = arith.constant 0 : index
    %c0_18 = arith.constant 0 : index
    %c0_19 = arith.constant 0 : index
    %33 = vector.load %arg7[%c0_17, %c0_18, %c0_19] : memref<1x32x16xf32, #tpu.memory_space<vmem>>, vector<1x32x16xf32>
    %34 = vector.shape_cast %33 : vector<1x32x16xf32> to vector<32x16xf32>
    %35 = vector.shape_cast %32 : vector<32x16xf32> to vector<1x32x16xf32>
    tpu.vector_store %arg7[%c0_17, %c0_18, %c0_19], %35 {strides = array<i32>} : memref<1x32x16xf32, #tpu.memory_space<vmem>>, vector<1x32x16xf32>,
    return
  }
  func.func @transform_0(%arg0: i32, %arg1: i32) -> (i32, i32) {
    %c0_i32 = arith.constant 0 : i32
    %c0_i32_0 = arith.constant 0 : i32
    %c0_i32_1 = arith.constant 0 : i32
    return %c0_i32, %c0_i32_0 : i32, i32
  }
  func.func @transform_1(%arg0: i32, %arg1: i32) -> (i32, i32) {
    %c0_i32 = arith.constant 0 : i32
    %c0_i32_0 = arith.constant 0 : i32
    %c0_i32_1 = arith.constant 0 : i32
    return %c0_i32, %c0_i32_0 : i32, i32
  }
  func.func @transform_2(%arg0: i32, %arg1: i32) -> (i32, i32, i32) {
    %c0_i32 = arith.constant 0 : i32
    %c0_i32_0 = arith.constant 0 : i32
    %c0_i32_1 = arith.constant 0 : i32
    return %arg0, %c0_i32, %c0_i32_0 : i32, i32, i32
  }
  func.func @transform_3(%arg0: i32, %arg1: i32) -> (i32, i32, i32) {
    %c0_i32 = arith.constant 0 : i32
    %c0_i32_0 = arith.constant 0 : i32
    %c0_i32_1 = arith.constant 0 : i32
    return %arg0, %c0_i32, %c0_i32_0 : i32, i32, i32
  }
  func.func @transform_4(%arg0: i32, %arg1: i32) -> (i32, i32, i32) {
    %c0_i32 = arith.constant 0 : i32
    %c0_i32_0 = arith.constant 0 : i32
    return %arg0, %c0_i32, %arg1 : i32, i32, i32
  }
  func.func @transform_5(%arg0: i32, %arg1: i32) -> (i32, i32, i32) {
    %c0_i32 = arith.constant 0 : i32
    %c0_i32_0 = arith.constant 0 : i32
    return %arg0, %c0_i32, %arg1 : i32, i32, i32
  }
}

module attributes {stable_mosaic.version = 11 : i64} {
  func.func @_conv_kernel(%arg0: i32, %arg1: i32, %arg2: memref<8x147xbf16, #tpu.memory_space<vmem>>, %arg3: memref<8x1xf32, #tpu.memory_space<vmem>>, %arg4: memref<1x8x1xf32, #tpu.memory_space<vmem>>, %arg5: memref<1x8x1xf32, #tpu.memory_space<vmem>>, %arg6: memref<1x147x128xbf16, #tpu.memory_space<vmem>>, %arg7: memref<1x8x128xf32, #tpu.memory_space<vmem>>) attributes {dimension_semantics = [#tpu.dimension_semantics<parallel>, #tpu.dimension_semantics<parallel>], iteration_bounds = array<i64: 4, 2>, scalar_prefetch = 0 : i64, scratch_operands = 0 : i64, tpu.core_type = #tpu.core_type<tc>, window_params = [{pipeline_mode = #tpu.pipeline_mode<synchronous>, transform_indices = @transform_0, window_bounds = array<i64: 8, 147>}, {pipeline_mode = #tpu.pipeline_mode<synchronous>, transform_indices = @transform_1, window_bounds = array<i64: 8, 1>}, {transform_indices = @transform_2, window_bounds = array<i64: 1, 8, 1>}, {transform_indices = @transform_3, window_bounds = array<i64: 1, 8, 1>}, {transform_indices = @transform_4, window_bounds = array<i64: 1, 147, 128>}, {transform_indices = @transform_5, window_bounds = array<i64: 1, 8, 128>}]} {
    %c0 = arith.constant 0 : index
    %c0_0 = arith.constant 0 : index
    %0 = vector.load %arg2[%c0, %c0_0] : memref<8x147xbf16, #tpu.memory_space<vmem>>, vector<8x147xbf16>
    %c0_1 = arith.constant 0 : index
    %c0_2 = arith.constant 0 : index
    %c0_3 = arith.constant 0 : index
    %1 = vector.load %arg6[%c0_1, %c0_2, %c0_3] : memref<1x147x128xbf16, #tpu.memory_space<vmem>>, vector<1x147x128xbf16>
    %2 = vector.shape_cast %1 : vector<1x147x128xbf16> to vector<147x128xbf16>
    %cst = arith.constant dense<0.000000e+00> : vector<8x128xf32>
    %3 = tpu.matmul %0, %2, %cst {dimension_numbers = #tpu.dot_dimension_numbers<[1], [0], [0], [1], [0, 0, 1, 1], [], []>} : vector<8x147xbf16>, vector<147x128xbf16>, vector<8x128xf32> -> vector<8x128xf32>
    %c0_4 = arith.constant 0 : index
    %c0_5 = arith.constant 0 : index
    %4 = vector.load %arg3[%c0_4, %c0_5] : memref<8x1xf32, #tpu.memory_space<vmem>>, vector<8x1xf32>
    %5 = vector.broadcast %4 : vector<8x1xf32> to vector<8x128xf32>
    %6 = arith.addf %3, %5 : vector<8x128xf32>
    %cst_6 = arith.constant 0.000000e+00 : f32
    %7 = vector.broadcast %cst_6 : f32 to vector<8x128xf32>
    %8 = arith.maximumf %6, %7 : vector<8x128xf32>
    %c0_7 = arith.constant 0 : index
    %c0_8 = arith.constant 0 : index
    %c0_9 = arith.constant 0 : index
    %9 = vector.load %arg7[%c0_7, %c0_8, %c0_9] : memref<1x8x128xf32, #tpu.memory_space<vmem>>, vector<1x8x128xf32>
    %10 = vector.shape_cast %9 : vector<1x8x128xf32> to vector<8x128xf32>
    %11 = vector.shape_cast %8 : vector<8x128xf32> to vector<1x8x128xf32>
    tpu.vector_store %arg7[%c0_7, %c0_8, %c0_9], %11 {strides = array<i32>} : memref<1x8x128xf32, #tpu.memory_space<vmem>>, vector<1x8x128xf32>,
    return
  }
  func.func @transform_0(%arg0: i32, %arg1: i32) -> (i32, i32) {
    %c0_i32 = arith.constant 0 : i32
    %c0_i32_0 = arith.constant 0 : i32
    %c0_i32_1 = arith.constant 0 : i32
    return %c0_i32, %c0_i32_0 : i32, i32
  }
  func.func @transform_1(%arg0: i32, %arg1: i32) -> (i32, i32) {
    %c0_i32 = arith.constant 0 : i32
    %c0_i32_0 = arith.constant 0 : i32
    %c0_i32_1 = arith.constant 0 : i32
    return %c0_i32, %c0_i32_0 : i32, i32
  }
  func.func @transform_2(%arg0: i32, %arg1: i32) -> (i32, i32, i32) {
    %c0_i32 = arith.constant 0 : i32
    %c0_i32_0 = arith.constant 0 : i32
    %c0_i32_1 = arith.constant 0 : i32
    return %arg0, %c0_i32, %c0_i32_0 : i32, i32, i32
  }
  func.func @transform_3(%arg0: i32, %arg1: i32) -> (i32, i32, i32) {
    %c0_i32 = arith.constant 0 : i32
    %c0_i32_0 = arith.constant 0 : i32
    %c0_i32_1 = arith.constant 0 : i32
    return %arg0, %c0_i32, %c0_i32_0 : i32, i32, i32
  }
  func.func @transform_4(%arg0: i32, %arg1: i32) -> (i32, i32, i32) {
    %c0_i32 = arith.constant 0 : i32
    %c0_i32_0 = arith.constant 0 : i32
    return %arg0, %c0_i32, %arg1 : i32, i32, i32
  }
  func.func @transform_5(%arg0: i32, %arg1: i32) -> (i32, i32, i32) {
    %c0_i32 = arith.constant 0 : i32
    %c0_i32_0 = arith.constant 0 : i32
    return %arg0, %c0_i32, %arg1 : i32, i32, i32
  }
}

module attributes {stable_mosaic.version = 11 : i64} {
  func.func @_conv_kernel(%arg0: i32, %arg1: i32, %arg2: memref<16x128xbf16, #tpu.memory_space<vmem>>, %arg3: memref<16x1xf32, #tpu.memory_space<vmem>>, %arg4: memref<1x16x1xf32, #tpu.memory_space<vmem>>, %arg5: memref<1x16x1xf32, #tpu.memory_space<vmem>>, %arg6: memref<1x128x64xbf16, #tpu.memory_space<vmem>>, %arg7: memref<1x16x64xf32, #tpu.memory_space<vmem>>) attributes {dimension_semantics = [#tpu.dimension_semantics<parallel>, #tpu.dimension_semantics<parallel>], iteration_bounds = array<i64: 4, 1>, scalar_prefetch = 0 : i64, scratch_operands = 0 : i64, tpu.core_type = #tpu.core_type<tc>, window_params = [{pipeline_mode = #tpu.pipeline_mode<synchronous>, transform_indices = @transform_0, window_bounds = array<i64: 16, 128>}, {pipeline_mode = #tpu.pipeline_mode<synchronous>, transform_indices = @transform_1, window_bounds = array<i64: 16, 1>}, {transform_indices = @transform_2, window_bounds = array<i64: 1, 16, 1>}, {transform_indices = @transform_3, window_bounds = array<i64: 1, 16, 1>}, {transform_indices = @transform_4, window_bounds = array<i64: 1, 128, 64>}, {transform_indices = @transform_5, window_bounds = array<i64: 1, 16, 64>}]} {
    %c0 = arith.constant 0 : index
    %c0_0 = arith.constant 0 : index
    %0 = vector.load %arg2[%c0, %c0_0] : memref<16x128xbf16, #tpu.memory_space<vmem>>, vector<16x128xbf16>
    %c0_1 = arith.constant 0 : index
    %c0_2 = arith.constant 0 : index
    %c0_3 = arith.constant 0 : index
    %1 = vector.load %arg6[%c0_1, %c0_2, %c0_3] : memref<1x128x64xbf16, #tpu.memory_space<vmem>>, vector<1x128x64xbf16>
    %2 = vector.shape_cast %1 : vector<1x128x64xbf16> to vector<128x64xbf16>
    %cst = arith.constant dense<0.000000e+00> : vector<16x64xf32>
    %3 = tpu.matmul %0, %2, %cst {dimension_numbers = #tpu.dot_dimension_numbers<[1], [0], [0], [1], [0, 0, 1, 1], [], []>} : vector<16x128xbf16>, vector<128x64xbf16>, vector<16x64xf32> -> vector<16x64xf32>
    %c0_4 = arith.constant 0 : index
    %c0_5 = arith.constant 0 : index
    %4 = vector.load %arg3[%c0_4, %c0_5] : memref<16x1xf32, #tpu.memory_space<vmem>>, vector<16x1xf32>
    %5 = vector.broadcast %4 : vector<16x1xf32> to vector<16x64xf32>
    %6 = arith.addf %3, %5 : vector<16x64xf32>
    %cst_6 = arith.constant 0.000000e+00 : f32
    %7 = vector.broadcast %cst_6 : f32 to vector<16x64xf32>
    %8 = arith.maximumf %6, %7 : vector<16x64xf32>
    %c0_7 = arith.constant 0 : index
    %c0_8 = arith.constant 0 : index
    %c0_9 = arith.constant 0 : index
    %9 = vector.load %arg7[%c0_7, %c0_8, %c0_9] : memref<1x16x64xf32, #tpu.memory_space<vmem>>, vector<1x16x64xf32>
    %10 = vector.shape_cast %9 : vector<1x16x64xf32> to vector<16x64xf32>
    %11 = vector.shape_cast %8 : vector<16x64xf32> to vector<1x16x64xf32>
    tpu.vector_store %arg7[%c0_7, %c0_8, %c0_9], %11 {strides = array<i32>} : memref<1x16x64xf32, #tpu.memory_space<vmem>>, vector<1x16x64xf32>,
    return
  }
  func.func @transform_0(%arg0: i32, %arg1: i32) -> (i32, i32) {
    %c0_i32 = arith.constant 0 : i32
    %c0_i32_0 = arith.constant 0 : i32
    %c0_i32_1 = arith.constant 0 : i32
    return %c0_i32, %c0_i32_0 : i32, i32
  }
  func.func @transform_1(%arg0: i32, %arg1: i32) -> (i32, i32) {
    %c0_i32 = arith.constant 0 : i32
    %c0_i32_0 = arith.constant 0 : i32
    %c0_i32_1 = arith.constant 0 : i32
    return %c0_i32, %c0_i32_0 : i32, i32
  }
  func.func @transform_2(%arg0: i32, %arg1: i32) -> (i32, i32, i32) {
    %c0_i32 = arith.constant 0 : i32
    %c0_i32_0 = arith.constant 0 : i32
    %c0_i32_1 = arith.constant 0 : i32
    return %arg0, %c0_i32, %c0_i32_0 : i32, i32, i32
  }
  func.func @transform_3(%arg0: i32, %arg1: i32) -> (i32, i32, i32) {
    %c0_i32 = arith.constant 0 : i32
    %c0_i32_0 = arith.constant 0 : i32
    %c0_i32_1 = arith.constant 0 : i32
    return %arg0, %c0_i32, %c0_i32_0 : i32, i32, i32
  }
  func.func @transform_4(%arg0: i32, %arg1: i32) -> (i32, i32, i32) {
    %c0_i32 = arith.constant 0 : i32
    %c0_i32_0 = arith.constant 0 : i32
    return %arg0, %c0_i32, %arg1 : i32, i32, i32
  }
  func.func @transform_5(%arg0: i32, %arg1: i32) -> (i32, i32, i32) {
    %c0_i32 = arith.constant 0 : i32
    %c0_i32_0 = arith.constant 0 : i32
    return %arg0, %c0_i32, %arg1 : i32, i32, i32
  }
}

module attributes {stable_mosaic.version = 11 : i64} {
  func.func @_conv_kernel(%arg0: i32, %arg1: i32, %arg2: memref<32x256xbf16, #tpu.memory_space<vmem>>, %arg3: memref<32x1xf32, #tpu.memory_space<vmem>>, %arg4: memref<1x32x1xf32, #tpu.memory_space<vmem>>, %arg5: memref<1x32x1xf32, #tpu.memory_space<vmem>>, %arg6: memref<1x256x16xbf16, #tpu.memory_space<vmem>>, %arg7: memref<1x32x16xf32, #tpu.memory_space<vmem>>) attributes {dimension_semantics = [#tpu.dimension_semantics<parallel>, #tpu.dimension_semantics<parallel>], iteration_bounds = array<i64: 4, 1>, scalar_prefetch = 0 : i64, scratch_operands = 0 : i64, tpu.core_type = #tpu.core_type<tc>, window_params = [{pipeline_mode = #tpu.pipeline_mode<synchronous>, transform_indices = @transform_0, window_bounds = array<i64: 32, 256>}, {pipeline_mode = #tpu.pipeline_mode<synchronous>, transform_indices = @transform_1, window_bounds = array<i64: 32, 1>}, {transform_indices = @transform_2, window_bounds = array<i64: 1, 32, 1>}, {transform_indices = @transform_3, window_bounds = array<i64: 1, 32, 1>}, {transform_indices = @transform_4, window_bounds = array<i64: 1, 256, 16>}, {transform_indices = @transform_5, window_bounds = array<i64: 1, 32, 16>}]} {
    %c0 = arith.constant 0 : index
    %c0_0 = arith.constant 0 : index
    %0 = vector.load %arg2[%c0, %c0_0] : memref<32x256xbf16, #tpu.memory_space<vmem>>, vector<32x256xbf16>
    %c0_1 = arith.constant 0 : index
    %c0_2 = arith.constant 0 : index
    %c0_3 = arith.constant 0 : index
    %1 = vector.load %arg6[%c0_1, %c0_2, %c0_3] : memref<1x256x16xbf16, #tpu.memory_space<vmem>>, vector<1x256x16xbf16>
    %2 = vector.shape_cast %1 : vector<1x256x16xbf16> to vector<256x16xbf16>
    %cst = arith.constant dense<0.000000e+00> : vector<32x16xf32>
    %3 = tpu.matmul %0, %2, %cst {dimension_numbers = #tpu.dot_dimension_numbers<[1], [0], [0], [1], [0, 0, 1, 1], [], []>} : vector<32x256xbf16>, vector<256x16xbf16>, vector<32x16xf32> -> vector<32x16xf32>
    %c0_4 = arith.constant 0 : index
    %c0_5 = arith.constant 0 : index
    %4 = vector.load %arg3[%c0_4, %c0_5] : memref<32x1xf32, #tpu.memory_space<vmem>>, vector<32x1xf32>
    %5 = vector.broadcast %4 : vector<32x1xf32> to vector<32x16xf32>
    %6 = arith.addf %3, %5 : vector<32x16xf32>
    %cst_6 = arith.constant 0.000000e+00 : f32
    %7 = vector.broadcast %cst_6 : f32 to vector<32x16xf32>
    %8 = arith.maximumf %6, %7 : vector<32x16xf32>
    %c0_7 = arith.constant 0 : index
    %c0_8 = arith.constant 0 : index
    %c0_9 = arith.constant 0 : index
    %9 = vector.load %arg7[%c0_7, %c0_8, %c0_9] : memref<1x32x16xf32, #tpu.memory_space<vmem>>, vector<1x32x16xf32>
    %10 = vector.shape_cast %9 : vector<1x32x16xf32> to vector<32x16xf32>
    %11 = vector.shape_cast %8 : vector<32x16xf32> to vector<1x32x16xf32>
    tpu.vector_store %arg7[%c0_7, %c0_8, %c0_9], %11 {strides = array<i32>} : memref<1x32x16xf32, #tpu.memory_space<vmem>>, vector<1x32x16xf32>,
    return
  }
  func.func @transform_0(%arg0: i32, %arg1: i32) -> (i32, i32) {
    %c0_i32 = arith.constant 0 : i32
    %c0_i32_0 = arith.constant 0 : i32
    %c0_i32_1 = arith.constant 0 : i32
    return %c0_i32, %c0_i32_0 : i32, i32
  }
  func.func @transform_1(%arg0: i32, %arg1: i32) -> (i32, i32) {
    %c0_i32 = arith.constant 0 : i32
    %c0_i32_0 = arith.constant 0 : i32
    %c0_i32_1 = arith.constant 0 : i32
    return %c0_i32, %c0_i32_0 : i32, i32
  }
  func.func @transform_2(%arg0: i32, %arg1: i32) -> (i32, i32, i32) {
    %c0_i32 = arith.constant 0 : i32
    %c0_i32_0 = arith.constant 0 : i32
    %c0_i32_1 = arith.constant 0 : i32
    return %arg0, %c0_i32, %c0_i32_0 : i32, i32, i32
  }
  func.func @transform_3(%arg0: i32, %arg1: i32) -> (i32, i32, i32) {
    %c0_i32 = arith.constant 0 : i32
    %c0_i32_0 = arith.constant 0 : i32
    %c0_i32_1 = arith.constant 0 : i32
    return %arg0, %c0_i32, %c0_i32_0 : i32, i32, i32
  }
  func.func @transform_4(%arg0: i32, %arg1: i32) -> (i32, i32, i32) {
    %c0_i32 = arith.constant 0 : i32
    %c0_i32_0 = arith.constant 0 : i32
    return %arg0, %c0_i32, %arg1 : i32, i32, i32
  }
  func.func @transform_5(%arg0: i32, %arg1: i32) -> (i32, i32, i32) {
    %c0_i32 = arith.constant 0 : i32
    %c0_i32_0 = arith.constant 0 : i32
    return %arg0, %c0_i32, %arg1 : i32, i32, i32
  }
}

module attributes {stable_mosaic.version = 11 : i64} {
  func.func @_conv_pool_kernel(%arg0: i32, %arg1: i32, %arg2: memref<32x512xbf16, #tpu.memory_space<vmem>>, %arg3: memref<32x1xf32, #tpu.memory_space<vmem>>, %arg4: memref<1x32x1xf32, #tpu.memory_space<vmem>>, %arg5: memref<1x32x1xf32, #tpu.memory_space<vmem>>, %arg6: memref<1x512x4xbf16, #tpu.memory_space<vmem>>, %arg7: memref<1x32x4xf32, #tpu.memory_space<vmem>>, %arg8: memref<1x32x1xf32, #tpu.memory_space<vmem>>) attributes {dimension_semantics = [#tpu.dimension_semantics<parallel>, #tpu.dimension_semantics<parallel>], iteration_bounds = array<i64: 4, 1>, scalar_prefetch = 0 : i64, scratch_operands = 0 : i64, tpu.core_type = #tpu.core_type<tc>, window_params = [{pipeline_mode = #tpu.pipeline_mode<synchronous>, transform_indices = @transform_0, window_bounds = array<i64: 32, 512>}, {pipeline_mode = #tpu.pipeline_mode<synchronous>, transform_indices = @transform_1, window_bounds = array<i64: 32, 1>}, {transform_indices = @transform_2, window_bounds = array<i64: 1, 32, 1>}, {transform_indices = @transform_3, window_bounds = array<i64: 1, 32, 1>}, {transform_indices = @transform_4, window_bounds = array<i64: 1, 512, 4>}, {transform_indices = @transform_5, window_bounds = array<i64: 1, 32, 4>}, {transform_indices = @transform_6, window_bounds = array<i64: 1, 32, 1>}]} {
    %c0 = arith.constant 0 : index
    %c0_0 = arith.constant 0 : index
    %0 = vector.load %arg2[%c0, %c0_0] : memref<32x512xbf16, #tpu.memory_space<vmem>>, vector<32x512xbf16>
    %c0_1 = arith.constant 0 : index
    %c0_2 = arith.constant 0 : index
    %c0_3 = arith.constant 0 : index
    %1 = vector.load %arg6[%c0_1, %c0_2, %c0_3] : memref<1x512x4xbf16, #tpu.memory_space<vmem>>, vector<1x512x4xbf16>
    %2 = vector.shape_cast %1 : vector<1x512x4xbf16> to vector<512x4xbf16>
    %cst = arith.constant dense<0.000000e+00> : vector<32x4xf32>
    %3 = tpu.matmul %0, %2, %cst {dimension_numbers = #tpu.dot_dimension_numbers<[1], [0], [0], [1], [0, 0, 1, 1], [], []>} : vector<32x512xbf16>, vector<512x4xbf16>, vector<32x4xf32> -> vector<32x4xf32>
    %c0_4 = arith.constant 0 : index
    %c0_5 = arith.constant 0 : index
    %4 = vector.load %arg3[%c0_4, %c0_5] : memref<32x1xf32, #tpu.memory_space<vmem>>, vector<32x1xf32>
    %5 = vector.broadcast %4 : vector<32x1xf32> to vector<32x4xf32>
    %6 = arith.addf %3, %5 : vector<32x4xf32>
    %cst_6 = arith.constant 0.000000e+00 : f32
    %7 = vector.broadcast %cst_6 : f32 to vector<32x4xf32>
    %8 = arith.maximumf %6, %7 : vector<32x4xf32>
    %c0_7 = arith.constant 0 : index
    %c0_8 = arith.constant 0 : index
    %c0_9 = arith.constant 0 : index
    %9 = vector.load %arg7[%c0_7, %c0_8, %c0_9] : memref<1x32x4xf32, #tpu.memory_space<vmem>>, vector<1x32x4xf32>
    %10 = vector.shape_cast %9 : vector<1x32x4xf32> to vector<32x4xf32>
    %11 = vector.shape_cast %8 : vector<32x4xf32> to vector<1x32x4xf32>
    tpu.vector_store %arg7[%c0_7, %c0_8, %c0_9], %11 {strides = array<i32>} : memref<1x32x4xf32, #tpu.memory_space<vmem>>, vector<1x32x4xf32>,
    %cst_10 = arith.constant dense<0.000000e+00> : vector<32xf32>
    %12 = vector.multi_reduction <add>, %8, %cst_10 [1] : vector<32x4xf32> to vector<32xf32>
    %13 = vector.shape_cast %12 : vector<32xf32> to vector<32x1xf32>
    %cst_11 = arith.constant 4.000000e+00 : f32
    %14 = vector.broadcast %cst_11 : f32 to vector<32x1xf32>
    %15 = arith.divf %13, %14 : vector<32x1xf32>
    %c0_12 = arith.constant 0 : index
    %c0_13 = arith.constant 0 : index
    %c0_14 = arith.constant 0 : index
    %16 = vector.load %arg8[%c0_12, %c0_13, %c0_14] : memref<1x32x1xf32, #tpu.memory_space<vmem>>, vector<1x32x1xf32>
    %17 = vector.shape_cast %16 : vector<1x32x1xf32> to vector<32x1xf32>
    %18 = vector.shape_cast %15 : vector<32x1xf32> to vector<1x32x1xf32>
    tpu.vector_store %arg8[%c0_12, %c0_13, %c0_14], %18 {strides = array<i32>} : memref<1x32x1xf32, #tpu.memory_space<vmem>>, vector<1x32x1xf32>,
    return
  }
  func.func @transform_0(%arg0: i32, %arg1: i32) -> (i32, i32) {
    %c0_i32 = arith.constant 0 : i32
    %c0_i32_0 = arith.constant 0 : i32
    %c0_i32_1 = arith.constant 0 : i32
    return %c0_i32, %c0_i32_0 : i32, i32
  }
  func.func @transform_1(%arg0: i32, %arg1: i32) -> (i32, i32) {
    %c0_i32 = arith.constant 0 : i32
    %c0_i32_0 = arith.constant 0 : i32
    %c0_i32_1 = arith.constant 0 : i32
    return %c0_i32, %c0_i32_0 : i32, i32
  }
  func.func @transform_2(%arg0: i32, %arg1: i32) -> (i32, i32, i32) {
    %c0_i32 = arith.constant 0 : i32
    %c0_i32_0 = arith.constant 0 : i32
    %c0_i32_1 = arith.constant 0 : i32
    return %arg0, %c0_i32, %c0_i32_0 : i32, i32, i32
  }
  func.func @transform_3(%arg0: i32, %arg1: i32) -> (i32, i32, i32) {
    %c0_i32 = arith.constant 0 : i32
    %c0_i32_0 = arith.constant 0 : i32
    %c0_i32_1 = arith.constant 0 : i32
    return %arg0, %c0_i32, %c0_i32_0 : i32, i32, i32
  }
  func.func @transform_4(%arg0: i32, %arg1: i32) -> (i32, i32, i32) {
    %c0_i32 = arith.constant 0 : i32
    %c0_i32_0 = arith.constant 0 : i32
    return %arg0, %c0_i32, %arg1 : i32, i32, i32
  }
  func.func @transform_5(%arg0: i32, %arg1: i32) -> (i32, i32, i32) {
    %c0_i32 = arith.constant 0 : i32
    %c0_i32_0 = arith.constant 0 : i32
    return %arg0, %c0_i32, %arg1 : i32, i32, i32
  }
  func.func @transform_6(%arg0: i32, %arg1: i32) -> (i32, i32, i32) {
    %c0_i32 = arith.constant 0 : i32
    %c0_i32_0 = arith.constant 0 : i32
    %c0_i32_1 = arith.constant 0 : i32
    return %arg0, %c0_i32, %c0_i32_0 : i32, i32, i32
  }
}

module attributes {stable_mosaic.version = 11 : i64} {
  func.func @_mlp_kernel(%arg0: memref<4x8xf32, #tpu.memory_space<vmem>>, %arg1: memref<8x16xf32, #tpu.memory_space<vmem>>, %arg2: memref<1x16xf32, #tpu.memory_space<vmem>>, %arg3: memref<16x16xf32, #tpu.memory_space<vmem>>, %arg4: memref<1x16xf32, #tpu.memory_space<vmem>>, %arg5: memref<16x128xf32, #tpu.memory_space<vmem>>, %arg6: memref<1x128xf32, #tpu.memory_space<vmem>>, %arg7: memref<4x128xf32, #tpu.memory_space<vmem>>) attributes {dimension_semantics = [], scalar_prefetch = 0 : i64, scratch_operands = 0 : i64, tpu.core_type = #tpu.core_type<tc>} {
    %c0 = arith.constant 0 : index
    %c0_0 = arith.constant 0 : index
    %0 = vector.load %arg0[%c0, %c0_0] : memref<4x8xf32, #tpu.memory_space<vmem>>, vector<4x8xf32>
    %c0_1 = arith.constant 0 : index
    %c0_2 = arith.constant 0 : index
    %1 = vector.load %arg1[%c0_1, %c0_2] : memref<8x16xf32, #tpu.memory_space<vmem>>, vector<8x16xf32>
    %cst = arith.constant dense<0.000000e+00> : vector<4x16xf32>
    %2 = tpu.matmul %0, %1, %cst {dimension_numbers = #tpu.dot_dimension_numbers<[1], [0], [0], [1], [0, 0, 1, 1], [], []>} : vector<4x8xf32>, vector<8x16xf32>, vector<4x16xf32> -> vector<4x16xf32>
    %c0_3 = arith.constant 0 : index
    %c0_4 = arith.constant 0 : index
    %3 = vector.load %arg2[%c0_3, %c0_4] : memref<1x16xf32, #tpu.memory_space<vmem>>, vector<1x16xf32>
    %4 = vector.broadcast %3 : vector<1x16xf32> to vector<4x16xf32>
    %5 = arith.addf %2, %4 : vector<4x16xf32>
    %cst_5 = arith.constant 0.000000e+00 : f32
    %6 = vector.broadcast %cst_5 : f32 to vector<4x16xf32>
    %7 = arith.maximumf %5, %6 : vector<4x16xf32>
    %c0_6 = arith.constant 0 : index
    %c0_7 = arith.constant 0 : index
    %8 = vector.load %arg3[%c0_6, %c0_7] : memref<16x16xf32, #tpu.memory_space<vmem>>, vector<16x16xf32>
    %cst_8 = arith.constant dense<0.000000e+00> : vector<4x16xf32>
    %9 = tpu.matmul %7, %8, %cst_8 {dimension_numbers = #tpu.dot_dimension_numbers<[1], [0], [0], [1], [0, 0, 1, 1], [], []>} : vector<4x16xf32>, vector<16x16xf32>, vector<4x16xf32> -> vector<4x16xf32>
    %c0_9 = arith.constant 0 : index
    %c0_10 = arith.constant 0 : index
    %10 = vector.load %arg4[%c0_9, %c0_10] : memref<1x16xf32, #tpu.memory_space<vmem>>, vector<1x16xf32>
    %11 = vector.broadcast %10 : vector<1x16xf32> to vector<4x16xf32>
    %12 = arith.addf %9, %11 : vector<4x16xf32>
    %cst_11 = arith.constant 0.000000e+00 : f32
    %13 = vector.broadcast %cst_11 : f32 to vector<4x16xf32>
    %14 = arith.maximumf %12, %13 : vector<4x16xf32>
    %c0_12 = arith.constant 0 : index
    %c0_13 = arith.constant 0 : index
    %15 = vector.load %arg5[%c0_12, %c0_13] : memref<16x128xf32, #tpu.memory_space<vmem>>, vector<16x128xf32>
    %cst_14 = arith.constant dense<0.000000e+00> : vector<4x128xf32>
    %16 = tpu.matmul %14, %15, %cst_14 {dimension_numbers = #tpu.dot_dimension_numbers<[1], [0], [0], [1], [0, 0, 1, 1], [], []>} : vector<4x16xf32>, vector<16x128xf32>, vector<4x128xf32> -> vector<4x128xf32>
    %c0_15 = arith.constant 0 : index
    %c0_16 = arith.constant 0 : index
    %17 = vector.load %arg6[%c0_15, %c0_16] : memref<1x128xf32, #tpu.memory_space<vmem>>, vector<1x128xf32>
    %18 = vector.broadcast %17 : vector<1x128xf32> to vector<4x128xf32>
    %19 = arith.addf %16, %18 : vector<4x128xf32>
    %c0_17 = arith.constant 0 : index
    %c0_18 = arith.constant 0 : index
    %20 = vector.load %arg7[%c0_17, %c0_18] : memref<4x128xf32, #tpu.memory_space<vmem>>, vector<4x128xf32>
    tpu.vector_store %arg7[%c0_17, %c0_18], %19 {strides = array<i32>} : memref<4x128xf32, #tpu.memory_space<vmem>>, vector<4x128xf32>,
    return
  }
}

module attributes {stable_mosaic.version = 11 : i64} {
  func.func @_dense_kernel(%arg0: memref<4x32xf32, #tpu.memory_space<vmem>>, %arg1: memref<32x8xf32, #tpu.memory_space<vmem>>, %arg2: memref<1x8xf32, #tpu.memory_space<vmem>>, %arg3: memref<4x8xf32, #tpu.memory_space<vmem>>) attributes {dimension_semantics = [], scalar_prefetch = 0 : i64, scratch_operands = 0 : i64, tpu.core_type = #tpu.core_type<tc>} {
    %c0 = arith.constant 0 : index
    %c0_0 = arith.constant 0 : index
    %0 = vector.load %arg0[%c0, %c0_0] : memref<4x32xf32, #tpu.memory_space<vmem>>, vector<4x32xf32>
    %c0_1 = arith.constant 0 : index
    %c0_2 = arith.constant 0 : index
    %1 = vector.load %arg1[%c0_1, %c0_2] : memref<32x8xf32, #tpu.memory_space<vmem>>, vector<32x8xf32>
    %cst = arith.constant dense<0.000000e+00> : vector<4x8xf32>
    %2 = tpu.matmul %0, %1, %cst {dimension_numbers = #tpu.dot_dimension_numbers<[1], [0], [0], [1], [0, 0, 1, 1], [], []>} : vector<4x32xf32>, vector<32x8xf32>, vector<4x8xf32> -> vector<4x8xf32>
    %c0_3 = arith.constant 0 : index
    %c0_4 = arith.constant 0 : index
    %3 = vector.load %arg2[%c0_3, %c0_4] : memref<1x8xf32, #tpu.memory_space<vmem>>, vector<1x8xf32>
    %4 = vector.broadcast %3 : vector<1x8xf32> to vector<4x8xf32>
    %5 = arith.addf %2, %4 : vector<4x8xf32>
    %c0_5 = arith.constant 0 : index
    %c0_6 = arith.constant 0 : index
    %6 = vector.load %arg3[%c0_5, %c0_6] : memref<4x8xf32, #tpu.memory_space<vmem>>, vector<4x8xf32>
    tpu.vector_store %arg3[%c0_5, %c0_6], %5 {strides = array<i32>} : memref<4x8xf32, #tpu.memory_space<vmem>>, vector<4x8xf32>,
    return
  }
}

module attributes {stable_mosaic.version = 11 : i64} {
  func.func @_conv_kernel(%arg0: i32, %arg1: i32, %arg2: memref<32x288xbf16, #tpu.memory_space<vmem>>, %arg3: memref<32x1xf32, #tpu.memory_space<vmem>>, %arg4: memref<1x32x1xf32, #tpu.memory_space<vmem>>, %arg5: memref<1x32x1xf32, #tpu.memory_space<vmem>>, %arg6: memref<1x288x16xbf16, #tpu.memory_space<vmem>>, %arg7: memref<1x32x16xf32, #tpu.memory_space<vmem>>) attributes {dimension_semantics = [#tpu.dimension_semantics<parallel>, #tpu.dimension_semantics<parallel>], iteration_bounds = array<i64: 4, 1>, scalar_prefetch = 0 : i64, scratch_operands = 0 : i64, tpu.core_type = #tpu.core_type<tc>, window_params = [{pipeline_mode = #tpu.pipeline_mode<synchronous>, transform_indices = @transform_0, window_bounds = array<i64: 32, 288>}, {pipeline_mode = #tpu.pipeline_mode<synchronous>, transform_indices = @transform_1, window_bounds = array<i64: 32, 1>}, {transform_indices = @transform_2, window_bounds = array<i64: 1, 32, 1>}, {transform_indices = @transform_3, window_bounds = array<i64: 1, 32, 1>}, {transform_indices = @transform_4, window_bounds = array<i64: 1, 288, 16>}, {transform_indices = @transform_5, window_bounds = array<i64: 1, 32, 16>}]} {
    %c0 = arith.constant 0 : index
    %c0_0 = arith.constant 0 : index
    %0 = vector.load %arg2[%c0, %c0_0] : memref<32x288xbf16, #tpu.memory_space<vmem>>, vector<32x288xbf16>
    %c0_1 = arith.constant 0 : index
    %c0_2 = arith.constant 0 : index
    %c0_3 = arith.constant 0 : index
    %1 = vector.load %arg6[%c0_1, %c0_2, %c0_3] : memref<1x288x16xbf16, #tpu.memory_space<vmem>>, vector<1x288x16xbf16>
    %2 = vector.shape_cast %1 : vector<1x288x16xbf16> to vector<288x16xbf16>
    %cst = arith.constant dense<0.000000e+00> : vector<32x16xf32>
    %3 = tpu.matmul %0, %2, %cst {dimension_numbers = #tpu.dot_dimension_numbers<[1], [0], [0], [1], [0, 0, 1, 1], [], []>} : vector<32x288xbf16>, vector<288x16xbf16>, vector<32x16xf32> -> vector<32x16xf32>
    %c0_4 = arith.constant 0 : index
    %c0_5 = arith.constant 0 : index
    %4 = vector.load %arg3[%c0_4, %c0_5] : memref<32x1xf32, #tpu.memory_space<vmem>>, vector<32x1xf32>
    %5 = vector.broadcast %4 : vector<32x1xf32> to vector<32x16xf32>
    %6 = arith.addf %3, %5 : vector<32x16xf32>
    %cst_6 = arith.constant dense<0.000000e+00> : vector<32xf32>
    %7 = vector.multi_reduction <add>, %6, %cst_6 [1] : vector<32x16xf32> to vector<32xf32>
    %8 = vector.shape_cast %7 : vector<32xf32> to vector<32x1xf32>
    %cst_7 = arith.constant 1.600000e+01 : f32
    %9 = vector.broadcast %cst_7 : f32 to vector<32x1xf32>
    %10 = arith.divf %8, %9 : vector<32x1xf32>
    %11 = vector.broadcast %10 : vector<32x1xf32> to vector<32x16xf32>
    %12 = arith.subf %6, %11 : vector<32x16xf32>
    %13 = arith.mulf %12, %12 : vector<32x16xf32>
    %cst_8 = arith.constant dense<0.000000e+00> : vector<32xf32>
    %14 = vector.multi_reduction <add>, %13, %cst_8 [1] : vector<32x16xf32> to vector<32xf32>
    %15 = vector.shape_cast %14 : vector<32xf32> to vector<32x1xf32>
    %cst_9 = arith.constant 1.600000e+01 : f32
    %16 = vector.broadcast %cst_9 : f32 to vector<32x1xf32>
    %17 = arith.divf %15, %16 : vector<32x1xf32>
    %18 = vector.broadcast %10 : vector<32x1xf32> to vector<32x16xf32>
    %19 = arith.subf %6, %18 : vector<32x16xf32>
    %cst_10 = arith.constant 9.99999974E-6 : f32
    %20 = vector.broadcast %cst_10 : f32 to vector<32x1xf32>
    %21 = arith.addf %17, %20 : vector<32x1xf32>
    %22 = math.rsqrt %21 : vector<32x1xf32>
    %23 = vector.broadcast %22 : vector<32x1xf32> to vector<32x16xf32>
    %24 = arith.mulf %19, %23 : vector<32x16xf32>
    %c0_11 = arith.constant 0 : index
    %c0_12 = arith.constant 0 : index
    %c0_13 = arith.constant 0 : index
    %25 = vector.load %arg4[%c0_11, %c0_12, %c0_13] : memref<1x32x1xf32, #tpu.memory_space<vmem>>, vector<1x32x1xf32>
    %26 = vector.shape_cast %25 : vector<1x32x1xf32> to vector<32x1xf32>
    %27 = vector.broadcast %26 : vector<32x1xf32> to vector<32x16xf32>
    %28 = arith.mulf %24, %27 : vector<32x16xf32>
    %c0_14 = arith.constant 0 : index
    %c0_15 = arith.constant 0 : index
    %c0_16 = arith.constant 0 : index
    %29 = vector.load %arg5[%c0_14, %c0_15, %c0_16] : memref<1x32x1xf32, #tpu.memory_space<vmem>>, vector<1x32x1xf32>
    %30 = vector.shape_cast %29 : vector<1x32x1xf32> to vector<32x1xf32>
    %31 = vector.broadcast %30 : vector<32x1xf32> to vector<32x16xf32>
    %32 = arith.addf %28, %31 : vector<32x16xf32>
    %cst_17 = arith.constant 0.000000e+00 : f32
    %33 = vector.broadcast %cst_17 : f32 to vector<32x16xf32>
    %34 = arith.maximumf %32, %33 : vector<32x16xf32>
    %c0_18 = arith.constant 0 : index
    %c0_19 = arith.constant 0 : index
    %c0_20 = arith.constant 0 : index
    %35 = vector.load %arg7[%c0_18, %c0_19, %c0_20] : memref<1x32x16xf32, #tpu.memory_space<vmem>>, vector<1x32x16xf32>
    %36 = vector.shape_cast %35 : vector<1x32x16xf32> to vector<32x16xf32>
    %37 = vector.shape_cast %34 : vector<32x16xf32> to vector<1x32x16xf32>
    tpu.vector_store %arg7[%c0_18, %c0_19, %c0_20], %37 {strides = array<i32>} : memref<1x32x16xf32, #tpu.memory_space<vmem>>, vector<1x32x16xf32>,
    return
  }
  func.func @transform_0(%arg0: i32, %arg1: i32) -> (i32, i32) {
    %c0_i32 = arith.constant 0 : i32
    %c0_i32_0 = arith.constant 0 : i32
    %c0_i32_1 = arith.constant 0 : i32
    return %c0_i32, %c0_i32_0 : i32, i32
  }
  func.func @transform_1(%arg0: i32, %arg1: i32) -> (i32, i32) {
    %c0_i32 = arith.constant 0 : i32
    %c0_i32_0 = arith.constant 0 : i32
    %c0_i32_1 = arith.constant 0 : i32
    return %c0_i32, %c0_i32_0 : i32, i32
  }
  func.func @transform_2(%arg0: i32, %arg1: i32) -> (i32, i32, i32) {
    %c0_i32 = arith.constant 0 : i32
    %c0_i32_0 = arith.constant 0 : i32
    %c0_i32_1 = arith.constant 0 : i32
    return %arg0, %c0_i32, %c0_i32_0 : i32, i32, i32
  }
  func.func @transform_3(%arg0: i32, %arg1: i32) -> (i32, i32, i32) {
    %c0_i32 = arith.constant 0 : i32
    %c0_i32_0 = arith.constant 0 : i32
    %c0_i32_1 = arith.constant 0 : i32
    return %arg0, %c0_i32, %c0_i32_0 : i32, i32, i32
  }
  func.func @transform_4(%arg0: i32, %arg1: i32) -> (i32, i32, i32) {
    %c0_i32 = arith.constant 0 : i32
    %c0_i32_0 = arith.constant 0 : i32
    return %arg0, %c0_i32, %arg1 : i32, i32, i32
  }
  func.func @transform_5(%arg0: i32, %arg1: i32) -> (i32, i32, i32) {
    %c0_i32 = arith.constant 0 : i32
    %c0_i32_0 = arith.constant 0 : i32
    return %arg0, %c0_i32, %arg1 : i32, i32, i32
  }
}

module attributes {stable_mosaic.version = 11 : i64} {
  func.func @_conv_kernel(%arg0: i32, %arg1: i32, %arg2: memref<32x288xbf16, #tpu.memory_space<vmem>>, %arg3: memref<32x1xf32, #tpu.memory_space<vmem>>, %arg4: memref<1x32x1xf32, #tpu.memory_space<vmem>>, %arg5: memref<1x32x1xf32, #tpu.memory_space<vmem>>, %arg6: memref<1x288x16xbf16, #tpu.memory_space<vmem>>, %arg7: memref<1x32x16xf32, #tpu.memory_space<vmem>>) attributes {dimension_semantics = [#tpu.dimension_semantics<parallel>, #tpu.dimension_semantics<parallel>], iteration_bounds = array<i64: 4, 1>, scalar_prefetch = 0 : i64, scratch_operands = 0 : i64, tpu.core_type = #tpu.core_type<tc>, window_params = [{pipeline_mode = #tpu.pipeline_mode<synchronous>, transform_indices = @transform_0, window_bounds = array<i64: 32, 288>}, {pipeline_mode = #tpu.pipeline_mode<synchronous>, transform_indices = @transform_1, window_bounds = array<i64: 32, 1>}, {transform_indices = @transform_2, window_bounds = array<i64: 1, 32, 1>}, {transform_indices = @transform_3, window_bounds = array<i64: 1, 32, 1>}, {transform_indices = @transform_4, window_bounds = array<i64: 1, 288, 16>}, {transform_indices = @transform_5, window_bounds = array<i64: 1, 32, 16>}]} {
    %c0 = arith.constant 0 : index
    %c0_0 = arith.constant 0 : index
    %0 = vector.load %arg2[%c0, %c0_0] : memref<32x288xbf16, #tpu.memory_space<vmem>>, vector<32x288xbf16>
    %c0_1 = arith.constant 0 : index
    %c0_2 = arith.constant 0 : index
    %c0_3 = arith.constant 0 : index
    %1 = vector.load %arg6[%c0_1, %c0_2, %c0_3] : memref<1x288x16xbf16, #tpu.memory_space<vmem>>, vector<1x288x16xbf16>
    %2 = vector.shape_cast %1 : vector<1x288x16xbf16> to vector<288x16xbf16>
    %cst = arith.constant dense<0.000000e+00> : vector<32x16xf32>
    %3 = tpu.matmul %0, %2, %cst {dimension_numbers = #tpu.dot_dimension_numbers<[1], [0], [0], [1], [0, 0, 1, 1], [], []>} : vector<32x288xbf16>, vector<288x16xbf16>, vector<32x16xf32> -> vector<32x16xf32>
    %c0_4 = arith.constant 0 : index
    %c0_5 = arith.constant 0 : index
    %4 = vector.load %arg3[%c0_4, %c0_5] : memref<32x1xf32, #tpu.memory_space<vmem>>, vector<32x1xf32>
    %5 = vector.broadcast %4 : vector<32x1xf32> to vector<32x16xf32>
    %6 = arith.addf %3, %5 : vector<32x16xf32>
    %cst_6 = arith.constant dense<0.000000e+00> : vector<32xf32>
    %7 = vector.multi_reduction <add>, %6, %cst_6 [1] : vector<32x16xf32> to vector<32xf32>
    %8 = vector.shape_cast %7 : vector<32xf32> to vector<32x1xf32>
    %cst_7 = arith.constant 1.600000e+01 : f32
    %9 = vector.broadcast %cst_7 : f32 to vector<32x1xf32>
    %10 = arith.divf %8, %9 : vector<32x1xf32>
    %11 = vector.broadcast %10 : vector<32x1xf32> to vector<32x16xf32>
    %12 = arith.subf %6, %11 : vector<32x16xf32>
    %13 = arith.mulf %12, %12 : vector<32x16xf32>
    %cst_8 = arith.constant dense<0.000000e+00> : vector<32xf32>
    %14 = vector.multi_reduction <add>, %13, %cst_8 [1] : vector<32x16xf32> to vector<32xf32>
    %15 = vector.shape_cast %14 : vector<32xf32> to vector<32x1xf32>
    %cst_9 = arith.constant 1.600000e+01 : f32
    %16 = vector.broadcast %cst_9 : f32 to vector<32x1xf32>
    %17 = arith.divf %15, %16 : vector<32x1xf32>
    %18 = vector.broadcast %10 : vector<32x1xf32> to vector<32x16xf32>
    %19 = arith.subf %6, %18 : vector<32x16xf32>
    %cst_10 = arith.constant 9.99999974E-6 : f32
    %20 = vector.broadcast %cst_10 : f32 to vector<32x1xf32>
    %21 = arith.addf %17, %20 : vector<32x1xf32>
    %22 = math.rsqrt %21 : vector<32x1xf32>
    %23 = vector.broadcast %22 : vector<32x1xf32> to vector<32x16xf32>
    %24 = arith.mulf %19, %23 : vector<32x16xf32>
    %c0_11 = arith.constant 0 : index
    %c0_12 = arith.constant 0 : index
    %c0_13 = arith.constant 0 : index
    %25 = vector.load %arg4[%c0_11, %c0_12, %c0_13] : memref<1x32x1xf32, #tpu.memory_space<vmem>>, vector<1x32x1xf32>
    %26 = vector.shape_cast %25 : vector<1x32x1xf32> to vector<32x1xf32>
    %27 = vector.broadcast %26 : vector<32x1xf32> to vector<32x16xf32>
    %28 = arith.mulf %24, %27 : vector<32x16xf32>
    %c0_14 = arith.constant 0 : index
    %c0_15 = arith.constant 0 : index
    %c0_16 = arith.constant 0 : index
    %29 = vector.load %arg5[%c0_14, %c0_15, %c0_16] : memref<1x32x1xf32, #tpu.memory_space<vmem>>, vector<1x32x1xf32>
    %30 = vector.shape_cast %29 : vector<1x32x1xf32> to vector<32x1xf32>
    %31 = vector.broadcast %30 : vector<32x1xf32> to vector<32x16xf32>
    %32 = arith.addf %28, %31 : vector<32x16xf32>
    %c0_17 = arith.constant 0 : index
    %c0_18 = arith.constant 0 : index
    %c0_19 = arith.constant 0 : index
    %33 = vector.load %arg7[%c0_17, %c0_18, %c0_19] : memref<1x32x16xf32, #tpu.memory_space<vmem>>, vector<1x32x16xf32>
    %34 = vector.shape_cast %33 : vector<1x32x16xf32> to vector<32x16xf32>
    %35 = vector.shape_cast %32 : vector<32x16xf32> to vector<1x32x16xf32>
    tpu.vector_store %arg7[%c0_17, %c0_18, %c0_19], %35 {strides = array<i32>} : memref<1x32x16xf32, #tpu.memory_space<vmem>>, vector<1x32x16xf32>,
    return
  }
  func.func @transform_0(%arg0: i32, %arg1: i32) -> (i32, i32) {
    %c0_i32 = arith.constant 0 : i32
    %c0_i32_0 = arith.constant 0 : i32
    %c0_i32_1 = arith.constant 0 : i32
    return %c0_i32, %c0_i32_0 : i32, i32
  }
  func.func @transform_1(%arg0: i32, %arg1: i32) -> (i32, i32) {
    %c0_i32 = arith.constant 0 : i32
    %c0_i32_0 = arith.constant 0 : i32
    %c0_i32_1 = arith.constant 0 : i32
    return %c0_i32, %c0_i32_0 : i32, i32
  }
  func.func @transform_2(%arg0: i32, %arg1: i32) -> (i32, i32, i32) {
    %c0_i32 = arith.constant 0 : i32
    %c0_i32_0 = arith.constant 0 : i32
    %c0_i32_1 = arith.constant 0 : i32
    return %arg0, %c0_i32, %c0_i32_0 : i32, i32, i32
  }
  func.func @transform_3(%arg0: i32, %arg1: i32) -> (i32, i32, i32) {
    %c0_i32 = arith.constant 0 : i32
    %c0_i32_0 = arith.constant 0 : i32
    %c0_i32_1 = arith.constant 0 : i32
    return %arg0, %c0_i32, %c0_i32_0 : i32, i32, i32
  }
  func.func @transform_4(%arg0: i32, %arg1: i32) -> (i32, i32, i32) {
    %c0_i32 = arith.constant 0 : i32
    %c0_i32_0 = arith.constant 0 : i32
    return %arg0, %c0_i32, %arg1 : i32, i32, i32
  }
  func.func @transform_5(%arg0: i32, %arg1: i32) -> (i32, i32, i32) {
    %c0_i32 = arith.constant 0 : i32
    %c0_i32_0 = arith.constant 0 : i32
    return %arg0, %c0_i32, %arg1 : i32, i32, i32
  }
}

module attributes {stable_mosaic.version = 11 : i64} {
  func.func @_conv_kernel(%arg0: i32, %arg1: i32, %arg2: memref<16x800xbf16, #tpu.memory_space<vmem>>, %arg3: memref<16x1xf32, #tpu.memory_space<vmem>>, %arg4: memref<1x16x1xf32, #tpu.memory_space<vmem>>, %arg5: memref<1x16x1xf32, #tpu.memory_space<vmem>>, %arg6: memref<1x800x64xbf16, #tpu.memory_space<vmem>>, %arg7: memref<1x16x64xf32, #tpu.memory_space<vmem>>) attributes {dimension_semantics = [#tpu.dimension_semantics<parallel>, #tpu.dimension_semantics<parallel>], iteration_bounds = array<i64: 4, 1>, scalar_prefetch = 0 : i64, scratch_operands = 0 : i64, tpu.core_type = #tpu.core_type<tc>, window_params = [{pipeline_mode = #tpu.pipeline_mode<synchronous>, transform_indices = @transform_0, window_bounds = array<i64: 16, 800>}, {pipeline_mode = #tpu.pipeline_mode<synchronous>, transform_indices = @transform_1, window_bounds = array<i64: 16, 1>}, {transform_indices = @transform_2, window_bounds = array<i64: 1, 16, 1>}, {transform_indices = @transform_3, window_bounds = array<i64: 1, 16, 1>}, {transform_indices = @transform_4, window_bounds = array<i64: 1, 800, 64>}, {transform_indices = @transform_5, window_bounds = array<i64: 1, 16, 64>}]} {
    %c0 = arith.constant 0 : index
    %c0_0 = arith.constant 0 : index
    %0 = vector.load %arg2[%c0, %c0_0] : memref<16x800xbf16, #tpu.memory_space<vmem>>, vector<16x800xbf16>
    %c0_1 = arith.constant 0 : index
    %c0_2 = arith.constant 0 : index
    %c0_3 = arith.constant 0 : index
    %1 = vector.load %arg6[%c0_1, %c0_2, %c0_3] : memref<1x800x64xbf16, #tpu.memory_space<vmem>>, vector<1x800x64xbf16>
    %2 = vector.shape_cast %1 : vector<1x800x64xbf16> to vector<800x64xbf16>
    %cst = arith.constant dense<0.000000e+00> : vector<16x64xf32>
    %3 = tpu.matmul %0, %2, %cst {dimension_numbers = #tpu.dot_dimension_numbers<[1], [0], [0], [1], [0, 0, 1, 1], [], []>} : vector<16x800xbf16>, vector<800x64xbf16>, vector<16x64xf32> -> vector<16x64xf32>
    %c0_4 = arith.constant 0 : index
    %c0_5 = arith.constant 0 : index
    %4 = vector.load %arg3[%c0_4, %c0_5] : memref<16x1xf32, #tpu.memory_space<vmem>>, vector<16x1xf32>
    %5 = vector.broadcast %4 : vector<16x1xf32> to vector<16x64xf32>
    %6 = arith.addf %3, %5 : vector<16x64xf32>
    %cst_6 = arith.constant dense<0.000000e+00> : vector<16xf32>
    %7 = vector.multi_reduction <add>, %6, %cst_6 [1] : vector<16x64xf32> to vector<16xf32>
    %8 = vector.shape_cast %7 : vector<16xf32> to vector<16x1xf32>
    %cst_7 = arith.constant 6.400000e+01 : f32
    %9 = vector.broadcast %cst_7 : f32 to vector<16x1xf32>
    %10 = arith.divf %8, %9 : vector<16x1xf32>
    %11 = vector.broadcast %10 : vector<16x1xf32> to vector<16x64xf32>
    %12 = arith.subf %6, %11 : vector<16x64xf32>
    %13 = arith.mulf %12, %12 : vector<16x64xf32>
    %cst_8 = arith.constant dense<0.000000e+00> : vector<16xf32>
    %14 = vector.multi_reduction <add>, %13, %cst_8 [1] : vector<16x64xf32> to vector<16xf32>
    %15 = vector.shape_cast %14 : vector<16xf32> to vector<16x1xf32>
    %cst_9 = arith.constant 6.400000e+01 : f32
    %16 = vector.broadcast %cst_9 : f32 to vector<16x1xf32>
    %17 = arith.divf %15, %16 : vector<16x1xf32>
    %18 = vector.broadcast %10 : vector<16x1xf32> to vector<16x64xf32>
    %19 = arith.subf %6, %18 : vector<16x64xf32>
    %cst_10 = arith.constant 9.99999974E-6 : f32
    %20 = vector.broadcast %cst_10 : f32 to vector<16x1xf32>
    %21 = arith.addf %17, %20 : vector<16x1xf32>
    %22 = math.rsqrt %21 : vector<16x1xf32>
    %23 = vector.broadcast %22 : vector<16x1xf32> to vector<16x64xf32>
    %24 = arith.mulf %19, %23 : vector<16x64xf32>
    %c0_11 = arith.constant 0 : index
    %c0_12 = arith.constant 0 : index
    %c0_13 = arith.constant 0 : index
    %25 = vector.load %arg4[%c0_11, %c0_12, %c0_13] : memref<1x16x1xf32, #tpu.memory_space<vmem>>, vector<1x16x1xf32>
    %26 = vector.shape_cast %25 : vector<1x16x1xf32> to vector<16x1xf32>
    %27 = vector.broadcast %26 : vector<16x1xf32> to vector<16x64xf32>
    %28 = arith.mulf %24, %27 : vector<16x64xf32>
    %c0_14 = arith.constant 0 : index
    %c0_15 = arith.constant 0 : index
    %c0_16 = arith.constant 0 : index
    %29 = vector.load %arg5[%c0_14, %c0_15, %c0_16] : memref<1x16x1xf32, #tpu.memory_space<vmem>>, vector<1x16x1xf32>
    %30 = vector.shape_cast %29 : vector<1x16x1xf32> to vector<16x1xf32>
    %31 = vector.broadcast %30 : vector<16x1xf32> to vector<16x64xf32>
    %32 = arith.addf %28, %31 : vector<16x64xf32>
    %cst_17 = arith.constant 0.000000e+00 : f32
    %33 = vector.broadcast %cst_17 : f32 to vector<16x64xf32>
    %34 = arith.maximumf %32, %33 : vector<16x64xf32>
    %c0_18 = arith.constant 0 : index
    %c0_19 = arith.constant 0 : index
    %c0_20 = arith.constant 0 : index
    %35 = vector.load %arg7[%c0_18, %c0_19, %c0_20] : memref<1x16x64xf32, #tpu.memory_space<vmem>>, vector<1x16x64xf32>
    %36 = vector.shape_cast %35 : vector<1x16x64xf32> to vector<16x64xf32>
    %37 = vector.shape_cast %34 : vector<16x64xf32> to vector<1x16x64xf32>
    tpu.vector_store %arg7[%c0_18, %c0_19, %c0_20], %37 {strides = array<i32>} : memref<1x16x64xf32, #tpu.memory_space<vmem>>, vector<1x16x64xf32>,
    return
  }
  func.func @transform_0(%arg0: i32, %arg1: i32) -> (i32, i32) {
    %c0_i32 = arith.constant 0 : i32
    %c0_i32_0 = arith.constant 0 : i32
    %c0_i32_1 = arith.constant 0 : i32
    return %c0_i32, %c0_i32_0 : i32, i32
  }
  func.func @transform_1(%arg0: i32, %arg1: i32) -> (i32, i32) {
    %c0_i32 = arith.constant 0 : i32
    %c0_i32_0 = arith.constant 0 : i32
    %c0_i32_1 = arith.constant 0 : i32
    return %c0_i32, %c0_i32_0 : i32, i32
  }
  func.func @transform_2(%arg0: i32, %arg1: i32) -> (i32, i32, i32) {
    %c0_i32 = arith.constant 0 : i32
    %c0_i32_0 = arith.constant 0 : i32
    %c0_i32_1 = arith.constant 0 : i32
    return %arg0, %c0_i32, %c0_i32_0 : i32, i32, i32
  }
  func.func @transform_3(%arg0: i32, %arg1: i32) -> (i32, i32, i32) {
    %c0_i32 = arith.constant 0 : i32
    %c0_i32_0 = arith.constant 0 : i32
    %c0_i32_1 = arith.constant 0 : i32
    return %arg0, %c0_i32, %c0_i32_0 : i32, i32, i32
  }
  func.func @transform_4(%arg0: i32, %arg1: i32) -> (i32, i32, i32) {
    %c0_i32 = arith.constant 0 : i32
    %c0_i32_0 = arith.constant 0 : i32
    return %arg0, %c0_i32, %arg1 : i32, i32, i32
  }
  func.func @transform_5(%arg0: i32, %arg1: i32) -> (i32, i32, i32) {
    %c0_i32 = arith.constant 0 : i32
    %c0_i32_0 = arith.constant 0 : i32
    return %arg0, %c0_i32, %arg1 : i32, i32, i32
  }
}

module attributes {stable_mosaic.version = 11 : i64} {
  func.func @_conv_kernel(%arg0: i32, %arg1: i32, %arg2: memref<8x400xbf16, #tpu.memory_space<vmem>>, %arg3: memref<8x1xf32, #tpu.memory_space<vmem>>, %arg4: memref<1x8x1xf32, #tpu.memory_space<vmem>>, %arg5: memref<1x8x1xf32, #tpu.memory_space<vmem>>, %arg6: memref<1x400x256xbf16, #tpu.memory_space<vmem>>, %arg7: memref<1x8x256xf32, #tpu.memory_space<vmem>>) attributes {dimension_semantics = [#tpu.dimension_semantics<parallel>, #tpu.dimension_semantics<parallel>], iteration_bounds = array<i64: 4, 1>, scalar_prefetch = 0 : i64, scratch_operands = 0 : i64, tpu.core_type = #tpu.core_type<tc>, window_params = [{pipeline_mode = #tpu.pipeline_mode<synchronous>, transform_indices = @transform_0, window_bounds = array<i64: 8, 400>}, {pipeline_mode = #tpu.pipeline_mode<synchronous>, transform_indices = @transform_1, window_bounds = array<i64: 8, 1>}, {transform_indices = @transform_2, window_bounds = array<i64: 1, 8, 1>}, {transform_indices = @transform_3, window_bounds = array<i64: 1, 8, 1>}, {transform_indices = @transform_4, window_bounds = array<i64: 1, 400, 256>}, {transform_indices = @transform_5, window_bounds = array<i64: 1, 8, 256>}]} {
    %c0 = arith.constant 0 : index
    %c0_0 = arith.constant 0 : index
    %0 = vector.load %arg2[%c0, %c0_0] : memref<8x400xbf16, #tpu.memory_space<vmem>>, vector<8x400xbf16>
    %c0_1 = arith.constant 0 : index
    %c0_2 = arith.constant 0 : index
    %c0_3 = arith.constant 0 : index
    %1 = vector.load %arg6[%c0_1, %c0_2, %c0_3] : memref<1x400x256xbf16, #tpu.memory_space<vmem>>, vector<1x400x256xbf16>
    %2 = vector.shape_cast %1 : vector<1x400x256xbf16> to vector<400x256xbf16>
    %cst = arith.constant dense<0.000000e+00> : vector<8x256xf32>
    %3 = tpu.matmul %0, %2, %cst {dimension_numbers = #tpu.dot_dimension_numbers<[1], [0], [0], [1], [0, 0, 1, 1], [], []>} : vector<8x400xbf16>, vector<400x256xbf16>, vector<8x256xf32> -> vector<8x256xf32>
    %c0_4 = arith.constant 0 : index
    %c0_5 = arith.constant 0 : index
    %4 = vector.load %arg3[%c0_4, %c0_5] : memref<8x1xf32, #tpu.memory_space<vmem>>, vector<8x1xf32>
    %5 = vector.broadcast %4 : vector<8x1xf32> to vector<8x256xf32>
    %6 = arith.addf %3, %5 : vector<8x256xf32>
    %cst_6 = arith.constant dense<0.000000e+00> : vector<8xf32>
    %7 = vector.multi_reduction <add>, %6, %cst_6 [1] : vector<8x256xf32> to vector<8xf32>
    %8 = vector.shape_cast %7 : vector<8xf32> to vector<8x1xf32>
    %cst_7 = arith.constant 2.560000e+02 : f32
    %9 = vector.broadcast %cst_7 : f32 to vector<8x1xf32>
    %10 = arith.divf %8, %9 : vector<8x1xf32>
    %11 = vector.broadcast %10 : vector<8x1xf32> to vector<8x256xf32>
    %12 = arith.subf %6, %11 : vector<8x256xf32>
    %13 = arith.mulf %12, %12 : vector<8x256xf32>
    %cst_8 = arith.constant dense<0.000000e+00> : vector<8xf32>
    %14 = vector.multi_reduction <add>, %13, %cst_8 [1] : vector<8x256xf32> to vector<8xf32>
    %15 = vector.shape_cast %14 : vector<8xf32> to vector<8x1xf32>
    %cst_9 = arith.constant 2.560000e+02 : f32
    %16 = vector.broadcast %cst_9 : f32 to vector<8x1xf32>
    %17 = arith.divf %15, %16 : vector<8x1xf32>
    %18 = vector.broadcast %10 : vector<8x1xf32> to vector<8x256xf32>
    %19 = arith.subf %6, %18 : vector<8x256xf32>
    %cst_10 = arith.constant 9.99999974E-6 : f32
    %20 = vector.broadcast %cst_10 : f32 to vector<8x1xf32>
    %21 = arith.addf %17, %20 : vector<8x1xf32>
    %22 = math.rsqrt %21 : vector<8x1xf32>
    %23 = vector.broadcast %22 : vector<8x1xf32> to vector<8x256xf32>
    %24 = arith.mulf %19, %23 : vector<8x256xf32>
    %c0_11 = arith.constant 0 : index
    %c0_12 = arith.constant 0 : index
    %c0_13 = arith.constant 0 : index
    %25 = vector.load %arg4[%c0_11, %c0_12, %c0_13] : memref<1x8x1xf32, #tpu.memory_space<vmem>>, vector<1x8x1xf32>
    %26 = vector.shape_cast %25 : vector<1x8x1xf32> to vector<8x1xf32>
    %27 = vector.broadcast %26 : vector<8x1xf32> to vector<8x256xf32>
    %28 = arith.mulf %24, %27 : vector<8x256xf32>
    %c0_14 = arith.constant 0 : index
    %c0_15 = arith.constant 0 : index
    %c0_16 = arith.constant 0 : index
    %29 = vector.load %arg5[%c0_14, %c0_15, %c0_16] : memref<1x8x1xf32, #tpu.memory_space<vmem>>, vector<1x8x1xf32>
    %30 = vector.shape_cast %29 : vector<1x8x1xf32> to vector<8x1xf32>
    %31 = vector.broadcast %30 : vector<8x1xf32> to vector<8x256xf32>
    %32 = arith.addf %28, %31 : vector<8x256xf32>
    %cst_17 = arith.constant 0.000000e+00 : f32
    %33 = vector.broadcast %cst_17 : f32 to vector<8x256xf32>
    %34 = arith.maximumf %32, %33 : vector<8x256xf32>
    %c0_18 = arith.constant 0 : index
    %c0_19 = arith.constant 0 : index
    %c0_20 = arith.constant 0 : index
    %35 = vector.load %arg7[%c0_18, %c0_19, %c0_20] : memref<1x8x256xf32, #tpu.memory_space<vmem>>, vector<1x8x256xf32>
    %36 = vector.shape_cast %35 : vector<1x8x256xf32> to vector<8x256xf32>
    %37 = vector.shape_cast %34 : vector<8x256xf32> to vector<1x8x256xf32>
    tpu.vector_store %arg7[%c0_18, %c0_19, %c0_20], %37 {strides = array<i32>} : memref<1x8x256xf32, #tpu.memory_space<vmem>>, vector<1x8x256xf32>,
    return
  }
  func.func @transform_0(%arg0: i32, %arg1: i32) -> (i32, i32) {
    %c0_i32 = arith.constant 0 : i32
    %c0_i32_0 = arith.constant 0 : i32
    %c0_i32_1 = arith.constant 0 : i32
    return %c0_i32, %c0_i32_0 : i32, i32
  }
  func.func @transform_1(%arg0: i32, %arg1: i32) -> (i32, i32) {
    %c0_i32 = arith.constant 0 : i32
    %c0_i32_0 = arith.constant 0 : i32
    %c0_i32_1 = arith.constant 0 : i32
    return %c0_i32, %c0_i32_0 : i32, i32
  }
  func.func @transform_2(%arg0: i32, %arg1: i32) -> (i32, i32, i32) {
    %c0_i32 = arith.constant 0 : i32
    %c0_i32_0 = arith.constant 0 : i32
    %c0_i32_1 = arith.constant 0 : i32
    return %arg0, %c0_i32, %c0_i32_0 : i32, i32, i32
  }
  func.func @transform_3(%arg0: i32, %arg1: i32) -> (i32, i32, i32) {
    %c0_i32 = arith.constant 0 : i32
    %c0_i32_0 = arith.constant 0 : i32
    %c0_i32_1 = arith.constant 0 : i32
    return %arg0, %c0_i32, %c0_i32_0 : i32, i32, i32
  }
  func.func @transform_4(%arg0: i32, %arg1: i32) -> (i32, i32, i32) {
    %c0_i32 = arith.constant 0 : i32
    %c0_i32_0 = arith.constant 0 : i32
    return %arg0, %c0_i32, %arg1 : i32, i32, i32
  }
  func.func @transform_5(%arg0: i32, %arg1: i32) -> (i32, i32, i32) {
    %c0_i32 = arith.constant 0 : i32
    %c0_i32_0 = arith.constant 0 : i32
    return %arg0, %c0_i32, %arg1 : i32, i32, i32
  }
}

module attributes {stable_mosaic.version = 11 : i64} {
  func.func @_conv_kernel(%arg0: i32, %arg1: i32, %arg2: memref<3x392xbf16, #tpu.memory_space<vmem>>, %arg3: memref<3x1xf32, #tpu.memory_space<vmem>>, %arg4: memref<1x3x1xf32, #tpu.memory_space<vmem>>, %arg5: memref<1x3x1xf32, #tpu.memory_space<vmem>>, %arg6: memref<1x392x128xbf16, #tpu.memory_space<vmem>>, %arg7: memref<1x3x128xf32, #tpu.memory_space<vmem>>) attributes {dimension_semantics = [#tpu.dimension_semantics<parallel>, #tpu.dimension_semantics<parallel>], iteration_bounds = array<i64: 4, 2>, scalar_prefetch = 0 : i64, scratch_operands = 0 : i64, tpu.core_type = #tpu.core_type<tc>, window_params = [{pipeline_mode = #tpu.pipeline_mode<synchronous>, transform_indices = @transform_0, window_bounds = array<i64: 3, 392>}, {pipeline_mode = #tpu.pipeline_mode<synchronous>, transform_indices = @transform_1, window_bounds = array<i64: 3, 1>}, {transform_indices = @transform_2, window_bounds = array<i64: 1, 3, 1>}, {transform_indices = @transform_3, window_bounds = array<i64: 1, 3, 1>}, {transform_indices = @transform_4, window_bounds = array<i64: 1, 392, 128>}, {transform_indices = @transform_5, window_bounds = array<i64: 1, 3, 128>}]} {
    %c0 = arith.constant 0 : index
    %c0_0 = arith.constant 0 : index
    %0 = vector.load %arg2[%c0, %c0_0] : memref<3x392xbf16, #tpu.memory_space<vmem>>, vector<3x392xbf16>
    %c0_1 = arith.constant 0 : index
    %c0_2 = arith.constant 0 : index
    %c0_3 = arith.constant 0 : index
    %1 = vector.load %arg6[%c0_1, %c0_2, %c0_3] : memref<1x392x128xbf16, #tpu.memory_space<vmem>>, vector<1x392x128xbf16>
    %2 = vector.shape_cast %1 : vector<1x392x128xbf16> to vector<392x128xbf16>
    %cst = arith.constant dense<0.000000e+00> : vector<3x128xf32>
    %3 = tpu.matmul %0, %2, %cst {dimension_numbers = #tpu.dot_dimension_numbers<[1], [0], [0], [1], [0, 0, 1, 1], [], []>} : vector<3x392xbf16>, vector<392x128xbf16>, vector<3x128xf32> -> vector<3x128xf32>
    %c0_4 = arith.constant 0 : index
    %c0_5 = arith.constant 0 : index
    %4 = vector.load %arg3[%c0_4, %c0_5] : memref<3x1xf32, #tpu.memory_space<vmem>>, vector<3x1xf32>
    %5 = vector.broadcast %4 : vector<3x1xf32> to vector<3x128xf32>
    %6 = arith.addf %3, %5 : vector<3x128xf32>
    %7 = math.tanh %6 : vector<3x128xf32>
    %c0_6 = arith.constant 0 : index
    %c0_7 = arith.constant 0 : index
    %c0_8 = arith.constant 0 : index
    %8 = vector.load %arg7[%c0_6, %c0_7, %c0_8] : memref<1x3x128xf32, #tpu.memory_space<vmem>>, vector<1x3x128xf32>
    %9 = vector.shape_cast %8 : vector<1x3x128xf32> to vector<3x128xf32>
    %10 = vector.shape_cast %7 : vector<3x128xf32> to vector<1x3x128xf32>
    tpu.vector_store %arg7[%c0_6, %c0_7, %c0_8], %10 {strides = array<i32>} : memref<1x3x128xf32, #tpu.memory_space<vmem>>, vector<1x3x128xf32>,
    return
  }
  func.func @transform_0(%arg0: i32, %arg1: i32) -> (i32, i32) {
    %c0_i32 = arith.constant 0 : i32
    %c0_i32_0 = arith.constant 0 : i32
    %c0_i32_1 = arith.constant 0 : i32
    return %c0_i32, %c0_i32_0 : i32, i32
  }
  func.func @transform_1(%arg0: i32, %arg1: i32) -> (i32, i32) {
    %c0_i32 = arith.constant 0 : i32
    %c0_i32_0 = arith.constant 0 : i32
    %c0_i32_1 = arith.constant 0 : i32
    return %c0_i32, %c0_i32_0 : i32, i32
  }
  func.func @transform_2(%arg0: i32, %arg1: i32) -> (i32, i32, i32) {
    %c0_i32 = arith.constant 0 : i32
    %c0_i32_0 = arith.constant 0 : i32
    %c0_i32_1 = arith.constant 0 : i32
    return %arg0, %c0_i32, %c0_i32_0 : i32, i32, i32
  }
  func.func @transform_3(%arg0: i32, %arg1: i32) -> (i32, i32, i32) {
    %c0_i32 = arith.constant 0 : i32
    %c0_i32_0 = arith.constant 0 : i32
    %c0_i32_1 = arith.constant 0 : i32
    return %arg0, %c0_i32, %c0_i32_0 : i32, i32, i32
  }
  func.func @transform_4(%arg0: i32, %arg1: i32) -> (i32, i32, i32) {
    %c0_i32 = arith.constant 0 : i32
    %c0_i32_0 = arith.constant 0 : i32
    return %arg0, %c0_i32, %arg1 : i32, i32, i32
  }
  func.func @transform_5(%arg0: i32, %arg1: i32) -> (i32, i32, i32) {
    %c0_i32 = arith.constant 0 : i32
    %c0_i32_0 = arith.constant 0 : i32
    return %arg0, %c0_i32, %arg1 : i32, i32, i32
  }
}

module attributes {stable_mosaic.version = 11 : i64} {
  func.func @_conv_kernel(%arg0: i32, %arg1: i32, %arg2: memref<8x147xbf16, #tpu.memory_space<vmem>>, %arg3: memref<8x1xf32, #tpu.memory_space<vmem>>, %arg4: memref<1x8x1xf32, #tpu.memory_space<vmem>>, %arg5: memref<1x8x1xf32, #tpu.memory_space<vmem>>, %arg6: memref<1x147x128xbf16, #tpu.memory_space<vmem>>, %arg7: memref<1x8x128xf32, #tpu.memory_space<vmem>>) attributes {dimension_semantics = [#tpu.dimension_semantics<parallel>, #tpu.dimension_semantics<parallel>], iteration_bounds = array<i64: 8, 2>, scalar_prefetch = 0 : i64, scratch_operands = 0 : i64, tpu.core_type = #tpu.core_type<tc>, window_params = [{pipeline_mode = #tpu.pipeline_mode<synchronous>, transform_indices = @transform_0, window_bounds = array<i64: 8, 147>}, {pipeline_mode = #tpu.pipeline_mode<synchronous>, transform_indices = @transform_1, window_bounds = array<i64: 8, 1>}, {transform_indices = @transform_2, window_bounds = array<i64: 1, 8, 1>}, {transform_indices = @transform_3, window_bounds = array<i64: 1, 8, 1>}, {transform_indices = @transform_4, window_bounds = array<i64: 1, 147, 128>}, {transform_indices = @transform_5, window_bounds = array<i64: 1, 8, 128>}]} {
    %c0 = arith.constant 0 : index
    %c0_0 = arith.constant 0 : index
    %0 = vector.load %arg2[%c0, %c0_0] : memref<8x147xbf16, #tpu.memory_space<vmem>>, vector<8x147xbf16>
    %c0_1 = arith.constant 0 : index
    %c0_2 = arith.constant 0 : index
    %c0_3 = arith.constant 0 : index
    %1 = vector.load %arg6[%c0_1, %c0_2, %c0_3] : memref<1x147x128xbf16, #tpu.memory_space<vmem>>, vector<1x147x128xbf16>
    %2 = vector.shape_cast %1 : vector<1x147x128xbf16> to vector<147x128xbf16>
    %cst = arith.constant dense<0.000000e+00> : vector<8x128xf32>
    %3 = tpu.matmul %0, %2, %cst {dimension_numbers = #tpu.dot_dimension_numbers<[1], [0], [0], [1], [0, 0, 1, 1], [], []>} : vector<8x147xbf16>, vector<147x128xbf16>, vector<8x128xf32> -> vector<8x128xf32>
    %c0_4 = arith.constant 0 : index
    %c0_5 = arith.constant 0 : index
    %4 = vector.load %arg3[%c0_4, %c0_5] : memref<8x1xf32, #tpu.memory_space<vmem>>, vector<8x1xf32>
    %5 = vector.broadcast %4 : vector<8x1xf32> to vector<8x128xf32>
    %6 = arith.addf %3, %5 : vector<8x128xf32>
    %cst_6 = arith.constant 0.000000e+00 : f32
    %7 = vector.broadcast %cst_6 : f32 to vector<8x128xf32>
    %8 = arith.cmpf oge, %6, %7 : vector<8x128xf32>
    %cst_7 = arith.constant 2.000000e-01 : f32
    %9 = vector.broadcast %cst_7 : f32 to vector<8x128xf32>
    %10 = arith.mulf %9, %6 : vector<8x128xf32>
    %11 = arith.select %8, %6, %10 : vector<8x128xi1>, vector<8x128xf32>
    %c0_8 = arith.constant 0 : index
    %c0_9 = arith.constant 0 : index
    %c0_10 = arith.constant 0 : index
    %12 = vector.load %arg7[%c0_8, %c0_9, %c0_10] : memref<1x8x128xf32, #tpu.memory_space<vmem>>, vector<1x8x128xf32>
    %13 = vector.shape_cast %12 : vector<1x8x128xf32> to vector<8x128xf32>
    %14 = vector.shape_cast %11 : vector<8x128xf32> to vector<1x8x128xf32>
    tpu.vector_store %arg7[%c0_8, %c0_9, %c0_10], %14 {strides = array<i32>} : memref<1x8x128xf32, #tpu.memory_space<vmem>>, vector<1x8x128xf32>,
    return
  }
  func.func @transform_0(%arg0: i32, %arg1: i32) -> (i32, i32) {
    %c0_i32 = arith.constant 0 : i32
    %c0_i32_0 = arith.constant 0 : i32
    %c0_i32_1 = arith.constant 0 : i32
    return %c0_i32, %c0_i32_0 : i32, i32
  }
  func.func @transform_1(%arg0: i32, %arg1: i32) -> (i32, i32) {
    %c0_i32 = arith.constant 0 : i32
    %c0_i32_0 = arith.constant 0 : i32
    %c0_i32_1 = arith.constant 0 : i32
    return %c0_i32, %c0_i32_0 : i32, i32
  }
  func.func @transform_2(%arg0: i32, %arg1: i32) -> (i32, i32, i32) {
    %c0_i32 = arith.constant 0 : i32
    %c0_i32_0 = arith.constant 0 : i32
    %c0_i32_1 = arith.constant 0 : i32
    return %arg0, %c0_i32, %c0_i32_0 : i32, i32, i32
  }
  func.func @transform_3(%arg0: i32, %arg1: i32) -> (i32, i32, i32) {
    %c0_i32 = arith.constant 0 : i32
    %c0_i32_0 = arith.constant 0 : i32
    %c0_i32_1 = arith.constant 0 : i32
    return %arg0, %c0_i32, %c0_i32_0 : i32, i32, i32
  }
  func.func @transform_4(%arg0: i32, %arg1: i32) -> (i32, i32, i32) {
    %c0_i32 = arith.constant 0 : i32
    %c0_i32_0 = arith.constant 0 : i32
    return %arg0, %c0_i32, %arg1 : i32, i32, i32
  }
  func.func @transform_5(%arg0: i32, %arg1: i32) -> (i32, i32, i32) {
    %c0_i32 = arith.constant 0 : i32
    %c0_i32_0 = arith.constant 0 : i32
    return %arg0, %c0_i32, %arg1 : i32, i32, i32
  }
}

module attributes {stable_mosaic.version = 11 : i64} {
  func.func @_conv_kernel(%arg0: i32, %arg1: i32, %arg2: memref<16x128xbf16, #tpu.memory_space<vmem>>, %arg3: memref<16x1xf32, #tpu.memory_space<vmem>>, %arg4: memref<1x16x1xf32, #tpu.memory_space<vmem>>, %arg5: memref<1x16x1xf32, #tpu.memory_space<vmem>>, %arg6: memref<1x128x64xbf16, #tpu.memory_space<vmem>>, %arg7: memref<1x16x64xf32, #tpu.memory_space<vmem>>) attributes {dimension_semantics = [#tpu.dimension_semantics<parallel>, #tpu.dimension_semantics<parallel>], iteration_bounds = array<i64: 8, 1>, scalar_prefetch = 0 : i64, scratch_operands = 0 : i64, tpu.core_type = #tpu.core_type<tc>, window_params = [{pipeline_mode = #tpu.pipeline_mode<synchronous>, transform_indices = @transform_0, window_bounds = array<i64: 16, 128>}, {pipeline_mode = #tpu.pipeline_mode<synchronous>, transform_indices = @transform_1, window_bounds = array<i64: 16, 1>}, {transform_indices = @transform_2, window_bounds = array<i64: 1, 16, 1>}, {transform_indices = @transform_3, window_bounds = array<i64: 1, 16, 1>}, {transform_indices = @transform_4, window_bounds = array<i64: 1, 128, 64>}, {transform_indices = @transform_5, window_bounds = array<i64: 1, 16, 64>}]} {
    %c0 = arith.constant 0 : index
    %c0_0 = arith.constant 0 : index
    %0 = vector.load %arg2[%c0, %c0_0] : memref<16x128xbf16, #tpu.memory_space<vmem>>, vector<16x128xbf16>
    %c0_1 = arith.constant 0 : index
    %c0_2 = arith.constant 0 : index
    %c0_3 = arith.constant 0 : index
    %1 = vector.load %arg6[%c0_1, %c0_2, %c0_3] : memref<1x128x64xbf16, #tpu.memory_space<vmem>>, vector<1x128x64xbf16>
    %2 = vector.shape_cast %1 : vector<1x128x64xbf16> to vector<128x64xbf16>
    %cst = arith.constant dense<0.000000e+00> : vector<16x64xf32>
    %3 = tpu.matmul %0, %2, %cst {dimension_numbers = #tpu.dot_dimension_numbers<[1], [0], [0], [1], [0, 0, 1, 1], [], []>} : vector<16x128xbf16>, vector<128x64xbf16>, vector<16x64xf32> -> vector<16x64xf32>
    %c0_4 = arith.constant 0 : index
    %c0_5 = arith.constant 0 : index
    %4 = vector.load %arg3[%c0_4, %c0_5] : memref<16x1xf32, #tpu.memory_space<vmem>>, vector<16x1xf32>
    %5 = vector.broadcast %4 : vector<16x1xf32> to vector<16x64xf32>
    %6 = arith.addf %3, %5 : vector<16x64xf32>
    %cst_6 = arith.constant 0.000000e+00 : f32
    %7 = vector.broadcast %cst_6 : f32 to vector<16x64xf32>
    %8 = arith.cmpf oge, %6, %7 : vector<16x64xf32>
    %cst_7 = arith.constant 2.000000e-01 : f32
    %9 = vector.broadcast %cst_7 : f32 to vector<16x64xf32>
    %10 = arith.mulf %9, %6 : vector<16x64xf32>
    %11 = arith.select %8, %6, %10 : vector<16x64xi1>, vector<16x64xf32>
    %c0_8 = arith.constant 0 : index
    %c0_9 = arith.constant 0 : index
    %c0_10 = arith.constant 0 : index
    %12 = vector.load %arg7[%c0_8, %c0_9, %c0_10] : memref<1x16x64xf32, #tpu.memory_space<vmem>>, vector<1x16x64xf32>
    %13 = vector.shape_cast %12 : vector<1x16x64xf32> to vector<16x64xf32>
    %14 = vector.shape_cast %11 : vector<16x64xf32> to vector<1x16x64xf32>
    tpu.vector_store %arg7[%c0_8, %c0_9, %c0_10], %14 {strides = array<i32>} : memref<1x16x64xf32, #tpu.memory_space<vmem>>, vector<1x16x64xf32>,
    return
  }
  func.func @transform_0(%arg0: i32, %arg1: i32) -> (i32, i32) {
    %c0_i32 = arith.constant 0 : i32
    %c0_i32_0 = arith.constant 0 : i32
    %c0_i32_1 = arith.constant 0 : i32
    return %c0_i32, %c0_i32_0 : i32, i32
  }
  func.func @transform_1(%arg0: i32, %arg1: i32) -> (i32, i32) {
    %c0_i32 = arith.constant 0 : i32
    %c0_i32_0 = arith.constant 0 : i32
    %c0_i32_1 = arith.constant 0 : i32
    return %c0_i32, %c0_i32_0 : i32, i32
  }
  func.func @transform_2(%arg0: i32, %arg1: i32) -> (i32, i32, i32) {
    %c0_i32 = arith.constant 0 : i32
    %c0_i32_0 = arith.constant 0 : i32
    %c0_i32_1 = arith.constant 0 : i32
    return %arg0, %c0_i32, %c0_i32_0 : i32, i32, i32
  }
  func.func @transform_3(%arg0: i32, %arg1: i32) -> (i32, i32, i32) {
    %c0_i32 = arith.constant 0 : i32
    %c0_i32_0 = arith.constant 0 : i32
    %c0_i32_1 = arith.constant 0 : i32
    return %arg0, %c0_i32, %c0_i32_0 : i32, i32, i32
  }
  func.func @transform_4(%arg0: i32, %arg1: i32) -> (i32, i32, i32) {
    %c0_i32 = arith.constant 0 : i32
    %c0_i32_0 = arith.constant 0 : i32
    return %arg0, %c0_i32, %arg1 : i32, i32, i32
  }
  func.func @transform_5(%arg0: i32, %arg1: i32) -> (i32, i32, i32) {
    %c0_i32 = arith.constant 0 : i32
    %c0_i32_0 = arith.constant 0 : i32
    return %arg0, %c0_i32, %arg1 : i32, i32, i32
  }
}

module attributes {stable_mosaic.version = 11 : i64} {
  func.func @_conv_pool_kernel(%arg0: i32, %arg1: i32, %arg2: memref<32x256xbf16, #tpu.memory_space<vmem>>, %arg3: memref<32x1xf32, #tpu.memory_space<vmem>>, %arg4: memref<1x32x1xf32, #tpu.memory_space<vmem>>, %arg5: memref<1x32x1xf32, #tpu.memory_space<vmem>>, %arg6: memref<1x256x16xbf16, #tpu.memory_space<vmem>>, %arg7: memref<1x32x16xf32, #tpu.memory_space<vmem>>, %arg8: memref<1x32x1xf32, #tpu.memory_space<vmem>>) attributes {dimension_semantics = [#tpu.dimension_semantics<parallel>, #tpu.dimension_semantics<parallel>], iteration_bounds = array<i64: 8, 1>, scalar_prefetch = 0 : i64, scratch_operands = 0 : i64, tpu.core_type = #tpu.core_type<tc>, window_params = [{pipeline_mode = #tpu.pipeline_mode<synchronous>, transform_indices = @transform_0, window_bounds = array<i64: 32, 256>}, {pipeline_mode = #tpu.pipeline_mode<synchronous>, transform_indices = @transform_1, window_bounds = array<i64: 32, 1>}, {transform_indices = @transform_2, window_bounds = array<i64: 1, 32, 1>}, {transform_indices = @transform_3, window_bounds = array<i64: 1, 32, 1>}, {transform_indices = @transform_4, window_bounds = array<i64: 1, 256, 16>}, {transform_indices = @transform_5, window_bounds = array<i64: 1, 32, 16>}, {transform_indices = @transform_6, window_bounds = array<i64: 1, 32, 1>}]} {
    %c0 = arith.constant 0 : index
    %c0_0 = arith.constant 0 : index
    %0 = vector.load %arg2[%c0, %c0_0] : memref<32x256xbf16, #tpu.memory_space<vmem>>, vector<32x256xbf16>
    %c0_1 = arith.constant 0 : index
    %c0_2 = arith.constant 0 : index
    %c0_3 = arith.constant 0 : index
    %1 = vector.load %arg6[%c0_1, %c0_2, %c0_3] : memref<1x256x16xbf16, #tpu.memory_space<vmem>>, vector<1x256x16xbf16>
    %2 = vector.shape_cast %1 : vector<1x256x16xbf16> to vector<256x16xbf16>
    %cst = arith.constant dense<0.000000e+00> : vector<32x16xf32>
    %3 = tpu.matmul %0, %2, %cst {dimension_numbers = #tpu.dot_dimension_numbers<[1], [0], [0], [1], [0, 0, 1, 1], [], []>} : vector<32x256xbf16>, vector<256x16xbf16>, vector<32x16xf32> -> vector<32x16xf32>
    %c0_4 = arith.constant 0 : index
    %c0_5 = arith.constant 0 : index
    %4 = vector.load %arg3[%c0_4, %c0_5] : memref<32x1xf32, #tpu.memory_space<vmem>>, vector<32x1xf32>
    %5 = vector.broadcast %4 : vector<32x1xf32> to vector<32x16xf32>
    %6 = arith.addf %3, %5 : vector<32x16xf32>
    %cst_6 = arith.constant 0.000000e+00 : f32
    %7 = vector.broadcast %cst_6 : f32 to vector<32x16xf32>
    %8 = arith.cmpf oge, %6, %7 : vector<32x16xf32>
    %cst_7 = arith.constant 2.000000e-01 : f32
    %9 = vector.broadcast %cst_7 : f32 to vector<32x16xf32>
    %10 = arith.mulf %9, %6 : vector<32x16xf32>
    %11 = arith.select %8, %6, %10 : vector<32x16xi1>, vector<32x16xf32>
    %c0_8 = arith.constant 0 : index
    %c0_9 = arith.constant 0 : index
    %c0_10 = arith.constant 0 : index
    %12 = vector.load %arg7[%c0_8, %c0_9, %c0_10] : memref<1x32x16xf32, #tpu.memory_space<vmem>>, vector<1x32x16xf32>
    %13 = vector.shape_cast %12 : vector<1x32x16xf32> to vector<32x16xf32>
    %14 = vector.shape_cast %11 : vector<32x16xf32> to vector<1x32x16xf32>
    tpu.vector_store %arg7[%c0_8, %c0_9, %c0_10], %14 {strides = array<i32>} : memref<1x32x16xf32, #tpu.memory_space<vmem>>, vector<1x32x16xf32>,
    %cst_11 = arith.constant dense<0.000000e+00> : vector<32xf32>
    %15 = vector.multi_reduction <add>, %11, %cst_11 [1] : vector<32x16xf32> to vector<32xf32>
    %16 = vector.shape_cast %15 : vector<32xf32> to vector<32x1xf32>
    %cst_12 = arith.constant 1.600000e+01 : f32
    %17 = vector.broadcast %cst_12 : f32 to vector<32x1xf32>
    %18 = arith.divf %16, %17 : vector<32x1xf32>
    %c0_13 = arith.constant 0 : index
    %c0_14 = arith.constant 0 : index
    %c0_15 = arith.constant 0 : index
    %19 = vector.load %arg8[%c0_13, %c0_14, %c0_15] : memref<1x32x1xf32, #tpu.memory_space<vmem>>, vector<1x32x1xf32>
    %20 = vector.shape_cast %19 : vector<1x32x1xf32> to vector<32x1xf32>
    %21 = vector.shape_cast %18 : vector<32x1xf32> to vector<1x32x1xf32>
    tpu.vector_store %arg8[%c0_13, %c0_14, %c0_15], %21 {strides = array<i32>} : memref<1x32x1xf32, #tpu.memory_space<vmem>>, vector<1x32x1xf32>,
    return
  }
  func.func @transform_0(%arg0: i32, %arg1: i32) -> (i32, i32) {
    %c0_i32 = arith.constant 0 : i32
    %c0_i32_0 = arith.constant 0 : i32
    %c0_i32_1 = arith.constant 0 : i32
    return %c0_i32, %c0_i32_0 : i32, i32
  }
  func.func @transform_1(%arg0: i32, %arg1: i32) -> (i32, i32) {
    %c0_i32 = arith.constant 0 : i32
    %c0_i32_0 = arith.constant 0 : i32
    %c0_i32_1 = arith.constant 0 : i32
    return %c0_i32, %c0_i32_0 : i32, i32
  }
  func.func @transform_2(%arg0: i32, %arg1: i32) -> (i32, i32, i32) {
    %c0_i32 = arith.constant 0 : i32
    %c0_i32_0 = arith.constant 0 : i32
    %c0_i32_1 = arith.constant 0 : i32
    return %arg0, %c0_i32, %c0_i32_0 : i32, i32, i32
  }
  func.func @transform_3(%arg0: i32, %arg1: i32) -> (i32, i32, i32) {
    %c0_i32 = arith.constant 0 : i32
    %c0_i32_0 = arith.constant 0 : i32
    %c0_i32_1 = arith.constant 0 : i32
    return %arg0, %c0_i32, %c0_i32_0 : i32, i32, i32
  }
  func.func @transform_4(%arg0: i32, %arg1: i32) -> (i32, i32, i32) {
    %c0_i32 = arith.constant 0 : i32
    %c0_i32_0 = arith.constant 0 : i32
    return %arg0, %c0_i32, %arg1 : i32, i32, i32
  }
  func.func @transform_5(%arg0: i32, %arg1: i32) -> (i32, i32, i32) {
    %c0_i32 = arith.constant 0 : i32
    %c0_i32_0 = arith.constant 0 : i32
    return %arg0, %c0_i32, %arg1 : i32, i32, i32
  }
  func.func @transform_6(%arg0: i32, %arg1: i32) -> (i32, i32, i32) {
    %c0_i32 = arith.constant 0 : i32
    %c0_i32_0 = arith.constant 0 : i32
    %c0_i32_1 = arith.constant 0 : i32
    return %arg0, %c0_i32, %c0_i32_0 : i32, i32, i32
  }
}

module attributes {stable_mosaic.version = 11 : i64} {
  func.func @_mean_abs_diff_kernel(%arg0: memref<2x32xf32, #tpu.memory_space<vmem>>, %arg1: memref<2x32xf32, #tpu.memory_space<vmem>>, %arg2: memref<1x1xf32, #tpu.memory_space<vmem>>) attributes {dimension_semantics = [], scalar_prefetch = 0 : i64, scratch_operands = 0 : i64, tpu.core_type = #tpu.core_type<tc>} {
    %c0 = arith.constant 0 : index
    %c0_0 = arith.constant 0 : index
    %0 = vector.load %arg0[%c0, %c0_0] : memref<2x32xf32, #tpu.memory_space<vmem>>, vector<2x32xf32>
    %c0_1 = arith.constant 0 : index
    %c0_2 = arith.constant 0 : index
    %1 = vector.load %arg1[%c0_1, %c0_2] : memref<2x32xf32, #tpu.memory_space<vmem>>, vector<2x32xf32>
    %2 = arith.subf %0, %1 : vector<2x32xf32>
    %3 = math.absf %2 : vector<2x32xf32>
    %4 = vector.shape_cast %3 : vector<2x32xf32> to vector<1x2x32xf32>
    %cst = arith.constant dense<0.000000e+00> : vector<1xf32>
    %5 = vector.multi_reduction <add>, %4, %cst [1, 2] : vector<1x2x32xf32> to vector<1xf32>
    %6 = vector.shape_cast %5 : vector<1xf32> to vector<1x1x1xf32>
    %7 = vector.extract %6[0, 0, 0] : f32 from vector<1x1x1xf32>
    %cst_3 = arith.constant 6.400000e+01 : f32
    %8 = arith.divf %7, %cst_3 : f32
    %9 = vector.broadcast %8 : f32 to vector<1x1xf32>
    %c0_4 = arith.constant 0 : index
    %c0_5 = arith.constant 0 : index
    %10 = vector.load %arg2[%c0_4, %c0_5] : memref<1x1xf32, #tpu.memory_space<vmem>>, vector<1x1xf32>
    tpu.vector_store %arg2[%c0_4, %c0_5], %9 {strides = array<i32>} : memref<1x1xf32, #tpu.memory_space<vmem>>, vector<1x1xf32>,
    return
  }
}

module attributes {stable_mosaic.version = 11 : i64} {
  func.func @_conv_kernel(%arg0: i32, %arg1: i32, %arg2: memref<4x32xbf16, #tpu.memory_space<vmem>>, %arg3: memref<4x1xf32, #tpu.memory_space<vmem>>, %arg4: memref<1x4x1xf32, #tpu.memory_space<vmem>>, %arg5: memref<1x4x1xf32, #tpu.memory_space<vmem>>, %arg6: memref<1x32x16xbf16, #tpu.memory_space<vmem>>, %arg7: memref<1x4x16xf32, #tpu.memory_space<vmem>>) attributes {dimension_semantics = [#tpu.dimension_semantics<parallel>, #tpu.dimension_semantics<parallel>], iteration_bounds = array<i64: 8, 1>, scalar_prefetch = 0 : i64, scratch_operands = 0 : i64, tpu.core_type = #tpu.core_type<tc>, window_params = [{pipeline_mode = #tpu.pipeline_mode<synchronous>, transform_indices = @transform_0, window_bounds = array<i64: 4, 32>}, {pipeline_mode = #tpu.pipeline_mode<synchronous>, transform_indices = @transform_1, window_bounds = array<i64: 4, 1>}, {transform_indices = @transform_2, window_bounds = array<i64: 1, 4, 1>}, {transform_indices = @transform_3, window_bounds = array<i64: 1, 4, 1>}, {transform_indices = @transform_4, window_bounds = array<i64: 1, 32, 16>}, {transform_indices = @transform_5, window_bounds = array<i64: 1, 4, 16>}]} {
    %c0 = arith.constant 0 : index
    %c0_0 = arith.constant 0 : index
    %0 = vector.load %arg2[%c0, %c0_0] : memref<4x32xbf16, #tpu.memory_space<vmem>>, vector<4x32xbf16>
    %c0_1 = arith.constant 0 : index
    %c0_2 = arith.constant 0 : index
    %c0_3 = arith.constant 0 : index
    %1 = vector.load %arg6[%c0_1, %c0_2, %c0_3] : memref<1x32x16xbf16, #tpu.memory_space<vmem>>, vector<1x32x16xbf16>
    %2 = vector.shape_cast %1 : vector<1x32x16xbf16> to vector<32x16xbf16>
    %cst = arith.constant dense<0.000000e+00> : vector<4x16xf32>
    %3 = tpu.matmul %0, %2, %cst {dimension_numbers = #tpu.dot_dimension_numbers<[1], [0], [0], [1], [0, 0, 1, 1], [], []>} : vector<4x32xbf16>, vector<32x16xbf16>, vector<4x16xf32> -> vector<4x16xf32>
    %c0_4 = arith.constant 0 : index
    %c0_5 = arith.constant 0 : index
    %4 = vector.load %arg3[%c0_4, %c0_5] : memref<4x1xf32, #tpu.memory_space<vmem>>, vector<4x1xf32>
    %5 = vector.broadcast %4 : vector<4x1xf32> to vector<4x16xf32>
    %6 = arith.addf %3, %5 : vector<4x16xf32>
    %c0_6 = arith.constant 0 : index
    %c0_7 = arith.constant 0 : index
    %c0_8 = arith.constant 0 : index
    %7 = vector.load %arg7[%c0_6, %c0_7, %c0_8] : memref<1x4x16xf32, #tpu.memory_space<vmem>>, vector<1x4x16xf32>
    %8 = vector.shape_cast %7 : vector<1x4x16xf32> to vector<4x16xf32>
    %9 = vector.shape_cast %6 : vector<4x16xf32> to vector<1x4x16xf32>
    tpu.vector_store %arg7[%c0_6, %c0_7, %c0_8], %9 {strides = array<i32>} : memref<1x4x16xf32, #tpu.memory_space<vmem>>, vector<1x4x16xf32>,
    return
  }
  func.func @transform_0(%arg0: i32, %arg1: i32) -> (i32, i32) {
    %c0_i32 = arith.constant 0 : i32
    %c0_i32_0 = arith.constant 0 : i32
    %c0_i32_1 = arith.constant 0 : i32
    return %c0_i32, %c0_i32_0 : i32, i32
  }
  func.func @transform_1(%arg0: i32, %arg1: i32) -> (i32, i32) {
    %c0_i32 = arith.constant 0 : i32
    %c0_i32_0 = arith.constant 0 : i32
    %c0_i32_1 = arith.constant 0 : i32
    return %c0_i32, %c0_i32_0 : i32, i32
  }
  func.func @transform_2(%arg0: i32, %arg1: i32) -> (i32, i32, i32) {
    %c0_i32 = arith.constant 0 : i32
    %c0_i32_0 = arith.constant 0 : i32
    %c0_i32_1 = arith.constant 0 : i32
    return %arg0, %c0_i32, %c0_i32_0 : i32, i32, i32
  }
  func.func @transform_3(%arg0: i32, %arg1: i32) -> (i32, i32, i32) {
    %c0_i32 = arith.constant 0 : i32
    %c0_i32_0 = arith.constant 0 : i32
    %c0_i32_1 = arith.constant 0 : i32
    return %arg0, %c0_i32, %c0_i32_0 : i32, i32, i32
  }
  func.func @transform_4(%arg0: i32, %arg1: i32) -> (i32, i32, i32) {
    %c0_i32 = arith.constant 0 : i32
    %c0_i32_0 = arith.constant 0 : i32
    return %arg0, %c0_i32, %arg1 : i32, i32, i32
  }
  func.func @transform_5(%arg0: i32, %arg1: i32) -> (i32, i32, i32) {
    %c0_i32 = arith.constant 0 : i32
    %c0_i32_0 = arith.constant 0 : i32
    return %arg0, %c0_i32, %arg1 : i32, i32, i32
  }
}

module attributes {stable_mosaic.version = 11 : i64} {
  func.func @_gan_gen_loss_kernel(%arg0: memref<4x16xf32, #tpu.memory_space<vmem>>, %arg1: memref<1x1xf32, #tpu.memory_space<vmem>>, %arg2: memref<1x1xf32, #tpu.memory_space<vmem>>) attributes {dimension_semantics = [], scalar_prefetch = 0 : i64, scratch_operands = 0 : i64, tpu.core_type = #tpu.core_type<tc>} {
    %c0 = arith.constant 0 : index
    %c0_0 = arith.constant 0 : index
    %0 = vector.load %arg0[%c0, %c0_0] : memref<4x16xf32, #tpu.memory_space<vmem>>, vector<4x16xf32>
    %1 = vector.shape_cast %0 : vector<4x16xf32> to vector<1x4x16xf32>
    %cst = arith.constant dense<0.000000e+00> : vector<1xf32>
    %2 = vector.multi_reduction <add>, %1, %cst [1, 2] : vector<1x4x16xf32> to vector<1xf32>
    %3 = vector.shape_cast %2 : vector<1xf32> to vector<1x1x1xf32>
    %4 = vector.extract %3[0, 0, 0] : f32 from vector<1x1x1xf32>
    %cst_1 = arith.constant 6.400000e+01 : f32
    %5 = arith.divf %4, %cst_1 : f32
    %cst_2 = arith.constant 0.000000e+00 : f32
    %6 = arith.subf %cst_2, %5 : f32
    %7 = vector.broadcast %6 : f32 to vector<1x1xf32>
    %c0_3 = arith.constant 0 : index
    %c0_4 = arith.constant 0 : index
    %8 = vector.load %arg1[%c0_3, %c0_4] : memref<1x1xf32, #tpu.memory_space<vmem>>, vector<1x1xf32>
    tpu.vector_store %arg1[%c0_3, %c0_4], %7 {strides = array<i32>} : memref<1x1xf32, #tpu.memory_space<vmem>>, vector<1x1xf32>,
    %cst_5 = arith.constant 0.000000e+00 : f32
    %9 = vector.broadcast %cst_5 : f32 to vector<4x16xf32>
    %10 = arith.cmpf oge, %0, %9 : vector<4x16xf32>
    %11 = arith.extui %10 : vector<4x16xi1> to vector<4x16xi32>
    %12 = arith.sitofp %11 : vector<4x16xi32> to vector<4x16xf32>
    %13 = vector.shape_cast %12 : vector<4x16xf32> to vector<1x4x16xf32>
    %cst_6 = arith.constant dense<0.000000e+00> : vector<1xf32>
    %14 = vector.multi_reduction <add>, %13, %cst_6 [1, 2] : vector<1x4x16xf32> to vector<1xf32>
    %15 = vector.shape_cast %14 : vector<1xf32> to vector<1x1x1xf32>
    %16 = vector.extract %15[0, 0, 0] : f32 from vector<1x1x1xf32>
    %cst_7 = arith.constant 6.400000e+01 : f32
    %17 = arith.divf %16, %cst_7 : f32
    %18 = vector.broadcast %17 : f32 to vector<1x1xf32>
    %c0_8 = arith.constant 0 : index
    %c0_9 = arith.constant 0 : index
    %19 = vector.load %arg2[%c0_8, %c0_9] : memref<1x1xf32, #tpu.memory_space<vmem>>, vector<1x1xf32>
    tpu.vector_store %arg2[%c0_8, %c0_9], %18 {strides = array<i32>} : memref<1x1xf32, #tpu.memory_space<vmem>>, vector<1x1xf32>,
    return
  }
}

module attributes {stable_mosaic.version = 11 : i64} {
  func.func @_mean_abs_diff_kernel(%arg0: memref<2x768xf32, #tpu.memory_space<vmem>>, %arg1: memref<2x768xf32, #tpu.memory_space<vmem>>, %arg2: memref<1x1xf32, #tpu.memory_space<vmem>>) attributes {dimension_semantics = [], scalar_prefetch = 0 : i64, scratch_operands = 0 : i64, tpu.core_type = #tpu.core_type<tc>} {
    %c0 = arith.constant 0 : index
    %c0_0 = arith.constant 0 : index
    %0 = vector.load %arg0[%c0, %c0_0] : memref<2x768xf32, #tpu.memory_space<vmem>>, vector<2x768xf32>
    %c0_1 = arith.constant 0 : index
    %c0_2 = arith.constant 0 : index
    %1 = vector.load %arg1[%c0_1, %c0_2] : memref<2x768xf32, #tpu.memory_space<vmem>>, vector<2x768xf32>
    %2 = arith.subf %0, %1 : vector<2x768xf32>
    %3 = math.absf %2 : vector<2x768xf32>
    %4 = vector.shape_cast %3 : vector<2x768xf32> to vector<1x2x768xf32>
    %cst = arith.constant dense<0.000000e+00> : vector<1xf32>
    %5 = vector.multi_reduction <add>, %4, %cst [1, 2] : vector<1x2x768xf32> to vector<1xf32>
    %6 = vector.shape_cast %5 : vector<1xf32> to vector<1x1x1xf32>
    %7 = vector.extract %6[0, 0, 0] : f32 from vector<1x1x1xf32>
    %cst_3 = arith.constant 1.536000e+03 : f32
    %8 = arith.divf %7, %cst_3 : f32
    %9 = vector.broadcast %8 : f32 to vector<1x1xf32>
    %c0_4 = arith.constant 0 : index
    %c0_5 = arith.constant 0 : index
    %10 = vector.load %arg2[%c0_4, %c0_5] : memref<1x1xf32, #tpu.memory_space<vmem>>, vector<1x1xf32>
    tpu.vector_store %arg2[%c0_4, %c0_5], %9 {strides = array<i32>} : memref<1x1xf32, #tpu.memory_space<vmem>>, vector<1x1xf32>,
    return
  }
}

</mosaic_0001>

<bundles_post_ra>
// kernel: _lambda_.24
= control target key start
LH: loop header
LB: loop body
LE: loop exit
PB: predicated region body
PF: predicated region fallthrough
CT: control target
= control target key end

     0   :  { %s783_s18 = smov 0   ;;  %s785_s19 = smov 0   ;;  %s854_s0 = inlined_call_operand.vmem [shape: bf16[8,147], index: 0, kind: input, shape index: {}]   ;;  %s855_s1 = inlined_call_operand.vmem [shape: f32[8,1], index: 1, kind: input, shape index: {}]   ;;  %s856_s2 = inlined_call_operand.vmem [shape: f32[2,8,1], index: 2, kind: input, shape index: {}]   ;;  %s857_s3 = inlined_call_operand.vmem [shape: f32[2,8,1], index: 3, kind: input, shape index: {}]   ;;  %s858_s4 = inlined_call_operand.vmem [shape: bf16[2,147,256], index: 4, kind: input, shape index: {}]   ;;  %s859_s5 = inlined_call_operand.vmem [shape: f32[2,8,256], index: 5, kind: output, shape index: {}]  }
   0x1   :  { %s787_s20 = smov 0  }
   0x2 LB: > { %s27_s21 = sadd.s32 1, %s745_s19  ;;  %p633_p0 = scmp.ge.s32.totalorder %s749_s20, 1  ;;  %s749_s20 = sphi %s787_s20, %s15_s20   ;;  %s745_s19 = sphi %s785_s19, %s861_s19   ;;  %s741_s18 = sphi %s783_s18, %s860_s18  }
   0x3   : > { %p29_p1 = scmp.ge.s32.totalorder %s27_s21, 2  ;;  %p226_p2 = scmp.lt.s32.totalorder %s749_s20, 3 }
   0x5   : > { %s863_s21 = smov (%p29_p1, %s27_s21), 0  ;;  %p227_p3 = pnand %p633_p0, %p226_p2 }
   0x6   : > { %p270_p4 = scmp.lt.s32.totalorder (!%p227_p3), %s741_s18, 1 }
   0x7   : > { %230 = sbr.rel (%p227_p3) target bundleno = 567 (0x237), region = 40 }
   0xc   : > { %v299_v0 = vld [vmem:[%s854_s0] sm:$0xff]  ;;  %vm426_vm0 = vcmask 154624   ;;  %s865_s18 = smov (!%p270_p4, %s741_s18), 1  ;;  %v751_v3 = vmov 0   ;;  %vm430_vm1 = vcmask 1040384   ;;  %vm431_vm2 = vcmask 1041408  }
   0xd   : > { %v640_v1 = vcombine.high %v299_v0, %v299_v0  ;;  %v319_v2 = vld [vmem:[%s855_s1] sm:$0xff]  ;;  %692 = vset.pattern.permute.xlu0 %v751_v3  ;;  %693 = vset.pattern.permute.xlu1 %v751_v3  ;;  %s665_s26 = smul.u32 152, %s865_s18  ;;  %v752_v18 = vmov 65535   ;;  %v639_v30 = vcombine.low %v299_v0, %v299_v0  ;;  %s634_s30 = sshll.u32 %s865_s18, 3 }
   0xe   : > { %322 = vperm.xlu0 %692, %v319_v2   ;;  %v432_v19 = vsel %vm430_vm1, 4294967295, %v752_v18  ;;  %s273_s8 = scalar_lea.vmem %s856_s2, %s634_s30  ;;  %s277_s11 = scalar_lea.vmem %s857_s3, %s634_s30 }
   0xf   : > { %661 = vmatprep.mubr.msk.bf16.mxu0 %vm426_vm0, %v640_v1  ;;  %s813_s29 = scalar_lea.vmem %s858_s4, %s665_s26  ;;  %v433_v23 = vsel %vm431_vm2, %v432_v19, 0  ;;  %v498_v31 = vld [vmem:[%s273_s8] sm:$0xff]  ;;  %s664_s12 = sshll.u32 %s865_s18, 4 }
  0x10   : > { %v694_v4 = vld [vmem:[%s813_s29 + $0x74] ss:$8 sps:$4 sm:$0xff]   ;;  %v696_v5 = vld [vmem:[%s813_s29 + $0x70] ss:$8 sps:$4 sm:$0xff]   ;;  %v697_v6 = vld [vmem:[%s813_s29 + $0x64] ss:$8 sps:$4 sm:$0xff]   ;;  %501 = vperm.xlu1 %693, %v498_v31   ;;  %s296_s15 = scalar_lea.vmem %s859_s5, %s664_s12 }
  0x11   : > { %440 = vmatprep.subr.bf16.mxu0 %v694_v4  ;;  %v699_v7 = vld [vmem:[%s813_s29 + $0x60] ss:$8 sps:$4 sm:$0xff]   ;;  %v700_v8 = vld [vmem:[%s813_s29 + $0x54] ss:$8 sps:$4 sm:$0xff]   ;;  %v702_v9 = vld [vmem:[%s813_s29 + $0x50] ss:$8 sps:$4 sm:$0xff]  }
  0x12   : > { %441 = vmatpush1.bf16.msra.mxu0 %v696_v5  ;;  %v703_v10 = vld [vmem:[%s813_s29 + $0x44] ss:$8 sps:$4 sm:$0xff]   ;;  %v705_v11 = vld [vmem:[%s813_s29 + $0x40] ss:$8 sps:$4 sm:$0xff]   ;;  %v706_v12 = vld [vmem:[%s813_s29 + $0x34] ss:$8 sps:$4 sm:$0xff]  }
  0x13   : > { %442 = vmatprep.subr.bf16.mxu0 %v697_v6  ;;  %v708_v13 = vld [vmem:[%s813_s29 + $0x30] ss:$8 sps:$4 sm:$0xff]   ;;  %v709_v14 = vld [vmem:[%s813_s29 + $0x24] ss:$8 sps:$4 sm:$0xff]   ;;  %v711_v15 = vld [vmem:[%s813_s29 + $0x20] ss:$8 sps:$4 sm:$0xff]  }
  0x14   : > { %v712_v16 = vld [vmem:[%s813_s29 + $0x14] ss:$8 sps:$4 sm:$0xff]   ;;  %v714_v20 = vld [vmem:[%s813_s29 + $0x10] ss:$8 sps:$4 sm:$0xff]   ;;  %v715_v21 = vld [vmem:[%s813_s29 + $0x4] ss:$8 sps:$4 sm:$0xff]  }
  0x15   : > { %v318_v17 = vld [vmem:[%s813_s29 + $0x90] sm:$0x33]  ;;  %v717_v24 = vld [vmem:[%s813_s29] ss:$8 sps:$4 sm:$0xff]   ;;  %v720_v28 = vld [vmem:[%s813_s29 + $0x84] ss:$8 sps:$4 sm:$0xff]  }
  0x16   : > { %443 = vmatpush1.bf16.msra.mxu0 %v699_v7  ;;  %v660_v22 = vcombine.high %v318_v17, %v318_v17  ;;  %v659_v25 = vcombine.low %v318_v17, %v318_v17  ;;  %v722_v29 = vld [vmem:[%s813_s29 + $0x80] ss:$8 sps:$4 sm:$0xff]  }
  0x17   : > { %444 = vmatprep.subr.bf16.mxu0 %v700_v8  ;;  %v506_v47 = vld [vmem:[%s277_s11] sm:$0xff] }
  0x18   : > { %v438_v26 = vand.u32 %v660_v22, %v433_v23  ;;  %v435_v27 = vand.u32 %v659_v25, %v433_v23 }
  0x1a   : > { %445 = vmatpush1.bf16.msra.mxu0 %v702_v9 }
  0x1b   : > { %446 = vmatprep.subr.bf16.mxu0 %v703_v10 }
  0x1e   : > { %447 = vmatpush1.bf16.msra.mxu0 %v705_v11 }
  0x1f   : > { %448 = vmatprep.subr.bf16.mxu0 %v706_v12 }
  0x22   : > { %449 = vmatpush1.bf16.msra.mxu0 %v708_v13 }
  0x23   : > { %450 = vmatprep.subr.bf16.mxu0 %v709_v14 }
  0x26   : > { %451 = vmatpush1.bf16.msra.mxu0 %v711_v15 }
  0x27   : > { %452 = vmatprep.subr.bf16.mxu0 %v712_v16 }
  0x2a   : > { %453 = vmatpush1.bf16.msra.mxu0 %v714_v20 }
  0x2b   : > { %454 = vmatprep.subr.bf16.mxu0 %v715_v21 }
  0x2e   : > { %455 = vmatpush1.bf16.msra.mxu0 %v717_v24 }
  0x2f   : > { %468 = vmatprep.subr.bf16.mxu0 %v438_v26 }
  0x32   : > { %469 = vmatpush2.bf16.msra.mxu0 %v435_v27 }
  0x33   : > { %470 = vmatprep.subr.bf16.mxu0 %v720_v28 }
  0x36   : > { %471 = vmatpush2.bf16.msra.mxu0 %v722_v29 }
  0x39   : > { %473 = vmatmul.mubr.bf16.vlgmr.msra.gmra.mxu0 %v639_v30 }
  0x89   : > { %v323_v32 = vpop.permute.xlu0 %322 }
  0x8b   : > { %v502_v48 = vpop.permute.xlu1 %501 }
  0xf9   : > { %v474_v33 = vpop.f32.mrf.mxu0 }
  0xfa   : > { %v475_v35 = vadd.f32 %v474_v33, %v323_v32 }
  0xfb   : > { %v476_v34 = vpop.f32.mrf.mxu0 }
  0xfc   : > { %v477_v36 = vadd.f32 %v476_v34, %v323_v32 }
  0xfd   : > { %v478_v37 = vpop.f32.mrf.mxu0 }
  0xfe   : > { %v481_v38 = vadd.f32 %v477_v36, %v475_v35 }
  0xff   : > { %v479_v39 = vpop.f32.mrf.mxu0 }
 0x100   : > { %482 = vadd.xlane.f32.xlu0 %v481_v38 }
 0x189   : > { %v483_v40 = vpop.xlane.xlu0 %482 }
 0x18a   : > { %v485_v41 = vmul.f32 0.00390625, %v483_v40 }
 0x18c   : > { %v486_v42 = vsub.f32 %v475_v35, %v485_v41  ;;  %v487_v43 = vsub.f32 %v477_v36, %v485_v41 }
 0x18e   : > { %v488_v44 = vmul.f32 %v486_v42, %v486_v42  ;;  %v489_v45 = vmul.f32 %v487_v43, %v487_v43 }
 0x190   : > { %v490_v46 = vadd.f32 %v489_v45, %v488_v44 }
 0x192   : > { %491 = vadd.xlane.f32.xlu1 %v490_v46 }
 0x1a3   : > { %509 = vperm.xlu1 %693, %v506_v47  }
 0x21b   : > { %v492_v49 = vpop.xlane.xlu1 %491 }
 0x21c   : > { %v493_v50 = vmul.f32 0.00390625, %v492_v49 }
 0x21e   : > { %v494_v51 = vadd.f32 1e-05, %v493_v50 }
 0x21f   : > { %v510_v57 = vpop.permute.xlu1 %509 }
 0x220   : > { %725 = vrsqrt.f32 %v494_v51 }
 0x22d   : > { %v726_v52 = vpop.eup %725 }
 0x22e   : > { %v496_v53 = vmul.f32 %v726_v52, %v486_v42  ;;  %v497_v54 = vmul.f32 %v726_v52, %v487_v43 }
 0x230   : > { %v504_v55 = vmul.f32 %v502_v48, %v496_v53  ;;  %v505_v56 = vmul.f32 %v502_v48, %v497_v54 }
 0x232   : > { %v512_v58 = vadd.f32 %v510_v57, %v504_v55  ;;  %v513_v59 = vadd.f32 %v510_v57, %v505_v56 }
 0x234   : > { %v514_v60 = vmax.f32 %v512_v58, 0.0  ;;  %v515_v61 = vmax.f32 %v513_v59, 0.0 }
 0x236   : > { %516 = vst [vmem:[%s296_s15] sm:$0xff] %v514_v60  ;;  %517 = vst [vmem:[%s296_s15 + $0x8] sm:$0xff] %v515_v61 }
 0x237 PF: > { %s15_s20 = sadd.s32 1, %s749_s20   ;;  %s860_s18 = smov %s745_s19 }
 0x238   : > { %p12_p5 = scmp.ge.s32.totalorder %s15_s20, 4   ;;  %s861_s19 = smov %s863_s21 }
 0x23a   :  { %14 = sbr.rel (!%p12_p5) target bundleno = 2 (0x2), region = 76 }

// kernel: _lambda_.25
= control target key start
LH: loop header
LB: loop body
LE: loop exit
PB: predicated region body
PF: predicated region fallthrough
CT: control target
= control target key end

     0   :  { %s745_s18 = smov 0   ;;  %s747_s19 = smov 0   ;;  %s808_s0 = inlined_call_operand.vmem [shape: bf16[16,128], index: 0, kind: input, shape index: {}]   ;;  %s809_s1 = inlined_call_operand.vmem [shape: f32[16,1], index: 1, kind: input, shape index: {}]   ;;  %s810_s2 = inlined_call_operand.vmem [shape: f32[2,16,1], index: 2, kind: input, shape index: {}]   ;;  %s811_s3 = inlined_call_operand.vmem [shape: f32[2,16,1], index: 3, kind: input, shape index: {}]   ;;  %s812_s4 = inlined_call_operand.vmem [shape: bf16[2,128,64], index: 4, kind: input, shape index: {}]   ;;  %s813_s5 = inlined_call_operand.vmem [shape: f32[2,16,64], index: 5, kind: output, shape index: {}]  }
   0x1   :  { %s749_s20 = smov 0  }
   0x2 LB: > { %s27_s21 = sadd.s32 1, %s706_s19  ;;  %p593_p0 = scmp.ge.s32.totalorder %s710_s20, 1  ;;  %s710_s20 = sphi %s749_s20, %s15_s20   ;;  %s706_s19 = sphi %s747_s19, %s815_s19   ;;  %s702_s18 = sphi %s745_s18, %s814_s18  }
   0x3   : > { %p29_p1 = scmp.ge.s32.totalorder %s27_s21, 2  ;;  %p226_p2 = scmp.lt.s32.totalorder %s710_s20, 3 }
   0x5   : > { %s817_s21 = smov (%p29_p1, %s27_s21), 0  ;;  %p227_p3 = pnand %p593_p0, %p226_p2 }
   0x6   : > { %p270_p4 = scmp.lt.s32.totalorder (!%p227_p3), %s702_s18, 1 }
   0x7   : > { %230 = sbr.rel (%p227_p3) target bundleno = 557 (0x22d), region = 40 }
   0xc   : > { %v712_v0 = vmov 0.0   ;;  %vm713_vm0 = vmmov 0   ;;  %v315_v1 = vld [vmem:[%s809_s1] sm:$0xff]  ;;  %s819_s18 = smov (!%p270_p4, %s702_s18), 1  ;;  %v714_v2 = vmov 0   ;;  %v316_v3 = vld [vmem:[%s809_s1 + $0x8] sm:$0xff] }
   0xd   : > { %626 = vmatprep.subr.bf16.mxu0 %v712_v0  ;;  %642 = vmatprep.mubr.msk.bf16.mxu0 %vm713_vm0, %v712_v0  ;;  %s615_s24 = sshll.u32 %s819_s18, 6  ;;  %v683_v12 = vld [vmem:[%s808_s0] sm:$0xff]   ;;  %vm422_vm1 = vcmask 523264   ;;  %s781_s7 = sshll.u32 %s819_s18, 4 }
   0xe   : > { %673 = vset.pattern.permute.xlu0 %v714_v2  ;;  %674 = vset.pattern.permute.xlu1 %v714_v2  ;;  %s287_s29 = scalar_lea.vmem %s812_s4, %s615_s24  ;;  %s274_s10 = scalar_lea.vmem %s810_s2, %s781_s7 }
   0xf   : > { %319 = vperm.xlu0 %673, %v315_v1   ;;  %v675_v4 = vld [vmem:[%s287_s29 + $0x38] sm:$0xff]   ;;  %v676_v5 = vld [vmem:[%s287_s29 + $0x30] sm:$0xff]   ;;  %v677_v6 = vld [vmem:[%s287_s29 + $0x28] sm:$0xff]   ;;  %s279_s13 = scalar_lea.vmem %s811_s3, %s781_s7  ;;  %s295_s16 = scalar_lea.vmem %s813_s5, %s781_s7 }
  0x10   : > { %627 = vmatpush3.bf16.msra.mxu0 %v675_v4  ;;  %v678_v7 = vld [vmem:[%s287_s29 + $0x20] sm:$0xff]   ;;  %v679_v8 = vld [vmem:[%s287_s29 + $0x18] sm:$0xff]   ;;  %v680_v9 = vld [vmem:[%s287_s29 + $0x10] sm:$0xff]  }
  0x11   : > { %628 = vmatprep.subr.bf16.mxu0 %v712_v0  ;;  %v681_v10 = vld [vmem:[%s287_s29 + $0x8] sm:$0xff]   ;;  %v682_v11 = vld [vmem:[%s287_s29] sm:$0xff]  }
  0x12   : > { %v450_v23 = vld [vmem:[%s274_s10] sm:$0xff]  ;;  %v451_v24 = vld [vmem:[%s274_s10 + $0x8] sm:$0xff] }
  0x13   : > { %324 = vperm.xlu0 %673, %v316_v3   ;;  %v464_v25 = vld [vmem:[%s279_s13] sm:$0xff]  ;;  %v465_v36 = vld [vmem:[%s279_s13 + $0x8] sm:$0xff] }
  0x14   : > { %629 = vmatpush3.bf16.msra.mxu0 %v676_v5 }
  0x15   : > { %630 = vmatprep.subr.bf16.mxu0 %v712_v0 }
  0x18   : > { %631 = vmatpush3.bf16.msra.mxu0 %v677_v6 }
  0x19   : > { %632 = vmatprep.subr.bf16.mxu0 %v712_v0 }
  0x1c   : > { %633 = vmatpush3.bf16.msra.mxu0 %v678_v7 }
  0x1d   : > { %634 = vmatprep.subr.bf16.mxu0 %v712_v0 }
  0x20   : > { %635 = vmatpush3.bf16.msra.mxu0 %v679_v8 }
  0x21   : > { %636 = vmatprep.subr.bf16.mxu0 %v712_v0 }
  0x24   : > { %637 = vmatpush3.bf16.msra.mxu0 %v680_v9 }
  0x25   : > { %638 = vmatprep.subr.bf16.mxu0 %v712_v0 }
  0x28   : > { %639 = vmatpush3.bf16.msra.mxu0 %v681_v10 }
  0x29   : > { %640 = vmatprep.subr.bf16.mxu0 %v712_v0 }
  0x2c   : > { %641 = vmatpush3.bf16.msra.mxu0 %v682_v11 }
  0x2f   : > { %643 = vmatmul.mubr.bf16.vlgmr.msra.gmra.mxu0 %v683_v12 }
  0x8a   : > { %v320_v13 = vpop.permute.xlu0 %319 }
  0x8e   : > { %v325_v18 = vpop.permute.xlu0 %324 }
  0xef   : > { %v415_v14 = vpop.f32.mrf.mxu0 }
  0xf0   : > { %v416_v15 = vadd.f32 %v415_v14, %v320_v13 }
  0xf1   : > { %v644_v16 = vpop.f32.mrf.mxu0 }
  0xf2   : > { %v423_v17 = vsel %vm422_vm1, %v416_v15, 0.0 }
  0xf3   : > { %424 = vadd.xlane.f32.xlu1 %v423_v17  ;;  %v418_v19 = vpop.f32.mrf.mxu0 }
  0xf4   : > { %v419_v20 = vadd.f32 %v418_v19, %v325_v18 }
  0xf5   : > { %v645_v21 = vpop.f32.mrf.mxu0 }
  0xf6   : > { %v426_v22 = vsel %vm422_vm1, %v419_v20, 0.0 }
  0xf7   : > { %427 = vadd.xlane.f32.xlu1 %v426_v22 }
 0x108   : > { %454 = vperm.xlu1 %674, %v450_v23  }
 0x10c   : > { %459 = vperm.xlu1 %674, %v451_v24  }
 0x110   : > { %468 = vperm.xlu1 %674, %v464_v25  }
 0x17c   : > { %v425_v26 = vpop.xlane.xlu1 %424 }
 0x17d   : > { %v430_v27 = vmul.f32 0.015625, %v425_v26 }
 0x17f   : > { %v432_v28 = vsub.f32 %v416_v15, %v430_v27 }
 0x180   : > { %v428_v29 = vpop.xlane.xlu1 %427 }
 0x181   : > { %v431_v30 = vmul.f32 0.015625, %v428_v29  ;;  %v434_v31 = vmul.f32 %v432_v28, %v432_v28 }
 0x183   : > { %v433_v32 = vsub.f32 %v419_v20, %v431_v30  ;;  %v436_v33 = vsel %vm422_vm1, %v434_v31, 0.0 }
 0x184   : > { %437 = vadd.xlane.f32.xlu0 %v436_v33  ;;  %v455_v37 = vpop.permute.xlu1 %454 }
 0x185   : > { %v435_v34 = vmul.f32 %v433_v32, %v433_v32 }
 0x187   : > { %v439_v35 = vsel %vm422_vm1, %v435_v34, 0.0 }
 0x188   : > { %440 = vadd.xlane.f32.xlu1 %v439_v35  ;;  %v460_v38 = vpop.permute.xlu1 %459 }
 0x18c   : > { %v469_v39 = vpop.permute.xlu1 %468 }
 0x199   : > { %473 = vperm.xlu1 %674, %v465_v36  }
 0x20d   : > { %v438_v40 = vpop.xlane.xlu0 %437 }
 0x20e   : > { %v442_v41 = vmul.f32 0.015625, %v438_v40 }
 0x210   : > { %v444_v42 = vadd.f32 1e-05, %v442_v41 }
 0x211   : > { %v441_v43 = vpop.xlane.xlu1 %440 }
 0x212   : > { %684 = vrsqrt.f32 %v444_v42  ;;  %v443_v44 = vmul.f32 0.015625, %v441_v43 }
 0x214   : > { %v445_v45 = vadd.f32 1e-05, %v443_v44 }
 0x215   : > { %v474_v54 = vpop.permute.xlu1 %473 }
 0x216   : > { %686 = vrsqrt.f32 %v445_v45 }
 0x21f   : > { %v685_v46 = vpop.eup %684 }
 0x220   : > { %v448_v47 = vmul.f32 %v685_v46, %v432_v28 }
 0x222   : > { %v462_v48 = vmul.f32 %v455_v37, %v448_v47 }
 0x223   : > { %v687_v49 = vpop.eup %686 }
 0x224   : > { %v476_v50 = vadd.f32 %v469_v39, %v462_v48  ;;  %v449_v51 = vmul.f32 %v687_v49, %v433_v32 }
 0x226   : > { %v478_v52 = vmax.f32 %v476_v50, 0.0  ;;  %v463_v53 = vmul.f32 %v460_v38, %v449_v51 }
 0x228   : > { %480 = vst.msk [vmem:[%s295_s16] sm:$0xff] %vm422_vm1, %v478_v52  ;;  %v477_v55 = vadd.f32 %v474_v54, %v463_v53 }
 0x22a   : > { %v479_v56 = vmax.f32 %v477_v55, 0.0 }
 0x22c   : > { %481 = vst.msk [vmem:[%s295_s16 + $0x8] sm:$0xff] %vm422_vm1, %v479_v56 }
 0x22d PF: > { %s15_s20 = sadd.s32 1, %s710_s20   ;;  %s814_s18 = smov %s706_s19 }
 0x22e   : > { %p12_p5 = scmp.ge.s32.totalorder %s15_s20, 4   ;;  %s815_s19 = smov %s817_s21 }
 0x230   :  { %14 = sbr.rel (!%p12_p5) target bundleno = 2 (0x2), region = 76 }

// kernel: _lambda_.26
= control target key start
LH: loop header
LB: loop body
LE: loop exit
PB: predicated region body
PF: predicated region fallthrough
CT: control target
= control target key end

     0   :  { %s942_s18 = smov 0   ;;  %s944_s19 = smov 0   ;;  %s1050_s0 = inlined_call_operand.vmem [shape: bf16[32,256], index: 0, kind: input, shape index: {}]   ;;  %s1051_s1 = inlined_call_operand.vmem [shape: f32[32,1], index: 1, kind: input, shape index: {}]   ;;  %s1052_s2 = inlined_call_operand.vmem [shape: f32[2,32,1], index: 2, kind: input, shape index: {}]   ;;  %s1053_s3 = inlined_call_operand.vmem [shape: f32[2,32,1], index: 3, kind: input, shape index: {}]   ;;  %s1054_s4 = inlined_call_operand.vmem [shape: bf16[2,256,16], index: 4, kind: input, shape index: {}]   ;;  %s1055_s5 = inlined_call_operand.vmem [shape: f32[2,32,16], index: 5, kind: output, shape index: {}]  }
   0x1   :  { %s946_s20 = smov 0  }
   0x2 LB: > { %s27_s21 = sadd.s32 1, %s905_s19  ;;  %p751_p0 = scmp.ge.s32.totalorder %s909_s20, 1  ;;  %s909_s20 = sphi %s946_s20, %s15_s20   ;;  %s905_s19 = sphi %s944_s19, %s1057_s19   ;;  %s901_s18 = sphi %s942_s18, %s1056_s18  }
   0x3   : > { %p29_p1 = scmp.ge.s32.totalorder %s27_s21, 2  ;;  %p226_p2 = scmp.lt.s32.totalorder %s909_s20, 3 }
   0x5   : > { %s1059_s21 = smov (%p29_p1, %s27_s21), 0  ;;  %p227_p3 = pnand %p751_p0, %p226_p2 }
   0x6   : > { %p270_p4 = scmp.lt.s32.totalorder (!%p227_p3), %s901_s18, 1 }
   0x7   : > { %230 = sbr.rel (%p227_p3) target bundleno = 566 (0x236), region = 40 }
   0xc   : > { %v875_v0 = vld [vmem:[%s1050_s0 + $0x4] ss:$8 sps:$4 sm:$0xff]   ;;  %v911_v1 = vmov 0   ;;  %s1061_s18 = smov (!%p270_p4, %s901_s18), 1  ;;  %v878_v2 = vld [vmem:[%s1050_s0 + $0x14] ss:$8 sps:$4 sm:$0xff]  }
   0xd   : > { %855 = vset.pattern.permute.xlu0 %v911_v1  ;;  %856 = vset.pattern.permute.xlu1 %v911_v1  ;;  %v333_v3 = vld [vmem:[%s1051_s1] sm:$0xff]  ;;  %v335_v4 = vld [vmem:[%s1051_s1 + $0x10] sm:$0xff]  ;;  %s784_s30 = sshll.u32 %s1061_s18, 7  ;;  %v334_v5 = vld [vmem:[%s1051_s1 + $0x8] sm:$0xff]  ;;  %vm522_vm0 = vcmask 130048   ;;  %s1013_s17 = sshll.u32 %s1061_s18, 5 }
   0xe   : > { %505 = vmatprep.mubr.bf16.mxu0 %v875_v0  ;;  %339 = vperm.xlu0 %855, %v333_v3   ;;  %s981_s10 = scalar_lea.vmem %s1054_s4, %s784_s30  ;;  %v336_v7 = vld [vmem:[%s1051_s1 + $0x18] sm:$0xff]  ;;  %v873_v23 = vld [vmem:[%s1050_s0] ss:$8 sps:$4 sm:$0xff]   ;;  %s274_s24 = scalar_lea.vmem %s1052_s2, %s1013_s17 }
   0xf   : > { %513 = vmatprep.mubr.bf16.mxu1 %v878_v2  ;;  %349 = vperm.xlu1 %856, %v335_v4   ;;  %v857_v6 = vld [vmem:[%s981_s10 + $0x78] sm:$0xff]   ;;  %v859_v9 = vld [vmem:[%s981_s10 + $0x70] sm:$0xff]   ;;  %v861_v11 = vld [vmem:[%s981_s10 + $0x68] sm:$0xff]   ;;  %s1023_s27 = scalar_lea.vmem %s1053_s3, %s1013_s17  ;;  %s295_s29 = scalar_lea.vmem %s1055_s5, %s1013_s17 }
  0x10   : > { %v858_v8 = vld [vmem:[%s981_s10 + $0x38] sm:$0xff]   ;;  %786 = vmatprep.subr.bf16.mxu0 %v857_v6  ;;  %814 = vmatprep.subr.bf16.mxu1 %v857_v6  ;;  %v860_v10 = vld [vmem:[%s981_s10 + $0x30] sm:$0xff]   ;;  %v862_v12 = vld [vmem:[%s981_s10 + $0x28] sm:$0xff]  }
  0x11   : > { %787 = vmatpush3.bf16.msra.mxu0 %v858_v8  ;;  %822 = vmatpush3.bf16.msra.mxu1 %v858_v8  ;;  %v863_v13 = vld [vmem:[%s981_s10 + $0x60] sm:$0xff]   ;;  %v865_v15 = vld [vmem:[%s981_s10 + $0x58] sm:$0xff]   ;;  %v867_v17 = vld [vmem:[%s981_s10 + $0x50] sm:$0xff]  }
  0x12   : > { %344 = vperm.xlu0 %855, %v334_v5   ;;  %788 = vmatprep.subr.bf16.mxu0 %v859_v9  ;;  %v864_v14 = vld [vmem:[%s981_s10 + $0x20] sm:$0xff]   ;;  %v866_v16 = vld [vmem:[%s981_s10 + $0x18] sm:$0xff]   ;;  %v868_v18 = vld [vmem:[%s981_s10 + $0x10] sm:$0xff]  }
  0x13   : > { %815 = vmatprep.subr.bf16.mxu1 %v859_v9  ;;  %354 = vperm.xlu1 %856, %v336_v7   ;;  %v869_v19 = vld [vmem:[%s981_s10 + $0x48] sm:$0xff]   ;;  %v871_v21 = vld [vmem:[%s981_s10 + $0x40] sm:$0xff]   ;;  %v876_v24 = vld [vmem:[%s1050_s0 + $0x10] ss:$8 sps:$4 sm:$0xff]  }
  0x14   : > { %v870_v20 = vld [vmem:[%s981_s10 + $0x8] sm:$0xff]   ;;  %v872_v22 = vld [vmem:[%s981_s10] sm:$0xff]   ;;  %v578_v50 = vld [vmem:[%s274_s24 + $0x10] sm:$0xff] }
  0x15   : > { %789 = vmatpush3.bf16.msra.mxu0 %v860_v10  ;;  %823 = vmatpush3.bf16.msra.mxu1 %v860_v10  ;;  %v576_v49 = vld [vmem:[%s274_s24] sm:$0xff]  ;;  %v579_v51 = vld [vmem:[%s274_s24 + $0x18] sm:$0xff]  ;;  %v577_v52 = vld [vmem:[%s274_s24 + $0x8] sm:$0xff] }
  0x16   : > { %790 = vmatprep.subr.bf16.mxu0 %v861_v11  ;;  %816 = vmatprep.subr.bf16.mxu1 %v861_v11  ;;  %v605_v53 = vld [vmem:[%s1023_s27 + $0x8] sm:$0xff]  ;;  %v604_v54 = vld [vmem:[%s1023_s27] sm:$0xff]  ;;  %v607_v11 = vld [vmem:[%s1023_s27 + $0x18] sm:$0xff] }
  0x19   : > { %791 = vmatpush3.bf16.msra.mxu0 %v862_v12  ;;  %824 = vmatpush3.bf16.msra.mxu1 %v862_v12  ;;  %v606_v12 = vld [vmem:[%s1023_s27 + $0x10] sm:$0xff] }
  0x1a   : > { %792 = vmatprep.subr.bf16.mxu0 %v863_v13  ;;  %817 = vmatprep.subr.bf16.mxu1 %v863_v13 }
  0x1d   : > { %793 = vmatpush3.bf16.msra.mxu0 %v864_v14  ;;  %825 = vmatpush3.bf16.msra.mxu1 %v864_v14 }
  0x1e   : > { %794 = vmatprep.subr.bf16.mxu0 %v865_v15  ;;  %818 = vmatprep.subr.bf16.mxu1 %v865_v15 }
  0x21   : > { %795 = vmatpush3.bf16.msra.mxu0 %v866_v16  ;;  %826 = vmatpush3.bf16.msra.mxu1 %v866_v16 }
  0x22   : > { %796 = vmatprep.subr.bf16.mxu0 %v867_v17  ;;  %819 = vmatprep.subr.bf16.mxu1 %v867_v17 }
  0x25   : > { %797 = vmatpush3.bf16.msra.mxu0 %v868_v18  ;;  %827 = vmatpush3.bf16.msra.mxu1 %v868_v18 }
  0x26   : > { %798 = vmatprep.subr.bf16.mxu0 %v869_v19  ;;  %820 = vmatprep.subr.bf16.mxu1 %v869_v19 }
  0x29   : > { %799 = vmatpush3.bf16.msra.mxu0 %v870_v20  ;;  %828 = vmatpush3.bf16.msra.mxu1 %v870_v20 }
  0x2a   : > { %800 = vmatprep.subr.bf16.mxu0 %v871_v21  ;;  %821 = vmatprep.subr.bf16.mxu1 %v871_v21 }
  0x2d   : > { %801 = vmatpush3.bf16.msra.mxu0 %v872_v22  ;;  %829 = vmatpush3.bf16.msra.mxu1 %v872_v22 }
  0x30   : > { %506 = vmatmul.mubr.bf16.vlgmr.msra.gmra.mxu0 %v873_v23  ;;  %514 = vmatmul.mubr.bf16.vlgmr.msra.gmra.mxu1 %v876_v24 }
  0x89   : > { %v340_v27 = vpop.permute.xlu0 %339 }
  0x8a   : > { %v350_v28 = vpop.permute.xlu1 %349 }
  0x8d   : > { %v345_v42 = vpop.permute.xlu0 %344 }
  0x8e   : > { %v355_v43 = vpop.permute.xlu1 %354 }
  0xf0   : > { %v802_v25 = vpop.f32.mrf.mxu0  ;;  %v808_v26 = vpop.f32.mrf.mxu1 }
  0xf2   : > { %v803_v29 = vpop.f32.mrf.mxu0  ;;  %v809_v30 = vpop.f32.mrf.mxu1 }
  0xf3   : > { %v804_v31 = vadd.f32 %v803_v29, %v802_v25  ;;  %v810_v32 = vadd.f32 %v809_v30, %v808_v26 }
  0xf4   : > { %v805_v33 = vpop.f32.mrf.mxu0  ;;  %v811_v34 = vpop.f32.mrf.mxu1 }
  0xf5   : > { %v508_v35 = vadd.f32 %v804_v31, %v340_v27  ;;  %v516_v38 = vadd.f32 %v810_v32, %v350_v28 }
  0xf6   : > { %v806_v36 = vpop.f32.mrf.mxu0  ;;  %v812_v37 = vpop.f32.mrf.mxu1 }
  0xf7   : > { %v807_v39 = vadd.f32 %v806_v36, %v805_v33  ;;  %v813_v40 = vadd.f32 %v812_v37, %v811_v34  ;;  %v523_v41 = vsel %vm522_vm0, %v508_v35, 0.0  ;;  %v529_v47 = vsel %vm522_vm0, %v516_v38, 0.0 }
  0xf8   : > { %524 = vadd.xlane.f32.xlu0 %v523_v41 }
  0xf9   : > { %v511_v44 = vadd.f32 %v807_v39, %v345_v42  ;;  %v519_v45 = vadd.f32 %v813_v40, %v355_v43 }
  0xfb   : > { %v526_v46 = vsel %vm522_vm0, %v511_v44, 0.0  ;;  %v532_v48 = vsel %vm522_vm0, %v519_v45, 0.0 }
  0xfc   : > { %527 = vadd.xlane.f32.xlu1 %v526_v46  ;;  %530 = vadd.xlane.f32.xlu0 %v529_v47 }
 0x100   : > { %533 = vadd.xlane.f32.xlu0 %v532_v48 }
 0x10d   : > { %582 = vperm.xlu1 %856, %v576_v49  }
 0x111   : > { %592 = vperm.xlu1 %856, %v578_v50  }
 0x115   : > { %597 = vperm.xlu1 %856, %v579_v51  }
 0x116   : > { %587 = vperm.xlu0 %855, %v577_v52  }
 0x119   : > { %615 = vperm.xlu1 %856, %v605_v53  }
 0x11a   : > { %610 = vperm.xlu0 %855, %v604_v54  }
 0x181   : > { %v525_v55 = vpop.xlane.xlu0 %524 }
 0x182   : > { %v536_v56 = vmul.f32 0.0625, %v525_v55 }
 0x184   : > { %v540_v57 = vsub.f32 %v508_v35, %v536_v56 }
 0x185   : > { %v528_v58 = vpop.xlane.xlu1 %527  ;;  %v531_v59 = vpop.xlane.xlu0 %530 }
 0x186   : > { %v537_v60 = vmul.f32 0.0625, %v528_v58  ;;  %v538_v61 = vmul.f32 0.0625, %v531_v59  ;;  %v544_v62 = vmul.f32 %v540_v57, %v540_v57 }
 0x188   : > { %v541_v63 = vsub.f32 %v511_v44, %v537_v60  ;;  %v542_v0 = vsub.f32 %v516_v38, %v538_v61  ;;  %v548_v1 = vsel %vm522_vm0, %v544_v62, 0.0 }
 0x189   : > { %v534_v2 = vpop.xlane.xlu0 %533  ;;  %549 = vadd.xlane.f32.xlu1 %v548_v1  ;;  %v583_v13 = vpop.permute.xlu1 %582 }
 0x18a   : > { %v539_v3 = vmul.f32 0.0625, %v534_v2  ;;  %v545_v4 = vmul.f32 %v541_v63, %v541_v63  ;;  %v546_v5 = vmul.f32 %v542_v0, %v542_v0 }
 0x18c   : > { %v543_v6 = vsub.f32 %v519_v45, %v539_v3  ;;  %v551_v7 = vsel %vm522_vm0, %v545_v4, 0.0  ;;  %v554_v8 = vsel %vm522_vm0, %v546_v5, 0.0 }
 0x18d   : > { %552 = vadd.xlane.f32.xlu0 %v551_v7  ;;  %555 = vadd.xlane.f32.xlu1 %v554_v8  ;;  %v593_v14 = vpop.permute.xlu1 %592 }
 0x18e   : > { %v547_v9 = vmul.f32 %v543_v6, %v543_v6 }
 0x190   : > { %v557_v10 = vsel %vm522_vm0, %v547_v9, 0.0 }
 0x191   : > { %558 = vadd.xlane.f32.xlu0 %v557_v10  ;;  %v598_v15 = vpop.permute.xlu1 %597  ;;  %v588_v16 = vpop.permute.xlu0 %587 }
 0x195   : > { %v616_v17 = vpop.permute.xlu1 %615  ;;  %v611_v18 = vpop.permute.xlu0 %610 }
 0x19e   : > { %625 = vperm.xlu1 %856, %v607_v11  }
 0x1a7   : > { %620 = vperm.xlu0 %855, %v606_v12  }
 0x212   : > { %v550_v19 = vpop.xlane.xlu1 %549 }
 0x213   : > { %v560_v20 = vmul.f32 0.0625, %v550_v19 }
 0x215   : > { %v564_v21 = vadd.f32 1e-05, %v560_v20 }
 0x216   : > { %v553_v22 = vpop.xlane.xlu0 %552  ;;  %v556_v23 = vpop.xlane.xlu1 %555 }
 0x217   : > { %879 = vrsqrt.f32 %v564_v21  ;;  %v561_v24 = vmul.f32 0.0625, %v553_v22  ;;  %v562_v25 = vmul.f32 0.0625, %v556_v23 }
 0x219   : > { %v565_v26 = vadd.f32 1e-05, %v561_v24  ;;  %v566_v27 = vadd.f32 1e-05, %v562_v25 }
 0x21a   : > { %v559_v28 = vpop.xlane.xlu0 %558  ;;  %v626_v49 = vpop.permute.xlu1 %625 }
 0x21b   : > { %881 = vrsqrt.f32 %v565_v26  ;;  %v563_v29 = vmul.f32 0.0625, %v559_v28 }
 0x21c   : > { %883 = vrsqrt.f32 %v566_v27 }
 0x21d   : > { %v567_v30 = vadd.f32 1e-05, %v563_v29 }
 0x21f   : > { %885 = vrsqrt.f32 %v567_v30 }
 0x222   : > { %v621_v45 = vpop.permute.xlu0 %620 }
 0x224   : > { %v880_v31 = vpop.eup %879 }
 0x225   : > { %v572_v32 = vmul.f32 %v880_v31, %v540_v57 }
 0x227   : > { %v600_v33 = vmul.f32 %v583_v13, %v572_v32 }
 0x228   : > { %v882_v34 = vpop.eup %881 }
 0x229   : > { %v884_v35 = vpop.eup %883  ;;  %v573_v36 = vmul.f32 %v882_v34, %v541_v63  ;;  %v628_v37 = vadd.f32 %v611_v18, %v600_v33 }
 0x22a   : > { %v574_v38 = vmul.f32 %v884_v35, %v542_v0 }
 0x22b   : > { %v601_v39 = vmul.f32 %v588_v16, %v573_v36  ;;  %v632_v40 = vmax.f32 %v628_v37, 0.0 }
 0x22c   : > { %v886_v41 = vpop.eup %885  ;;  %v602_v42 = vmul.f32 %v593_v14, %v574_v38 }
 0x22d   : > { %v575_v43 = vmul.f32 %v886_v41, %v543_v6  ;;  %v629_v44 = vadd.f32 %v616_v17, %v601_v39  ;;  %636 = vst.msk [vmem:[%s295_s29] sm:$0xff] %vm522_vm0, %v632_v40 }
 0x22e   : > { %v630_v46 = vadd.f32 %v621_v45, %v602_v42 }
 0x22f   : > { %v603_v47 = vmul.f32 %v598_v15, %v575_v43  ;;  %v633_v48 = vmax.f32 %v629_v44, 0.0 }
 0x230   : > { %v634_v50 = vmax.f32 %v630_v46, 0.0 }
 0x231   : > { %637 = vst.msk [vmem:[%s295_s29 + $0x8] sm:$0xff] %vm522_vm0, %v633_v48  ;;  %v631_v51 = vadd.f32 %v626_v49, %v603_v47 }
 0x232   : > { %638 = vst.msk [vmem:[%s295_s29 + $0x10] sm:$0xff] %vm522_vm0, %v634_v50 }
 0x233   : > { %v635_v52 = vmax.f32 %v631_v51, 0.0 }
 0x235   : > { %639 = vst.msk [vmem:[%s295_s29 + $0x18] sm:$0xff] %vm522_vm0, %v635_v52 }
 0x236 PF: > { %s15_s20 = sadd.s32 1, %s909_s20   ;;  %s1056_s18 = smov %s905_s19 }
 0x237   : > { %p12_p5 = scmp.ge.s32.totalorder %s15_s20, 4   ;;  %s1057_s19 = smov %s1059_s21 }
 0x239   :  { %14 = sbr.rel (!%p12_p5) target bundleno = 2 (0x2), region = 76 }

// kernel: _lambda_.27
= control target key start
LH: loop header
LB: loop body
LE: loop exit
PB: predicated region body
PF: predicated region fallthrough
CT: control target
= control target key end

     0   :  { %s1033_s18 = smov 0   ;;  %s1035_s19 = smov 0   ;;  %s1151_s0 = inlined_call_operand.vmem [shape: bf16[32,288], index: 0, kind: input, shape index: {}]   ;;  %s1152_s1 = inlined_call_operand.vmem [shape: f32[32,1], index: 1, kind: input, shape index: {}]   ;;  %s1153_s2 = inlined_call_operand.vmem [shape: f32[2,32,1], index: 2, kind: input, shape index: {}]   ;;  %s1154_s3 = inlined_call_operand.vmem [shape: f32[2,32,1], index: 3, kind: input, shape index: {}]   ;;  %s1155_s4 = inlined_call_operand.vmem [shape: bf16[2,288,16], index: 4, kind: input, shape index: {}]   ;;  %s1156_s5 = inlined_call_operand.vmem [shape: f32[2,32,16], index: 5, kind: output, shape index: {}]  }
   0x1   :  { %s1037_s20 = smov 0  }
   0x2 LB: > { %s27_s21 = sadd.s32 1, %s996_s19  ;;  %p837_p0 = scmp.ge.s32.totalorder %s1000_s20, 1  ;;  %s1000_s20 = sphi %s1037_s20, %s15_s20   ;;  %s996_s19 = sphi %s1035_s19, %s1158_s19   ;;  %s992_s18 = sphi %s1033_s18, %s1157_s18  }
   0x3   : > { %p29_p1 = scmp.ge.s32.totalorder %s27_s21, 2  ;;  %p226_p2 = scmp.lt.s32.totalorder %s1000_s20, 3 }
   0x5   : > { %s1160_s21 = smov (%p29_p1, %s27_s21), 0  ;;  %p227_p3 = pnand %p837_p0, %p226_p2 }
   0x6   : > { %p270_p4 = scmp.lt.s32.totalorder (!%p227_p3), %s992_s18, 1 }
   0x7   : > { %230 = sbr.rel (%p227_p3) target bundleno = 573 (0x23d), region = 40 }
   0xc   : > { %vm503_vm0 = vcmask 261120   ;;  %v964_v0 = vld [vmem:[%s1151_s0 + $0x4] ss:$12 sps:$4 sm:$0xff]   ;;  %s1162_s18 = smov (!%p270_p4, %s992_s18), 1  ;;  %v965_v1 = vld [vmem:[%s1151_s0 + $0x8] ss:$12 sps:$4 sm:$0xff]  }
   0xd   : > { %542 = vmatprep.mubr.bf16.mxu0 %v964_v0  ;;  %s916_s26 = smul.u32 144, %s1162_s18  ;;  %912 = vmatprep.mubr.msk.bf16.mxu1 %vm503_vm0, %v965_v1  ;;  %v1002_v2 = vmov 0   ;;  %v341_v3 = vld [vmem:[%s1152_s1] sm:$0xff]  ;;  %v343_v4 = vld [vmem:[%s1152_s1 + $0x10] sm:$0xff]  ;;  %v342_v5 = vld [vmem:[%s1152_s1 + $0x8] sm:$0xff]  ;;  %vm608_vm1 = vcmask 130048  }
   0xe   : > { %942 = vset.pattern.permute.xlu0 %v1002_v2  ;;  %943 = vset.pattern.permute.xlu1 %v1002_v2  ;;  %v344_v6 = vld [vmem:[%s1152_s1 + $0x18] sm:$0xff]  ;;  %v966_v22 = vld [vmem:[%s1151_s0 + $0x20] ss:$12 sps:$4 sm:$0xff]   ;;  %s1114_s25 = sshll.u32 %s1162_s18, 5 }
   0xf   : > { %347 = vperm.xlu0 %942, %v341_v3   ;;  %s1070_s8 = scalar_lea.vmem %s1155_s4, %s916_s26  ;;  %357 = vperm.xlu1 %943, %v343_v4   ;;  %v962_v26 = vld [vmem:[%s1151_s0] ss:$12 sps:$4 sm:$0xff]   ;;  %v967_v27 = vld [vmem:[%s1151_s0 + $0x1c] ss:$12 sps:$4 sm:$0xff]   ;;  %v969_v28 = vld [vmem:[%s1151_s0 + $0x18] ss:$12 sps:$4 sm:$0xff]   ;;  %s274_s28 = scalar_lea.vmem %s1153_s2, %s1114_s25 }
  0x10   : > { %v944_v7 = vld [vmem:[%s1070_s8 + $0x78] sm:$0xff]   ;;  %v946_v9 = vld [vmem:[%s1070_s8 + $0x70] sm:$0xff]   ;;  %v948_v11 = vld [vmem:[%s1070_s8 + $0x68] sm:$0xff]   ;;  %s1124_s6 = scalar_lea.vmem %s1154_s3, %s1114_s25 }
  0x11   : > { %v945_v8 = vld [vmem:[%s1070_s8 + $0x38] sm:$0xff]   ;;  %876 = vmatprep.subr.bf16.mxu0 %v944_v7  ;;  %v947_v10 = vld [vmem:[%s1070_s8 + $0x30] sm:$0xff]   ;;  %v949_v12 = vld [vmem:[%s1070_s8 + $0x28] sm:$0xff]  }
  0x12   : > { %877 = vmatpush3.bf16.msra.mxu0 %v945_v8  ;;  %v950_v13 = vld [vmem:[%s1070_s8 + $0x60] sm:$0xff]   ;;  %v952_v15 = vld [vmem:[%s1070_s8 + $0x58] sm:$0xff]   ;;  %v958_v16 = vld [vmem:[%s1070_s8 + $0x88] sm:$0xff]  }
  0x13   : > { %352 = vperm.xlu0 %942, %v342_v5   ;;  %362 = vperm.xlu1 %943, %v344_v6   ;;  %v951_v14 = vld [vmem:[%s1070_s8 + $0x20] sm:$0xff]   ;;  %v953_v17 = vld [vmem:[%s1070_s8 + $0x18] sm:$0xff]   ;;  %v954_v18 = vld [vmem:[%s1070_s8 + $0x50] sm:$0xff]  }
  0x14   : > { %878 = vmatprep.subr.bf16.mxu0 %v946_v9  ;;  %908 = vmatprep.subr.bf16.mxu1 %v958_v16  ;;  %v961_v19 = vld [vmem:[%s1070_s8 + $0x80] sm:$0xff]   ;;  %v955_v20 = vld [vmem:[%s1070_s8 + $0x10] sm:$0xff]   ;;  %v956_v21 = vld [vmem:[%s1070_s8 + $0x48] sm:$0xff]  }
  0x15   : > { %909 = vmatpush3.bf16.msra.mxu1 %v958_v16  ;;  %v957_v23 = vld [vmem:[%s1070_s8 + $0x8] sm:$0xff]   ;;  %v959_v24 = vld [vmem:[%s1070_s8 + $0x40] sm:$0xff]   ;;  %v664_v62 = vld [vmem:[%s274_s28 + $0x10] sm:$0xff] }
  0x16   : > { %879 = vmatpush3.bf16.msra.mxu0 %v947_v10  ;;  %910 = vmatprep.subr.bf16.mxu1 %v961_v19  ;;  %v960_v25 = vld [vmem:[%s1070_s8] sm:$0xff]   ;;  %v665_v63 = vld [vmem:[%s274_s28 + $0x18] sm:$0xff]  ;;  %v691_v0 = vld [vmem:[%s1124_s6 + $0x8] sm:$0xff]  ;;  %s295_s8 = scalar_lea.vmem %s1156_s5, %s1114_s25 }
  0x17   : > { %880 = vmatprep.subr.bf16.mxu0 %v948_v11  ;;  %v662_v61 = vld [vmem:[%s274_s28] sm:$0xff]  ;;  %v663_v1 = vld [vmem:[%s274_s28 + $0x8] sm:$0xff] }
  0x18   : > { %v690_v2 = vld [vmem:[%s1124_s6] sm:$0xff] }
  0x19   : > { %911 = vmatpush3.bf16.msra.mxu1 %v961_v19 }
  0x1a   : > { %881 = vmatpush3.bf16.msra.mxu0 %v949_v12 }
  0x1b   : > { %882 = vmatprep.subr.bf16.mxu0 %v950_v13 }
  0x1c   : > { %913 = vmatmul.mubr.msk.bf16.vlgmr.msra.gmra.mxu1 %vm503_vm0, %v966_v22 }
  0x1e   : > { %883 = vmatpush3.bf16.msra.mxu0 %v951_v14 }
  0x1f   : > { %884 = vmatprep.subr.bf16.mxu0 %v952_v15 }
  0x22   : > { %885 = vmatpush3.bf16.msra.mxu0 %v953_v17 }
  0x23   : > { %886 = vmatprep.subr.bf16.mxu0 %v954_v18 }
  0x26   : > { %887 = vmatpush3.bf16.msra.mxu0 %v955_v20 }
  0x27   : > { %888 = vmatprep.subr.bf16.mxu0 %v956_v21 }
  0x2a   : > { %889 = vmatpush3.bf16.msra.mxu0 %v957_v23  ;;  %v693_v23 = vld [vmem:[%s1124_s6 + $0x18] sm:$0xff] }
  0x2b   : > { %890 = vmatprep.subr.bf16.mxu0 %v959_v24  ;;  %v692_v24 = vld [vmem:[%s1124_s6 + $0x10] sm:$0xff] }
  0x2e   : > { %891 = vmatpush3.bf16.msra.mxu0 %v960_v25 }
  0x31   : > { %543 = vmatmul.mubr.bf16.vlgmr.msra.gmra.mxu0 %v962_v26 }
  0x32   : > { %550 = vmatprep.mubr.bf16.mxu0 %v967_v27 }
  0x39   : > { %551 = vmatmul.mubr.bf16.gmra.mxu0 %v969_v28 }
  0x8a   : > { %v348_v30 = vpop.permute.xlu0 %347  ;;  %v358_v43 = vpop.permute.xlu1 %357 }
  0x8e   : > { %v353_v37 = vpop.permute.xlu0 %352  ;;  %v363_v56 = vpop.permute.xlu1 %362 }
  0xdc   : > { %v914_v29 = vpop.f32.mrf.mxu1 }
  0xde   : > { %v593_v33 = vpop.f32.mrf.mxu1 }
  0xe0   : > { %v915_v39 = vpop.f32.mrf.mxu1 }
  0xe2   : > { %v596_v46 = vpop.f32.mrf.mxu1 }
  0xf1   : > { %v892_v31 = vpop.f32.mrf.mxu0 }
  0xf3   : > { %v893_v32 = vpop.f32.mrf.mxu0 }
  0xf4   : > { %v894_v34 = vadd.f32 %v893_v32, %v892_v31 }
  0xf5   : > { %v895_v35 = vpop.f32.mrf.mxu0 }
  0xf6   : > { %v545_v36 = vadd.f32 %v894_v34, %v348_v30 }
  0xf7   : > { %v896_v38 = vpop.f32.mrf.mxu0 }
  0xf8   : > { %v594_v40 = vadd.f32 %v593_v33, %v545_v36  ;;  %v897_v41 = vadd.f32 %v896_v38, %v895_v35 }
  0xf9   : > { %v898_v42 = vpop.f32.mrf.mxu0 }
  0xfa   : > { %v548_v44 = vadd.f32 %v897_v41, %v353_v37  ;;  %v609_v45 = vsel %vm608_vm1, %v594_v40, 0.0 }
  0xfb   : > { %v899_v47 = vpop.f32.mrf.mxu0  ;;  %610 = vadd.xlane.f32.xlu0 %v609_v45 }
  0xfc   : > { %v597_v48 = vadd.f32 %v596_v46, %v548_v44  ;;  %v900_v49 = vadd.f32 %v899_v47, %v898_v42 }
  0xfd   : > { %v901_v50 = vpop.f32.mrf.mxu0 }
  0xfe   : > { %v553_v51 = vadd.f32 %v900_v49, %v358_v43  ;;  %v612_v52 = vsel %vm608_vm1, %v597_v48, 0.0 }
  0xff   : > { %v902_v53 = vpop.f32.mrf.mxu0  ;;  %613 = vadd.xlane.f32.xlu1 %v612_v52 }
 0x100   : > { %v903_v54 = vadd.f32 %v902_v53, %v901_v50  ;;  %v602_v55 = vadd.f32 %v914_v29, %v553_v51 }
 0x102   : > { %v556_v57 = vadd.f32 %v903_v54, %v363_v56  ;;  %v615_v58 = vsel %vm608_vm1, %v602_v55, 0.0 }
 0x103   : > { %616 = vadd.xlane.f32.xlu0 %v615_v58 }
 0x104   : > { %v605_v59 = vadd.f32 %v915_v39, %v556_v57 }
 0x106   : > { %v618_v60 = vsel %vm608_vm1, %v605_v59, 0.0 }
 0x107   : > { %619 = vadd.xlane.f32.xlu0 %v618_v60 }
 0x110   : > { %668 = vperm.xlu1 %943, %v662_v61  }
 0x114   : > { %678 = vperm.xlu1 %943, %v664_v62  }
 0x118   : > { %683 = vperm.xlu1 %943, %v665_v63  }
 0x11c   : > { %701 = vperm.xlu1 %943, %v691_v0  }
 0x11d   : > { %673 = vperm.xlu0 %942, %v663_v1  }
 0x121   : > { %696 = vperm.xlu0 %942, %v690_v2  }
 0x184   : > { %v611_v3 = vpop.xlane.xlu0 %610 }
 0x185   : > { %v622_v4 = vmul.f32 0.0625, %v611_v3 }
 0x187   : > { %v626_v5 = vsub.f32 %v594_v40, %v622_v4 }
 0x188   : > { %v614_v6 = vpop.xlane.xlu1 %613 }
 0x189   : > { %v623_v7 = vmul.f32 0.0625, %v614_v6  ;;  %v630_v8 = vmul.f32 %v626_v5, %v626_v5 }
 0x18b   : > { %v627_v9 = vsub.f32 %v597_v48, %v623_v7  ;;  %v634_v10 = vsel %vm608_vm1, %v630_v8, 0.0 }
 0x18c   : > { %v617_v11 = vpop.xlane.xlu0 %616  ;;  %635 = vadd.xlane.f32.xlu1 %v634_v10  ;;  %v669_v25 = vpop.permute.xlu1 %668 }
 0x18d   : > { %v624_v12 = vmul.f32 0.0625, %v617_v11  ;;  %v631_v13 = vmul.f32 %v627_v9, %v627_v9 }
 0x18f   : > { %v628_v14 = vsub.f32 %v602_v55, %v624_v12  ;;  %v637_v15 = vsel %vm608_vm1, %v631_v13, 0.0 }
 0x190   : > { %v620_v16 = vpop.xlane.xlu0 %619  ;;  %638 = vadd.xlane.f32.xlu0 %v637_v15  ;;  %v679_v26 = vpop.permute.xlu1 %678 }
 0x191   : > { %v625_v17 = vmul.f32 0.0625, %v620_v16  ;;  %v632_v18 = vmul.f32 %v628_v14, %v628_v14 }
 0x193   : > { %v629_v19 = vsub.f32 %v605_v59, %v625_v17  ;;  %v640_v20 = vsel %vm608_vm1, %v632_v18, 0.0 }
 0x194   : > { %641 = vadd.xlane.f32.xlu1 %v640_v20  ;;  %v684_v27 = vpop.permute.xlu1 %683 }
 0x195   : > { %v633_v21 = vmul.f32 %v629_v19, %v629_v19 }
 0x197   : > { %v643_v22 = vsel %vm608_vm1, %v633_v21, 0.0 }
 0x198   : > { %644 = vadd.xlane.f32.xlu0 %v643_v22  ;;  %v674_v28 = vpop.permute.xlu0 %673  ;;  %v702_v29 = vpop.permute.xlu1 %701 }
 0x19c   : > { %v697_v30 = vpop.permute.xlu0 %696 }
 0x1a5   : > { %711 = vperm.xlu1 %943, %v693_v23  }
 0x1ae   : > { %706 = vperm.xlu0 %942, %v692_v24  }
 0x215   : > { %v636_v31 = vpop.xlane.xlu1 %635 }
 0x216   : > { %v646_v32 = vmul.f32 0.0625, %v636_v31 }
 0x218   : > { %v650_v33 = vadd.f32 1e-05, %v646_v32 }
 0x219   : > { %v639_v34 = vpop.xlane.xlu0 %638 }
 0x21a   : > { %970 = vrsqrt.f32 %v650_v33  ;;  %v647_v35 = vmul.f32 0.0625, %v639_v34 }
 0x21c   : > { %v651_v36 = vadd.f32 1e-05, %v647_v35 }
 0x21d   : > { %v642_v37 = vpop.xlane.xlu1 %641 }
 0x21e   : > { %972 = vrsqrt.f32 %v651_v36  ;;  %v648_v38 = vmul.f32 0.0625, %v642_v37 }
 0x220   : > { %v652_v39 = vadd.f32 1e-05, %v648_v38 }
 0x221   : > { %v645_v40 = vpop.xlane.xlu0 %644  ;;  %v712_v62 = vpop.permute.xlu1 %711 }
 0x222   : > { %974 = vrsqrt.f32 %v652_v39  ;;  %v649_v41 = vmul.f32 0.0625, %v645_v40 }
 0x224   : > { %v653_v42 = vadd.f32 1e-05, %v649_v41 }
 0x226   : > { %976 = vrsqrt.f32 %v653_v42 }
 0x227   : > { %v971_v43 = vpop.eup %970 }
 0x228   : > { %v658_v44 = vmul.f32 %v971_v43, %v626_v5 }
 0x229   : > { %v707_v57 = vpop.permute.xlu0 %706 }
 0x22a   : > { %v686_v45 = vmul.f32 %v669_v25, %v658_v44 }
 0x22b   : > { %v973_v46 = vpop.eup %972 }
 0x22c   : > { %v659_v47 = vmul.f32 %v973_v46, %v627_v9  ;;  %v714_v48 = vadd.f32 %v697_v30, %v686_v45 }
 0x22e   : > { %v687_v49 = vmul.f32 %v674_v28, %v659_v47  ;;  %v718_v50 = vmax.f32 %v714_v48, 0.0 }
 0x22f   : > { %v975_v51 = vpop.eup %974 }
 0x230   : > { %v715_v52 = vadd.f32 %v702_v29, %v687_v49  ;;  %722 = vst.msk [vmem:[%s295_s8] sm:$0xff] %vm608_vm1, %v718_v50  ;;  %v660_v53 = vmul.f32 %v975_v51, %v628_v14 }
 0x232   : > { %v719_v54 = vmax.f32 %v715_v52, 0.0  ;;  %v688_v55 = vmul.f32 %v679_v26, %v660_v53 }
 0x233   : > { %v977_v56 = vpop.eup %976 }
 0x234   : > { %v661_v58 = vmul.f32 %v977_v56, %v629_v19  ;;  %723 = vst.msk [vmem:[%s295_s8 + $0x8] sm:$0xff] %vm608_vm1, %v719_v54  ;;  %v716_v59 = vadd.f32 %v707_v57, %v688_v55 }
 0x236   : > { %v689_v60 = vmul.f32 %v684_v27, %v661_v58  ;;  %v720_v61 = vmax.f32 %v716_v59, 0.0 }
 0x238   : > { %v717_v63 = vadd.f32 %v712_v62, %v689_v60  ;;  %724 = vst.msk [vmem:[%s295_s8 + $0x10] sm:$0xff] %vm608_vm1, %v720_v61 }
 0x23a   : > { %v721_v0 = vmax.f32 %v717_v63, 0.0 }
 0x23c   : > { %725 = vst.msk [vmem:[%s295_s8 + $0x18] sm:$0xff] %vm608_vm1, %v721_v0 }
 0x23d PF: > { %s15_s20 = sadd.s32 1, %s1000_s20   ;;  %s1157_s18 = smov %s996_s19 }
 0x23e   : > { %p12_p5 = scmp.ge.s32.totalorder %s15_s20, 4   ;;  %s1158_s19 = smov %s1160_s21 }
 0x240   :  { %14 = sbr.rel (!%p12_p5) target bundleno = 2 (0x2), region = 76 }

// kernel: _lambda_.28
= control target key start
LH: loop header
LB: loop body
LE: loop exit
PB: predicated region body
PF: predicated region fallthrough
CT: control target
= control target key end

     0   :  { %s1029_s18 = smov 0   ;;  %s1031_s19 = smov 0   ;;  %s1147_s0 = inlined_call_operand.vmem [shape: bf16[32,288], index: 0, kind: input, shape index: {}]   ;;  %s1148_s1 = inlined_call_operand.vmem [shape: f32[32,1], index: 1, kind: input, shape index: {}]   ;;  %s1149_s2 = inlined_call_operand.vmem [shape: f32[2,32,1], index: 2, kind: input, shape index: {}]   ;;  %s1150_s3 = inlined_call_operand.vmem [shape: f32[2,32,1], index: 3, kind: input, shape index: {}]   ;;  %s1151_s4 = inlined_call_operand.vmem [shape: bf16[2,288,16], index: 4, kind: input, shape index: {}]   ;;  %s1152_s5 = inlined_call_operand.vmem [shape: f32[2,32,16], index: 5, kind: output, shape index: {}]  }
   0x1   :  { %s1033_s20 = smov 0  }
   0x2 LB: > { %s27_s21 = sadd.s32 1, %s992_s19  ;;  %p833_p0 = scmp.ge.s32.totalorder %s996_s20, 1  ;;  %s996_s20 = sphi %s1033_s20, %s15_s20   ;;  %s992_s19 = sphi %s1031_s19, %s1154_s19   ;;  %s988_s18 = sphi %s1029_s18, %s1153_s18  }
   0x3   : > { %p29_p1 = scmp.ge.s32.totalorder %s27_s21, 2  ;;  %p226_p2 = scmp.lt.s32.totalorder %s996_s20, 3 }
   0x5   : > { %s1156_s21 = smov (%p29_p1, %s27_s21), 0  ;;  %p227_p3 = pnand %p833_p0, %p226_p2 }
   0x6   : > { %p270_p4 = scmp.lt.s32.totalorder (!%p227_p3), %s988_s18, 1 }
   0x7   : > { %230 = sbr.rel (%p227_p3) target bundleno = 571 (0x23b), region = 40 }
   0xc   : > { %vm503_vm0 = vcmask 261120   ;;  %v960_v0 = vld [vmem:[%s1147_s0 + $0x4] ss:$12 sps:$4 sm:$0xff]   ;;  %s1158_s18 = smov (!%p270_p4, %s988_s18), 1  ;;  %v961_v1 = vld [vmem:[%s1147_s0 + $0x8] ss:$12 sps:$4 sm:$0xff]  }
   0xd   : > { %542 = vmatprep.mubr.bf16.mxu0 %v960_v0  ;;  %s912_s26 = smul.u32 144, %s1158_s18  ;;  %908 = vmatprep.mubr.msk.bf16.mxu1 %vm503_vm0, %v961_v1  ;;  %v998_v2 = vmov 0   ;;  %v341_v3 = vld [vmem:[%s1148_s1] sm:$0xff]  ;;  %v343_v4 = vld [vmem:[%s1148_s1 + $0x10] sm:$0xff]  ;;  %v342_v5 = vld [vmem:[%s1148_s1 + $0x8] sm:$0xff]  ;;  %vm608_vm1 = vcmask 130048  }
   0xe   : > { %938 = vset.pattern.permute.xlu0 %v998_v2  ;;  %939 = vset.pattern.permute.xlu1 %v998_v2  ;;  %v344_v6 = vld [vmem:[%s1148_s1 + $0x18] sm:$0xff]  ;;  %v962_v22 = vld [vmem:[%s1147_s0 + $0x20] ss:$12 sps:$4 sm:$0xff]   ;;  %s1110_s25 = sshll.u32 %s1158_s18, 5 }
   0xf   : > { %347 = vperm.xlu0 %938, %v341_v3   ;;  %s1066_s8 = scalar_lea.vmem %s1151_s4, %s912_s26  ;;  %357 = vperm.xlu1 %939, %v343_v4   ;;  %v958_v26 = vld [vmem:[%s1147_s0] ss:$12 sps:$4 sm:$0xff]   ;;  %v963_v27 = vld [vmem:[%s1147_s0 + $0x1c] ss:$12 sps:$4 sm:$0xff]   ;;  %v965_v28 = vld [vmem:[%s1147_s0 + $0x18] ss:$12 sps:$4 sm:$0xff]   ;;  %s274_s28 = scalar_lea.vmem %s1149_s2, %s1110_s25 }
  0x10   : > { %v940_v7 = vld [vmem:[%s1066_s8 + $0x78] sm:$0xff]   ;;  %v942_v9 = vld [vmem:[%s1066_s8 + $0x70] sm:$0xff]   ;;  %v944_v11 = vld [vmem:[%s1066_s8 + $0x68] sm:$0xff]   ;;  %s1120_s6 = scalar_lea.vmem %s1150_s3, %s1110_s25 }
  0x11   : > { %v941_v8 = vld [vmem:[%s1066_s8 + $0x38] sm:$0xff]   ;;  %872 = vmatprep.subr.bf16.mxu0 %v940_v7  ;;  %v943_v10 = vld [vmem:[%s1066_s8 + $0x30] sm:$0xff]   ;;  %v945_v12 = vld [vmem:[%s1066_s8 + $0x28] sm:$0xff]  }
  0x12   : > { %873 = vmatpush3.bf16.msra.mxu0 %v941_v8  ;;  %v946_v13 = vld [vmem:[%s1066_s8 + $0x60] sm:$0xff]   ;;  %v948_v15 = vld [vmem:[%s1066_s8 + $0x58] sm:$0xff]   ;;  %v954_v16 = vld [vmem:[%s1066_s8 + $0x88] sm:$0xff]  }
  0x13   : > { %352 = vperm.xlu0 %938, %v342_v5   ;;  %362 = vperm.xlu1 %939, %v344_v6   ;;  %v947_v14 = vld [vmem:[%s1066_s8 + $0x20] sm:$0xff]   ;;  %v949_v17 = vld [vmem:[%s1066_s8 + $0x18] sm:$0xff]   ;;  %v950_v18 = vld [vmem:[%s1066_s8 + $0x50] sm:$0xff]  }
  0x14   : > { %874 = vmatprep.subr.bf16.mxu0 %v942_v9  ;;  %904 = vmatprep.subr.bf16.mxu1 %v954_v16  ;;  %v957_v19 = vld [vmem:[%s1066_s8 + $0x80] sm:$0xff]   ;;  %v951_v20 = vld [vmem:[%s1066_s8 + $0x10] sm:$0xff]   ;;  %v952_v21 = vld [vmem:[%s1066_s8 + $0x48] sm:$0xff]  }
  0x15   : > { %905 = vmatpush3.bf16.msra.mxu1 %v954_v16  ;;  %v953_v23 = vld [vmem:[%s1066_s8 + $0x8] sm:$0xff]   ;;  %v955_v24 = vld [vmem:[%s1066_s8 + $0x40] sm:$0xff]   ;;  %v664_v62 = vld [vmem:[%s274_s28 + $0x10] sm:$0xff] }
  0x16   : > { %875 = vmatpush3.bf16.msra.mxu0 %v943_v10  ;;  %906 = vmatprep.subr.bf16.mxu1 %v957_v19  ;;  %v956_v25 = vld [vmem:[%s1066_s8] sm:$0xff]   ;;  %v665_v63 = vld [vmem:[%s274_s28 + $0x18] sm:$0xff]  ;;  %v691_v0 = vld [vmem:[%s1120_s6 + $0x8] sm:$0xff]  ;;  %s295_s8 = scalar_lea.vmem %s1152_s5, %s1110_s25 }
  0x17   : > { %876 = vmatprep.subr.bf16.mxu0 %v944_v11  ;;  %v662_v61 = vld [vmem:[%s274_s28] sm:$0xff]  ;;  %v663_v1 = vld [vmem:[%s274_s28 + $0x8] sm:$0xff] }
  0x18   : > { %v690_v2 = vld [vmem:[%s1120_s6] sm:$0xff] }
  0x19   : > { %907 = vmatpush3.bf16.msra.mxu1 %v957_v19 }
  0x1a   : > { %877 = vmatpush3.bf16.msra.mxu0 %v945_v12 }
  0x1b   : > { %878 = vmatprep.subr.bf16.mxu0 %v946_v13 }
  0x1c   : > { %909 = vmatmul.mubr.msk.bf16.vlgmr.msra.gmra.mxu1 %vm503_vm0, %v962_v22 }
  0x1e   : > { %879 = vmatpush3.bf16.msra.mxu0 %v947_v14 }
  0x1f   : > { %880 = vmatprep.subr.bf16.mxu0 %v948_v15 }
  0x22   : > { %881 = vmatpush3.bf16.msra.mxu0 %v949_v17 }
  0x23   : > { %882 = vmatprep.subr.bf16.mxu0 %v950_v18 }
  0x26   : > { %883 = vmatpush3.bf16.msra.mxu0 %v951_v20 }
  0x27   : > { %884 = vmatprep.subr.bf16.mxu0 %v952_v21 }
  0x2a   : > { %885 = vmatpush3.bf16.msra.mxu0 %v953_v23  ;;  %v693_v23 = vld [vmem:[%s1120_s6 + $0x18] sm:$0xff] }
  0x2b   : > { %886 = vmatprep.subr.bf16.mxu0 %v955_v24  ;;  %v692_v24 = vld [vmem:[%s1120_s6 + $0x10] sm:$0xff] }
  0x2e   : > { %887 = vmatpush3.bf16.msra.mxu0 %v956_v25 }
  0x31   : > { %543 = vmatmul.mubr.bf16.vlgmr.msra.gmra.mxu0 %v958_v26 }
  0x32   : > { %550 = vmatprep.mubr.bf16.mxu0 %v963_v27 }
  0x39   : > { %551 = vmatmul.mubr.bf16.gmra.mxu0 %v965_v28 }
  0x8a   : > { %v348_v30 = vpop.permute.xlu0 %347  ;;  %v358_v43 = vpop.permute.xlu1 %357 }
  0x8e   : > { %v353_v37 = vpop.permute.xlu0 %352  ;;  %v363_v56 = vpop.permute.xlu1 %362 }
  0xdc   : > { %v910_v29 = vpop.f32.mrf.mxu1 }
  0xde   : > { %v593_v33 = vpop.f32.mrf.mxu1 }
  0xe0   : > { %v911_v39 = vpop.f32.mrf.mxu1 }
  0xe2   : > { %v596_v46 = vpop.f32.mrf.mxu1 }
  0xf1   : > { %v888_v31 = vpop.f32.mrf.mxu0 }
  0xf3   : > { %v889_v32 = vpop.f32.mrf.mxu0 }
  0xf4   : > { %v890_v34 = vadd.f32 %v889_v32, %v888_v31 }
  0xf5   : > { %v891_v35 = vpop.f32.mrf.mxu0 }
  0xf6   : > { %v545_v36 = vadd.f32 %v890_v34, %v348_v30 }
  0xf7   : > { %v892_v38 = vpop.f32.mrf.mxu0 }
  0xf8   : > { %v594_v40 = vadd.f32 %v593_v33, %v545_v36  ;;  %v893_v41 = vadd.f32 %v892_v38, %v891_v35 }
  0xf9   : > { %v894_v42 = vpop.f32.mrf.mxu0 }
  0xfa   : > { %v548_v44 = vadd.f32 %v893_v41, %v353_v37  ;;  %v609_v45 = vsel %vm608_vm1, %v594_v40, 0.0 }
  0xfb   : > { %v895_v47 = vpop.f32.mrf.mxu0  ;;  %610 = vadd.xlane.f32.xlu0 %v609_v45 }
  0xfc   : > { %v597_v48 = vadd.f32 %v596_v46, %v548_v44  ;;  %v896_v49 = vadd.f32 %v895_v47, %v894_v42 }
  0xfd   : > { %v897_v50 = vpop.f32.mrf.mxu0 }
  0xfe   : > { %v553_v51 = vadd.f32 %v896_v49, %v358_v43  ;;  %v612_v52 = vsel %vm608_vm1, %v597_v48, 0.0 }
  0xff   : > { %v898_v53 = vpop.f32.mrf.mxu0  ;;  %613 = vadd.xlane.f32.xlu1 %v612_v52 }
 0x100   : > { %v899_v54 = vadd.f32 %v898_v53, %v897_v50  ;;  %v602_v55 = vadd.f32 %v910_v29, %v553_v51 }
 0x102   : > { %v556_v57 = vadd.f32 %v899_v54, %v363_v56  ;;  %v615_v58 = vsel %vm608_vm1, %v602_v55, 0.0 }
 0x103   : > { %616 = vadd.xlane.f32.xlu0 %v615_v58 }
 0x104   : > { %v605_v59 = vadd.f32 %v911_v39, %v556_v57 }
 0x106   : > { %v618_v60 = vsel %vm608_vm1, %v605_v59, 0.0 }
 0x107   : > { %619 = vadd.xlane.f32.xlu0 %v618_v60 }
 0x110   : > { %668 = vperm.xlu1 %939, %v662_v61  }
 0x114   : > { %678 = vperm.xlu1 %939, %v664_v62  }
 0x118   : > { %683 = vperm.xlu1 %939, %v665_v63  }
 0x11c   : > { %701 = vperm.xlu1 %939, %v691_v0  }
 0x11d   : > { %673 = vperm.xlu0 %938, %v663_v1  }
 0x121   : > { %696 = vperm.xlu0 %938, %v690_v2  }
 0x184   : > { %v611_v3 = vpop.xlane.xlu0 %610 }
 0x185   : > { %v622_v4 = vmul.f32 0.0625, %v611_v3 }
 0x187   : > { %v626_v5 = vsub.f32 %v594_v40, %v622_v4 }
 0x188   : > { %v614_v6 = vpop.xlane.xlu1 %613 }
 0x189   : > { %v623_v7 = vmul.f32 0.0625, %v614_v6  ;;  %v630_v8 = vmul.f32 %v626_v5, %v626_v5 }
 0x18b   : > { %v627_v9 = vsub.f32 %v597_v48, %v623_v7  ;;  %v634_v10 = vsel %vm608_vm1, %v630_v8, 0.0 }
 0x18c   : > { %v617_v11 = vpop.xlane.xlu0 %616  ;;  %635 = vadd.xlane.f32.xlu1 %v634_v10  ;;  %v669_v25 = vpop.permute.xlu1 %668 }
 0x18d   : > { %v624_v12 = vmul.f32 0.0625, %v617_v11  ;;  %v631_v13 = vmul.f32 %v627_v9, %v627_v9 }
 0x18f   : > { %v628_v14 = vsub.f32 %v602_v55, %v624_v12  ;;  %v637_v15 = vsel %vm608_vm1, %v631_v13, 0.0 }
 0x190   : > { %v620_v16 = vpop.xlane.xlu0 %619  ;;  %638 = vadd.xlane.f32.xlu0 %v637_v15  ;;  %v679_v26 = vpop.permute.xlu1 %678 }
 0x191   : > { %v625_v17 = vmul.f32 0.0625, %v620_v16  ;;  %v632_v18 = vmul.f32 %v628_v14, %v628_v14 }
 0x193   : > { %v629_v19 = vsub.f32 %v605_v59, %v625_v17  ;;  %v640_v20 = vsel %vm608_vm1, %v632_v18, 0.0 }
 0x194   : > { %641 = vadd.xlane.f32.xlu1 %v640_v20  ;;  %v684_v27 = vpop.permute.xlu1 %683 }
 0x195   : > { %v633_v21 = vmul.f32 %v629_v19, %v629_v19 }
 0x197   : > { %v643_v22 = vsel %vm608_vm1, %v633_v21, 0.0 }
 0x198   : > { %644 = vadd.xlane.f32.xlu0 %v643_v22  ;;  %v674_v28 = vpop.permute.xlu0 %673  ;;  %v702_v29 = vpop.permute.xlu1 %701 }
 0x19c   : > { %v697_v30 = vpop.permute.xlu0 %696 }
 0x1a5   : > { %711 = vperm.xlu1 %939, %v693_v23  }
 0x1ae   : > { %706 = vperm.xlu0 %938, %v692_v24  }
 0x215   : > { %v636_v31 = vpop.xlane.xlu1 %635 }
 0x216   : > { %v646_v32 = vmul.f32 0.0625, %v636_v31 }
 0x218   : > { %v650_v33 = vadd.f32 1e-05, %v646_v32 }
 0x219   : > { %v639_v34 = vpop.xlane.xlu0 %638 }
 0x21a   : > { %966 = vrsqrt.f32 %v650_v33  ;;  %v647_v35 = vmul.f32 0.0625, %v639_v34 }
 0x21c   : > { %v651_v36 = vadd.f32 1e-05, %v647_v35 }
 0x21d   : > { %v642_v37 = vpop.xlane.xlu1 %641 }
 0x21e   : > { %968 = vrsqrt.f32 %v651_v36  ;;  %v648_v38 = vmul.f32 0.0625, %v642_v37 }
 0x220   : > { %v652_v39 = vadd.f32 1e-05, %v648_v38 }
 0x221   : > { %v645_v40 = vpop.xlane.xlu0 %644  ;;  %v712_v59 = vpop.permute.xlu1 %711 }
 0x222   : > { %970 = vrsqrt.f32 %v652_v39  ;;  %v649_v41 = vmul.f32 0.0625, %v645_v40 }
 0x224   : > { %v653_v42 = vadd.f32 1e-05, %v649_v41 }
 0x226   : > { %972 = vrsqrt.f32 %v653_v42 }
 0x227   : > { %v967_v43 = vpop.eup %966 }
 0x228   : > { %v658_v44 = vmul.f32 %v967_v43, %v626_v5 }
 0x229   : > { %v707_v55 = vpop.permute.xlu0 %706 }
 0x22a   : > { %v686_v45 = vmul.f32 %v669_v25, %v658_v44 }
 0x22b   : > { %v969_v46 = vpop.eup %968 }
 0x22c   : > { %v659_v47 = vmul.f32 %v969_v46, %v627_v9  ;;  %v714_v48 = vadd.f32 %v697_v30, %v686_v45 }
 0x22e   : > { %v687_v49 = vmul.f32 %v674_v28, %v659_v47  ;;  %718 = vst.msk [vmem:[%s295_s8] sm:$0xff] %vm608_vm1, %v714_v48 }
 0x22f   : > { %v971_v50 = vpop.eup %970 }
 0x230   : > { %v715_v51 = vadd.f32 %v702_v29, %v687_v49  ;;  %v660_v52 = vmul.f32 %v971_v50, %v628_v14 }
 0x232   : > { %719 = vst.msk [vmem:[%s295_s8 + $0x8] sm:$0xff] %vm608_vm1, %v715_v51  ;;  %v688_v53 = vmul.f32 %v679_v26, %v660_v52 }
 0x233   : > { %v973_v54 = vpop.eup %972 }
 0x234   : > { %v661_v56 = vmul.f32 %v973_v54, %v629_v19  ;;  %v716_v57 = vadd.f32 %v707_v55, %v688_v53 }
 0x236   : > { %v689_v58 = vmul.f32 %v684_v27, %v661_v56  ;;  %720 = vst.msk [vmem:[%s295_s8 + $0x10] sm:$0xff] %vm608_vm1, %v716_v57 }
 0x238   : > { %v717_v60 = vadd.f32 %v712_v59, %v689_v58 }
 0x23a   : > { %721 = vst.msk [vmem:[%s295_s8 + $0x18] sm:$0xff] %vm608_vm1, %v717_v60 }
 0x23b PF: > { %s15_s20 = sadd.s32 1, %s996_s20   ;;  %s1153_s18 = smov %s992_s19 }
 0x23c   : > { %p12_p5 = scmp.ge.s32.totalorder %s15_s20, 4   ;;  %s1154_s19 = smov %s1156_s21 }
 0x23e   :  { %14 = sbr.rel (!%p12_p5) target bundleno = 2 (0x2), region = 76 }

// kernel: _lambda_.29
= control target key start
LH: loop header
LB: loop body
LE: loop exit
PB: predicated region body
PF: predicated region fallthrough
CT: control target
= control target key end

     0   :  { %s838_s18 = smov 0   ;;  %s840_s19 = smov 0   ;;  %s989_s0 = inlined_call_operand.vmem [shape: bf16[8,147], index: 0, kind: input, shape index: {}]   ;;  %s990_s1 = inlined_call_operand.vmem [shape: f32[8,1], index: 1, kind: input, shape index: {}]   ;;  %s991_s2 = inlined_call_operand.vmem [shape: f32[4,8,1], index: 2, kind: input, shape index: {}]   ;;  %s992_s3 = inlined_call_operand.vmem [shape: f32[4,8,1], index: 3, kind: input, shape index: {}]   ;;  %s993_s4 = inlined_call_operand.vmem [shape: bf16[4,147,256], index: 4, kind: input, shape index: {}]   ;;  %s994_s5 = inlined_call_operand.vmem [shape: f32[4,8,256], index: 5, kind: output, shape index: {}]  }
   0x1   :  { %s842_s20 = smov 0   ;;  %s844_s21 = smov 0  }
   0x2   :  { %s846_s22 = smov 0   ;;  %s848_s2 = smov 0  }
   0x3   :  { %s850_s23 = smov 0  }
   0x4 LB: > { %s24_s3 = sadd.s32 1, %s796_s22  ;;  %s27_s24 = sadd.s32 1, %s800_s2  ;;  %s804_s23 = sphi %s850_s23, %s15_s23   ;;  %s800_s2 = sphi %s848_s2, %s1000_s2   ;;  %s796_s22 = sphi %s846_s22, %s999_s22   ;;  %s792_s21 = sphi %s844_s21, %s998_s21   ;;  %s788_s20 = sphi %s842_s20, %s997_s20   ;;  %s784_s19 = sphi %s840_s19, %s996_s19   ;;  %s780_s18 = sphi %s838_s18, %s995_s18  }
   0x5   : > { %p25_p0 = scmp.ge.s32.totalorder %s24_s3, 2  ;;  %p137_p1 = scmp.ne.s32.totalorder %s784_s19, %s780_s18 }
   0x6   : > { %p138_p2 = scmp.eq.s32.totalorder %s804_s23, 0  ;;  %s130_s28 = sadd.s32 1, %s784_s19 }
   0x7   : > { %s1002_s3 = smov (%p25_p0, %s24_s3), 0  ;;  %s1004_s24 = smov (!%p25_p0, %s27_s24), %s800_s2 }
   0x8   : > { %p139_p3 = por %p138_p2, %p137_p1  ;;  %p29_p4 = scmp.ge.s32.totalorder %s1004_s24, 4 }
   0x9   : > { %s126_s25 = ssub.s32 %s796_s22, %s1002_s3  ;;  %p656_p6 = scmp.ge.s32.totalorder %s804_s23, 8 }
   0xa   : > { %s1006_s24 = smov (%p29_p4, %s1004_s24), 0 }
   0xb   : > { %s125_s26 = ssub.s32 %s800_s2, %s1006_s24  ;;  %197 = sbr.rel (%p656_p6) target bundleno = 35 (0x23), region = 24 }
   0xc   : > { %s127_s27 = sor.u32 %s126_s25, %s125_s26 }
   0xd   : > { %p128_p5 = scmp.eq.s32.totalorder %s127_s27, 0 }
   0xf   : > { %s889_s29 = scalar_select %p128_p5, %s784_s19, %s130_s28  }
  0x10   : > { %214 = sbr.rel (!%p139_p3) target bundleno = 35 (0x23), region = 36  ;;  %s216_s30 = sand.u32 (%p139_p3), 1, %s784_s19  }
  0x11   : > { %s677_s6 = smul.u32 (%p139_p3), 38, %s800_s2 }
  0x12   : > { %s676_s7 = smul.u32 (%p139_p3), 76, %s216_s30 }
  0x13   : > { %s220_s8 = sadd.s32 (%p139_p3), %s796_s22, %s677_s6 }
  0x14   : > { %s657_s9 = sshll.u32 (%p139_p3), %s220_s8, 2  ;;  %s903_s13 = scalar_lea.vmem (%p139_p3), [#allocation2], %s676_s7 }
  0x15   : > { %s898_s12 = scalar_lea.vmem %s993_s4, %s657_s9 }
  0x16   : > { %v239_v0 = vld [vmem:[%s898_s12] sm:$0xf]  ;;  %v241_v1 = vld [vmem:[%s898_s12 + $0x8] sm:$0xf]  ;;  %v243_v2 = vld [vmem:[%s898_s12 + $0x10] sm:$0xf] }
  0x17   : > { %240 = vst [vmem:[%s903_s13] sm:$0xf] %v239_v0  ;;  %242 = vst [vmem:[%s903_s13 + $0x4] sm:$0xf] %v241_v1  ;;  %v245_v3 = vld [vmem:[%s898_s12 + $0x18] sm:$0xf] }
  0x18   : > { %244 = vst [vmem:[%s903_s13 + $0x8] sm:$0xf] %v243_v2  ;;  %v247_v4 = vld [vmem:[%s898_s12 + $0x20] sm:$0xf]  ;;  %v249_v5 = vld [vmem:[%s898_s12 + $0x28] sm:$0xf] }
  0x19   : > { %246 = vst [vmem:[%s903_s13 + $0xc] sm:$0xf] %v245_v3  ;;  %248 = vst [vmem:[%s903_s13 + $0x10] sm:$0xf] %v247_v4  ;;  %v251_v6 = vld [vmem:[%s898_s12 + $0x30] sm:$0xf] }
  0x1a   : > { %250 = vst [vmem:[%s903_s13 + $0x14] sm:$0xf] %v249_v5  ;;  %v253_v7 = vld [vmem:[%s898_s12 + $0x38] sm:$0xf]  ;;  %v255_v8 = vld [vmem:[%s898_s12 + $0x40] sm:$0xf] }
  0x1b   : > { %252 = vst [vmem:[%s903_s13 + $0x18] sm:$0xf] %v251_v6  ;;  %254 = vst [vmem:[%s903_s13 + $0x1c] sm:$0xf] %v253_v7  ;;  %v257_v9 = vld [vmem:[%s898_s12 + $0x48] sm:$0xf] }
  0x1c   : > { %256 = vst [vmem:[%s903_s13 + $0x20] sm:$0xf] %v255_v8  ;;  %v259_v10 = vld [vmem:[%s898_s12 + $0x50] sm:$0xf]  ;;  %v261_v11 = vld [vmem:[%s898_s12 + $0x58] sm:$0xf] }
  0x1d   : > { %258 = vst [vmem:[%s903_s13 + $0x24] sm:$0xf] %v257_v9  ;;  %260 = vst [vmem:[%s903_s13 + $0x28] sm:$0xf] %v259_v10  ;;  %v263_v12 = vld [vmem:[%s898_s12 + $0x60] sm:$0xf] }
  0x1e   : > { %262 = vst [vmem:[%s903_s13 + $0x2c] sm:$0xf] %v261_v11  ;;  %v265_v13 = vld [vmem:[%s898_s12 + $0x68] sm:$0xf]  ;;  %v267_v14 = vld [vmem:[%s898_s12 + $0x70] sm:$0xf] }
  0x1f   : > { %264 = vst [vmem:[%s903_s13 + $0x30] sm:$0xf] %v263_v12  ;;  %266 = vst [vmem:[%s903_s13 + $0x34] sm:$0xf] %v265_v13  ;;  %v269_v15 = vld [vmem:[%s898_s12 + $0x78] sm:$0xf] }
  0x20   : > { %268 = vst [vmem:[%s903_s13 + $0x38] sm:$0xf] %v267_v14  ;;  %v271_v16 = vld [vmem:[%s898_s12 + $0x80] sm:$0xf]  ;;  %v273_v17 = vld [vmem:[%s898_s12 + $0x88] sm:$0xf] }
  0x21   : > { %270 = vst [vmem:[%s903_s13 + $0x3c] sm:$0xf] %v269_v15  ;;  %272 = vst [vmem:[%s903_s13 + $0x40] sm:$0xf] %v271_v16  ;;  %v275_v18 = vld [vmem:[%s898_s12 + $0x90] sm:$0xf] }
  0x22   : > { %274 = vst [vmem:[%s903_s13 + $0x44] sm:$0xf] %v273_v17  ;;  %276 = vst [vmem:[%s903_s13 + $0x48] sm:$0xf] %v275_v18 }
  0x23 PF: > { %p658_p7 = scmp.ge.s32.totalorder %s804_s23, 1  ;;  %p337_p8 = scmp.lt.s32.totalorder %s804_s23, 9 }
  0x25   : > { %p338_p9 = pnand %p658_p7, %p337_p8 }
  0x26   : > { %s344_s14 = sand.u32 (!%p338_p9), 1, %s780_s18   ;;  %p390_p10 = scmp.lt.s32.totalorder (!%p338_p9), %s792_s21, 3 }
  0x27   : > { %341 = sbr.rel (%p338_p9) target bundleno = 285 (0x11d), region = 77  ;;  %p392_p11 = scmp.lt.s32.totalorder (!%p338_p9), %s788_s20, 1 }
  0x28   : > { %s678_s17 = smul.u32 (!%p338_p9), 76, %s344_s14 }
  0x2a   : > { %s949_s27 = scalar_lea.vmem (!%p338_p9), [#allocation2], %s678_s17 }
  0x2c   : > { %v399_v19 = vld [vmem:[%s989_s0] sm:$0xff]  ;;  %v806_v20 = vmov 0   ;;  %vm488_vm0 = vcmask 154624   ;;  %v740_v25 = vld [vmem:[%s949_s27 + $0x28] sm:$0xff]   ;;  %vm492_vm1 = vcmask 1040384   ;;  %vm493_vm2 = vcmask 1041408  }
  0x2d   : > { %499 = vmatprep.subr.bf16.mxu0 %v806_v20  ;;  %v662_v21 = vcombine.high %v399_v19, %v399_v19  ;;  %737 = vset.pattern.permute.xlu0 %v806_v20  ;;  %v419_v22 = vld [vmem:[%s990_s1] sm:$0xff]  ;;  %v744_v29 = vld [vmem:[%s949_s27 + $0x8] sm:$0xff]   ;;  %v807_v30 = vmov 65535   ;;  %v661_v37 = vcombine.low %v399_v19, %v399_v19  ;;  %s1008_s21 = smov (!%p390_p10, %s792_s21), 3  ;;  %s1010_s20 = smov (!%p392_p11, %s788_s20), 1 }
  0x2e   : > { %422 = vperm.xlu0 %737, %v419_v22   ;;  %v738_v23 = vld [vmem:[%s949_s27 + $0x38] sm:$0xff]   ;;  %v739_v24 = vld [vmem:[%s949_s27 + $0x30] sm:$0xff]   ;;  %v741_v26 = vld [vmem:[%s949_s27 + $0x20] sm:$0xff]   ;;  %v494_v31 = vsel %vm492_vm1, 4294967295, %v807_v30  ;;  %s659_s18 = sshll.u32 %s1008_s21, 1 }
  0x2f   : > { %673 = vmatprep.mubr.msk.bf16.mxu0 %vm488_vm0, %v662_v21  ;;  %500 = vmatpush1.bf16.msra.mxu0 %v738_v23  ;;  %v742_v27 = vld [vmem:[%s949_s27 + $0x18] sm:$0xff]   ;;  %v743_v28 = vld [vmem:[%s949_s27 + $0x10] sm:$0xff]   ;;  %v745_v32 = vld [vmem:[%s949_s27] sm:$0xff]   ;;  %v495_v34 = vsel %vm493_vm2, %v494_v31, 0  ;;  %s395_s28 = sadd.s32 %s659_s18, %s1010_s20 }
  0x30   : > { %501 = vmatprep.subr.bf16.mxu0 %v806_v20  ;;  %v746_v33 = vld [vmem:[%s949_s27 + $0x48] ss:$0 sps:$4 sm:$0x33]   ;;  %v747_v36 = vld [vmem:[%s949_s27 + $0x40] sm:$0xff]   ;;  %s660_s30 = sshll.u32 %s395_s28, 3 }
  0x31   : > { %v497_v35 = vand.u32 %v746_v33, %v495_v34  ;;  %s397_s8 = scalar_lea.vmem %s994_s5, %s660_s30 }
  0x33   : > { %502 = vmatpush1.bf16.msra.mxu0 %v739_v24 }
  0x34   : > { %503 = vmatprep.subr.bf16.mxu0 %v806_v20 }
  0x37   : > { %504 = vmatpush1.bf16.msra.mxu0 %v740_v25 }
  0x38   : > { %505 = vmatprep.subr.bf16.mxu0 %v806_v20 }
  0x3b   : > { %506 = vmatpush1.bf16.msra.mxu0 %v741_v26 }
  0x3c   : > { %507 = vmatprep.subr.bf16.mxu0 %v806_v20 }
  0x3f   : > { %508 = vmatpush1.bf16.msra.mxu0 %v742_v27 }
  0x40   : > { %509 = vmatprep.subr.bf16.mxu0 %v806_v20 }
  0x43   : > { %510 = vmatpush1.bf16.msra.mxu0 %v743_v28 }
  0x44   : > { %511 = vmatprep.subr.bf16.mxu0 %v806_v20 }
  0x47   : > { %512 = vmatpush1.bf16.msra.mxu0 %v744_v29 }
  0x48   : > { %513 = vmatprep.subr.bf16.mxu0 %v806_v20 }
  0x4b   : > { %514 = vmatpush1.bf16.msra.mxu0 %v745_v32 }
  0x4c   : > { %527 = vmatprep.subr.bf16.mxu0 %v806_v20 }
  0x4f   : > { %528 = vmatpush2.bf16.msra.mxu0 %v497_v35 }
  0x50   : > { %529 = vmatprep.subr.bf16.mxu0 %v806_v20 }
  0x53   : > { %530 = vmatpush2.bf16.msra.mxu0 %v747_v36 }
  0x56   : > { %532 = vmatmul.mubr.bf16.vlgmr.msra.gmra.mxu0 %v661_v37 }
  0xa9   : > { %v423_v38 = vpop.permute.xlu0 %422 }
 0x116   : > { %v533_v39 = vpop.f32.mrf.mxu0 }
 0x117   : > { %v534_v40 = vadd.f32 %v533_v39, %v423_v38 }
 0x118   : > { %v535_v41 = vpop.f32.mrf.mxu0 }
 0x119   : > { %v539_v42 = vmax.f32 %v534_v40, 0.0 }
 0x11a   : > { %v536_v43 = vpop.f32.mrf.mxu0 }
 0x11b   : > { %540 = vst [vmem:[%s397_s8] sm:$0xff] %v539_v42 }
 0x11c   : > { %v537_v44 = vpop.f32.mrf.mxu0 }
 0x11d PF: > { %s15_s23 = sadd.s32 1, %s804_s23   ;;  %s995_s18 = smov %s784_s19 }
 0x11e   : > { %p12_p12 = scmp.ge.s32.totalorder %s15_s23, 10   ;;  %s996_s19 = smov %s889_s29 }
 0x11f   : > { %s997_s20 = smov %s796_s22  ;;  %s998_s21 = smov %s800_s2 }
 0x120   : > { %s999_s22 = smov %s1002_s3  ;;  %s1000_s2 = smov %s1006_s24 }
 0x121   :  { %14 = sbr.rel (!%p12_p12) target bundleno = 4 (0x4), region = 122 }

// kernel: _lambda_.30
= control target key start
LH: loop header
LB: loop body
LE: loop exit
PB: predicated region body
PF: predicated region fallthrough
CT: control target
= control target key end

     0   :  { %s679_s18 = smov 0   ;;  %s681_s19 = smov 0   ;;  %s725_s0 = inlined_call_operand.vmem [shape: bf16[16,128], index: 0, kind: input, shape index: {}]   ;;  %s726_s1 = inlined_call_operand.vmem [shape: f32[16,1], index: 1, kind: input, shape index: {}]   ;;  %s727_s2 = inlined_call_operand.vmem [shape: f32[4,16,1], index: 2, kind: input, shape index: {}]   ;;  %s728_s3 = inlined_call_operand.vmem [shape: f32[4,16,1], index: 3, kind: input, shape index: {}]   ;;  %s729_s4 = inlined_call_operand.vmem [shape: bf16[4,128,64], index: 4, kind: input, shape index: {}]   ;;  %s730_s5 = inlined_call_operand.vmem [shape: f32[4,16,64], index: 5, kind: output, shape index: {}]  }
   0x1   :  { %s683_s20 = smov 0  }
   0x2 LB: > { %s27_s2 = sadd.s32 1, %s640_s19  ;;  %p538_p0 = scmp.ge.s32.totalorder %s644_s20, 1  ;;  %s644_s20 = sphi %s683_s20, %s15_s20   ;;  %s640_s19 = sphi %s681_s19, %s732_s19   ;;  %s636_s18 = sphi %s679_s18, %s731_s18  }
   0x3   : > { %p29_p1 = scmp.ge.s32.totalorder %s27_s2, 4  ;;  %p226_p2 = scmp.lt.s32.totalorder %s644_s20, 5 }
   0x5   : > { %s734_s2 = smov (%p29_p1, %s27_s2), 0  ;;  %p227_p3 = pnand %p538_p0, %p226_p2 }
   0x6   : > { %p280_p4 = scmp.lt.s32.totalorder (!%p227_p3), %s636_s18, 3 }
   0x7   : > { %230 = sbr.rel (%p227_p3) target bundleno = 249 (0xf9), region = 40 }
   0xc   : > { %v646_v0 = vmov 0.0   ;;  %vm647_vm0 = vmmov 0   ;;  %v315_v1 = vld [vmem:[%s726_s1] sm:$0xff]  ;;  %s736_s18 = smov (!%p280_p4, %s636_s18), 3  ;;  %v648_v2 = vmov 0   ;;  %v316_v3 = vld [vmem:[%s726_s1 + $0x8] sm:$0xff] }
   0xd   : > { %565 = vmatprep.subr.bf16.mxu0 %v646_v0  ;;  %581 = vmatprep.mubr.msk.bf16.mxu0 %vm647_vm0, %v646_v0  ;;  %s554_s22 = sshll.u32 %s736_s18, 6  ;;  %v621_v12 = vld [vmem:[%s725_s0] sm:$0xff]   ;;  %s555_s30 = sshll.u32 %s736_s18, 4  ;;  %vm424_vm1 = vcmask 523264  }
   0xe   : > { %612 = vset.pattern.permute.xlu0 %v648_v2  ;;  %s287_s27 = scalar_lea.vmem %s729_s4, %s554_s22  ;;  %s295_s8 = scalar_lea.vmem %s730_s5, %s555_s30 }
   0xf   : > { %319 = vperm.xlu0 %612, %v315_v1   ;;  %v613_v4 = vld [vmem:[%s287_s27 + $0x38] sm:$0xff]   ;;  %v614_v5 = vld [vmem:[%s287_s27 + $0x30] sm:$0xff]   ;;  %v615_v6 = vld [vmem:[%s287_s27 + $0x28] sm:$0xff]  }
  0x10   : > { %566 = vmatpush3.bf16.msra.mxu0 %v613_v4  ;;  %v616_v7 = vld [vmem:[%s287_s27 + $0x20] sm:$0xff]   ;;  %v617_v8 = vld [vmem:[%s287_s27 + $0x18] sm:$0xff]   ;;  %v618_v9 = vld [vmem:[%s287_s27 + $0x10] sm:$0xff]  }
  0x11   : > { %567 = vmatprep.subr.bf16.mxu0 %v646_v0  ;;  %v619_v10 = vld [vmem:[%s287_s27 + $0x8] sm:$0xff]   ;;  %v620_v11 = vld [vmem:[%s287_s27] sm:$0xff]  }
  0x13   : > { %324 = vperm.xlu0 %612, %v316_v3  }
  0x14   : > { %568 = vmatpush3.bf16.msra.mxu0 %v614_v5 }
  0x15   : > { %569 = vmatprep.subr.bf16.mxu0 %v646_v0 }
  0x18   : > { %570 = vmatpush3.bf16.msra.mxu0 %v615_v6 }
  0x19   : > { %571 = vmatprep.subr.bf16.mxu0 %v646_v0 }
  0x1c   : > { %572 = vmatpush3.bf16.msra.mxu0 %v616_v7 }
  0x1d   : > { %573 = vmatprep.subr.bf16.mxu0 %v646_v0 }
  0x20   : > { %574 = vmatpush3.bf16.msra.mxu0 %v617_v8 }
  0x21   : > { %575 = vmatprep.subr.bf16.mxu0 %v646_v0 }
  0x24   : > { %576 = vmatpush3.bf16.msra.mxu0 %v618_v9 }
  0x25   : > { %577 = vmatprep.subr.bf16.mxu0 %v646_v0 }
  0x28   : > { %578 = vmatpush3.bf16.msra.mxu0 %v619_v10 }
  0x29   : > { %579 = vmatprep.subr.bf16.mxu0 %v646_v0 }
  0x2c   : > { %580 = vmatpush3.bf16.msra.mxu0 %v620_v11 }
  0x2f   : > { %582 = vmatmul.mubr.bf16.vlgmr.msra.gmra.mxu0 %v621_v12 }
  0x8a   : > { %v320_v13 = vpop.permute.xlu0 %319 }
  0x8e   : > { %v325_v18 = vpop.permute.xlu0 %324 }
  0xef   : > { %v415_v14 = vpop.f32.mrf.mxu0 }
  0xf0   : > { %v416_v15 = vadd.f32 %v415_v14, %v320_v13 }
  0xf1   : > { %v583_v16 = vpop.f32.mrf.mxu0 }
  0xf2   : > { %v422_v17 = vmax.f32 %v416_v15, 0.0 }
  0xf3   : > { %v418_v19 = vpop.f32.mrf.mxu0 }
  0xf4   : > { %425 = vst.msk [vmem:[%s295_s8] sm:$0xff] %vm424_vm1, %v422_v17  ;;  %v419_v20 = vadd.f32 %v418_v19, %v325_v18 }
  0xf5   : > { %v584_v21 = vpop.f32.mrf.mxu0 }
  0xf6   : > { %v423_v22 = vmax.f32 %v419_v20, 0.0 }
  0xf8   : > { %426 = vst.msk [vmem:[%s295_s8 + $0x8] sm:$0xff] %vm424_vm1, %v423_v22 }
  0xf9 PF: > { %s15_s20 = sadd.s32 1, %s644_s20   ;;  %s731_s18 = smov %s640_s19 }
  0xfa   : > { %p12_p5 = scmp.ge.s32.totalorder %s15_s20, 6   ;;  %s732_s19 = smov %s734_s2 }
  0xfc   :  { %14 = sbr.rel (!%p12_p5) target bundleno = 2 (0x2), region = 76 }

// kernel: _lambda_.31
= control target key start
LH: loop header
LB: loop body
LE: loop exit
PB: predicated region body
PF: predicated region fallthrough
CT: control target
= control target key end

     0   :  { %s819_s18 = smov 0   ;;  %s821_s19 = smov 0   ;;  %s902_s0 = inlined_call_operand.vmem [shape: bf16[32,256], index: 0, kind: input, shape index: {}]   ;;  %s903_s1 = inlined_call_operand.vmem [shape: f32[32,1], index: 1, kind: input, shape index: {}]   ;;  %s904_s2 = inlined_call_operand.vmem [shape: f32[4,32,1], index: 2, kind: input, shape index: {}]   ;;  %s905_s3 = inlined_call_operand.vmem [shape: f32[4,32,1], index: 3, kind: input, shape index: {}]   ;;  %s906_s4 = inlined_call_operand.vmem [shape: bf16[4,256,16], index: 4, kind: input, shape index: {}]   ;;  %s907_s5 = inlined_call_operand.vmem [shape: f32[4,32,16], index: 5, kind: output, shape index: {}]  }
   0x1   :  { %s823_s20 = smov 0  }
   0x2 LB: > { %s27_s2 = sadd.s32 1, %s782_s19  ;;  %p642_p0 = scmp.ge.s32.totalorder %s786_s20, 1  ;;  %s786_s20 = sphi %s823_s20, %s15_s20   ;;  %s782_s19 = sphi %s821_s19, %s909_s19   ;;  %s778_s18 = sphi %s819_s18, %s908_s18  }
   0x3   : > { %p29_p1 = scmp.ge.s32.totalorder %s27_s2, 4  ;;  %p226_p2 = scmp.lt.s32.totalorder %s786_s20, 5 }
   0x5   : > { %s911_s2 = smov (%p29_p1, %s27_s2), 0  ;;  %p227_p3 = pnand %p642_p0, %p226_p2 }
   0x6   : > { %p280_p4 = scmp.lt.s32.totalorder (!%p227_p3), %s778_s18, 3 }
   0x7   : > { %230 = sbr.rel (%p227_p3) target bundleno = 254 (0xfe), region = 40 }
   0xc   : > { %v760_v0 = vld [vmem:[%s902_s0 + $0x4] ss:$8 sps:$4 sm:$0xff]   ;;  %v788_v1 = vmov 0   ;;  %s913_s18 = smov (!%p280_p4, %s778_s18), 3  ;;  %v763_v2 = vld [vmem:[%s902_s0 + $0x14] ss:$8 sps:$4 sm:$0xff]  }
   0xd   : > { %741 = vset.pattern.permute.xlu1 %v788_v1  ;;  %740 = vset.pattern.permute.xlu0 %v788_v1  ;;  %v335_v3 = vld [vmem:[%s903_s1 + $0x10] sm:$0xff]  ;;  %v333_v4 = vld [vmem:[%s903_s1] sm:$0xff]  ;;  %s669_s28 = sshll.u32 %s913_s18, 7  ;;  %v336_v5 = vld [vmem:[%s903_s1 + $0x18] sm:$0xff]  ;;  %s670_s15 = sshll.u32 %s913_s18, 5  ;;  %vm526_vm0 = vcmask 130048  }
   0xe   : > { %505 = vmatprep.mubr.bf16.mxu0 %v760_v0  ;;  %349 = vperm.xlu1 %741, %v335_v3   ;;  %s858_s8 = scalar_lea.vmem %s906_s4, %s669_s28  ;;  %v334_v7 = vld [vmem:[%s903_s1 + $0x8] sm:$0xff]  ;;  %v761_v24 = vld [vmem:[%s902_s0 + $0x10] ss:$8 sps:$4 sm:$0xff]   ;;  %s295_s3 = scalar_lea.vmem %s907_s5, %s670_s15 }
   0xf   : > { %513 = vmatprep.mubr.bf16.mxu1 %v763_v2  ;;  %339 = vperm.xlu0 %740, %v333_v4   ;;  %v742_v6 = vld [vmem:[%s858_s8 + $0x78] sm:$0xff]   ;;  %v744_v9 = vld [vmem:[%s858_s8 + $0x70] sm:$0xff]   ;;  %v746_v11 = vld [vmem:[%s858_s8 + $0x68] sm:$0xff]  }
  0x10   : > { %v743_v8 = vld [vmem:[%s858_s8 + $0x38] sm:$0xff]   ;;  %671 = vmatprep.subr.bf16.mxu0 %v742_v6  ;;  %699 = vmatprep.subr.bf16.mxu1 %v742_v6  ;;  %v745_v10 = vld [vmem:[%s858_s8 + $0x30] sm:$0xff]   ;;  %v747_v12 = vld [vmem:[%s858_s8 + $0x28] sm:$0xff]  }
  0x11   : > { %672 = vmatpush3.bf16.msra.mxu0 %v743_v8  ;;  %707 = vmatpush3.bf16.msra.mxu1 %v743_v8  ;;  %v748_v13 = vld [vmem:[%s858_s8 + $0x60] sm:$0xff]   ;;  %v750_v15 = vld [vmem:[%s858_s8 + $0x58] sm:$0xff]   ;;  %v752_v17 = vld [vmem:[%s858_s8 + $0x50] sm:$0xff]  }
  0x12   : > { %354 = vperm.xlu1 %741, %v336_v5   ;;  %673 = vmatprep.subr.bf16.mxu0 %v744_v9  ;;  %v749_v14 = vld [vmem:[%s858_s8 + $0x20] sm:$0xff]   ;;  %v751_v16 = vld [vmem:[%s858_s8 + $0x18] sm:$0xff]   ;;  %v753_v18 = vld [vmem:[%s858_s8 + $0x10] sm:$0xff]  }
  0x13   : > { %700 = vmatprep.subr.bf16.mxu1 %v744_v9  ;;  %344 = vperm.xlu0 %740, %v334_v7   ;;  %v754_v19 = vld [vmem:[%s858_s8 + $0x48] sm:$0xff]   ;;  %v756_v21 = vld [vmem:[%s858_s8 + $0x40] sm:$0xff]  }
  0x14   : > { %v755_v20 = vld [vmem:[%s858_s8 + $0x8] sm:$0xff]   ;;  %v757_v22 = vld [vmem:[%s858_s8] sm:$0xff]  }
  0x15   : > { %674 = vmatpush3.bf16.msra.mxu0 %v745_v10  ;;  %708 = vmatpush3.bf16.msra.mxu1 %v745_v10  ;;  %v758_v23 = vld [vmem:[%s902_s0] ss:$8 sps:$4 sm:$0xff]  }
  0x16   : > { %675 = vmatprep.subr.bf16.mxu0 %v746_v11  ;;  %701 = vmatprep.subr.bf16.mxu1 %v746_v11 }
  0x19   : > { %676 = vmatpush3.bf16.msra.mxu0 %v747_v12  ;;  %709 = vmatpush3.bf16.msra.mxu1 %v747_v12 }
  0x1a   : > { %677 = vmatprep.subr.bf16.mxu0 %v748_v13  ;;  %702 = vmatprep.subr.bf16.mxu1 %v748_v13 }
  0x1d   : > { %678 = vmatpush3.bf16.msra.mxu0 %v749_v14  ;;  %710 = vmatpush3.bf16.msra.mxu1 %v749_v14 }
  0x1e   : > { %679 = vmatprep.subr.bf16.mxu0 %v750_v15  ;;  %703 = vmatprep.subr.bf16.mxu1 %v750_v15 }
  0x21   : > { %680 = vmatpush3.bf16.msra.mxu0 %v751_v16  ;;  %711 = vmatpush3.bf16.msra.mxu1 %v751_v16 }
  0x22   : > { %681 = vmatprep.subr.bf16.mxu0 %v752_v17  ;;  %704 = vmatprep.subr.bf16.mxu1 %v752_v17 }
  0x25   : > { %682 = vmatpush3.bf16.msra.mxu0 %v753_v18  ;;  %712 = vmatpush3.bf16.msra.mxu1 %v753_v18 }
  0x26   : > { %683 = vmatprep.subr.bf16.mxu0 %v754_v19  ;;  %705 = vmatprep.subr.bf16.mxu1 %v754_v19 }
  0x29   : > { %684 = vmatpush3.bf16.msra.mxu0 %v755_v20  ;;  %713 = vmatpush3.bf16.msra.mxu1 %v755_v20 }
  0x2a   : > { %685 = vmatprep.subr.bf16.mxu0 %v756_v21  ;;  %706 = vmatprep.subr.bf16.mxu1 %v756_v21 }
  0x2d   : > { %686 = vmatpush3.bf16.msra.mxu0 %v757_v22  ;;  %714 = vmatpush3.bf16.msra.mxu1 %v757_v22 }
  0x30   : > { %506 = vmatmul.mubr.bf16.vlgmr.msra.gmra.mxu0 %v758_v23  ;;  %514 = vmatmul.mubr.bf16.vlgmr.msra.gmra.mxu1 %v761_v24 }
  0x89   : > { %v350_v27 = vpop.permute.xlu1 %349 }
  0x8a   : > { %v340_v28 = vpop.permute.xlu0 %339 }
  0x8d   : > { %v355_v43 = vpop.permute.xlu1 %354 }
  0x8e   : > { %v345_v44 = vpop.permute.xlu0 %344 }
  0xf0   : > { %v687_v25 = vpop.f32.mrf.mxu0  ;;  %v693_v26 = vpop.f32.mrf.mxu1 }
  0xf2   : > { %v688_v29 = vpop.f32.mrf.mxu0  ;;  %v694_v30 = vpop.f32.mrf.mxu1 }
  0xf3   : > { %v689_v31 = vadd.f32 %v688_v29, %v687_v25  ;;  %v695_v32 = vadd.f32 %v694_v30, %v693_v26 }
  0xf4   : > { %v690_v33 = vpop.f32.mrf.mxu0  ;;  %v696_v34 = vpop.f32.mrf.mxu1 }
  0xf5   : > { %v508_v35 = vadd.f32 %v689_v31, %v340_v28  ;;  %v516_v36 = vadd.f32 %v695_v32, %v350_v27 }
  0xf6   : > { %v691_v37 = vpop.f32.mrf.mxu0  ;;  %v697_v38 = vpop.f32.mrf.mxu1 }
  0xf7   : > { %v522_v39 = vmax.f32 %v508_v35, 0.0  ;;  %v524_v40 = vmax.f32 %v516_v36, 0.0  ;;  %v692_v41 = vadd.f32 %v691_v37, %v690_v33  ;;  %v698_v42 = vadd.f32 %v697_v38, %v696_v34 }
  0xf9   : > { %527 = vst.msk [vmem:[%s295_s3] sm:$0xff] %vm526_vm0, %v522_v39  ;;  %529 = vst.msk [vmem:[%s295_s3 + $0x10] sm:$0xff] %vm526_vm0, %v524_v40  ;;  %v511_v45 = vadd.f32 %v692_v41, %v345_v44  ;;  %v519_v46 = vadd.f32 %v698_v42, %v355_v43 }
  0xfb   : > { %v523_v47 = vmax.f32 %v511_v45, 0.0  ;;  %v525_v48 = vmax.f32 %v519_v46, 0.0 }
  0xfd   : > { %528 = vst.msk [vmem:[%s295_s3 + $0x8] sm:$0xff] %vm526_vm0, %v523_v47  ;;  %530 = vst.msk [vmem:[%s295_s3 + $0x18] sm:$0xff] %vm526_vm0, %v525_v48 }
  0xfe PF: > { %s15_s20 = sadd.s32 1, %s786_s20   ;;  %s908_s18 = smov %s782_s19 }
  0xff   : > { %p12_p5 = scmp.ge.s32.totalorder %s15_s20, 6   ;;  %s909_s19 = smov %s911_s2 }
 0x101   :  { %14 = sbr.rel (!%p12_p5) target bundleno = 2 (0x2), region = 76 }

// kernel: _lambda_.32
= control target key start
LH: loop header
LB: loop body
LE: loop exit
PB: predicated region body
PF: predicated region fallthrough
CT: control target
= control target key end

     0   :  { %12 = vsyncpa [#allocation3], 0  ;;  %s1481_s0 = inlined_call_operand.vmem [shape: bf16[32,512], index: 0, kind: input, shape index: {}]   ;;  %s1482_s1 = inlined_call_operand.vmem [shape: f32[32,1], index: 1, kind: input, shape index: {}]   ;;  %s1483_s2 = inlined_call_operand.vmem [shape: f32[4,32,1], index: 2, kind: input, shape index: {}]   ;;  %s1484_s3 = inlined_call_operand.vmem [shape: f32[4,32,1], index: 3, kind: input, shape index: {}]   ;;  %s1485_s4 = inlined_call_operand.vmem [shape: bf16[4,512,4], index: 4, kind: input, shape index: {}]   ;;  %s1486_s5 = inlined_call_operand.hbm [shape: f32[4,32,4], index: 5, kind: output, shape index: {0}]   ;;  %s1487_s6 = inlined_call_operand.vmem [shape: f32[4,32,1], index: 6, kind: output, shape index: {1}]  }
   0x1   :  { %14 = vsyncpa [#allocation3 + $0x1], 0  ;;  %s1271_s21 = smov 0   ;;  %s1273_s22 = smov 0  }
   0x2   :  { %s1275_s23 = smov 0   ;;  %s1277_s2 = smov 0  }
   0x3   :  { %s1279_s3 = smov 0   ;;  %s1281_s24 = smov 0  }
   0x4 LB: > { %s936_s25 = sadd.s32 4294967295, %s1230_s24   ;;  %s937_s26 = sadd.s32 4294967294, %s1230_s24   ;;  %s1230_s24 = sphi %s1281_s24, %s20_s24   ;;  %s1226_s3 = sphi %s1279_s3, %s1494_s3   ;;  %s1222_s2 = sphi %s1277_s2, %s1493_s2   ;;  %s1218_s23 = sphi %s1275_s23, %s1492_s23   ;;  %s1214_s22 = sphi %s1273_s22, %s1491_s22   ;;  %s1210_s21 = sphi %s1271_s21, %s1490_s21  }
   0x5   : > { %s32_s27 = sadd.s32 1, %s1226_s3  ;;  %s163_s28 = sadd.s32 1, %s1218_s23 }
   0x6   : > { %p34_p0 = scmp.ge.s32.totalorder %s32_s27, 4  ;;  %p173_p1 = scmp.ne.s32.totalorder %s1218_s23, %s1214_s22 }
   0x7   : > { %p174_p2 = scmp.eq.s32.totalorder %s936_s25, 3  ;;  %p179_p3 = scmp.ne.s32.totalorder %s1214_s22, %s1210_s21 }
   0x8   : > { %s1496_s27 = smov (%p34_p0, %s32_s27), 0  ;;  %p180_p5 = scmp.eq.s32.totalorder %s937_s26, 3 }
   0x9   : > { %p1311_p4 = por %p174_p2, %p173_p1  ;;  %s158_s30 = ssub.s32 %s1226_s3, %s1496_s27 }
   0xa   : > { %p940_p6 = scmp.ge.s32.totalorder %s1230_s24, 1  ;;  %p161_p7 = scmp.eq.s32.totalorder %s158_s30, 0 }
   0xb   : > { %p1318_p8 = por %p180_p5, %p179_p3  ;;  %p257_p9 = scmp.lt.s32.totalorder %s1230_s24, 5 }
   0xc   : > { %s1324_s8 = scalar_select %p161_p7, %s1218_s23, %s163_s28  }
   0xd   : > { %p258_p10 = pnand %p940_p6, %p257_p9 }
   0xe   : > { %p315_p11 = scmp.lt.s32.totalorder (!%p258_p10), %s1222_s2, 3  ;;  %s295_s28 = sand.u32 (!%p258_p10), 1, %s1214_s22  }
   0xf   : > { %261 = sbr.rel (%p258_p10) target bundleno = 415 (0x19f), region = 40  ;;  %s941_s30 = sshll.u32 (!%p258_p10), %s295_s28, 5 }
  0x10   : > { %s1408_s9 = scalar_lea.vmem (!%p258_p10), [#allocation2], %s941_s30  ;;  %s993_s12 = sshll.u32 (!%p258_p10), %s1222_s2, 9 }
  0x11   : > { %s806_s10 = sshll.u32 (!%p258_p10), %s1408_s9, 4  ;;  %s1426_s15 = scalar_lea.hbm (!%p258_p10), %s1486_s5, %s993_s12  ;;  %s1428_s10 = int_to_ptr.vmem [resolvable:$true] %s806_s10 }
  0x12   : > { %s1432_s16 = scalar_lea.sflag (!%p258_p10), [#allocation3], %s295_s28  ;;  %s1154_s18 = scalar_lea.vmem (!%p258_p10), %s1428_s10, 512 }
  0x13   : > { %p1155_p12 = scmp.ne.s32.totalorder (!%p258_p10), %s1428_s10, %s1154_s18  ;;  %s1233_s19 = smov (!%p258_p10), [#allocation2]  }
  0x14   : > { %v1144_v0 = vld [vmem:[%s1481_s0 + $0x4] ss:$16 sps:$4 sm:$0xff]   ;;  %v1232_v1 = vmov 0   ;;  %s1331_s11 = scalar_select %p315_p11, %s1222_s2, 3  ;;  %v1147_v2 = vld [vmem:[%s1481_s0 + $0xc] ss:$16 sps:$4 sm:$0xff]  }
  0x15   : > { %1108 = vset.pattern.permute.xlu0 %v1232_v1  ;;  %1109 = vset.pattern.permute.xlu1 %v1232_v1  ;;  %v401_v3 = vld [vmem:[%s1482_s1] sm:$0xff]  ;;  %v403_v4 = vld [vmem:[%s1482_s1 + $0x10] sm:$0xff]  ;;  %v1145_v37 = vld [vmem:[%s1481_s0 + $0x8] ss:$16 sps:$4 sm:$0xff]   ;;  %vm759_vm0 = vcmask 31744   ;;  %p1156_p13 = pnand %p1155_p12, %p1311_p4  ;;  %s1158_s2 = sshll.u32 %s1233_s19, 4  ;;  %s1159_s2 = int_to_ptr.vmem [resolvable:$false] %s1158_s2 }
  0x16   : > { %689 = vmatprep.mubr.bf16.mxu0 %v1144_v0  ;;  %s991_s14 = sshll.u32 %s1331_s11, 8  ;;  %738 = vmatprep.mubr.bf16.mxu1 %v1147_v2  ;;  %v1142_v35 = vld [vmem:[%s1481_s0] ss:$16 sps:$4 sm:$0xff]   ;;  %v1148_v39 = vld [vmem:[%s1481_s0 + $0x24] ss:$16 sps:$4 sm:$0xff]   ;;  %v402_v40 = vld [vmem:[%s1482_s1 + $0x8] sm:$0xff]  ;;  %p1161_p1 = scmp.lt.s32.totalorder %s1428_s10, %s1159_s2 }
  0x17   : > { %s1340_s17 = scalar_lea.vmem %s1485_s4, %s991_s14  ;;  %407 = vperm.xlu0 %1108, %v401_v3   ;;  %417 = vperm.xlu1 %1109, %v403_v4   ;;  %v404_v41 = vld [vmem:[%s1482_s1 + $0x18] sm:$0xff]  ;;  %v1152_v43 = vld [vmem:[%s1481_s0 + $0x20] ss:$16 sps:$4 sm:$0xff]   ;;  %p1157_p0 = pneg %p1156_p13 }
  0x18   : > { %v1110_v5 = vld [vmem:[%s1340_s17 + $0x78] sm:$0xff]   ;;  %v1114_v9 = vld [vmem:[%s1340_s17 + $0x70] sm:$0xff]   ;;  %v1118_v13 = vld [vmem:[%s1340_s17 + $0x68] sm:$0xff]  }
  0x19   : > { %v1111_v6 = vld [vmem:[%s1340_s17 + $0xf8] sm:$0xff]   ;;  %994 = vmatprep.subr.bf16.mxu0 %v1110_v5  ;;  %v1115_v10 = vld [vmem:[%s1340_s17 + $0xf0] sm:$0xff]   ;;  %v1119_v14 = vld [vmem:[%s1340_s17 + $0xe8] sm:$0xff]  }
  0x1a   : > { %v1112_v7 = vld [vmem:[%s1340_s17 + $0x38] sm:$0xff]   ;;  %1022 = vmatprep.subr.bf16.mxu1 %v1111_v6  ;;  %v1116_v11 = vld [vmem:[%s1340_s17 + $0x30] sm:$0xff]   ;;  %v1120_v15 = vld [vmem:[%s1340_s17 + $0x28] sm:$0xff]  }
  0x1b   : > { %v1113_v8 = vld [vmem:[%s1340_s17 + $0xb8] sm:$0xff]   ;;  %995 = vmatpush3.bf16.msra.mxu0 %v1112_v7  ;;  %v1117_v12 = vld [vmem:[%s1340_s17 + $0xb0] sm:$0xff]   ;;  %v1121_v16 = vld [vmem:[%s1340_s17 + $0xa8] sm:$0xff]   ;;  %412 = vperm.xlu0 %1108, %v402_v40  }
  0x1c   : > { %1023 = vmatpush3.bf16.msra.mxu1 %v1113_v8  ;;  %996 = vmatprep.subr.bf16.mxu0 %v1114_v9  ;;  %v1122_v17 = vld [vmem:[%s1340_s17 + $0x60] sm:$0xff]   ;;  %v1126_v21 = vld [vmem:[%s1340_s17 + $0x58] sm:$0xff]   ;;  %v1130_v25 = vld [vmem:[%s1340_s17 + $0x50] sm:$0xff]  }
  0x1d   : > { %1024 = vmatprep.subr.bf16.mxu1 %v1115_v10  ;;  %v1123_v18 = vld [vmem:[%s1340_s17 + $0xe0] sm:$0xff]   ;;  %v1127_v22 = vld [vmem:[%s1340_s17 + $0xd8] sm:$0xff]   ;;  %v1131_v26 = vld [vmem:[%s1340_s17 + $0xd0] sm:$0xff]   ;;  %422 = vperm.xlu1 %1109, %v404_v41  }
  0x1e   : > { %v1124_v19 = vld [vmem:[%s1340_s17 + $0x20] sm:$0xff]   ;;  %v1128_v23 = vld [vmem:[%s1340_s17 + $0x18] sm:$0xff]   ;;  %v1132_v27 = vld [vmem:[%s1340_s17 + $0x10] sm:$0xff]  }
  0x1f   : > { %997 = vmatpush3.bf16.msra.mxu0 %v1116_v11  ;;  %v1125_v20 = vld [vmem:[%s1340_s17 + $0xa0] sm:$0xff]   ;;  %v1129_v24 = vld [vmem:[%s1340_s17 + $0x98] sm:$0xff]   ;;  %v1133_v28 = vld [vmem:[%s1340_s17 + $0x90] sm:$0xff]  }
  0x20   : > { %1025 = vmatpush3.bf16.msra.mxu1 %v1117_v12  ;;  %998 = vmatprep.subr.bf16.mxu0 %v1118_v13  ;;  %v1134_v29 = vld [vmem:[%s1340_s17 + $0x48] sm:$0xff]   ;;  %v1138_v33 = vld [vmem:[%s1340_s17 + $0x40] sm:$0xff]  }
  0x21   : > { %1026 = vmatprep.subr.bf16.mxu1 %v1119_v14  ;;  %v1135_v30 = vld [vmem:[%s1340_s17 + $0xc8] sm:$0xff]   ;;  %v1139_v34 = vld [vmem:[%s1340_s17 + $0xc0] sm:$0xff]  }
  0x22   : > { %v1136_v31 = vld [vmem:[%s1340_s17 + $0x8] sm:$0xff]   ;;  %v1140_v36 = vld [vmem:[%s1340_s17] sm:$0xff]  }
  0x23   : > { %999 = vmatpush3.bf16.msra.mxu0 %v1120_v15  ;;  %v1137_v32 = vld [vmem:[%s1340_s17 + $0x88] sm:$0xff]   ;;  %v1141_v38 = vld [vmem:[%s1340_s17 + $0x80] sm:$0xff]   ;;  %s1160_s17 = scalar_lea.vmem %s1159_s2, 1024 }
  0x24   : > { %1027 = vmatpush3.bf16.msra.mxu1 %v1121_v16  ;;  %1000 = vmatprep.subr.bf16.mxu0 %v1122_v17  ;;  %v1150_v42 = vld [vmem:[%s1481_s0 + $0x2c] ss:$16 sps:$4 sm:$0xff]   ;;  %v1153_v44 = vld [vmem:[%s1481_s0 + $0x28] ss:$16 sps:$4 sm:$0xff]   ;;  %p1162_p2 = scmp.lt.s32.totalorder %s1160_s17, %s1154_s18 }
  0x25   : > { %1028 = vmatprep.subr.bf16.mxu1 %v1123_v18 }
  0x26   : > { %p1163_p3 = por %p1162_p2, %p1161_p1 }
  0x27   : > { %1001 = vmatpush3.bf16.msra.mxu0 %v1124_v19 }
  0x28   : > { %1029 = vmatpush3.bf16.msra.mxu1 %v1125_v20  ;;  %1002 = vmatprep.subr.bf16.mxu0 %v1126_v21  ;;  %p1164_p5 = pnand %p1163_p3, %p1157_p0 }
  0x29   : > { %1030 = vmatprep.subr.bf16.mxu1 %v1127_v22 }
  0x2b   : > { %1003 = vmatpush3.bf16.msra.mxu0 %v1128_v23 }
  0x2c   : > { %1031 = vmatpush3.bf16.msra.mxu1 %v1129_v24  ;;  %1004 = vmatprep.subr.bf16.mxu0 %v1130_v25 }
  0x2d   : > { %1032 = vmatprep.subr.bf16.mxu1 %v1131_v26 }
  0x2f   : > { %1005 = vmatpush3.bf16.msra.mxu0 %v1132_v27 }
  0x30   : > { %1033 = vmatpush3.bf16.msra.mxu1 %v1133_v28  ;;  %1006 = vmatprep.subr.bf16.mxu0 %v1134_v29 }
  0x31   : > { %1034 = vmatprep.subr.bf16.mxu1 %v1135_v30 }
  0x33   : > { %1007 = vmatpush3.bf16.msra.mxu0 %v1136_v31 }
  0x34   : > { %1035 = vmatpush3.bf16.msra.mxu1 %v1137_v32  ;;  %1008 = vmatprep.subr.bf16.mxu0 %v1138_v33 }
  0x35   : > { %1036 = vmatprep.subr.bf16.mxu1 %v1139_v34 }
  0x37   : > { %1009 = vmatpush3.bf16.msra.mxu0 %v1140_v36 }
  0x38   : > { %1037 = vmatpush3.bf16.msra.mxu1 %v1141_v38 }
  0x3a   : > { %690 = vmatmul.mubr.bf16.vlgmr.msra.gmra.mxu0 %v1142_v35 }
  0x3b   : > { %739 = vmatmul.mubr.bf16.vlgmr.msra.gmra.mxu1 %v1145_v37  ;;  %697 = vmatprep.mubr.bf16.mxu0 %v1148_v39 }
  0x3c   : > { %746 = vmatprep.mubr.bf16.mxu1 %v1150_v42 }
  0x42   : > { %698 = vmatmul.mubr.bf16.gmra.mxu0 %v1152_v43 }
  0x43   : > { %747 = vmatmul.mubr.bf16.gmra.mxu1 %v1153_v44 }
  0x92   : > { %v408_v46 = vpop.permute.xlu0 %407  ;;  %v418_v1 = vpop.permute.xlu1 %417 }
  0x96   : > { %v413_v56 = vpop.permute.xlu0 %412 }
  0x98   : > { %v423_v17 = vpop.permute.xlu1 %422 }
  0xfa   : > { %v1010_v45 = vpop.f32.mrf.mxu0 }
  0xfb   : > { %v1038_v47 = vpop.f32.mrf.mxu1 }
  0xfc   : > { %v1011_v48 = vpop.f32.mrf.mxu0 }
  0xfd   : > { %v1012_v49 = vadd.f32 %v1011_v48, %v1010_v45  ;;  %v1039_v50 = vpop.f32.mrf.mxu1 }
  0xfe   : > { %v1013_v51 = vpop.f32.mrf.mxu0  ;;  %v1040_v52 = vadd.f32 %v1039_v50, %v1038_v47 }
  0xff   : > { %v692_v53 = vadd.f32 %v1012_v49, %v408_v46  ;;  %v1041_v54 = vpop.f32.mrf.mxu1 }
 0x100   : > { %v1014_v55 = vpop.f32.mrf.mxu0 }
 0x101   : > { %v741_v57 = vadd.f32 %v1040_v52, %v692_v53  ;;  %v1015_v58 = vadd.f32 %v1014_v55, %v1013_v51  ;;  %v1042_v59 = vpop.f32.mrf.mxu1 }
 0x102   : > { %v1016_v60 = vpop.f32.mrf.mxu0  ;;  %v1043_v61 = vadd.f32 %v1042_v59, %v1041_v54 }
 0x103   : > { %v695_v62 = vadd.f32 %v1015_v58, %v413_v56  ;;  %v1044_v63 = vpop.f32.mrf.mxu1  ;;  %v755_v0 = vmax.f32 %v741_v57, 0.0 }
 0x104   : > { %v1017_v2 = vpop.f32.mrf.mxu0 }
 0x105   : > { %v744_v3 = vadd.f32 %v1043_v61, %v695_v62  ;;  %v1018_v4 = vadd.f32 %v1017_v2, %v1016_v60  ;;  %v1045_v5 = vpop.f32.mrf.mxu1  ;;  %v764_v6 = vsel %vm759_vm0, %v755_v0, 0.0  ;;  %760 = vst.msk [vmem:[%s1408_s9] sm:$0xff] %vm759_vm0, %v755_v0 }
 0x106   : > { %v1019_v7 = vpop.f32.mrf.mxu0  ;;  %765 = vadd.xlane.f32.xlu0 %v764_v6  ;;  %v1046_v9 = vadd.f32 %v1045_v5, %v1044_v63 }
 0x107   : > { %v700_v8 = vadd.f32 %v1018_v4, %v418_v1  ;;  %v1047_v10 = vpop.f32.mrf.mxu1  ;;  %v756_v11 = vmax.f32 %v744_v3, 0.0 }
 0x108   : > { %v1020_v12 = vpop.f32.mrf.mxu0 }
 0x109   : > { %v749_v13 = vadd.f32 %v1046_v9, %v700_v8  ;;  %v1021_v14 = vadd.f32 %v1020_v12, %v1019_v7  ;;  %v1048_v15 = vpop.f32.mrf.mxu1  ;;  %v767_v16 = vsel %vm759_vm0, %v756_v11, 0.0  ;;  %761 = vst.msk [vmem:[%s1408_s9 + $0x8] sm:$0xff] %vm759_vm0, %v756_v11 }
 0x10a   : > { %768 = vadd.xlane.f32.xlu1 %v767_v16  ;;  %v1049_v19 = vadd.f32 %v1048_v15, %v1047_v10 }
 0x10b   : > { %v703_v18 = vadd.f32 %v1021_v14, %v423_v17  ;;  %v757_v20 = vmax.f32 %v749_v13, 0.0 }
 0x10d   : > { %v752_v21 = vadd.f32 %v1049_v19, %v703_v18  ;;  %v770_v22 = vsel %vm759_vm0, %v757_v20, 0.0  ;;  %762 = vst.msk [vmem:[%s1408_s9 + $0x10] sm:$0xff] %vm759_vm0, %v757_v20 }
 0x10e   : > { %771 = vadd.xlane.f32.xlu0 %v770_v22 }
 0x10f   : > { %v758_v23 = vmax.f32 %v752_v21, 0.0 }
 0x111   : > { %v773_v24 = vsel %vm759_vm0, %v758_v23, 0.0  ;;  %763 = vst.msk [vmem:[%s1408_s9 + $0x18] sm:$0xff] %vm759_vm0, %v758_v23 }
 0x112   : > { %774 = vadd.xlane.f32.xlu0 %v773_v24 }
 0x113   : > { %1167 = shalt.err (!%p1164_p5)
}
 0x114   : > { %s1168_s20 = scalar_lea.hbm %s1426_s15, 512  ;;  %s1172_s28 = scalar_lea.hbm %s1486_s5, 2048 }
 0x115   : > { %p1169_p6 = scmp.ne.s32.totalorder %s1426_s15, %s1168_s20  ;;  %p1173_p10 = scmp.lt.s32.totalorder %s1426_s15, %s1486_s5 }
 0x116   : > { %p1174_p11 = scmp.lt.s32.totalorder %s1172_s28, %s1168_s20 }
 0x117   : > { %p1170_p7 = pnand %p1169_p6, %p1311_p4 }
 0x118   : > { %p1175_p12 = por %p1174_p11, %p1173_p10 }
 0x119   : > { %p1171_p9 = pneg %p1170_p7 }
 0x11b   : > { %p1176_p13 = pnand %p1175_p12, %p1171_p9 }
 0x11d   : > { %1179 = shalt.err (!%p1176_p13)
}
 0x11e   : > { %s1234_s12 = smov 128   ;;  %s1235_s13 = smov 8   ;;  %vm781_vm1 = vcmask 7168  }
 0x11f   : > { %1050 = dma.vmem_to_hbm [thread:$0]  (%p1311_p4), %s1428_s10, 512, %s1426_s15, %s1432_s16, %s1234_s12, %s1234_s12, %s1235_s13  }
 0x120   : > { %s992_s14 = sshll.u32 %s1331_s11, 5 }
 0x121   : > { %s327_s2 = scalar_lea.vmem %s1487_s6, %s992_s14 }
 0x18f   : > { %v766_v25 = vpop.xlane.xlu0 %765 }
 0x190   : > { %v777_v26 = vmul.f32 0.25, %v766_v25 }
 0x192   : > { %782 = vst.msk [vmem:[%s327_s2] sm:$0xff] %vm781_vm1, %v777_v26 }
 0x193   : > { %v769_v27 = vpop.xlane.xlu1 %768 }
 0x194   : > { %v778_v28 = vmul.f32 0.25, %v769_v27 }
 0x196   : > { %783 = vst.msk [vmem:[%s327_s2 + $0x8] sm:$0xff] %vm781_vm1, %v778_v28 }
 0x197   : > { %v772_v29 = vpop.xlane.xlu0 %771 }
 0x198   : > { %v779_v30 = vmul.f32 0.25, %v772_v29 }
 0x19a   : > { %784 = vst.msk [vmem:[%s327_s2 + $0x10] sm:$0xff] %vm781_vm1, %v779_v30 }
 0x19b   : > { %v775_v31 = vpop.xlane.xlu0 %774 }
 0x19c   : > { %v780_v32 = vmul.f32 0.25, %v775_v31 }
 0x19e   : > { %785 = vst.msk [vmem:[%s327_s2 + $0x18] sm:$0xff] %vm781_vm1, %v780_v32 }
 0x19f PF: > { %p1056_p4 = scmp.ge.s32.totalorder %s1230_s24, 2  ;;  %s824_s29 = sand.u32 1, %s1210_s21  }
 0x1a0   : > { %s825_s11 = scalar_lea.sflag [#allocation3], %s824_s29 }
 0x1a1   : > { %p1053_p0 = pnand %p1056_p4, %p1318_p8 }
 0x1a3   : > { %p1054_p1 = pneg %p1053_p0 }
 0x1a5   : > { %1205 = dma.done.wait (%p1054_p1), %s825_s11, 512  }
 0x1a6   : > { %1207 = vsyncadd (%p1054_p1), %s825_s11, 4294966784  ;;  %s20_s24 = sadd.s32 1, %s1230_s24   ;;  %s1490_s21 = smov %s1214_s22 }
 0x1a7   : > { %p17_p2 = scmp.ge.s32.totalorder %s20_s24, 6   ;;  %s1491_s22 = smov %s1218_s23 }
 0x1a8   : > { %s1492_s23 = smov %s1324_s8  ;;  %s1493_s2 = smov %s1226_s3 }
 0x1a9   : > { %s1494_s3 = smov %s1496_s27  ;;  %19 = sbr.rel (!%p17_p2) target bundleno = 4 (0x4), region = 93 }
 0x1ae   :  { %838 = vsyncpa [#allocation3], 1 }
 0x1af   :  { %840 = vsyncpa [#allocation3 + $0x1], 1 }

// kernel: _lambda_.34
= control target key start
LH: loop header
LB: loop body
LE: loop exit
PB: predicated region body
PF: predicated region fallthrough
CT: control target
= control target key end

     0   :  { %vm35_vm0 = vcmask 64512   ;;  %v316_v0 = vmov 0.0   ;;  %vm317_vm1 = vmmov 0   ;;  %vm119_vm2 = vcmask 130048   ;;  %s388_s1 = inlined_call_operand.vmem [shape: f32[8,16], index: 1, kind: input, shape index: {}]   ;;  %s389_s0 = inlined_call_operand.vmem [shape: f32[4,8], index: 0, kind: input, shape index: {}]   ;;  %s390_s3 = inlined_call_operand.vmem [shape: f32[16,16], index: 3, kind: input, shape index: {}]   ;;  %s391_s2 = inlined_call_operand.vmem [shape: f32[1,16], index: 2, kind: input, shape index: {}]   ;;  %s392_s5 = inlined_call_operand.vmem [shape: f32[16,128], index: 5, kind: input, shape index: {}]   ;;  %s393_s4 = inlined_call_operand.vmem [shape: f32[1,16], index: 4, kind: input, shape index: {}]   ;;  %s394_s6 = inlined_call_operand.vmem [shape: f32[1,128], index: 6, kind: input, shape index: {}]   ;;  %s395_s7 = inlined_call_operand.vmem [shape: f32[4,128], index: 7, kind: output, shape index: {}]  }
   0x1   :  { %295 = vmatprep.subr.mxu0 %v316_v0  ;;  %v27_v1 = vld [vmem:[%s388_s1] sm:$0xff]  ;;  %297 = vmatprep.mubr.msk.f32.mxu0 %vm317_vm1, %v316_v0  ;;  %v111_v3 = vld [vmem:[%s390_s3 + $0x8] sm:$0xff] }
   0x2   :  { %v26_v2 = vld [vmem:[%s389_s0] sm:$0xf]  ;;  %296 = vmatpush3.msra.mxu0 %v27_v1  ;;  %300 = vmatprep.subr.mxu1 %v316_v0  ;;  %v195_v10 = vld [vmem:[%s392_s5 + $0x8] sm:$0xff] }
   0x3   :  { %298 = vmatmul.mubr.msk.f32.vlgmr.msra.gmra.mxu0 %vm35_vm0, %v26_v2  ;;  %304 = vmatprep.mubr.msk.f32.mxu1 %vm317_vm1, %v316_v0  ;;  %v110_v4 = vld [vmem:[%s390_s3] sm:$0xff] }
   0x4   :  { %307 = vmatprep.subr.mxu0 %v316_v0  ;;  %311 = vmatprep.mubr.msk.f32.mxu0 %vm317_vm1, %v316_v0  ;;  %v281_v5 = vld [vmem:[%s391_s2] ss:$0 sm:$0xff] }
   0x5   :  { %301 = vmatpush3.msra.mxu1 %v111_v3  ;;  %308 = vmatpush3.msra.mxu0 %v195_v10  ;;  %v194_v11 = vld [vmem:[%s392_s5] sm:$0xff] }
   0x6   :  { %302 = vmatprep.subr.mxu1 %v316_v0  ;;  %309 = vmatprep.subr.mxu0 %v316_v0  ;;  %v283_v12 = vld [vmem:[%s393_s4] ss:$0 sm:$0xff] }
   0x7   :  { %303 = vmatpush3.msra.mxu1 %v110_v4  ;;  %310 = vmatpush3.msra.mxu0 %v194_v11  ;;  %v285_v17 = vld [vmem:[%s394_s6] ss:$0 sm:$0xff] }
  0xc3   :  { %v105_v6 = vpop.f32.mrf.mxu0 }
  0xc4   :  { %v106_v7 = vadd.f32 %v281_v5, %v105_v6 }
  0xc5   :  { %v299_v8 = vpop.f32.mrf.mxu0 }
  0xc6   :  { %v109_v9 = vmax.f32 %v106_v7, 0.0 }
  0xc8   :  { %305 = vmatmul.mubr.msk.f32.vlgmr.msra.gmra.mxu1 %vm119_vm2, %v109_v9 }
 0x188   :  { %v189_v13 = vpop.f32.mrf.mxu1 }
 0x189   :  { %v190_v14 = vadd.f32 %v283_v12, %v189_v13 }
 0x18a   :  { %v306_v15 = vpop.f32.mrf.mxu1 }
 0x18b   :  { %v193_v16 = vmax.f32 %v190_v14, 0.0 }
 0x18d   :  { %312 = vmatmul.mubr.msk.f32.vlgmr.msra.gmra.mxu0 %vm119_vm2, %v193_v16 }
 0x24d   :  { %v272_v18 = vpop.f32.mrf.mxu0 }
 0x24e   :  { %v273_v19 = vadd.f32 %v285_v17, %v272_v18 }
 0x24f   :  { %v313_v20 = vpop.f32.mrf.mxu0 }
 0x250   :  { %276 = vst [vmem:[%s395_s7] sm:$0xf] %v273_v19 }

// kernel: _lambda_.33
= control target key start
LH: loop header
LB: loop body
LE: loop exit
PB: predicated region body
PF: predicated region fallthrough
CT: control target
= control target key end

     0   :  { %v126_v0 = vmov 0.0   ;;  %vm127_vm0 = vmmov 0   ;;  %vm26_vm1 = vcmask 261120   ;;  %vm100_vm2 = vcmask 60416   ;;  %s169_s1 = inlined_call_operand.vmem [shape: f32[32,8], index: 1, kind: input, shape index: {}]   ;;  %s170_s0 = inlined_call_operand.vmem [shape: f32[4,32], index: 0, kind: input, shape index: {}]   ;;  %s171_s2 = inlined_call_operand.vmem [shape: f32[1,8], index: 2, kind: input, shape index: {}]   ;;  %s172_s3 = inlined_call_operand.vmem [shape: f32[4,8], index: 3, kind: output, shape index: {}]  }
   0x1   :  { %113 = vmatprep.subr.mxu0 %v126_v0  ;;  %v18_v1 = vld [vmem:[%s169_s1 + $0x18] sm:$0xff]  ;;  %v17_v2 = vld [vmem:[%s169_s1 + $0x10] sm:$0xff]  ;;  %121 = vmatprep.mubr.msk.f32.mxu0 %vm127_vm0, %v126_v0  ;;  %v16_v3 = vld [vmem:[%s169_s1 + $0x8] sm:$0xff] }
   0x2   :  { %114 = vmatpush3.msra.mxu0 %v18_v1  ;;  %v15_v4 = vld [vmem:[%s169_s1] sm:$0xff] }
   0x3   :  { %115 = vmatprep.subr.mxu0 %v126_v0  ;;  %v14_v5 = vld [vmem:[%s170_s0] sm:$0xf] }
   0x4   :  { %116 = vmatpush3.msra.mxu0 %v17_v2  ;;  %v106_v6 = vld [vmem:[%s171_s2] ss:$0 sm:$0xff] }
   0x5   :  { %117 = vmatprep.subr.mxu0 %v126_v0 }
   0x6   :  { %118 = vmatpush3.msra.mxu0 %v16_v3 }
   0x7   :  { %119 = vmatprep.subr.mxu0 %v126_v0 }
   0x8   :  { %120 = vmatpush3.msra.mxu0 %v15_v4 }
   0x9   :  { %122 = vmatmul.mubr.msk.f32.vlgmr.msra.gmra.mxu0 %vm26_vm1, %v14_v5 }
  0xc9   :  { %v96_v7 = vpop.f32.mrf.mxu0 }
  0xca   :  { %v97_v8 = vadd.f32 %v106_v6, %v96_v7 }
  0xcb   :  { %v123_v9 = vpop.f32.mrf.mxu0 }
  0xcc   :  { %101 = vst.msk [vmem:[%s172_s3] sm:$0xf] %vm100_vm2, %v97_v8 }

// kernel: _lambda_.35
= control target key start
LH: loop header
LB: loop body
LE: loop exit
PB: predicated region body
PF: predicated region fallthrough
CT: control target
= control target key end

     0   :  { %s1033_s18 = smov 0   ;;  %s1035_s19 = smov 0   ;;  %s1151_s0 = inlined_call_operand.vmem [shape: bf16[32,288], index: 0, kind: input, shape index: {}]   ;;  %s1152_s1 = inlined_call_operand.vmem [shape: f32[32,1], index: 1, kind: input, shape index: {}]   ;;  %s1153_s2 = inlined_call_operand.vmem [shape: f32[4,32,1], index: 2, kind: input, shape index: {}]   ;;  %s1154_s3 = inlined_call_operand.vmem [shape: f32[4,32,1], index: 3, kind: input, shape index: {}]   ;;  %s1155_s4 = inlined_call_operand.vmem [shape: bf16[4,288,16], index: 4, kind: input, shape index: {}]   ;;  %s1156_s5 = inlined_call_operand.vmem [shape: f32[4,32,16], index: 5, kind: output, shape index: {}]  }
   0x1   :  { %s1037_s20 = smov 0  }
   0x2 LB: > { %s27_s21 = sadd.s32 1, %s996_s19  ;;  %p837_p0 = scmp.ge.s32.totalorder %s1000_s20, 1  ;;  %s1000_s20 = sphi %s1037_s20, %s15_s20   ;;  %s996_s19 = sphi %s1035_s19, %s1158_s19   ;;  %s992_s18 = sphi %s1033_s18, %s1157_s18  }
   0x3   : > { %p29_p1 = scmp.ge.s32.totalorder %s27_s21, 4  ;;  %p226_p2 = scmp.lt.s32.totalorder %s1000_s20, 5 }
   0x5   : > { %s1160_s21 = smov (%p29_p1, %s27_s21), 0  ;;  %p227_p3 = pnand %p837_p0, %p226_p2 }
   0x6   : > { %p270_p4 = scmp.lt.s32.totalorder (!%p227_p3), %s992_s18, 3 }
   0x7   : > { %230 = sbr.rel (%p227_p3) target bundleno = 573 (0x23d), region = 40 }
   0xc   : > { %vm503_vm0 = vcmask 261120   ;;  %v964_v0 = vld [vmem:[%s1151_s0 + $0x4] ss:$12 sps:$4 sm:$0xff]   ;;  %s1162_s18 = smov (!%p270_p4, %s992_s18), 3  ;;  %v965_v1 = vld [vmem:[%s1151_s0 + $0x8] ss:$12 sps:$4 sm:$0xff]  }
   0xd   : > { %542 = vmatprep.mubr.bf16.mxu0 %v964_v0  ;;  %s916_s26 = smul.u32 144, %s1162_s18  ;;  %912 = vmatprep.mubr.msk.bf16.mxu1 %vm503_vm0, %v965_v1  ;;  %v1002_v2 = vmov 0   ;;  %v341_v3 = vld [vmem:[%s1152_s1] sm:$0xff]  ;;  %v343_v4 = vld [vmem:[%s1152_s1 + $0x10] sm:$0xff]  ;;  %v342_v5 = vld [vmem:[%s1152_s1 + $0x8] sm:$0xff]  ;;  %vm608_vm1 = vcmask 130048  }
   0xe   : > { %942 = vset.pattern.permute.xlu0 %v1002_v2  ;;  %943 = vset.pattern.permute.xlu1 %v1002_v2  ;;  %v344_v6 = vld [vmem:[%s1152_s1 + $0x18] sm:$0xff]  ;;  %v966_v22 = vld [vmem:[%s1151_s0 + $0x20] ss:$12 sps:$4 sm:$0xff]   ;;  %s1114_s25 = sshll.u32 %s1162_s18, 5 }
   0xf   : > { %347 = vperm.xlu0 %942, %v341_v3   ;;  %s1070_s8 = scalar_lea.vmem %s1155_s4, %s916_s26  ;;  %357 = vperm.xlu1 %943, %v343_v4   ;;  %v962_v26 = vld [vmem:[%s1151_s0] ss:$12 sps:$4 sm:$0xff]   ;;  %v967_v27 = vld [vmem:[%s1151_s0 + $0x1c] ss:$12 sps:$4 sm:$0xff]   ;;  %v969_v28 = vld [vmem:[%s1151_s0 + $0x18] ss:$12 sps:$4 sm:$0xff]   ;;  %s274_s28 = scalar_lea.vmem %s1153_s2, %s1114_s25 }
  0x10   : > { %v944_v7 = vld [vmem:[%s1070_s8 + $0x78] sm:$0xff]   ;;  %v946_v9 = vld [vmem:[%s1070_s8 + $0x70] sm:$0xff]   ;;  %v948_v11 = vld [vmem:[%s1070_s8 + $0x68] sm:$0xff]   ;;  %s1124_s6 = scalar_lea.vmem %s1154_s3, %s1114_s25 }
  0x11   : > { %v945_v8 = vld [vmem:[%s1070_s8 + $0x38] sm:$0xff]   ;;  %876 = vmatprep.subr.bf16.mxu0 %v944_v7  ;;  %v947_v10 = vld [vmem:[%s1070_s8 + $0x30] sm:$0xff]   ;;  %v949_v12 = vld [vmem:[%s1070_s8 + $0x28] sm:$0xff]  }
  0x12   : > { %877 = vmatpush3.bf16.msra.mxu0 %v945_v8  ;;  %v950_v13 = vld [vmem:[%s1070_s8 + $0x60] sm:$0xff]   ;;  %v952_v15 = vld [vmem:[%s1070_s8 + $0x58] sm:$0xff]   ;;  %v958_v16 = vld [vmem:[%s1070_s8 + $0x88] sm:$0xff]  }
  0x13   : > { %352 = vperm.xlu0 %942, %v342_v5   ;;  %362 = vperm.xlu1 %943, %v344_v6   ;;  %v951_v14 = vld [vmem:[%s1070_s8 + $0x20] sm:$0xff]   ;;  %v953_v17 = vld [vmem:[%s1070_s8 + $0x18] sm:$0xff]   ;;  %v954_v18 = vld [vmem:[%s1070_s8 + $0x50] sm:$0xff]  }
  0x14   : > { %878 = vmatprep.subr.bf16.mxu0 %v946_v9  ;;  %908 = vmatprep.subr.bf16.mxu1 %v958_v16  ;;  %v961_v19 = vld [vmem:[%s1070_s8 + $0x80] sm:$0xff]   ;;  %v955_v20 = vld [vmem:[%s1070_s8 + $0x10] sm:$0xff]   ;;  %v956_v21 = vld [vmem:[%s1070_s8 + $0x48] sm:$0xff]  }
  0x15   : > { %909 = vmatpush3.bf16.msra.mxu1 %v958_v16  ;;  %v957_v23 = vld [vmem:[%s1070_s8 + $0x8] sm:$0xff]   ;;  %v959_v24 = vld [vmem:[%s1070_s8 + $0x40] sm:$0xff]   ;;  %v664_v62 = vld [vmem:[%s274_s28 + $0x10] sm:$0xff] }
  0x16   : > { %879 = vmatpush3.bf16.msra.mxu0 %v947_v10  ;;  %910 = vmatprep.subr.bf16.mxu1 %v961_v19  ;;  %v960_v25 = vld [vmem:[%s1070_s8] sm:$0xff]   ;;  %v665_v63 = vld [vmem:[%s274_s28 + $0x18] sm:$0xff]  ;;  %v691_v0 = vld [vmem:[%s1124_s6 + $0x8] sm:$0xff]  ;;  %s295_s8 = scalar_lea.vmem %s1156_s5, %s1114_s25 }
  0x17   : > { %880 = vmatprep.subr.bf16.mxu0 %v948_v11  ;;  %v662_v61 = vld [vmem:[%s274_s28] sm:$0xff]  ;;  %v663_v1 = vld [vmem:[%s274_s28 + $0x8] sm:$0xff] }
  0x18   : > { %v690_v2 = vld [vmem:[%s1124_s6] sm:$0xff] }
  0x19   : > { %911 = vmatpush3.bf16.msra.mxu1 %v961_v19 }
  0x1a   : > { %881 = vmatpush3.bf16.msra.mxu0 %v949_v12 }
  0x1b   : > { %882 = vmatprep.subr.bf16.mxu0 %v950_v13 }
  0x1c   : > { %913 = vmatmul.mubr.msk.bf16.vlgmr.msra.gmra.mxu1 %vm503_vm0, %v966_v22 }
  0x1e   : > { %883 = vmatpush3.bf16.msra.mxu0 %v951_v14 }
  0x1f   : > { %884 = vmatprep.subr.bf16.mxu0 %v952_v15 }
  0x22   : > { %885 = vmatpush3.bf16.msra.mxu0 %v953_v17 }
  0x23   : > { %886 = vmatprep.subr.bf16.mxu0 %v954_v18 }
  0x26   : > { %887 = vmatpush3.bf16.msra.mxu0 %v955_v20 }
  0x27   : > { %888 = vmatprep.subr.bf16.mxu0 %v956_v21 }
  0x2a   : > { %889 = vmatpush3.bf16.msra.mxu0 %v957_v23  ;;  %v693_v23 = vld [vmem:[%s1124_s6 + $0x18] sm:$0xff] }
  0x2b   : > { %890 = vmatprep.subr.bf16.mxu0 %v959_v24  ;;  %v692_v24 = vld [vmem:[%s1124_s6 + $0x10] sm:$0xff] }
  0x2e   : > { %891 = vmatpush3.bf16.msra.mxu0 %v960_v25 }
  0x31   : > { %543 = vmatmul.mubr.bf16.vlgmr.msra.gmra.mxu0 %v962_v26 }
  0x32   : > { %550 = vmatprep.mubr.bf16.mxu0 %v967_v27 }
  0x39   : > { %551 = vmatmul.mubr.bf16.gmra.mxu0 %v969_v28 }
  0x8a   : > { %v348_v30 = vpop.permute.xlu0 %347  ;;  %v358_v43 = vpop.permute.xlu1 %357 }
  0x8e   : > { %v353_v37 = vpop.permute.xlu0 %352  ;;  %v363_v56 = vpop.permute.xlu1 %362 }
  0xdc   : > { %v914_v29 = vpop.f32.mrf.mxu1 }
  0xde   : > { %v593_v33 = vpop.f32.mrf.mxu1 }
  0xe0   : > { %v915_v39 = vpop.f32.mrf.mxu1 }
  0xe2   : > { %v596_v46 = vpop.f32.mrf.mxu1 }
  0xf1   : > { %v892_v31 = vpop.f32.mrf.mxu0 }
  0xf3   : > { %v893_v32 = vpop.f32.mrf.mxu0 }
  0xf4   : > { %v894_v34 = vadd.f32 %v893_v32, %v892_v31 }
  0xf5   : > { %v895_v35 = vpop.f32.mrf.mxu0 }
  0xf6   : > { %v545_v36 = vadd.f32 %v894_v34, %v348_v30 }
  0xf7   : > { %v896_v38 = vpop.f32.mrf.mxu0 }
  0xf8   : > { %v594_v40 = vadd.f32 %v593_v33, %v545_v36  ;;  %v897_v41 = vadd.f32 %v896_v38, %v895_v35 }
  0xf9   : > { %v898_v42 = vpop.f32.mrf.mxu0 }
  0xfa   : > { %v548_v44 = vadd.f32 %v897_v41, %v353_v37  ;;  %v609_v45 = vsel %vm608_vm1, %v594_v40, 0.0 }
  0xfb   : > { %v899_v47 = vpop.f32.mrf.mxu0  ;;  %610 = vadd.xlane.f32.xlu0 %v609_v45 }
  0xfc   : > { %v597_v48 = vadd.f32 %v596_v46, %v548_v44  ;;  %v900_v49 = vadd.f32 %v899_v47, %v898_v42 }
  0xfd   : > { %v901_v50 = vpop.f32.mrf.mxu0 }
  0xfe   : > { %v553_v51 = vadd.f32 %v900_v49, %v358_v43  ;;  %v612_v52 = vsel %vm608_vm1, %v597_v48, 0.0 }
  0xff   : > { %v902_v53 = vpop.f32.mrf.mxu0  ;;  %613 = vadd.xlane.f32.xlu1 %v612_v52 }
 0x100   : > { %v903_v54 = vadd.f32 %v902_v53, %v901_v50  ;;  %v602_v55 = vadd.f32 %v914_v29, %v553_v51 }
 0x102   : > { %v556_v57 = vadd.f32 %v903_v54, %v363_v56  ;;  %v615_v58 = vsel %vm608_vm1, %v602_v55, 0.0 }
 0x103   : > { %616 = vadd.xlane.f32.xlu0 %v615_v58 }
 0x104   : > { %v605_v59 = vadd.f32 %v915_v39, %v556_v57 }
 0x106   : > { %v618_v60 = vsel %vm608_vm1, %v605_v59, 0.0 }
 0x107   : > { %619 = vadd.xlane.f32.xlu0 %v618_v60 }
 0x110   : > { %668 = vperm.xlu1 %943, %v662_v61  }
 0x114   : > { %678 = vperm.xlu1 %943, %v664_v62  }
 0x118   : > { %683 = vperm.xlu1 %943, %v665_v63  }
 0x11c   : > { %701 = vperm.xlu1 %943, %v691_v0  }
 0x11d   : > { %673 = vperm.xlu0 %942, %v663_v1  }
 0x121   : > { %696 = vperm.xlu0 %942, %v690_v2  }
 0x184   : > { %v611_v3 = vpop.xlane.xlu0 %610 }
 0x185   : > { %v622_v4 = vmul.f32 0.0625, %v611_v3 }
 0x187   : > { %v626_v5 = vsub.f32 %v594_v40, %v622_v4 }
 0x188   : > { %v614_v6 = vpop.xlane.xlu1 %613 }
 0x189   : > { %v623_v7 = vmul.f32 0.0625, %v614_v6  ;;  %v630_v8 = vmul.f32 %v626_v5, %v626_v5 }
 0x18b   : > { %v627_v9 = vsub.f32 %v597_v48, %v623_v7  ;;  %v634_v10 = vsel %vm608_vm1, %v630_v8, 0.0 }
 0x18c   : > { %v617_v11 = vpop.xlane.xlu0 %616  ;;  %635 = vadd.xlane.f32.xlu1 %v634_v10  ;;  %v669_v25 = vpop.permute.xlu1 %668 }
 0x18d   : > { %v624_v12 = vmul.f32 0.0625, %v617_v11  ;;  %v631_v13 = vmul.f32 %v627_v9, %v627_v9 }
 0x18f   : > { %v628_v14 = vsub.f32 %v602_v55, %v624_v12  ;;  %v637_v15 = vsel %vm608_vm1, %v631_v13, 0.0 }
 0x190   : > { %v620_v16 = vpop.xlane.xlu0 %619  ;;  %638 = vadd.xlane.f32.xlu0 %v637_v15  ;;  %v679_v26 = vpop.permute.xlu1 %678 }
 0x191   : > { %v625_v17 = vmul.f32 0.0625, %v620_v16  ;;  %v632_v18 = vmul.f32 %v628_v14, %v628_v14 }
 0x193   : > { %v629_v19 = vsub.f32 %v605_v59, %v625_v17  ;;  %v640_v20 = vsel %vm608_vm1, %v632_v18, 0.0 }
 0x194   : > { %641 = vadd.xlane.f32.xlu1 %v640_v20  ;;  %v684_v27 = vpop.permute.xlu1 %683 }
 0x195   : > { %v633_v21 = vmul.f32 %v629_v19, %v629_v19 }
 0x197   : > { %v643_v22 = vsel %vm608_vm1, %v633_v21, 0.0 }
 0x198   : > { %644 = vadd.xlane.f32.xlu0 %v643_v22  ;;  %v674_v28 = vpop.permute.xlu0 %673  ;;  %v702_v29 = vpop.permute.xlu1 %701 }
 0x19c   : > { %v697_v30 = vpop.permute.xlu0 %696 }
 0x1a5   : > { %711 = vperm.xlu1 %943, %v693_v23  }
 0x1ae   : > { %706 = vperm.xlu0 %942, %v692_v24  }
 0x215   : > { %v636_v31 = vpop.xlane.xlu1 %635 }
 0x216   : > { %v646_v32 = vmul.f32 0.0625, %v636_v31 }
 0x218   : > { %v650_v33 = vadd.f32 1e-05, %v646_v32 }
 0x219   : > { %v639_v34 = vpop.xlane.xlu0 %638 }
 0x21a   : > { %970 = vrsqrt.f32 %v650_v33  ;;  %v647_v35 = vmul.f32 0.0625, %v639_v34 }
 0x21c   : > { %v651_v36 = vadd.f32 1e-05, %v647_v35 }
 0x21d   : > { %v642_v37 = vpop.xlane.xlu1 %641 }
 0x21e   : > { %972 = vrsqrt.f32 %v651_v36  ;;  %v648_v38 = vmul.f32 0.0625, %v642_v37 }
 0x220   : > { %v652_v39 = vadd.f32 1e-05, %v648_v38 }
 0x221   : > { %v645_v40 = vpop.xlane.xlu0 %644  ;;  %v712_v62 = vpop.permute.xlu1 %711 }
 0x222   : > { %974 = vrsqrt.f32 %v652_v39  ;;  %v649_v41 = vmul.f32 0.0625, %v645_v40 }
 0x224   : > { %v653_v42 = vadd.f32 1e-05, %v649_v41 }
 0x226   : > { %976 = vrsqrt.f32 %v653_v42 }
 0x227   : > { %v971_v43 = vpop.eup %970 }
 0x228   : > { %v658_v44 = vmul.f32 %v971_v43, %v626_v5 }
 0x229   : > { %v707_v57 = vpop.permute.xlu0 %706 }
 0x22a   : > { %v686_v45 = vmul.f32 %v669_v25, %v658_v44 }
 0x22b   : > { %v973_v46 = vpop.eup %972 }
 0x22c   : > { %v659_v47 = vmul.f32 %v973_v46, %v627_v9  ;;  %v714_v48 = vadd.f32 %v697_v30, %v686_v45 }
 0x22e   : > { %v687_v49 = vmul.f32 %v674_v28, %v659_v47  ;;  %v718_v50 = vmax.f32 %v714_v48, 0.0 }
 0x22f   : > { %v975_v51 = vpop.eup %974 }
 0x230   : > { %v715_v52 = vadd.f32 %v702_v29, %v687_v49  ;;  %722 = vst.msk [vmem:[%s295_s8] sm:$0xff] %vm608_vm1, %v718_v50  ;;  %v660_v53 = vmul.f32 %v975_v51, %v628_v14 }
 0x232   : > { %v719_v54 = vmax.f32 %v715_v52, 0.0  ;;  %v688_v55 = vmul.f32 %v679_v26, %v660_v53 }
 0x233   : > { %v977_v56 = vpop.eup %976 }
 0x234   : > { %v661_v58 = vmul.f32 %v977_v56, %v629_v19  ;;  %723 = vst.msk [vmem:[%s295_s8 + $0x8] sm:$0xff] %vm608_vm1, %v719_v54  ;;  %v716_v59 = vadd.f32 %v707_v57, %v688_v55 }
 0x236   : > { %v689_v60 = vmul.f32 %v684_v27, %v661_v58  ;;  %v720_v61 = vmax.f32 %v716_v59, 0.0 }
 0x238   : > { %v717_v63 = vadd.f32 %v712_v62, %v689_v60  ;;  %724 = vst.msk [vmem:[%s295_s8 + $0x10] sm:$0xff] %vm608_vm1, %v720_v61 }
 0x23a   : > { %v721_v0 = vmax.f32 %v717_v63, 0.0 }
 0x23c   : > { %725 = vst.msk [vmem:[%s295_s8 + $0x18] sm:$0xff] %vm608_vm1, %v721_v0 }
 0x23d PF: > { %s15_s20 = sadd.s32 1, %s1000_s20   ;;  %s1157_s18 = smov %s996_s19 }
 0x23e   : > { %p12_p5 = scmp.ge.s32.totalorder %s15_s20, 6   ;;  %s1158_s19 = smov %s1160_s21 }
 0x240   :  { %14 = sbr.rel (!%p12_p5) target bundleno = 2 (0x2), region = 76 }

// kernel: _lambda_.36
= control target key start
LH: loop header
LB: loop body
LE: loop exit
PB: predicated region body
PF: predicated region fallthrough
CT: control target
= control target key end

     0   :  { %s1029_s18 = smov 0   ;;  %s1031_s19 = smov 0   ;;  %s1147_s0 = inlined_call_operand.vmem [shape: bf16[32,288], index: 0, kind: input, shape index: {}]   ;;  %s1148_s1 = inlined_call_operand.vmem [shape: f32[32,1], index: 1, kind: input, shape index: {}]   ;;  %s1149_s2 = inlined_call_operand.vmem [shape: f32[4,32,1], index: 2, kind: input, shape index: {}]   ;;  %s1150_s3 = inlined_call_operand.vmem [shape: f32[4,32,1], index: 3, kind: input, shape index: {}]   ;;  %s1151_s4 = inlined_call_operand.vmem [shape: bf16[4,288,16], index: 4, kind: input, shape index: {}]   ;;  %s1152_s5 = inlined_call_operand.vmem [shape: f32[4,32,16], index: 5, kind: output, shape index: {}]  }
   0x1   :  { %s1033_s20 = smov 0  }
   0x2 LB: > { %s27_s21 = sadd.s32 1, %s992_s19  ;;  %p833_p0 = scmp.ge.s32.totalorder %s996_s20, 1  ;;  %s996_s20 = sphi %s1033_s20, %s15_s20   ;;  %s992_s19 = sphi %s1031_s19, %s1154_s19   ;;  %s988_s18 = sphi %s1029_s18, %s1153_s18  }
   0x3   : > { %p29_p1 = scmp.ge.s32.totalorder %s27_s21, 4  ;;  %p226_p2 = scmp.lt.s32.totalorder %s996_s20, 5 }
   0x5   : > { %s1156_s21 = smov (%p29_p1, %s27_s21), 0  ;;  %p227_p3 = pnand %p833_p0, %p226_p2 }
   0x6   : > { %p270_p4 = scmp.lt.s32.totalorder (!%p227_p3), %s988_s18, 3 }
   0x7   : > { %230 = sbr.rel (%p227_p3) target bundleno = 571 (0x23b), region = 40 }
   0xc   : > { %vm503_vm0 = vcmask 261120   ;;  %v960_v0 = vld [vmem:[%s1147_s0 + $0x4] ss:$12 sps:$4 sm:$0xff]   ;;  %s1158_s18 = smov (!%p270_p4, %s988_s18), 3  ;;  %v961_v1 = vld [vmem:[%s1147_s0 + $0x8] ss:$12 sps:$4 sm:$0xff]  }
   0xd   : > { %542 = vmatprep.mubr.bf16.mxu0 %v960_v0  ;;  %s912_s26 = smul.u32 144, %s1158_s18  ;;  %908 = vmatprep.mubr.msk.bf16.mxu1 %vm503_vm0, %v961_v1  ;;  %v998_v2 = vmov 0   ;;  %v341_v3 = vld [vmem:[%s1148_s1] sm:$0xff]  ;;  %v343_v4 = vld [vmem:[%s1148_s1 + $0x10] sm:$0xff]  ;;  %v342_v5 = vld [vmem:[%s1148_s1 + $0x8] sm:$0xff]  ;;  %vm608_vm1 = vcmask 130048  }
   0xe   : > { %938 = vset.pattern.permute.xlu0 %v998_v2  ;;  %939 = vset.pattern.permute.xlu1 %v998_v2  ;;  %v344_v6 = vld [vmem:[%s1148_s1 + $0x18] sm:$0xff]  ;;  %v962_v22 = vld [vmem:[%s1147_s0 + $0x20] ss:$12 sps:$4 sm:$0xff]   ;;  %s1110_s25 = sshll.u32 %s1158_s18, 5 }
   0xf   : > { %347 = vperm.xlu0 %938, %v341_v3   ;;  %s1066_s8 = scalar_lea.vmem %s1151_s4, %s912_s26  ;;  %357 = vperm.xlu1 %939, %v343_v4   ;;  %v958_v26 = vld [vmem:[%s1147_s0] ss:$12 sps:$4 sm:$0xff]   ;;  %v963_v27 = vld [vmem:[%s1147_s0 + $0x1c] ss:$12 sps:$4 sm:$0xff]   ;;  %v965_v28 = vld [vmem:[%s1147_s0 + $0x18] ss:$12 sps:$4 sm:$0xff]   ;;  %s274_s28 = scalar_lea.vmem %s1149_s2, %s1110_s25 }
  0x10   : > { %v940_v7 = vld [vmem:[%s1066_s8 + $0x78] sm:$0xff]   ;;  %v942_v9 = vld [vmem:[%s1066_s8 + $0x70] sm:$0xff]   ;;  %v944_v11 = vld [vmem:[%s1066_s8 + $0x68] sm:$0xff]   ;;  %s1120_s6 = scalar_lea.vmem %s1150_s3, %s1110_s25 }
  0x11   : > { %v941_v8 = vld [vmem:[%s1066_s8 + $0x38] sm:$0xff]   ;;  %872 = vmatprep.subr.bf16.mxu0 %v940_v7  ;;  %v943_v10 = vld [vmem:[%s1066_s8 + $0x30] sm:$0xff]   ;;  %v945_v12 = vld [vmem:[%s1066_s8 + $0x28] sm:$0xff]  }
  0x12   : > { %873 = vmatpush3.bf16.msra.mxu0 %v941_v8  ;;  %v946_v13 = vld [vmem:[%s1066_s8 + $0x60] sm:$0xff]   ;;  %v948_v15 = vld [vmem:[%s1066_s8 + $0x58] sm:$0xff]   ;;  %v954_v16 = vld [vmem:[%s1066_s8 + $0x88] sm:$0xff]  }
  0x13   : > { %352 = vperm.xlu0 %938, %v342_v5   ;;  %362 = vperm.xlu1 %939, %v344_v6   ;;  %v947_v14 = vld [vmem:[%s1066_s8 + $0x20] sm:$0xff]   ;;  %v949_v17 = vld [vmem:[%s1066_s8 + $0x18] sm:$0xff]   ;;  %v950_v18 = vld [vmem:[%s1066_s8 + $0x50] sm:$0xff]  }
  0x14   : > { %874 = vmatprep.subr.bf16.mxu0 %v942_v9  ;;  %904 = vmatprep.subr.bf16.mxu1 %v954_v16  ;;  %v957_v19 = vld [vmem:[%s1066_s8 + $0x80] sm:$0xff]   ;;  %v951_v20 = vld [vmem:[%s1066_s8 + $0x10] sm:$0xff]   ;;  %v952_v21 = vld [vmem:[%s1066_s8 + $0x48] sm:$0xff]  }
  0x15   : > { %905 = vmatpush3.bf16.msra.mxu1 %v954_v16  ;;  %v953_v23 = vld [vmem:[%s1066_s8 + $0x8] sm:$0xff]   ;;  %v955_v24 = vld [vmem:[%s1066_s8 + $0x40] sm:$0xff]   ;;  %v664_v62 = vld [vmem:[%s274_s28 + $0x10] sm:$0xff] }
  0x16   : > { %875 = vmatpush3.bf16.msra.mxu0 %v943_v10  ;;  %906 = vmatprep.subr.bf16.mxu1 %v957_v19  ;;  %v956_v25 = vld [vmem:[%s1066_s8] sm:$0xff]   ;;  %v665_v63 = vld [vmem:[%s274_s28 + $0x18] sm:$0xff]  ;;  %v691_v0 = vld [vmem:[%s1120_s6 + $0x8] sm:$0xff]  ;;  %s295_s8 = scalar_lea.vmem %s1152_s5, %s1110_s25 }
  0x17   : > { %876 = vmatprep.subr.bf16.mxu0 %v944_v11  ;;  %v662_v61 = vld [vmem:[%s274_s28] sm:$0xff]  ;;  %v663_v1 = vld [vmem:[%s274_s28 + $0x8] sm:$0xff] }
  0x18   : > { %v690_v2 = vld [vmem:[%s1120_s6] sm:$0xff] }
  0x19   : > { %907 = vmatpush3.bf16.msra.mxu1 %v957_v19 }
  0x1a   : > { %877 = vmatpush3.bf16.msra.mxu0 %v945_v12 }
  0x1b   : > { %878 = vmatprep.subr.bf16.mxu0 %v946_v13 }
  0x1c   : > { %909 = vmatmul.mubr.msk.bf16.vlgmr.msra.gmra.mxu1 %vm503_vm0, %v962_v22 }
  0x1e   : > { %879 = vmatpush3.bf16.msra.mxu0 %v947_v14 }
  0x1f   : > { %880 = vmatprep.subr.bf16.mxu0 %v948_v15 }
  0x22   : > { %881 = vmatpush3.bf16.msra.mxu0 %v949_v17 }
  0x23   : > { %882 = vmatprep.subr.bf16.mxu0 %v950_v18 }
  0x26   : > { %883 = vmatpush3.bf16.msra.mxu0 %v951_v20 }
  0x27   : > { %884 = vmatprep.subr.bf16.mxu0 %v952_v21 }
  0x2a   : > { %885 = vmatpush3.bf16.msra.mxu0 %v953_v23  ;;  %v693_v23 = vld [vmem:[%s1120_s6 + $0x18] sm:$0xff] }
  0x2b   : > { %886 = vmatprep.subr.bf16.mxu0 %v955_v24  ;;  %v692_v24 = vld [vmem:[%s1120_s6 + $0x10] sm:$0xff] }
  0x2e   : > { %887 = vmatpush3.bf16.msra.mxu0 %v956_v25 }
  0x31   : > { %543 = vmatmul.mubr.bf16.vlgmr.msra.gmra.mxu0 %v958_v26 }
  0x32   : > { %550 = vmatprep.mubr.bf16.mxu0 %v963_v27 }
  0x39   : > { %551 = vmatmul.mubr.bf16.gmra.mxu0 %v965_v28 }
  0x8a   : > { %v348_v30 = vpop.permute.xlu0 %347  ;;  %v358_v43 = vpop.permute.xlu1 %357 }
  0x8e   : > { %v353_v37 = vpop.permute.xlu0 %352  ;;  %v363_v56 = vpop.permute.xlu1 %362 }
  0xdc   : > { %v910_v29 = vpop.f32.mrf.mxu1 }
  0xde   : > { %v593_v33 = vpop.f32.mrf.mxu1 }
  0xe0   : > { %v911_v39 = vpop.f32.mrf.mxu1 }
  0xe2   : > { %v596_v46 = vpop.f32.mrf.mxu1 }
  0xf1   : > { %v888_v31 = vpop.f32.mrf.mxu0 }
  0xf3   : > { %v889_v32 = vpop.f32.mrf.mxu0 }
  0xf4   : > { %v890_v34 = vadd.f32 %v889_v32, %v888_v31 }
  0xf5   : > { %v891_v35 = vpop.f32.mrf.mxu0 }
  0xf6   : > { %v545_v36 = vadd.f32 %v890_v34, %v348_v30 }
  0xf7   : > { %v892_v38 = vpop.f32.mrf.mxu0 }
  0xf8   : > { %v594_v40 = vadd.f32 %v593_v33, %v545_v36  ;;  %v893_v41 = vadd.f32 %v892_v38, %v891_v35 }
  0xf9   : > { %v894_v42 = vpop.f32.mrf.mxu0 }
  0xfa   : > { %v548_v44 = vadd.f32 %v893_v41, %v353_v37  ;;  %v609_v45 = vsel %vm608_vm1, %v594_v40, 0.0 }
  0xfb   : > { %v895_v47 = vpop.f32.mrf.mxu0  ;;  %610 = vadd.xlane.f32.xlu0 %v609_v45 }
  0xfc   : > { %v597_v48 = vadd.f32 %v596_v46, %v548_v44  ;;  %v896_v49 = vadd.f32 %v895_v47, %v894_v42 }
  0xfd   : > { %v897_v50 = vpop.f32.mrf.mxu0 }
  0xfe   : > { %v553_v51 = vadd.f32 %v896_v49, %v358_v43  ;;  %v612_v52 = vsel %vm608_vm1, %v597_v48, 0.0 }
  0xff   : > { %v898_v53 = vpop.f32.mrf.mxu0  ;;  %613 = vadd.xlane.f32.xlu1 %v612_v52 }
 0x100   : > { %v899_v54 = vadd.f32 %v898_v53, %v897_v50  ;;  %v602_v55 = vadd.f32 %v910_v29, %v553_v51 }
 0x102   : > { %v556_v57 = vadd.f32 %v899_v54, %v363_v56  ;;  %v615_v58 = vsel %vm608_vm1, %v602_v55, 0.0 }
 0x103   : > { %616 = vadd.xlane.f32.xlu0 %v615_v58 }
 0x104   : > { %v605_v59 = vadd.f32 %v911_v39, %v556_v57 }
 0x106   : > { %v618_v60 = vsel %vm608_vm1, %v605_v59, 0.0 }
 0x107   : > { %619 = vadd.xlane.f32.xlu0 %v618_v60 }
 0x110   : > { %668 = vperm.xlu1 %939, %v662_v61  }
 0x114   : > { %678 = vperm.xlu1 %939, %v664_v62  }
 0x118   : > { %683 = vperm.xlu1 %939, %v665_v63  }
 0x11c   : > { %701 = vperm.xlu1 %939, %v691_v0  }
 0x11d   : > { %673 = vperm.xlu0 %938, %v663_v1  }
 0x121   : > { %696 = vperm.xlu0 %938, %v690_v2  }
 0x184   : > { %v611_v3 = vpop.xlane.xlu0 %610 }
 0x185   : > { %v622_v4 = vmul.f32 0.0625, %v611_v3 }
 0x187   : > { %v626_v5 = vsub.f32 %v594_v40, %v622_v4 }
 0x188   : > { %v614_v6 = vpop.xlane.xlu1 %613 }
 0x189   : > { %v623_v7 = vmul.f32 0.0625, %v614_v6  ;;  %v630_v8 = vmul.f32 %v626_v5, %v626_v5 }
 0x18b   : > { %v627_v9 = vsub.f32 %v597_v48, %v623_v7  ;;  %v634_v10 = vsel %vm608_vm1, %v630_v8, 0.0 }
 0x18c   : > { %v617_v11 = vpop.xlane.xlu0 %616  ;;  %635 = vadd.xlane.f32.xlu1 %v634_v10  ;;  %v669_v25 = vpop.permute.xlu1 %668 }
 0x18d   : > { %v624_v12 = vmul.f32 0.0625, %v617_v11  ;;  %v631_v13 = vmul.f32 %v627_v9, %v627_v9 }
 0x18f   : > { %v628_v14 = vsub.f32 %v602_v55, %v624_v12  ;;  %v637_v15 = vsel %vm608_vm1, %v631_v13, 0.0 }
 0x190   : > { %v620_v16 = vpop.xlane.xlu0 %619  ;;  %638 = vadd.xlane.f32.xlu0 %v637_v15  ;;  %v679_v26 = vpop.permute.xlu1 %678 }
 0x191   : > { %v625_v17 = vmul.f32 0.0625, %v620_v16  ;;  %v632_v18 = vmul.f32 %v628_v14, %v628_v14 }
 0x193   : > { %v629_v19 = vsub.f32 %v605_v59, %v625_v17  ;;  %v640_v20 = vsel %vm608_vm1, %v632_v18, 0.0 }
 0x194   : > { %641 = vadd.xlane.f32.xlu1 %v640_v20  ;;  %v684_v27 = vpop.permute.xlu1 %683 }
 0x195   : > { %v633_v21 = vmul.f32 %v629_v19, %v629_v19 }
 0x197   : > { %v643_v22 = vsel %vm608_vm1, %v633_v21, 0.0 }
 0x198   : > { %644 = vadd.xlane.f32.xlu0 %v643_v22  ;;  %v674_v28 = vpop.permute.xlu0 %673  ;;  %v702_v29 = vpop.permute.xlu1 %701 }
 0x19c   : > { %v697_v30 = vpop.permute.xlu0 %696 }
 0x1a5   : > { %711 = vperm.xlu1 %939, %v693_v23  }
 0x1ae   : > { %706 = vperm.xlu0 %938, %v692_v24  }
 0x215   : > { %v636_v31 = vpop.xlane.xlu1 %635 }
 0x216   : > { %v646_v32 = vmul.f32 0.0625, %v636_v31 }
 0x218   : > { %v650_v33 = vadd.f32 1e-05, %v646_v32 }
 0x219   : > { %v639_v34 = vpop.xlane.xlu0 %638 }
 0x21a   : > { %966 = vrsqrt.f32 %v650_v33  ;;  %v647_v35 = vmul.f32 0.0625, %v639_v34 }
 0x21c   : > { %v651_v36 = vadd.f32 1e-05, %v647_v35 }
 0x21d   : > { %v642_v37 = vpop.xlane.xlu1 %641 }
 0x21e   : > { %968 = vrsqrt.f32 %v651_v36  ;;  %v648_v38 = vmul.f32 0.0625, %v642_v37 }
 0x220   : > { %v652_v39 = vadd.f32 1e-05, %v648_v38 }
 0x221   : > { %v645_v40 = vpop.xlane.xlu0 %644  ;;  %v712_v59 = vpop.permute.xlu1 %711 }
 0x222   : > { %970 = vrsqrt.f32 %v652_v39  ;;  %v649_v41 = vmul.f32 0.0625, %v645_v40 }
 0x224   : > { %v653_v42 = vadd.f32 1e-05, %v649_v41 }
 0x226   : > { %972 = vrsqrt.f32 %v653_v42 }
 0x227   : > { %v967_v43 = vpop.eup %966 }
 0x228   : > { %v658_v44 = vmul.f32 %v967_v43, %v626_v5 }
 0x229   : > { %v707_v55 = vpop.permute.xlu0 %706 }
 0x22a   : > { %v686_v45 = vmul.f32 %v669_v25, %v658_v44 }
 0x22b   : > { %v969_v46 = vpop.eup %968 }
 0x22c   : > { %v659_v47 = vmul.f32 %v969_v46, %v627_v9  ;;  %v714_v48 = vadd.f32 %v697_v30, %v686_v45 }
 0x22e   : > { %v687_v49 = vmul.f32 %v674_v28, %v659_v47  ;;  %718 = vst.msk [vmem:[%s295_s8] sm:$0xff] %vm608_vm1, %v714_v48 }
 0x22f   : > { %v971_v50 = vpop.eup %970 }
 0x230   : > { %v715_v51 = vadd.f32 %v702_v29, %v687_v49  ;;  %v660_v52 = vmul.f32 %v971_v50, %v628_v14 }
 0x232   : > { %719 = vst.msk [vmem:[%s295_s8 + $0x8] sm:$0xff] %vm608_vm1, %v715_v51  ;;  %v688_v53 = vmul.f32 %v679_v26, %v660_v52 }
 0x233   : > { %v973_v54 = vpop.eup %972 }
 0x234   : > { %v661_v56 = vmul.f32 %v973_v54, %v629_v19  ;;  %v716_v57 = vadd.f32 %v707_v55, %v688_v53 }
 0x236   : > { %v689_v58 = vmul.f32 %v684_v27, %v661_v56  ;;  %720 = vst.msk [vmem:[%s295_s8 + $0x10] sm:$0xff] %vm608_vm1, %v716_v57 }
 0x238   : > { %v717_v60 = vadd.f32 %v712_v59, %v689_v58 }
 0x23a   : > { %721 = vst.msk [vmem:[%s295_s8 + $0x18] sm:$0xff] %vm608_vm1, %v717_v60 }
 0x23b PF: > { %s15_s20 = sadd.s32 1, %s996_s20   ;;  %s1153_s18 = smov %s992_s19 }
 0x23c   : > { %p12_p5 = scmp.ge.s32.totalorder %s15_s20, 6   ;;  %s1154_s19 = smov %s1156_s21 }
 0x23e   :  { %14 = sbr.rel (!%p12_p5) target bundleno = 2 (0x2), region = 76 }

// kernel: _lambda_.37
= control target key start
LH: loop header
LB: loop body
LE: loop exit
PB: predicated region body
PF: predicated region fallthrough
CT: control target
= control target key end

     0   :  { %s1390_s18 = smov 0   ;;  %s1392_s19 = smov 0   ;;  %s1523_s0 = inlined_call_operand.vmem [shape: bf16[16,800], index: 0, kind: input, shape index: {}]   ;;  %s1524_s1 = inlined_call_operand.vmem [shape: f32[16,1], index: 1, kind: input, shape index: {}]   ;;  %s1525_s2 = inlined_call_operand.vmem [shape: f32[4,16,1], index: 2, kind: input, shape index: {}]   ;;  %s1526_s3 = inlined_call_operand.vmem [shape: f32[4,16,1], index: 3, kind: input, shape index: {}]   ;;  %s1527_s4 = inlined_call_operand.vmem [shape: bf16[4,800,64], index: 4, kind: input, shape index: {}]   ;;  %s1528_s5 = inlined_call_operand.vmem [shape: f32[4,16,64], index: 5, kind: output, shape index: {}]  }
   0x1   :  { %s1394_s20 = smov 0  }
   0x2 LB: > { %s27_s21 = sadd.s32 1, %s1351_s19  ;;  %p1091_p0 = scmp.ge.s32.totalorder %s1355_s20, 1  ;;  %s1355_s20 = sphi %s1394_s20, %s15_s20   ;;  %s1351_s19 = sphi %s1392_s19, %s1530_s19   ;;  %s1347_s18 = sphi %s1390_s18, %s1529_s18  }
   0x3   : > { %p29_p1 = scmp.ge.s32.totalorder %s27_s21, 4  ;;  %p226_p2 = scmp.lt.s32.totalorder %s1355_s20, 5 }
   0x5   : > { %s1532_s21 = smov (%p29_p1, %s27_s21), 0  ;;  %p227_p3 = pnand %p1091_p0, %p226_p2 }
   0x6   : > { %p270_p4 = scmp.lt.s32.totalorder (!%p227_p3), %s1347_s18, 3 }
   0x7   : > { %230 = sbr.rel (%p227_p3) target bundleno = 597 (0x255), region = 40 }
   0xc   : > { %v1302_v0 = vld [vmem:[%s1523_s0 + $0x4] ss:$28 sps:$4 sm:$0xff]   ;;  %s1534_s18 = smov (!%p270_p4, %s1347_s18), 3  ;;  %v1307_v1 = vld [vmem:[%s1523_s0 + $0xc] ss:$28 sps:$4 sm:$0xff]   ;;  %v1357_v2 = vmov 0  }
   0xd   : > { %788 = vmatprep.mubr.bf16.mxu0 %v1302_v0  ;;  %s1239_s26 = smul.u32 400, %s1534_s18  ;;  %829 = vmatprep.mubr.bf16.mxu1 %v1307_v1  ;;  %v405_v3 = vld [vmem:[%s1524_s1] sm:$0xff]  ;;  %v406_v4 = vld [vmem:[%s1524_s1 + $0x8] sm:$0xff]  ;;  %v1327_v39 = vld [vmem:[%s1523_s0 + $0x14] ss:$28 sps:$4 sm:$0xff]   ;;  %v1358_v44 = vmov 0.0  }
   0xe   : > { %1267 = vset.pattern.permute.xlu0 %v1357_v2  ;;  %1268 = vset.pattern.permute.xlu1 %v1357_v2  ;;  %v1300_v34 = vld [vmem:[%s1523_s0] ss:$28 sps:$4 sm:$0xff]   ;;  %v1305_v37 = vld [vmem:[%s1523_s0 + $0x8] ss:$28 sps:$4 sm:$0xff]   ;;  %vm1359_vm0 = vmmov 0   ;;  %vm752_vm1 = vcmask 261120  }
   0xf   : > { %409 = vperm.xlu0 %1267, %v405_v3   ;;  %s1423_s6 = scalar_lea.vmem %s1527_s4, %s1239_s26  ;;  %v1328_v55 = vld [vmem:[%s1523_s0 + $0x18] ss:$28 sps:$4 sm:$0xff]   ;;  %v1325_v60 = vld [vmem:[%s1523_s0 + $0x10] ss:$28 sps:$4 sm:$0xff]   ;;  %vm920_vm2 = vcmask 523264   ;;  %s1496_s23 = sshll.u32 %s1534_s18, 4 }
  0x10   : > { %v1269_v5 = vld [vmem:[%s1423_s6 + $0x78] sm:$0xff]   ;;  %v1273_v9 = vld [vmem:[%s1423_s6 + $0x70] sm:$0xff]   ;;  %v1277_v13 = vld [vmem:[%s1423_s6 + $0x68] sm:$0xff]   ;;  %s274_s26 = scalar_lea.vmem %s1525_s2, %s1496_s23  ;;  %s279_s29 = scalar_lea.vmem %s1526_s3, %s1496_s23 }
  0x11   : > { %v1270_v6 = vld [vmem:[%s1423_s6 + $0x38] sm:$0xff]   ;;  %1162 = vmatprep.subr.bf16.mxu0 %v1269_v5  ;;  %v1274_v10 = vld [vmem:[%s1423_s6 + $0x30] sm:$0xff]   ;;  %v1278_v14 = vld [vmem:[%s1423_s6 + $0x28] sm:$0xff]  }
  0x12   : > { %v1271_v7 = vld [vmem:[%s1423_s6 + $0xf8] sm:$0xff]   ;;  %1163 = vmatpush3.bf16.msra.mxu0 %v1270_v6  ;;  %v1275_v11 = vld [vmem:[%s1423_s6 + $0xf0] sm:$0xff]   ;;  %v1279_v15 = vld [vmem:[%s1423_s6 + $0xe8] sm:$0xff]  }
  0x13   : > { %414 = vperm.xlu0 %1267, %v406_v4   ;;  %v1272_v8 = vld [vmem:[%s1423_s6 + $0xb8] sm:$0xff]   ;;  %1184 = vmatprep.subr.bf16.mxu1 %v1271_v7  ;;  %v1276_v12 = vld [vmem:[%s1423_s6 + $0xb0] sm:$0xff]   ;;  %v1280_v16 = vld [vmem:[%s1423_s6 + $0xa8] sm:$0xff]  }
  0x14   : > { %1185 = vmatpush3.bf16.msra.mxu1 %v1272_v8  ;;  %1164 = vmatprep.subr.bf16.mxu0 %v1273_v9  ;;  %v1281_v17 = vld [vmem:[%s1423_s6 + $0x60] sm:$0xff]   ;;  %v1285_v21 = vld [vmem:[%s1423_s6 + $0x58] sm:$0xff]   ;;  %v1289_v25 = vld [vmem:[%s1423_s6 + $0x50] sm:$0xff]  }
  0x15   : > { %1186 = vmatprep.subr.bf16.mxu1 %v1275_v11  ;;  %v1282_v18 = vld [vmem:[%s1423_s6 + $0x20] sm:$0xff]   ;;  %v1286_v22 = vld [vmem:[%s1423_s6 + $0x18] sm:$0xff]   ;;  %v1290_v26 = vld [vmem:[%s1423_s6 + $0x10] sm:$0xff]  }
  0x16   : > { %1165 = vmatpush3.bf16.msra.mxu0 %v1274_v10  ;;  %v1283_v19 = vld [vmem:[%s1423_s6 + $0xe0] sm:$0xff]   ;;  %v1287_v23 = vld [vmem:[%s1423_s6 + $0xd8] sm:$0xff]   ;;  %v1291_v27 = vld [vmem:[%s1423_s6 + $0xd0] sm:$0xff]  }
  0x17   : > { %1166 = vmatprep.subr.bf16.mxu0 %v1277_v13  ;;  %v1284_v20 = vld [vmem:[%s1423_s6 + $0xa0] sm:$0xff]   ;;  %v1288_v24 = vld [vmem:[%s1423_s6 + $0x98] sm:$0xff]   ;;  %v1292_v28 = vld [vmem:[%s1423_s6 + $0x90] sm:$0xff]  }
  0x18   : > { %1187 = vmatpush3.bf16.msra.mxu1 %v1276_v12  ;;  %v1293_v29 = vld [vmem:[%s1423_s6 + $0x48] sm:$0xff]   ;;  %v1297_v33 = vld [vmem:[%s1423_s6 + $0x40] sm:$0xff]   ;;  %v1304_v40 = vld [vmem:[%s1423_s6 + $0x178] sm:$0xff]  }
  0x19   : > { %1188 = vmatprep.subr.bf16.mxu1 %v1279_v15  ;;  %v1294_v30 = vld [vmem:[%s1423_s6 + $0x8] sm:$0xff]   ;;  %v1298_v35 = vld [vmem:[%s1423_s6] sm:$0xff]   ;;  %v1308_v41 = vld [vmem:[%s1423_s6 + $0x138] sm:$0xff]  }
  0x1a   : > { %1167 = vmatpush3.bf16.msra.mxu0 %v1278_v14  ;;  %v1295_v31 = vld [vmem:[%s1423_s6 + $0xc8] sm:$0xff]   ;;  %v1299_v36 = vld [vmem:[%s1423_s6 + $0xc0] sm:$0xff]   ;;  %v1309_v42 = vld [vmem:[%s1423_s6 + $0x170] sm:$0xff]  }
  0x1b   : > { %1168 = vmatprep.subr.bf16.mxu0 %v1281_v17  ;;  %v1296_v32 = vld [vmem:[%s1423_s6 + $0x88] sm:$0xff]   ;;  %v1303_v38 = vld [vmem:[%s1423_s6 + $0x80] sm:$0xff]   ;;  %v1310_v43 = vld [vmem:[%s1423_s6 + $0x130] sm:$0xff]  }
  0x1c   : > { %1189 = vmatpush3.bf16.msra.mxu1 %v1280_v16  ;;  %v1311_v45 = vld [vmem:[%s1423_s6 + $0x168] sm:$0xff]   ;;  %v1313_v47 = vld [vmem:[%s1423_s6 + $0x160] sm:$0xff]   ;;  %v1315_v49 = vld [vmem:[%s1423_s6 + $0x158] sm:$0xff]  }
  0x1d   : > { %1190 = vmatprep.subr.bf16.mxu1 %v1283_v19  ;;  %v1312_v46 = vld [vmem:[%s1423_s6 + $0x128] sm:$0xff]   ;;  %v1314_v48 = vld [vmem:[%s1423_s6 + $0x120] sm:$0xff]   ;;  %v1316_v51 = vld [vmem:[%s1423_s6 + $0x118] sm:$0xff]  }
  0x1e   : > { %1169 = vmatpush3.bf16.msra.mxu0 %v1282_v18  ;;  %v1321_v50 = vld [vmem:[%s1423_s6 + $0x188] sm:$0xff]   ;;  %v1317_v52 = vld [vmem:[%s1423_s6 + $0x150] sm:$0xff]   ;;  %v1324_v53 = vld [vmem:[%s1423_s6 + $0x180] sm:$0xff]  }
  0x1f   : > { %1170 = vmatprep.subr.bf16.mxu0 %v1285_v21  ;;  %v1318_v54 = vld [vmem:[%s1423_s6 + $0x110] sm:$0xff]   ;;  %v1319_v56 = vld [vmem:[%s1423_s6 + $0x148] sm:$0xff]   ;;  %v1322_v58 = vld [vmem:[%s1423_s6 + $0x140] sm:$0xff]  }
  0x20   : > { %1191 = vmatpush3.bf16.msra.mxu1 %v1284_v20  ;;  %v1320_v57 = vld [vmem:[%s1423_s6 + $0x108] sm:$0xff]   ;;  %v1323_v59 = vld [vmem:[%s1423_s6 + $0x100] sm:$0xff]   ;;  %s295_s6 = scalar_lea.vmem %s1528_s5, %s1496_s23 }
  0x21   : > { %1192 = vmatprep.subr.bf16.mxu1 %v1287_v23 }
  0x22   : > { %1171 = vmatpush3.bf16.msra.mxu0 %v1286_v22 }
  0x23   : > { %1172 = vmatprep.subr.bf16.mxu0 %v1289_v25 }
  0x24   : > { %1193 = vmatpush3.bf16.msra.mxu1 %v1288_v24 }
  0x25   : > { %1194 = vmatprep.subr.bf16.mxu1 %v1291_v27 }
  0x26   : > { %1173 = vmatpush3.bf16.msra.mxu0 %v1290_v26 }
  0x27   : > { %1174 = vmatprep.subr.bf16.mxu0 %v1293_v29 }
  0x28   : > { %1195 = vmatpush3.bf16.msra.mxu1 %v1292_v28 }
  0x29   : > { %1196 = vmatprep.subr.bf16.mxu1 %v1295_v31  ;;  %v948_v31 = vld [vmem:[%s274_s26] sm:$0xff] }
  0x2a   : > { %1175 = vmatpush3.bf16.msra.mxu0 %v1294_v30 }
  0x2b   : > { %1176 = vmatprep.subr.bf16.mxu0 %v1297_v33  ;;  %v962_v33 = vld [vmem:[%s279_s29] sm:$0xff] }
  0x2c   : > { %1197 = vmatpush3.bf16.msra.mxu1 %v1296_v32  ;;  %v949_v32 = vld [vmem:[%s274_s26 + $0x8] sm:$0xff] }
  0x2d   : > { %1198 = vmatprep.subr.bf16.mxu1 %v1299_v36 }
  0x2e   : > { %1177 = vmatpush3.bf16.msra.mxu0 %v1298_v35 }
  0x2f   : > { %1206 = vmatprep.subr.bf16.mxu0 %v1304_v40 }
  0x30   : > { %1199 = vmatpush3.bf16.msra.mxu1 %v1303_v38 }
  0x31   : > { %789 = vmatmul.mubr.bf16.vlgmr.msra.gmra.mxu0 %v1300_v34  ;;  %1231 = vmatprep.subr.bf16.mxu1 %v1358_v44 }
  0x32   : > { %1207 = vmatpush3.bf16.msra.mxu0 %v1308_v41  ;;  %870 = vmatprep.mubr.bf16.mxu0 %v1327_v39 }
  0x33   : > { %830 = vmatmul.mubr.bf16.vlgmr.msra.gmra.mxu1 %v1305_v37  ;;  %1208 = vmatprep.subr.bf16.mxu0 %v1309_v42 }
  0x34   : > { %1235 = vmatprep.mubr.msk.bf16.mxu1 %vm1359_vm0, %v1358_v44  ;;  %1232 = vmatpush3.bf16.msra.mxu1 %v1321_v50 }
  0x35   : > { %1233 = vmatprep.subr.bf16.mxu1 %v1358_v44  ;;  %v963_v44 = vld [vmem:[%s279_s29 + $0x8] sm:$0xff] }
  0x36   : > { %1209 = vmatpush3.bf16.msra.mxu0 %v1310_v43 }
  0x37   : > { %1210 = vmatprep.subr.bf16.mxu0 %v1311_v45 }
  0x38   : > { %1234 = vmatpush3.bf16.msra.mxu1 %v1324_v53 }
  0x3a   : > { %1211 = vmatpush3.bf16.msra.mxu0 %v1312_v46 }
  0x3b   : > { %1212 = vmatprep.subr.bf16.mxu0 %v1313_v47  ;;  %1236 = vmatmul.mubr.msk.bf16.vlgmr.msra.gmra.mxu1 %vm752_vm1, %v1328_v55 }
  0x3e   : > { %1213 = vmatpush3.bf16.msra.mxu0 %v1314_v48 }
  0x3f   : > { %1214 = vmatprep.subr.bf16.mxu0 %v1315_v49 }
  0x42   : > { %1215 = vmatpush3.bf16.msra.mxu0 %v1316_v51 }
  0x43   : > { %1216 = vmatprep.subr.bf16.mxu0 %v1317_v52 }
  0x46   : > { %1217 = vmatpush3.bf16.msra.mxu0 %v1318_v54 }
  0x47   : > { %1218 = vmatprep.subr.bf16.mxu0 %v1319_v56 }
  0x4a   : > { %1219 = vmatpush3.bf16.msra.mxu0 %v1320_v57 }
  0x4b   : > { %1220 = vmatprep.subr.bf16.mxu0 %v1322_v58 }
  0x4e   : > { %1221 = vmatpush3.bf16.msra.mxu0 %v1323_v59 }
  0x51   : > { %871 = vmatmul.mubr.bf16.vlgmr.msra.gmra.mxu0 %v1325_v60 }
  0x8a   : > { %v410_v7 = vpop.permute.xlu0 %409 }
  0x8e   : > { %v415_v14 = vpop.permute.xlu0 %414 }
  0xf1   : > { %v1178_v0 = vpop.f32.mrf.mxu0 }
  0xf3   : > { %v1200_v61 = vpop.f32.mrf.mxu1  ;;  %v1179_v2 = vpop.f32.mrf.mxu0 }
  0xf4   : > { %v1180_v8 = vadd.f32 %v1179_v2, %v1178_v0 }
  0xf5   : > { %v1201_v62 = vpop.f32.mrf.mxu1  ;;  %v1181_v5 = vpop.f32.mrf.mxu0 }
  0xf6   : > { %v791_v11 = vadd.f32 %v1180_v8, %v410_v7  ;;  %v1202_v12 = vadd.f32 %v1201_v62, %v1200_v61 }
  0xf7   : > { %v1203_v63 = vpop.f32.mrf.mxu1  ;;  %v1182_v10 = vpop.f32.mrf.mxu0 }
  0xf8   : > { %v1183_v13 = vadd.f32 %v1182_v10, %v1181_v5  ;;  %v832_v17 = vadd.f32 %v1202_v12, %v791_v11 }
  0xf9   : > { %v1204_v1 = vpop.f32.mrf.mxu1 }
  0xfa   : > { %v794_v18 = vadd.f32 %v1183_v13, %v415_v14  ;;  %v1205_v19 = vadd.f32 %v1204_v1, %v1203_v63 }
  0xfb   : > { %v913_v3 = vpop.f32.mrf.mxu1 }
  0xfc   : > { %v835_v24 = vadd.f32 %v1205_v19, %v794_v18 }
  0xfd   : > { %v1237_v4 = vpop.f32.mrf.mxu1 }
  0xff   : > { %v916_v6 = vpop.f32.mrf.mxu1 }
 0x101   : > { %v1238_v9 = vpop.f32.mrf.mxu1 }
 0x111   : > { %v1222_v15 = vpop.f32.mrf.mxu0 }
 0x113   : > { %v1223_v16 = vpop.f32.mrf.mxu0 }
 0x114   : > { %v1224_v20 = vadd.f32 %v1223_v16, %v1222_v15 }
 0x115   : > { %v1225_v21 = vpop.f32.mrf.mxu0 }
 0x116   : > { %v873_v22 = vadd.f32 %v1224_v20, %v832_v17 }
 0x117   : > { %v1226_v23 = vpop.f32.mrf.mxu0 }
 0x118   : > { %v1227_v25 = vadd.f32 %v1226_v23, %v1225_v21  ;;  %v914_v26 = vadd.f32 %v913_v3, %v873_v22 }
 0x11a   : > { %v876_v27 = vadd.f32 %v1227_v25, %v835_v24  ;;  %v921_v28 = vsel %vm920_vm2, %v914_v26, 0.0 }
 0x11b   : > { %922 = vadd.xlane.f32.xlu1 %v921_v28 }
 0x11c   : > { %v917_v29 = vadd.f32 %v916_v6, %v876_v27 }
 0x11e   : > { %v924_v30 = vsel %vm920_vm2, %v917_v29, 0.0 }
 0x11f   : > { %925 = vadd.xlane.f32.xlu1 %v924_v30 }
 0x130   : > { %952 = vperm.xlu1 %1268, %v948_v31  }
 0x134   : > { %957 = vperm.xlu1 %1268, %v949_v32  }
 0x138   : > { %966 = vperm.xlu1 %1268, %v962_v33  }
 0x1a4   : > { %v923_v34 = vpop.xlane.xlu1 %922 }
 0x1a5   : > { %v928_v35 = vmul.f32 0.015625, %v923_v34 }
 0x1a7   : > { %v930_v36 = vsub.f32 %v914_v26, %v928_v35 }
 0x1a8   : > { %v926_v37 = vpop.xlane.xlu1 %925 }
 0x1a9   : > { %v929_v38 = vmul.f32 0.015625, %v926_v37  ;;  %v932_v39 = vmul.f32 %v930_v36, %v930_v36 }
 0x1ab   : > { %v931_v40 = vsub.f32 %v917_v29, %v929_v38  ;;  %v934_v41 = vsel %vm920_vm2, %v932_v39, 0.0 }
 0x1ac   : > { %935 = vadd.xlane.f32.xlu0 %v934_v41  ;;  %v953_v45 = vpop.permute.xlu1 %952 }
 0x1ad   : > { %v933_v42 = vmul.f32 %v931_v40, %v931_v40 }
 0x1af   : > { %v937_v43 = vsel %vm920_vm2, %v933_v42, 0.0 }
 0x1b0   : > { %938 = vadd.xlane.f32.xlu1 %v937_v43  ;;  %v958_v46 = vpop.permute.xlu1 %957 }
 0x1b4   : > { %v967_v47 = vpop.permute.xlu1 %966 }
 0x1c1   : > { %971 = vperm.xlu1 %1268, %v963_v44  }
 0x235   : > { %v936_v48 = vpop.xlane.xlu0 %935 }
 0x236   : > { %v940_v49 = vmul.f32 0.015625, %v936_v48 }
 0x238   : > { %v942_v50 = vadd.f32 1e-05, %v940_v49 }
 0x239   : > { %v939_v51 = vpop.xlane.xlu1 %938 }
 0x23a   : > { %1329 = vrsqrt.f32 %v942_v50  ;;  %v941_v52 = vmul.f32 0.015625, %v939_v51 }
 0x23c   : > { %v943_v53 = vadd.f32 1e-05, %v941_v52 }
 0x23d   : > { %v972_v62 = vpop.permute.xlu1 %971 }
 0x23e   : > { %1331 = vrsqrt.f32 %v943_v53 }
 0x247   : > { %v1330_v54 = vpop.eup %1329 }
 0x248   : > { %v946_v55 = vmul.f32 %v1330_v54, %v930_v36 }
 0x24a   : > { %v960_v56 = vmul.f32 %v953_v45, %v946_v55 }
 0x24b   : > { %v1332_v57 = vpop.eup %1331 }
 0x24c   : > { %v974_v58 = vadd.f32 %v967_v47, %v960_v56  ;;  %v947_v59 = vmul.f32 %v1332_v57, %v931_v40 }
 0x24e   : > { %v976_v60 = vmax.f32 %v974_v58, 0.0  ;;  %v961_v61 = vmul.f32 %v958_v46, %v947_v59 }
 0x250   : > { %978 = vst.msk [vmem:[%s295_s6] sm:$0xff] %vm920_vm2, %v976_v60  ;;  %v975_v63 = vadd.f32 %v972_v62, %v961_v61 }
 0x252   : > { %v977_v0 = vmax.f32 %v975_v63, 0.0 }
 0x254   : > { %979 = vst.msk [vmem:[%s295_s6 + $0x8] sm:$0xff] %vm920_vm2, %v977_v0 }
 0x255 PF: > { %s15_s20 = sadd.s32 1, %s1355_s20   ;;  %s1529_s18 = smov %s1351_s19 }
 0x256   : > { %p12_p5 = scmp.ge.s32.totalorder %s15_s20, 6   ;;  %s1530_s19 = smov %s1532_s21 }
 0x258   :  { %14 = sbr.rel (!%p12_p5) target bundleno = 2 (0x2), region = 76 }

// kernel: _lambda_.38
= control target key start
LH: loop header
LB: loop body
LE: loop exit
PB: predicated region body
PF: predicated region fallthrough
CT: control target
= control target key end

     0   :  { %s1086_s18 = smov 0   ;;  %s1088_s19 = smov 0   ;;  %s1203_s0 = inlined_call_operand.vmem [shape: bf16[8,400], index: 0, kind: input, shape index: {}]   ;;  %s1204_s1 = inlined_call_operand.vmem [shape: f32[8,1], index: 1, kind: input, shape index: {}]   ;;  %s1205_s2 = inlined_call_operand.vmem [shape: f32[4,8,1], index: 2, kind: input, shape index: {}]   ;;  %s1206_s3 = inlined_call_operand.vmem [shape: f32[4,8,1], index: 3, kind: input, shape index: {}]   ;;  %s1207_s4 = inlined_call_operand.vmem [shape: bf16[4,400,256], index: 4, kind: input, shape index: {}]   ;;  %s1208_s5 = inlined_call_operand.vmem [shape: f32[4,8,256], index: 5, kind: output, shape index: {}]  }
   0x1   :  { %s1090_s20 = smov 0  }
   0x2 LB: > { %s27_s21 = sadd.s32 1, %s1049_s19  ;;  %p858_p0 = scmp.ge.s32.totalorder %s1053_s20, 1  ;;  %s1053_s20 = sphi %s1090_s20, %s15_s20   ;;  %s1049_s19 = sphi %s1088_s19, %s1210_s19   ;;  %s1045_s18 = sphi %s1086_s18, %s1209_s18  }
   0x3   : > { %p29_p1 = scmp.ge.s32.totalorder %s27_s21, 4  ;;  %p226_p2 = scmp.lt.s32.totalorder %s1053_s20, 5 }
   0x5   : > { %s1212_s21 = smov (%p29_p1, %s27_s21), 0  ;;  %p227_p3 = pnand %p858_p0, %p226_p2 }
   0x6   : > { %p270_p4 = scmp.lt.s32.totalorder (!%p227_p3), %s1045_s18, 3 }
   0x7   : > { %230 = sbr.rel (%p227_p3) target bundleno = 593 (0x251), region = 40 }
   0xc   : > { %v1107_v0 = vld [vmem:[%s1203_s0 + $0x8] sm:$0xff]  ;;  %vm620_vm0 = vcmask 130048   ;;  %v1112_v1 = vld [vmem:[%s1203_s0] sm:$0xff]  ;;  %v1055_v5 = vmov 0   ;;  %s1214_s18 = smov (!%p270_p4, %s1045_s18), 3 }
   0xd   : > { %v351_v2 = vld [vmem:[%s1204_s1] sm:$0xff]  ;;  %v867_v3 = vcombine.high %v1107_v0, %v1107_v0  ;;  %v865_v4 = vcombine.high %v1112_v1, %v1112_v1  ;;  %948 = vset.pattern.permute.xlu0 %v1055_v5  ;;  %949 = vset.pattern.permute.xlu1 %v1055_v5  ;;  %s922_s28 = smul.u32 400, %s1214_s18  ;;  %v866_v48 = vcombine.low %v1107_v0, %v1107_v0  ;;  %s859_s7 = sshll.u32 %s1214_s18, 3 }
   0xe   : > { %354 = vperm.xlu0 %948, %v351_v2   ;;  %v864_v57 = vcombine.low %v1112_v1, %v1112_v1  ;;  %s273_s10 = scalar_lea.vmem %s1205_s2, %s859_s7  ;;  %s277_s13 = scalar_lea.vmem %s1206_s3, %s859_s7 }
   0xf   : > { %918 = vmatprep.mubr.msk.bf16.mxu1 %vm620_vm0, %v867_v3  ;;  %656 = vmatprep.mubr.bf16.mxu0 %v865_v4  ;;  %s1127_s6 = scalar_lea.vmem %s1207_s4, %s922_s28  ;;  %v723_v58 = vld [vmem:[%s273_s10] sm:$0xff]  ;;  %s921_s14 = sshll.u32 %s1214_s18, 4 }
  0x10   : > { %v950_v6 = vld [vmem:[%s1127_s6 + $0x74] ss:$8 sps:$4 sm:$0xff]   ;;  %v952_v7 = vld [vmem:[%s1127_s6 + $0x70] ss:$8 sps:$4 sm:$0xff]   ;;  %v953_v8 = vld [vmem:[%s1127_s6 + $0x64] ss:$8 sps:$4 sm:$0xff]   ;;  %726 = vperm.xlu1 %949, %v723_v58   ;;  %s296_s17 = scalar_lea.vmem %s1208_s5, %s921_s14 }
  0x11   : > { %624 = vmatprep.subr.bf16.mxu0 %v950_v6  ;;  %v955_v9 = vld [vmem:[%s1127_s6 + $0x60] ss:$8 sps:$4 sm:$0xff]   ;;  %v956_v10 = vld [vmem:[%s1127_s6 + $0x54] ss:$8 sps:$4 sm:$0xff]   ;;  %v958_v11 = vld [vmem:[%s1127_s6 + $0x50] ss:$8 sps:$4 sm:$0xff]  }
  0x12   : > { %625 = vmatpush1.bf16.msra.mxu0 %v952_v7  ;;  %v959_v12 = vld [vmem:[%s1127_s6 + $0x44] ss:$8 sps:$4 sm:$0xff]   ;;  %v970_v13 = vld [vmem:[%s1127_s6 + $0x174] ss:$8 sps:$4 sm:$0xff]   ;;  %v973_v14 = vld [vmem:[%s1127_s6 + $0x170] ss:$8 sps:$4 sm:$0xff]  }
  0x13   : > { %626 = vmatprep.subr.bf16.mxu0 %v953_v8  ;;  %v961_v15 = vld [vmem:[%s1127_s6 + $0x40] ss:$8 sps:$4 sm:$0xff]   ;;  %665 = vmatprep.subr.bf16.mxu1 %v970_v13  ;;  %v962_v16 = vld [vmem:[%s1127_s6 + $0x34] ss:$8 sps:$4 sm:$0xff]   ;;  %v976_v17 = vld [vmem:[%s1127_s6 + $0x164] ss:$8 sps:$4 sm:$0xff]  }
  0x14   : > { %666 = vmatpush1.bf16.msra.mxu1 %v973_v14  ;;  %v979_v18 = vld [vmem:[%s1127_s6 + $0x160] ss:$8 sps:$4 sm:$0xff]   ;;  %v964_v19 = vld [vmem:[%s1127_s6 + $0x30] ss:$8 sps:$4 sm:$0xff]   ;;  %v965_v20 = vld [vmem:[%s1127_s6 + $0x24] ss:$8 sps:$4 sm:$0xff]  }
  0x15   : > { %667 = vmatprep.subr.bf16.mxu1 %v976_v17  ;;  %v982_v21 = vld [vmem:[%s1127_s6 + $0x154] ss:$8 sps:$4 sm:$0xff]   ;;  %v985_v22 = vld [vmem:[%s1127_s6 + $0x150] ss:$8 sps:$4 sm:$0xff]   ;;  %v988_v23 = vld [vmem:[%s1127_s6 + $0x144] ss:$8 sps:$4 sm:$0xff]  }
  0x16   : > { %627 = vmatpush1.bf16.msra.mxu0 %v955_v9  ;;  %v967_v24 = vld [vmem:[%s1127_s6 + $0x20] ss:$8 sps:$4 sm:$0xff]   ;;  %v968_v25 = vld [vmem:[%s1127_s6 + $0x14] ss:$8 sps:$4 sm:$0xff]   ;;  %v972_v28 = vld [vmem:[%s1127_s6 + $0x10] ss:$8 sps:$4 sm:$0xff]  }
  0x17   : > { %628 = vmatprep.subr.bf16.mxu0 %v956_v10  ;;  %v991_v26 = vld [vmem:[%s1127_s6 + $0x140] ss:$8 sps:$4 sm:$0xff]   ;;  %v994_v27 = vld [vmem:[%s1127_s6 + $0x134] ss:$8 sps:$4 sm:$0xff]   ;;  %v974_v29 = vld [vmem:[%s1127_s6 + $0x4] ss:$8 sps:$4 sm:$0xff]  }
  0x18   : > { %668 = vmatpush1.bf16.msra.mxu1 %v979_v18  ;;  %v997_v30 = vld [vmem:[%s1127_s6 + $0x130] ss:$8 sps:$4 sm:$0xff]   ;;  %v1000_v31 = vld [vmem:[%s1127_s6 + $0x124] ss:$8 sps:$4 sm:$0xff]   ;;  %v978_v32 = vld [vmem:[%s1127_s6] ss:$8 sps:$4 sm:$0xff]  }
  0x19   : > { %669 = vmatprep.subr.bf16.mxu1 %v982_v21  ;;  %v980_v33 = vld [vmem:[%s1127_s6 + $0xf4] ss:$8 sps:$4 sm:$0xff]   ;;  %v1003_v34 = vld [vmem:[%s1127_s6 + $0x120] ss:$8 sps:$4 sm:$0xff]   ;;  %v984_v36 = vld [vmem:[%s1127_s6 + $0xf0] ss:$8 sps:$4 sm:$0xff]  }
  0x1a   : > { %629 = vmatpush1.bf16.msra.mxu0 %v958_v11  ;;  %v1006_v35 = vld [vmem:[%s1127_s6 + $0x114] ss:$8 sps:$4 sm:$0xff]   ;;  %v986_v37 = vld [vmem:[%s1127_s6 + $0xe4] ss:$8 sps:$4 sm:$0xff]   ;;  %v1009_v38 = vld [vmem:[%s1127_s6 + $0x110] ss:$8 sps:$4 sm:$0xff]  }
  0x1b   : > { %630 = vmatprep.subr.bf16.mxu0 %v959_v12  ;;  %v1012_v39 = vld [vmem:[%s1127_s6 + $0x104] ss:$8 sps:$4 sm:$0xff]   ;;  %v990_v40 = vld [vmem:[%s1127_s6 + $0xe0] ss:$8 sps:$4 sm:$0xff]   ;;  %v992_v41 = vld [vmem:[%s1127_s6 + $0xd4] ss:$8 sps:$4 sm:$0xff]  }
  0x1c   : > { %670 = vmatpush1.bf16.msra.mxu1 %v985_v22  ;;  %v1015_v42 = vld [vmem:[%s1127_s6 + $0x100] ss:$8 sps:$4 sm:$0xff]   ;;  %v1018_v43 = vld [vmem:[%s1127_s6 + $0x184] ss:$8 sps:$4 sm:$0xff]   ;;  %v996_v44 = vld [vmem:[%s1127_s6 + $0xd0] ss:$8 sps:$4 sm:$0xff]  }
  0x1d   : > { %671 = vmatprep.subr.bf16.mxu1 %v988_v23  ;;  %v998_v45 = vld [vmem:[%s1127_s6 + $0xc4] ss:$8 sps:$4 sm:$0xff]   ;;  %v1021_v46 = vld [vmem:[%s1127_s6 + $0x180] ss:$8 sps:$4 sm:$0xff]   ;;  %v1004_v49 = vld [vmem:[%s1127_s6 + $0xb4] ss:$8 sps:$4 sm:$0xff]  }
  0x1e   : > { %631 = vmatpush1.bf16.msra.mxu0 %v961_v15  ;;  %v1002_v47 = vld [vmem:[%s1127_s6 + $0xc0] ss:$8 sps:$4 sm:$0xff]   ;;  %v1008_v50 = vld [vmem:[%s1127_s6 + $0xb0] ss:$8 sps:$4 sm:$0xff]   ;;  %v1010_v51 = vld [vmem:[%s1127_s6 + $0xa4] ss:$8 sps:$4 sm:$0xff]  }
  0x1f   : > { %632 = vmatprep.subr.bf16.mxu0 %v962_v16  ;;  %v1014_v52 = vld [vmem:[%s1127_s6 + $0xa0] ss:$8 sps:$4 sm:$0xff]   ;;  %v1016_v53 = vld [vmem:[%s1127_s6 + $0x94] ss:$8 sps:$4 sm:$0xff]   ;;  %v1020_v54 = vld [vmem:[%s1127_s6 + $0x90] ss:$8 sps:$4 sm:$0xff]  }
  0x20   : > { %672 = vmatpush1.bf16.msra.mxu1 %v991_v26  ;;  %v1024_v55 = vld [vmem:[%s1127_s6 + $0x84] ss:$8 sps:$4 sm:$0xff]   ;;  %v1026_v56 = vld [vmem:[%s1127_s6 + $0x80] ss:$8 sps:$4 sm:$0xff]  }
  0x21   : > { %673 = vmatprep.subr.bf16.mxu1 %v994_v27  ;;  %v731_v16 = vld [vmem:[%s277_s13] sm:$0xff] }
  0x22   : > { %633 = vmatpush1.bf16.msra.mxu0 %v964_v19 }
  0x23   : > { %634 = vmatprep.subr.bf16.mxu0 %v965_v20 }
  0x24   : > { %674 = vmatpush1.bf16.msra.mxu1 %v997_v30 }
  0x25   : > { %675 = vmatprep.subr.bf16.mxu1 %v1000_v31 }
  0x26   : > { %635 = vmatpush1.bf16.msra.mxu0 %v967_v24 }
  0x27   : > { %636 = vmatprep.subr.bf16.mxu0 %v968_v25 }
  0x28   : > { %676 = vmatpush1.bf16.msra.mxu1 %v1003_v34 }
  0x29   : > { %677 = vmatprep.subr.bf16.mxu1 %v1006_v35 }
  0x2a   : > { %637 = vmatpush1.bf16.msra.mxu0 %v972_v28 }
  0x2b   : > { %638 = vmatprep.subr.bf16.mxu0 %v974_v29 }
  0x2c   : > { %678 = vmatpush1.bf16.msra.mxu1 %v1009_v38 }
  0x2d   : > { %679 = vmatprep.subr.bf16.mxu1 %v1012_v39 }
  0x2e   : > { %639 = vmatpush1.bf16.msra.mxu0 %v978_v32 }
  0x2f   : > { %640 = vmatprep.subr.bf16.mxu0 %v980_v33 }
  0x30   : > { %680 = vmatpush1.bf16.msra.mxu1 %v1015_v42 }
  0x31   : > { %695 = vmatprep.subr.bf16.mxu1 %v1018_v43 }
  0x32   : > { %641 = vmatpush2.bf16.msra.mxu0 %v984_v36 }
  0x33   : > { %642 = vmatprep.subr.bf16.mxu0 %v986_v37 }
  0x34   : > { %696 = vmatpush2.bf16.msra.mxu1 %v1021_v46 }
  0x36   : > { %643 = vmatpush2.bf16.msra.mxu0 %v990_v40 }
  0x37   : > { %644 = vmatprep.subr.bf16.mxu0 %v992_v41  ;;  %698 = vmatmul.mubr.bf16.vlgmr.msra.gmra.mxu1 %v866_v48 }
  0x3a   : > { %645 = vmatpush2.bf16.msra.mxu0 %v996_v44 }
  0x3b   : > { %646 = vmatprep.subr.bf16.mxu0 %v998_v45 }
  0x3e   : > { %647 = vmatpush2.bf16.msra.mxu0 %v1002_v47 }
  0x3f   : > { %648 = vmatprep.subr.bf16.mxu0 %v1004_v49 }
  0x42   : > { %649 = vmatpush2.bf16.msra.mxu0 %v1008_v50 }
  0x43   : > { %650 = vmatprep.subr.bf16.mxu0 %v1010_v51 }
  0x46   : > { %651 = vmatpush2.bf16.msra.mxu0 %v1014_v52 }
  0x47   : > { %652 = vmatprep.subr.bf16.mxu0 %v1016_v53 }
  0x4a   : > { %653 = vmatpush2.bf16.msra.mxu0 %v1020_v54 }
  0x4b   : > { %654 = vmatprep.subr.bf16.mxu0 %v1024_v55 }
  0x4e   : > { %655 = vmatpush2.bf16.msra.mxu0 %v1026_v56 }
  0x51   : > { %657 = vmatmul.mubr.bf16.vlgmr.msra.gmra.mxu0 %v864_v57 }
  0x89   : > { %v355_v63 = vpop.permute.xlu0 %354 }
  0x8b   : > { %v727_v17 = vpop.permute.xlu1 %726 }
  0xf7   : > { %v699_v59 = vpop.f32.mrf.mxu1 }
  0xf9   : > { %v701_v60 = vpop.f32.mrf.mxu1 }
  0xfb   : > { %v703_v61 = vpop.f32.mrf.mxu1 }
  0xfd   : > { %v704_v62 = vpop.f32.mrf.mxu1 }
 0x111   : > { %v658_v0 = vpop.f32.mrf.mxu0 }
 0x112   : > { %v659_v2 = vadd.f32 %v658_v0, %v355_v63 }
 0x113   : > { %v660_v3 = vpop.f32.mrf.mxu0 }
 0x114   : > { %v661_v4 = vadd.f32 %v660_v3, %v355_v63  ;;  %v700_v1 = vadd.f32 %v699_v59, %v659_v2 }
 0x115   : > { %v662_v5 = vpop.f32.mrf.mxu0 }
 0x116   : > { %v702_v6 = vadd.f32 %v701_v60, %v661_v4 }
 0x117   : > { %v663_v7 = vpop.f32.mrf.mxu0 }
 0x118   : > { %v706_v8 = vadd.f32 %v702_v6, %v700_v1 }
 0x11a   : > { %707 = vadd.xlane.f32.xlu0 %v706_v8 }
 0x1a3   : > { %v708_v9 = vpop.xlane.xlu0 %707 }
 0x1a4   : > { %v710_v10 = vmul.f32 0.00390625, %v708_v9 }
 0x1a6   : > { %v711_v11 = vsub.f32 %v700_v1, %v710_v10  ;;  %v712_v12 = vsub.f32 %v702_v6, %v710_v10 }
 0x1a8   : > { %v713_v13 = vmul.f32 %v711_v11, %v711_v11  ;;  %v714_v14 = vmul.f32 %v712_v12, %v712_v12 }
 0x1aa   : > { %v715_v15 = vadd.f32 %v714_v14, %v713_v13 }
 0x1ac   : > { %716 = vadd.xlane.f32.xlu1 %v715_v15 }
 0x1bd   : > { %734 = vperm.xlu1 %949, %v731_v16  }
 0x235   : > { %v717_v18 = vpop.xlane.xlu1 %716 }
 0x236   : > { %v718_v19 = vmul.f32 0.00390625, %v717_v18 }
 0x238   : > { %v719_v20 = vadd.f32 1e-05, %v718_v19 }
 0x239   : > { %v735_v26 = vpop.permute.xlu1 %734 }
 0x23a   : > { %1029 = vrsqrt.f32 %v719_v20 }
 0x247   : > { %v1030_v21 = vpop.eup %1029 }
 0x248   : > { %v721_v22 = vmul.f32 %v1030_v21, %v711_v11  ;;  %v722_v23 = vmul.f32 %v1030_v21, %v712_v12 }
 0x24a   : > { %v729_v24 = vmul.f32 %v727_v17, %v721_v22  ;;  %v730_v25 = vmul.f32 %v727_v17, %v722_v23 }
 0x24c   : > { %v737_v27 = vadd.f32 %v735_v26, %v729_v24  ;;  %v738_v28 = vadd.f32 %v735_v26, %v730_v25 }
 0x24e   : > { %v739_v29 = vmax.f32 %v737_v27, 0.0  ;;  %v740_v30 = vmax.f32 %v738_v28, 0.0 }
 0x250   : > { %741 = vst [vmem:[%s296_s17] sm:$0xff] %v739_v29  ;;  %742 = vst [vmem:[%s296_s17 + $0x8] sm:$0xff] %v740_v30 }
 0x251 PF: > { %s15_s20 = sadd.s32 1, %s1053_s20   ;;  %s1209_s18 = smov %s1049_s19 }
 0x252   : > { %p12_p5 = scmp.ge.s32.totalorder %s15_s20, 6   ;;  %s1210_s19 = smov %s1212_s21 }
 0x254   :  { %14 = sbr.rel (!%p12_p5) target bundleno = 2 (0x2), region = 76 }

// kernel: _lambda_.39
= control target key start
LH: loop header
LB: loop body
LE: loop exit
PB: predicated region body
PF: predicated region fallthrough
CT: control target
= control target key end

     0   :  { %s1181_s18 = smov 0   ;;  %s1183_s19 = smov 0   ;;  %s1417_s0 = inlined_call_operand.vmem [shape: bf16[3,392], index: 0, kind: input, shape index: {}]   ;;  %s1418_s1 = inlined_call_operand.vmem [shape: f32[3,1], index: 1, kind: input, shape index: {}]   ;;  %s1419_s2 = inlined_call_operand.vmem [shape: f32[4,3,1], index: 2, kind: input, shape index: {}]   ;;  %s1420_s3 = inlined_call_operand.vmem [shape: f32[4,3,1], index: 3, kind: input, shape index: {}]   ;;  %s1421_s4 = inlined_call_operand.vmem [shape: bf16[4,392,256], index: 4, kind: input, shape index: {}]   ;;  %s1422_s5 = inlined_call_operand.vmem [shape: f32[4,3,256], index: 5, kind: output, shape index: {}]  }
   0x1   :  { %s1185_s20 = smov 0   ;;  %s1187_s21 = smov 0  }
   0x2   :  { %s1189_s22 = smov 0   ;;  %s1191_s2 = smov 0  }
   0x3   :  { %s1193_s23 = smov 0  }
   0x4 LB: > { %s24_s3 = sadd.s32 1, %s1139_s22  ;;  %s27_s24 = sadd.s32 1, %s1143_s2  ;;  %s1147_s23 = sphi %s1193_s23, %s15_s23   ;;  %s1143_s2 = sphi %s1191_s2, %s1428_s2   ;;  %s1139_s22 = sphi %s1189_s22, %s1427_s22   ;;  %s1135_s21 = sphi %s1187_s21, %s1426_s21   ;;  %s1131_s20 = sphi %s1185_s20, %s1425_s20   ;;  %s1127_s19 = sphi %s1183_s19, %s1424_s19   ;;  %s1123_s18 = sphi %s1181_s18, %s1423_s18  }
   0x5   : > { %p25_p0 = scmp.ge.s32.totalorder %s24_s3, 2  ;;  %p137_p1 = scmp.ne.s32.totalorder %s1127_s19, %s1123_s18 }
   0x6   : > { %p138_p2 = scmp.eq.s32.totalorder %s1147_s23, 0  ;;  %s130_s28 = sadd.s32 1, %s1127_s19 }
   0x7   : > { %s1430_s3 = smov (%p25_p0, %s24_s3), 0  ;;  %s1432_s24 = smov (!%p25_p0, %s27_s24), %s1143_s2 }
   0x8   : > { %p139_p3 = por %p138_p2, %p137_p1  ;;  %p29_p4 = scmp.ge.s32.totalorder %s1432_s24, 4 }
   0x9   : > { %s126_s25 = ssub.s32 %s1139_s22, %s1430_s3  ;;  %p948_p6 = scmp.ge.s32.totalorder %s1147_s23, 8 }
   0xa   : > { %s1434_s24 = smov (%p29_p4, %s1432_s24), 0 }
   0xb   : > { %s125_s26 = ssub.s32 %s1143_s2, %s1434_s24  ;;  %197 = sbr.rel (%p948_p6) target bundleno = 55 (0x37), region = 24 }
   0xc   : > { %s127_s27 = sor.u32 %s126_s25, %s125_s26 }
   0xd   : > { %p128_p5 = scmp.eq.s32.totalorder %s127_s27, 0 }
   0xf   : > { %s1232_s29 = scalar_select %p128_p5, %s1127_s19, %s130_s28  }
  0x10   : > { %214 = sbr.rel (!%p139_p3) target bundleno = 55 (0x37), region = 36  ;;  %s216_s30 = sand.u32 (%p139_p3), 1, %s1127_s19  }
  0x11   : > { %s1004_s6 = smul.u32 (%p139_p3), 98, %s1143_s2 }
  0x12   : > { %s1003_s7 = smul.u32 (%p139_p3), 196, %s216_s30 }
  0x13   : > { %s220_s8 = sadd.s32 (%p139_p3), %s1139_s22, %s1004_s6 }
  0x14   : > { %s949_s9 = sshll.u32 (%p139_p3), %s220_s8, 2  ;;  %s1246_s13 = scalar_lea.vmem (%p139_p3), [#allocation2], %s1003_s7 }
  0x15   : > { %s1241_s12 = scalar_lea.vmem %s1421_s4, %s949_s9 }
  0x16   : > { %v239_v0 = vld [vmem:[%s1241_s12] sm:$0xf]  ;;  %v241_v1 = vld [vmem:[%s1241_s12 + $0x8] sm:$0xf]  ;;  %v243_v2 = vld [vmem:[%s1241_s12 + $0x10] sm:$0xf] }
  0x17   : > { %240 = vst [vmem:[%s1246_s13] sm:$0xf] %v239_v0  ;;  %242 = vst [vmem:[%s1246_s13 + $0x4] sm:$0xf] %v241_v1  ;;  %v245_v3 = vld [vmem:[%s1241_s12 + $0x18] sm:$0xf] }
  0x18   : > { %244 = vst [vmem:[%s1246_s13 + $0x8] sm:$0xf] %v243_v2  ;;  %v247_v4 = vld [vmem:[%s1241_s12 + $0x20] sm:$0xf]  ;;  %v249_v5 = vld [vmem:[%s1241_s12 + $0x28] sm:$0xf] }
  0x19   : > { %246 = vst [vmem:[%s1246_s13 + $0xc] sm:$0xf] %v245_v3  ;;  %248 = vst [vmem:[%s1246_s13 + $0x10] sm:$0xf] %v247_v4  ;;  %v251_v6 = vld [vmem:[%s1241_s12 + $0x30] sm:$0xf] }
  0x1a   : > { %250 = vst [vmem:[%s1246_s13 + $0x14] sm:$0xf] %v249_v5  ;;  %v253_v7 = vld [vmem:[%s1241_s12 + $0x38] sm:$0xf]  ;;  %v255_v8 = vld [vmem:[%s1241_s12 + $0x40] sm:$0xf] }
  0x1b   : > { %252 = vst [vmem:[%s1246_s13 + $0x18] sm:$0xf] %v251_v6  ;;  %254 = vst [vmem:[%s1246_s13 + $0x1c] sm:$0xf] %v253_v7  ;;  %v257_v9 = vld [vmem:[%s1241_s12 + $0x48] sm:$0xf] }
  0x1c   : > { %256 = vst [vmem:[%s1246_s13 + $0x20] sm:$0xf] %v255_v8  ;;  %v259_v10 = vld [vmem:[%s1241_s12 + $0x50] sm:$0xf]  ;;  %v261_v11 = vld [vmem:[%s1241_s12 + $0x58] sm:$0xf] }
  0x1d   : > { %258 = vst [vmem:[%s1246_s13 + $0x24] sm:$0xf] %v257_v9  ;;  %260 = vst [vmem:[%s1246_s13 + $0x28] sm:$0xf] %v259_v10  ;;  %v263_v12 = vld [vmem:[%s1241_s12 + $0x60] sm:$0xf] }
  0x1e   : > { %262 = vst [vmem:[%s1246_s13 + $0x2c] sm:$0xf] %v261_v11  ;;  %v265_v13 = vld [vmem:[%s1241_s12 + $0x68] sm:$0xf]  ;;  %v267_v14 = vld [vmem:[%s1241_s12 + $0x70] sm:$0xf] }
  0x1f   : > { %264 = vst [vmem:[%s1246_s13 + $0x30] sm:$0xf] %v263_v12  ;;  %266 = vst [vmem:[%s1246_s13 + $0x34] sm:$0xf] %v265_v13  ;;  %v269_v15 = vld [vmem:[%s1241_s12 + $0x78] sm:$0xf] }
  0x20   : > { %268 = vst [vmem:[%s1246_s13 + $0x38] sm:$0xf] %v267_v14  ;;  %v271_v16 = vld [vmem:[%s1241_s12 + $0x80] sm:$0xf]  ;;  %v273_v17 = vld [vmem:[%s1241_s12 + $0x88] sm:$0xf] }
  0x21   : > { %270 = vst [vmem:[%s1246_s13 + $0x3c] sm:$0xf] %v269_v15  ;;  %272 = vst [vmem:[%s1246_s13 + $0x40] sm:$0xf] %v271_v16  ;;  %v275_v18 = vld [vmem:[%s1241_s12 + $0x90] sm:$0xf] }
  0x22   : > { %274 = vst [vmem:[%s1246_s13 + $0x44] sm:$0xf] %v273_v17  ;;  %v277_v19 = vld [vmem:[%s1241_s12 + $0x98] sm:$0xf]  ;;  %v279_v20 = vld [vmem:[%s1241_s12 + $0xa0] sm:$0xf] }
  0x23   : > { %276 = vst [vmem:[%s1246_s13 + $0x48] sm:$0xf] %v275_v18  ;;  %278 = vst [vmem:[%s1246_s13 + $0x4c] sm:$0xf] %v277_v19  ;;  %v281_v21 = vld [vmem:[%s1241_s12 + $0xa8] sm:$0xf] }
  0x24   : > { %280 = vst [vmem:[%s1246_s13 + $0x50] sm:$0xf] %v279_v20  ;;  %v283_v22 = vld [vmem:[%s1241_s12 + $0xb0] sm:$0xf]  ;;  %v285_v23 = vld [vmem:[%s1241_s12 + $0xb8] sm:$0xf] }
  0x25   : > { %282 = vst [vmem:[%s1246_s13 + $0x54] sm:$0xf] %v281_v21  ;;  %284 = vst [vmem:[%s1246_s13 + $0x58] sm:$0xf] %v283_v22  ;;  %v287_v24 = vld [vmem:[%s1241_s12 + $0xc0] sm:$0xf] }
  0x26   : > { %286 = vst [vmem:[%s1246_s13 + $0x5c] sm:$0xf] %v285_v23  ;;  %v289_v25 = vld [vmem:[%s1241_s12 + $0xc8] sm:$0xf]  ;;  %v291_v26 = vld [vmem:[%s1241_s12 + $0xd0] sm:$0xf] }
  0x27   : > { %288 = vst [vmem:[%s1246_s13 + $0x60] sm:$0xf] %v287_v24  ;;  %290 = vst [vmem:[%s1246_s13 + $0x64] sm:$0xf] %v289_v25  ;;  %v293_v27 = vld [vmem:[%s1241_s12 + $0xd8] sm:$0xf] }
  0x28   : > { %292 = vst [vmem:[%s1246_s13 + $0x68] sm:$0xf] %v291_v26  ;;  %v295_v28 = vld [vmem:[%s1241_s12 + $0xe0] sm:$0xf]  ;;  %v297_v29 = vld [vmem:[%s1241_s12 + $0xe8] sm:$0xf] }
  0x29   : > { %294 = vst [vmem:[%s1246_s13 + $0x6c] sm:$0xf] %v293_v27  ;;  %296 = vst [vmem:[%s1246_s13 + $0x70] sm:$0xf] %v295_v28  ;;  %v299_v30 = vld [vmem:[%s1241_s12 + $0xf0] sm:$0xf] }
  0x2a   : > { %298 = vst [vmem:[%s1246_s13 + $0x74] sm:$0xf] %v297_v29  ;;  %v301_v31 = vld [vmem:[%s1241_s12 + $0xf8] sm:$0xf]  ;;  %v303_v32 = vld [vmem:[%s1241_s12 + $0x100] sm:$0xf] }
  0x2b   : > { %300 = vst [vmem:[%s1246_s13 + $0x78] sm:$0xf] %v299_v30  ;;  %302 = vst [vmem:[%s1246_s13 + $0x7c] sm:$0xf] %v301_v31  ;;  %v305_v33 = vld [vmem:[%s1241_s12 + $0x108] sm:$0xf] }
  0x2c   : > { %304 = vst [vmem:[%s1246_s13 + $0x80] sm:$0xf] %v303_v32  ;;  %v307_v34 = vld [vmem:[%s1241_s12 + $0x110] sm:$0xf]  ;;  %v309_v35 = vld [vmem:[%s1241_s12 + $0x118] sm:$0xf] }
  0x2d   : > { %306 = vst [vmem:[%s1246_s13 + $0x84] sm:$0xf] %v305_v33  ;;  %308 = vst [vmem:[%s1246_s13 + $0x88] sm:$0xf] %v307_v34  ;;  %v311_v36 = vld [vmem:[%s1241_s12 + $0x120] sm:$0xf] }
  0x2e   : > { %310 = vst [vmem:[%s1246_s13 + $0x8c] sm:$0xf] %v309_v35  ;;  %v313_v37 = vld [vmem:[%s1241_s12 + $0x128] sm:$0xf]  ;;  %v315_v38 = vld [vmem:[%s1241_s12 + $0x130] sm:$0xf] }
  0x2f   : > { %312 = vst [vmem:[%s1246_s13 + $0x90] sm:$0xf] %v311_v36  ;;  %314 = vst [vmem:[%s1246_s13 + $0x94] sm:$0xf] %v313_v37  ;;  %v317_v39 = vld [vmem:[%s1241_s12 + $0x138] sm:$0xf] }
  0x30   : > { %316 = vst [vmem:[%s1246_s13 + $0x98] sm:$0xf] %v315_v38  ;;  %v319_v40 = vld [vmem:[%s1241_s12 + $0x140] sm:$0xf]  ;;  %v321_v41 = vld [vmem:[%s1241_s12 + $0x148] sm:$0xf] }
  0x31   : > { %318 = vst [vmem:[%s1246_s13 + $0x9c] sm:$0xf] %v317_v39  ;;  %320 = vst [vmem:[%s1246_s13 + $0xa0] sm:$0xf] %v319_v40  ;;  %v323_v42 = vld [vmem:[%s1241_s12 + $0x150] sm:$0xf] }
  0x32   : > { %322 = vst [vmem:[%s1246_s13 + $0xa4] sm:$0xf] %v321_v41  ;;  %v325_v43 = vld [vmem:[%s1241_s12 + $0x158] sm:$0xf]  ;;  %v327_v44 = vld [vmem:[%s1241_s12 + $0x160] sm:$0xf] }
  0x33   : > { %324 = vst [vmem:[%s1246_s13 + $0xa8] sm:$0xf] %v323_v42  ;;  %326 = vst [vmem:[%s1246_s13 + $0xac] sm:$0xf] %v325_v43  ;;  %v329_v45 = vld [vmem:[%s1241_s12 + $0x168] sm:$0xf] }
  0x34   : > { %328 = vst [vmem:[%s1246_s13 + $0xb0] sm:$0xf] %v327_v44  ;;  %v331_v46 = vld [vmem:[%s1241_s12 + $0x170] sm:$0xf]  ;;  %v333_v47 = vld [vmem:[%s1241_s12 + $0x178] sm:$0xf] }
  0x35   : > { %330 = vst [vmem:[%s1246_s13 + $0xb4] sm:$0xf] %v329_v45  ;;  %332 = vst [vmem:[%s1246_s13 + $0xb8] sm:$0xf] %v331_v46  ;;  %v335_v48 = vld [vmem:[%s1241_s12 + $0x180] sm:$0xf] }
  0x36   : > { %334 = vst [vmem:[%s1246_s13 + $0xbc] sm:$0xf] %v333_v47  ;;  %336 = vst [vmem:[%s1246_s13 + $0xc0] sm:$0xf] %v335_v48 }
  0x37 PF: > { %p950_p7 = scmp.ge.s32.totalorder %s1147_s23, 1  ;;  %p457_p8 = scmp.lt.s32.totalorder %s1147_s23, 9 }
  0x39   : > { %p458_p9 = pnand %p950_p7, %p457_p8 }
  0x3a   : > { %s464_s14 = sand.u32 (!%p458_p9), 1, %s1123_s18   ;;  %p510_p10 = scmp.lt.s32.totalorder (!%p458_p9), %s1135_s21, 3 }
  0x3b   : > { %461 = sbr.rel (%p458_p9) target bundleno = 316 (0x13c), region = 77  ;;  %p512_p11 = scmp.lt.s32.totalorder (!%p458_p9), %s1131_s20, 1 }
  0x3c   : > { %s1005_s17 = smul.u32 (!%p458_p9), 196, %s464_s14 }
  0x3e   : > { %s1354_s18 = scalar_lea.vmem (!%p458_p9), [#allocation2], %s1005_s17 }
  0x40   : > { %v519_v49 = vld [vmem:[%s1417_s0] sm:$0xff]  ;;  %v580_v50 = vlaneseq  ;;  %v1149_v51 = vmov 0   ;;  %v1150_v52 = vmov 1983009808   ;;  %v1068_v62 = vld [vmem:[%s1354_s18 + $0x70] sm:$0xff]   ;;  %v1071_v5 = vld [vmem:[%s1354_s18 + $0x68] sm:$0xff]  }
  0x41   : > { %791 = vmatprep.subr.bf16.mxu1 %v1149_v51  ;;  %v578_v53 = vunpack.c.l.s4 %v1150_v52  ;;  %1064 = vset.pattern.permute.xlu0 %v1149_v51  ;;  %v569_v54 = vld [vmem:[%s1418_s1] sm:$0x7]  ;;  %v576_v56 = vcombine.high %v519_v49, %v519_v49  ;;  %v1069_v1 = vld [vmem:[%s1354_s18 + $0xb0] sm:$0xff]   ;;  %vm743_vm0 = vcmask 64512   ;;  %v1072_v6 = vld [vmem:[%s1354_s18 + $0xa8] sm:$0xff]   ;;  %vm747_vm1 = vcmask 1043456  }
  0x42   : > { %v581_v55 = vshrl.u32 %v580_v50, 7  ;;  %572 = vperm.xlu0 %1064, %v569_v54   ;;  %v1065_v58 = vld [vmem:[%s1354_s18 + $0x78] sm:$0xff]   ;;  %v1070_v2 = vld [vmem:[%s1354_s18 + $0x30] sm:$0xff]   ;;  %v1073_v7 = vld [vmem:[%s1354_s18 + $0x28] sm:$0xff]   ;;  %s1436_s21 = smov (!%p510_p10, %s1135_s21), 3  ;;  %s1438_s20 = smov (!%p512_p11, %s1131_s20), 1 }
  0x43   : > { %v579_v57 = vunpack.c.0.s8 %v578_v53  ;;  %v1066_v59 = vld [vmem:[%s1354_s18 + $0xb8] sm:$0xff]   ;;  %981 = vmatprep.subr.bf16.mxu0 %v1065_v58  ;;  %v1074_v8 = vld [vmem:[%s1354_s18 + $0x60] sm:$0xff]   ;;  %v1080_v14 = vld [vmem:[%s1354_s18 + $0x50] sm:$0xff]   ;;  %s951_s27 = sshll.u32 %s1436_s21, 1 }
  0x44   : > { %v1067_v61 = vld [vmem:[%s1354_s18 + $0x38] sm:$0xff]   ;;  %792 = vmatpush1.bf16.msra.mxu1 %v1066_v59  ;;  %v1075_v9 = vld [vmem:[%s1354_s18 + $0xa0] sm:$0xff]   ;;  %v1081_v15 = vld [vmem:[%s1354_s18 + $0x90] sm:$0xff]   ;;  %s515_s28 = sadd.s32 %s951_s27, %s1438_s20 }
  0x45   : > { %v582_v60 = vsub.s32 %v579_v57, %v581_v55  ;;  %982 = vmatpush3.bf16.msra.mxu0 %v1067_v61  ;;  %793 = vmatprep.subr.bf16.mxu1 %v1149_v51  ;;  %v1076_v10 = vld [vmem:[%s1354_s18 + $0x20] sm:$0xff]   ;;  %v1077_v11 = vld [vmem:[%s1354_s18 + $0x58] sm:$0xff]   ;;  %v1082_v16 = vld [vmem:[%s1354_s18 + $0x10] sm:$0xff]   ;;  %s952_s30 = sshll.u32 %s515_s28, 2 }
  0x46   : > { %983 = vmatprep.subr.bf16.mxu0 %v1068_v62  ;;  %v1078_v12 = vld [vmem:[%s1354_s18 + $0x98] sm:$0xff]   ;;  %v1083_v17 = vld [vmem:[%s1354_s18 + $0x48] sm:$0xff]   ;;  %v1086_v20 = vld [vmem:[%s1354_s18 + $0x40] sm:$0xff]   ;;  %s517_s8 = scalar_lea.vmem %s1422_s5, %s952_s30 }
  0x47   : > { %v583_v63 = vrot.slane %v519_v49, %v582_v60  ;;  %v590_v0 = vrot.slane %v576_v56, %v582_v60  ;;  %v1079_v13 = vld [vmem:[%s1354_s18 + $0x18] sm:$0xff]   ;;  %v1084_v18 = vld [vmem:[%s1354_s18 + $0x88] sm:$0xff]   ;;  %v1087_v21 = vld [vmem:[%s1354_s18 + $0x80] sm:$0xff]  }
  0x48   : > { %794 = vmatpush1.bf16.msra.mxu1 %v1069_v1  ;;  %v1085_v19 = vld [vmem:[%s1354_s18 + $0x8] sm:$0xff]   ;;  %v1088_v22 = vld [vmem:[%s1354_s18] sm:$0xff]  }
  0x49   : > { %v591_v3 = vcombine.high %v583_v63, %v583_v63  ;;  %v592_v4 = vcombine.high %v590_v0, %v590_v0  ;;  %984 = vmatpush3.bf16.msra.mxu0 %v1070_v2  ;;  %795 = vmatprep.subr.bf16.mxu1 %v1149_v51  ;;  %v1090_v23 = vld [vmem:[%s1354_s18 + $0xc0] ss:$0 sps:$4 sm:$0xff]  }
  0x4a   : > { %985 = vmatprep.subr.bf16.mxu0 %v1071_v5  ;;  %v749_v24 = vsel %vm747_vm1, %v1090_v23, 0 }
  0x4b   : > { %783 = vmatprep.mubr.bf16.mxu0 %v591_v3  ;;  %978 = vmatprep.mubr.msk.bf16.mxu1 %vm743_vm0, %v592_v4 }
  0x4c   : > { %796 = vmatpush1.bf16.msra.mxu1 %v1072_v6 }
  0x4d   : > { %986 = vmatpush3.bf16.msra.mxu0 %v1073_v7  ;;  %797 = vmatprep.subr.bf16.mxu1 %v1149_v51 }
  0x4e   : > { %987 = vmatprep.subr.bf16.mxu0 %v1074_v8 }
  0x50   : > { %798 = vmatpush1.bf16.msra.mxu1 %v1075_v9 }
  0x51   : > { %988 = vmatpush3.bf16.msra.mxu0 %v1076_v10  ;;  %799 = vmatprep.subr.bf16.mxu1 %v1149_v51 }
  0x52   : > { %989 = vmatprep.subr.bf16.mxu0 %v1077_v11 }
  0x54   : > { %800 = vmatpush1.bf16.msra.mxu1 %v1078_v12 }
  0x55   : > { %990 = vmatpush3.bf16.msra.mxu0 %v1079_v13  ;;  %801 = vmatprep.subr.bf16.mxu1 %v1149_v51 }
  0x56   : > { %991 = vmatprep.subr.bf16.mxu0 %v1080_v14 }
  0x58   : > { %802 = vmatpush1.bf16.msra.mxu1 %v1081_v15 }
  0x59   : > { %992 = vmatpush3.bf16.msra.mxu0 %v1082_v16  ;;  %803 = vmatprep.subr.bf16.mxu1 %v1149_v51 }
  0x5a   : > { %993 = vmatprep.subr.bf16.mxu0 %v1083_v17 }
  0x5c   : > { %804 = vmatpush1.bf16.msra.mxu1 %v1084_v18 }
  0x5d   : > { %994 = vmatpush3.bf16.msra.mxu0 %v1085_v19  ;;  %805 = vmatprep.subr.bf16.mxu1 %v1149_v51 }
  0x5e   : > { %995 = vmatprep.subr.bf16.mxu0 %v1086_v20 }
  0x60   : > { %806 = vmatpush1.bf16.msra.mxu1 %v1087_v21 }
  0x61   : > { %996 = vmatpush3.bf16.msra.mxu0 %v1088_v22  ;;  %821 = vmatprep.subr.bf16.mxu1 %v1149_v51 }
  0x64   : > { %784 = vmatmul.mubr.bf16.vlgmr.msra.gmra.mxu0 %v583_v63  ;;  %822 = vmatpush2.bf16.msra.mxu1 %v749_v24 }
  0x67   : > { %824 = vmatmul.mubr.bf16.vlgmr.msra.gmra.mxu1 %v590_v0 }
  0xbd   : > { %v573_v27 = vpop.permute.xlu0 %572 }
 0x124   : > { %v997_v25 = vpop.f32.mrf.mxu0 }
 0x126   : > { %v998_v26 = vpop.f32.mrf.mxu0 }
 0x127   : > { %v999_v28 = vadd.f32 %v998_v26, %v997_v25  ;;  %v825_v29 = vpop.f32.mrf.mxu1 }
 0x128   : > { %v1000_v30 = vpop.f32.mrf.mxu0 }
 0x129   : > { %v786_v31 = vadd.f32 %v999_v28, %v573_v27  ;;  %v827_v32 = vpop.f32.mrf.mxu1 }
 0x12a   : > { %v1001_v33 = vpop.f32.mrf.mxu0 }
 0x12b   : > { %v826_v34 = vadd.f32 %v825_v29, %v786_v31  ;;  %v828_v35 = vpop.f32.mrf.mxu1 }
 0x12d   : > { %1091 = vtanh.f32 %v826_v34  ;;  %v829_v36 = vpop.f32.mrf.mxu1 }
 0x13a   : > { %v1092_v37 = vpop.eup %1091 }
 0x13b   : > { %832 = vst [vmem:[%s517_s8] sm:$0x7] %v1092_v37 }
 0x13c PF: > { %s15_s23 = sadd.s32 1, %s1147_s23   ;;  %s1423_s18 = smov %s1127_s19 }
 0x13d   : > { %p12_p12 = scmp.ge.s32.totalorder %s15_s23, 10   ;;  %s1424_s19 = smov %s1232_s29 }
 0x13e   : > { %s1425_s20 = smov %s1139_s22  ;;  %s1426_s21 = smov %s1143_s2 }
 0x13f   : > { %s1427_s22 = smov %s1430_s3  ;;  %s1428_s2 = smov %s1434_s24 }
 0x140   :  { %14 = sbr.rel (!%p12_p12) target bundleno = 4 (0x4), region = 122 }

// kernel: _lambda_.40
= control target key start
LH: loop header
LB: loop body
LE: loop exit
PB: predicated region body
PF: predicated region fallthrough
CT: control target
= control target key end

     0   :  { %s840_s18 = smov 0   ;;  %s842_s19 = smov 0   ;;  %s991_s0 = inlined_call_operand.vmem [shape: bf16[8,147], index: 0, kind: input, shape index: {}]   ;;  %s992_s1 = inlined_call_operand.vmem [shape: f32[8,1], index: 1, kind: input, shape index: {}]   ;;  %s993_s2 = inlined_call_operand.vmem [shape: f32[8,8,1], index: 2, kind: input, shape index: {}]   ;;  %s994_s3 = inlined_call_operand.vmem [shape: f32[8,8,1], index: 3, kind: input, shape index: {}]   ;;  %s995_s4 = inlined_call_operand.vmem [shape: bf16[8,147,256], index: 4, kind: input, shape index: {}]   ;;  %s996_s5 = inlined_call_operand.vmem [shape: f32[8,8,256], index: 5, kind: output, shape index: {}]  }
   0x1   :  { %s844_s20 = smov 0   ;;  %s846_s21 = smov 0  }
   0x2   :  { %s848_s22 = smov 0   ;;  %s850_s2 = smov 0  }
   0x3   :  { %s852_s23 = smov 0  }
   0x4 LB: > { %s24_s3 = sadd.s32 1, %s798_s22  ;;  %s27_s24 = sadd.s32 1, %s802_s2  ;;  %s806_s23 = sphi %s852_s23, %s15_s23   ;;  %s802_s2 = sphi %s850_s2, %s1002_s2   ;;  %s798_s22 = sphi %s848_s22, %s1001_s22   ;;  %s794_s21 = sphi %s846_s21, %s1000_s21   ;;  %s790_s20 = sphi %s844_s20, %s999_s20   ;;  %s786_s19 = sphi %s842_s19, %s998_s19   ;;  %s782_s18 = sphi %s840_s18, %s997_s18  }
   0x5   : > { %p25_p0 = scmp.ge.s32.totalorder %s24_s3, 2  ;;  %p137_p1 = scmp.ne.s32.totalorder %s786_s19, %s782_s18 }
   0x6   : > { %p138_p2 = scmp.eq.s32.totalorder %s806_s23, 0  ;;  %s130_s28 = sadd.s32 1, %s786_s19 }
   0x7   : > { %s1004_s3 = smov (%p25_p0, %s24_s3), 0  ;;  %s1006_s24 = smov (!%p25_p0, %s27_s24), %s802_s2 }
   0x8   : > { %p139_p3 = por %p138_p2, %p137_p1  ;;  %p29_p4 = scmp.ge.s32.totalorder %s1006_s24, 8 }
   0x9   : > { %s126_s25 = ssub.s32 %s798_s22, %s1004_s3  ;;  %p658_p6 = scmp.ge.s32.totalorder %s806_s23, 16 }
   0xa   : > { %s1008_s24 = smov (%p29_p4, %s1006_s24), 0 }
   0xb   : > { %s125_s26 = ssub.s32 %s802_s2, %s1008_s24  ;;  %197 = sbr.rel (%p658_p6) target bundleno = 35 (0x23), region = 24 }
   0xc   : > { %s127_s27 = sor.u32 %s126_s25, %s125_s26 }
   0xd   : > { %p128_p5 = scmp.eq.s32.totalorder %s127_s27, 0 }
   0xf   : > { %s891_s29 = scalar_select %p128_p5, %s786_s19, %s130_s28  }
  0x10   : > { %214 = sbr.rel (!%p139_p3) target bundleno = 35 (0x23), region = 36  ;;  %s216_s30 = sand.u32 (%p139_p3), 1, %s786_s19  }
  0x11   : > { %s679_s6 = smul.u32 (%p139_p3), 38, %s802_s2 }
  0x12   : > { %s678_s7 = smul.u32 (%p139_p3), 76, %s216_s30 }
  0x13   : > { %s220_s8 = sadd.s32 (%p139_p3), %s798_s22, %s679_s6 }
  0x14   : > { %s659_s9 = sshll.u32 (%p139_p3), %s220_s8, 2  ;;  %s905_s13 = scalar_lea.vmem (%p139_p3), [#allocation2], %s678_s7 }
  0x15   : > { %s900_s12 = scalar_lea.vmem %s995_s4, %s659_s9 }
  0x16   : > { %v239_v0 = vld [vmem:[%s900_s12] sm:$0xf]  ;;  %v241_v1 = vld [vmem:[%s900_s12 + $0x8] sm:$0xf]  ;;  %v243_v2 = vld [vmem:[%s900_s12 + $0x10] sm:$0xf] }
  0x17   : > { %240 = vst [vmem:[%s905_s13] sm:$0xf] %v239_v0  ;;  %242 = vst [vmem:[%s905_s13 + $0x4] sm:$0xf] %v241_v1  ;;  %v245_v3 = vld [vmem:[%s900_s12 + $0x18] sm:$0xf] }
  0x18   : > { %244 = vst [vmem:[%s905_s13 + $0x8] sm:$0xf] %v243_v2  ;;  %v247_v4 = vld [vmem:[%s900_s12 + $0x20] sm:$0xf]  ;;  %v249_v5 = vld [vmem:[%s900_s12 + $0x28] sm:$0xf] }
  0x19   : > { %246 = vst [vmem:[%s905_s13 + $0xc] sm:$0xf] %v245_v3  ;;  %248 = vst [vmem:[%s905_s13 + $0x10] sm:$0xf] %v247_v4  ;;  %v251_v6 = vld [vmem:[%s900_s12 + $0x30] sm:$0xf] }
  0x1a   : > { %250 = vst [vmem:[%s905_s13 + $0x14] sm:$0xf] %v249_v5  ;;  %v253_v7 = vld [vmem:[%s900_s12 + $0x38] sm:$0xf]  ;;  %v255_v8 = vld [vmem:[%s900_s12 + $0x40] sm:$0xf] }
  0x1b   : > { %252 = vst [vmem:[%s905_s13 + $0x18] sm:$0xf] %v251_v6  ;;  %254 = vst [vmem:[%s905_s13 + $0x1c] sm:$0xf] %v253_v7  ;;  %v257_v9 = vld [vmem:[%s900_s12 + $0x48] sm:$0xf] }
  0x1c   : > { %256 = vst [vmem:[%s905_s13 + $0x20] sm:$0xf] %v255_v8  ;;  %v259_v10 = vld [vmem:[%s900_s12 + $0x50] sm:$0xf]  ;;  %v261_v11 = vld [vmem:[%s900_s12 + $0x58] sm:$0xf] }
  0x1d   : > { %258 = vst [vmem:[%s905_s13 + $0x24] sm:$0xf] %v257_v9  ;;  %260 = vst [vmem:[%s905_s13 + $0x28] sm:$0xf] %v259_v10  ;;  %v263_v12 = vld [vmem:[%s900_s12 + $0x60] sm:$0xf] }
  0x1e   : > { %262 = vst [vmem:[%s905_s13 + $0x2c] sm:$0xf] %v261_v11  ;;  %v265_v13 = vld [vmem:[%s900_s12 + $0x68] sm:$0xf]  ;;  %v267_v14 = vld [vmem:[%s900_s12 + $0x70] sm:$0xf] }
  0x1f   : > { %264 = vst [vmem:[%s905_s13 + $0x30] sm:$0xf] %v263_v12  ;;  %266 = vst [vmem:[%s905_s13 + $0x34] sm:$0xf] %v265_v13  ;;  %v269_v15 = vld [vmem:[%s900_s12 + $0x78] sm:$0xf] }
  0x20   : > { %268 = vst [vmem:[%s905_s13 + $0x38] sm:$0xf] %v267_v14  ;;  %v271_v16 = vld [vmem:[%s900_s12 + $0x80] sm:$0xf]  ;;  %v273_v17 = vld [vmem:[%s900_s12 + $0x88] sm:$0xf] }
  0x21   : > { %270 = vst [vmem:[%s905_s13 + $0x3c] sm:$0xf] %v269_v15  ;;  %272 = vst [vmem:[%s905_s13 + $0x40] sm:$0xf] %v271_v16  ;;  %v275_v18 = vld [vmem:[%s900_s12 + $0x90] sm:$0xf] }
  0x22   : > { %274 = vst [vmem:[%s905_s13 + $0x44] sm:$0xf] %v273_v17  ;;  %276 = vst [vmem:[%s905_s13 + $0x48] sm:$0xf] %v275_v18 }
  0x23 PF: > { %p660_p7 = scmp.ge.s32.totalorder %s806_s23, 1  ;;  %p337_p8 = scmp.lt.s32.totalorder %s806_s23, 17 }
  0x25   : > { %p338_p9 = pnand %p660_p7, %p337_p8 }
  0x26   : > { %s344_s14 = sand.u32 (!%p338_p9), 1, %s782_s18   ;;  %p390_p10 = scmp.lt.s32.totalorder (!%p338_p9), %s794_s21, 7 }
  0x27   : > { %341 = sbr.rel (%p338_p9) target bundleno = 285 (0x11d), region = 77  ;;  %p392_p11 = scmp.lt.s32.totalorder (!%p338_p9), %s790_s20, 1 }
  0x28   : > { %s680_s17 = smul.u32 (!%p338_p9), 76, %s344_s14 }
  0x2a   : > { %s951_s27 = scalar_lea.vmem (!%p338_p9), [#allocation2], %s680_s17 }
  0x2c   : > { %v399_v19 = vld [vmem:[%s991_s0] sm:$0xff]  ;;  %v808_v20 = vmov 0   ;;  %vm488_vm0 = vcmask 154624   ;;  %v742_v25 = vld [vmem:[%s951_s27 + $0x28] sm:$0xff]   ;;  %vm492_vm1 = vcmask 1040384   ;;  %vm493_vm2 = vcmask 1041408  }
  0x2d   : > { %499 = vmatprep.subr.bf16.mxu0 %v808_v20  ;;  %v664_v21 = vcombine.high %v399_v19, %v399_v19  ;;  %739 = vset.pattern.permute.xlu0 %v808_v20  ;;  %v419_v22 = vld [vmem:[%s992_s1] sm:$0xff]  ;;  %v746_v29 = vld [vmem:[%s951_s27 + $0x8] sm:$0xff]   ;;  %v809_v30 = vmov 65535   ;;  %v663_v37 = vcombine.low %v399_v19, %v399_v19  ;;  %s1010_s21 = smov (!%p390_p10, %s794_s21), 7  ;;  %s1012_s20 = smov (!%p392_p11, %s790_s20), 1 }
  0x2e   : > { %422 = vperm.xlu0 %739, %v419_v22   ;;  %v740_v23 = vld [vmem:[%s951_s27 + $0x38] sm:$0xff]   ;;  %v741_v24 = vld [vmem:[%s951_s27 + $0x30] sm:$0xff]   ;;  %v743_v26 = vld [vmem:[%s951_s27 + $0x20] sm:$0xff]   ;;  %v494_v31 = vsel %vm492_vm1, 4294967295, %v809_v30  ;;  %s661_s18 = sshll.u32 %s1010_s21, 1 }
  0x2f   : > { %675 = vmatprep.mubr.msk.bf16.mxu0 %vm488_vm0, %v664_v21  ;;  %500 = vmatpush1.bf16.msra.mxu0 %v740_v23  ;;  %v744_v27 = vld [vmem:[%s951_s27 + $0x18] sm:$0xff]   ;;  %v745_v28 = vld [vmem:[%s951_s27 + $0x10] sm:$0xff]   ;;  %v747_v32 = vld [vmem:[%s951_s27] sm:$0xff]   ;;  %v495_v34 = vsel %vm493_vm2, %v494_v31, 0  ;;  %s395_s28 = sadd.s32 %s661_s18, %s1012_s20 }
  0x30   : > { %501 = vmatprep.subr.bf16.mxu0 %v808_v20  ;;  %v748_v33 = vld [vmem:[%s951_s27 + $0x48] ss:$0 sps:$4 sm:$0x33]   ;;  %v749_v36 = vld [vmem:[%s951_s27 + $0x40] sm:$0xff]   ;;  %s662_s30 = sshll.u32 %s395_s28, 3 }
  0x31   : > { %v497_v35 = vand.u32 %v748_v33, %v495_v34  ;;  %s397_s8 = scalar_lea.vmem %s996_s5, %s662_s30 }
  0x33   : > { %502 = vmatpush1.bf16.msra.mxu0 %v741_v24 }
  0x34   : > { %503 = vmatprep.subr.bf16.mxu0 %v808_v20 }
  0x37   : > { %504 = vmatpush1.bf16.msra.mxu0 %v742_v25 }
  0x38   : > { %505 = vmatprep.subr.bf16.mxu0 %v808_v20 }
  0x3b   : > { %506 = vmatpush1.bf16.msra.mxu0 %v743_v26 }
  0x3c   : > { %507 = vmatprep.subr.bf16.mxu0 %v808_v20 }
  0x3f   : > { %508 = vmatpush1.bf16.msra.mxu0 %v744_v27 }
  0x40   : > { %509 = vmatprep.subr.bf16.mxu0 %v808_v20 }
  0x43   : > { %510 = vmatpush1.bf16.msra.mxu0 %v745_v28 }
  0x44   : > { %511 = vmatprep.subr.bf16.mxu0 %v808_v20 }
  0x47   : > { %512 = vmatpush1.bf16.msra.mxu0 %v746_v29 }
  0x48   : > { %513 = vmatprep.subr.bf16.mxu0 %v808_v20 }
  0x4b   : > { %514 = vmatpush1.bf16.msra.mxu0 %v747_v32 }
  0x4c   : > { %527 = vmatprep.subr.bf16.mxu0 %v808_v20 }
  0x4f   : > { %528 = vmatpush2.bf16.msra.mxu0 %v497_v35 }
  0x50   : > { %529 = vmatprep.subr.bf16.mxu0 %v808_v20 }
  0x53   : > { %530 = vmatpush2.bf16.msra.mxu0 %v749_v36 }
  0x56   : > { %532 = vmatmul.mubr.bf16.vlgmr.msra.gmra.mxu0 %v663_v37 }
  0xa9   : > { %v423_v38 = vpop.permute.xlu0 %422 }
 0x116   : > { %v533_v39 = vpop.f32.mrf.mxu0 }
 0x117   : > { %v534_v40 = vadd.f32 %v533_v39, %v423_v38 }
 0x118   : > { %v535_v41 = vpop.f32.mrf.mxu0 }
 0x119   : > { %vm539_vm3 = vcmp.ge.f32.partialorder %v534_v40, 0.0  ;;  %v540_v42 = vmul.f32 0.2, %v534_v40 }
 0x11a   : > { %v536_v43 = vpop.f32.mrf.mxu0 }
 0x11b   : > { %v541_v44 = vsel %vm539_vm3, %v534_v40, %v540_v42 }
 0x11c   : > { %542 = vst [vmem:[%s397_s8] sm:$0xff] %v541_v44  ;;  %v537_v45 = vpop.f32.mrf.mxu0 }
 0x11d PF: > { %s15_s23 = sadd.s32 1, %s806_s23   ;;  %s997_s18 = smov %s786_s19 }
 0x11e   : > { %p12_p12 = scmp.ge.s32.totalorder %s15_s23, 18   ;;  %s998_s19 = smov %s891_s29 }
 0x11f   : > { %s999_s20 = smov %s798_s22  ;;  %s1000_s21 = smov %s802_s2 }
 0x120   : > { %s1001_s22 = smov %s1004_s3  ;;  %s1002_s2 = smov %s1008_s24 }
 0x121   :  { %14 = sbr.rel (!%p12_p12) target bundleno = 4 (0x4), region = 122 }

// kernel: _lambda_.41
= control target key start
LH: loop header
LB: loop body
LE: loop exit
PB: predicated region body
PF: predicated region fallthrough
CT: control target
= control target key end

     0   :  { %s683_s18 = smov 0   ;;  %s685_s19 = smov 0   ;;  %s729_s0 = inlined_call_operand.vmem [shape: bf16[16,128], index: 0, kind: input, shape index: {}]   ;;  %s730_s1 = inlined_call_operand.vmem [shape: f32[16,1], index: 1, kind: input, shape index: {}]   ;;  %s731_s2 = inlined_call_operand.vmem [shape: f32[8,16,1], index: 2, kind: input, shape index: {}]   ;;  %s732_s3 = inlined_call_operand.vmem [shape: f32[8,16,1], index: 3, kind: input, shape index: {}]   ;;  %s733_s4 = inlined_call_operand.vmem [shape: bf16[8,128,64], index: 4, kind: input, shape index: {}]   ;;  %s734_s5 = inlined_call_operand.vmem [shape: f32[8,16,64], index: 5, kind: output, shape index: {}]  }
   0x1   :  { %s687_s20 = smov 0  }
   0x2 LB: > { %s27_s2 = sadd.s32 1, %s644_s19  ;;  %p542_p0 = scmp.ge.s32.totalorder %s648_s20, 1  ;;  %s648_s20 = sphi %s687_s20, %s15_s20   ;;  %s644_s19 = sphi %s685_s19, %s736_s19   ;;  %s640_s18 = sphi %s683_s18, %s735_s18  }
   0x3   : > { %p29_p1 = scmp.ge.s32.totalorder %s27_s2, 8  ;;  %p226_p2 = scmp.lt.s32.totalorder %s648_s20, 9 }
   0x5   : > { %s738_s2 = smov (%p29_p1, %s27_s2), 0  ;;  %p227_p3 = pnand %p542_p0, %p226_p2 }
   0x6   : > { %p280_p4 = scmp.lt.s32.totalorder (!%p227_p3), %s640_s18, 7 }
   0x7   : > { %230 = sbr.rel (%p227_p3) target bundleno = 250 (0xfa), region = 40 }
   0xc   : > { %v650_v0 = vmov 0.0   ;;  %vm651_vm0 = vmmov 0   ;;  %v315_v1 = vld [vmem:[%s730_s1] sm:$0xff]  ;;  %s740_s18 = smov (!%p280_p4, %s640_s18), 7  ;;  %v652_v2 = vmov 0   ;;  %v316_v3 = vld [vmem:[%s730_s1 + $0x8] sm:$0xff] }
   0xd   : > { %569 = vmatprep.subr.bf16.mxu0 %v650_v0  ;;  %585 = vmatprep.mubr.msk.bf16.mxu0 %vm651_vm0, %v650_v0  ;;  %s558_s22 = sshll.u32 %s740_s18, 6  ;;  %v625_v12 = vld [vmem:[%s729_s0] sm:$0xff]   ;;  %s559_s30 = sshll.u32 %s740_s18, 4  ;;  %vm428_vm2 = vcmask 523264  }
   0xe   : > { %616 = vset.pattern.permute.xlu0 %v652_v2  ;;  %s287_s27 = scalar_lea.vmem %s733_s4, %s558_s22  ;;  %s295_s8 = scalar_lea.vmem %s734_s5, %s559_s30 }
   0xf   : > { %319 = vperm.xlu0 %616, %v315_v1   ;;  %v617_v4 = vld [vmem:[%s287_s27 + $0x38] sm:$0xff]   ;;  %v618_v5 = vld [vmem:[%s287_s27 + $0x30] sm:$0xff]   ;;  %v619_v6 = vld [vmem:[%s287_s27 + $0x28] sm:$0xff]  }
  0x10   : > { %570 = vmatpush3.bf16.msra.mxu0 %v617_v4  ;;  %v620_v7 = vld [vmem:[%s287_s27 + $0x20] sm:$0xff]   ;;  %v621_v8 = vld [vmem:[%s287_s27 + $0x18] sm:$0xff]   ;;  %v622_v9 = vld [vmem:[%s287_s27 + $0x10] sm:$0xff]  }
  0x11   : > { %571 = vmatprep.subr.bf16.mxu0 %v650_v0  ;;  %v623_v10 = vld [vmem:[%s287_s27 + $0x8] sm:$0xff]   ;;  %v624_v11 = vld [vmem:[%s287_s27] sm:$0xff]  }
  0x13   : > { %324 = vperm.xlu0 %616, %v316_v3  }
  0x14   : > { %572 = vmatpush3.bf16.msra.mxu0 %v618_v5 }
  0x15   : > { %573 = vmatprep.subr.bf16.mxu0 %v650_v0 }
  0x18   : > { %574 = vmatpush3.bf16.msra.mxu0 %v619_v6 }
  0x19   : > { %575 = vmatprep.subr.bf16.mxu0 %v650_v0 }
  0x1c   : > { %576 = vmatpush3.bf16.msra.mxu0 %v620_v7 }
  0x1d   : > { %577 = vmatprep.subr.bf16.mxu0 %v650_v0 }
  0x20   : > { %578 = vmatpush3.bf16.msra.mxu0 %v621_v8 }
  0x21   : > { %579 = vmatprep.subr.bf16.mxu0 %v650_v0 }
  0x24   : > { %580 = vmatpush3.bf16.msra.mxu0 %v622_v9 }
  0x25   : > { %581 = vmatprep.subr.bf16.mxu0 %v650_v0 }
  0x28   : > { %582 = vmatpush3.bf16.msra.mxu0 %v623_v10 }
  0x29   : > { %583 = vmatprep.subr.bf16.mxu0 %v650_v0 }
  0x2c   : > { %584 = vmatpush3.bf16.msra.mxu0 %v624_v11 }
  0x2f   : > { %586 = vmatmul.mubr.bf16.vlgmr.msra.gmra.mxu0 %v625_v12 }
  0x8a   : > { %v320_v13 = vpop.permute.xlu0 %319 }
  0x8e   : > { %v325_v18 = vpop.permute.xlu0 %324 }
  0xef   : > { %v415_v14 = vpop.f32.mrf.mxu0 }
  0xf0   : > { %v416_v15 = vadd.f32 %v415_v14, %v320_v13 }
  0xf1   : > { %v587_v16 = vpop.f32.mrf.mxu0 }
  0xf2   : > { %vm422_vm1 = vcmp.ge.f32.partialorder %v416_v15, 0.0  ;;  %v424_v17 = vmul.f32 0.2, %v416_v15 }
  0xf3   : > { %v418_v19 = vpop.f32.mrf.mxu0 }
  0xf4   : > { %v426_v20 = vsel %vm422_vm1, %v416_v15, %v424_v17  ;;  %v419_v21 = vadd.f32 %v418_v19, %v325_v18 }
  0xf5   : > { %429 = vst.msk [vmem:[%s295_s8] sm:$0xff] %vm428_vm2, %v426_v20  ;;  %v588_v22 = vpop.f32.mrf.mxu0 }
  0xf6   : > { %vm423_vm3 = vcmp.ge.f32.partialorder %v419_v21, 0.0  ;;  %v425_v23 = vmul.f32 0.2, %v419_v21 }
  0xf8   : > { %v427_v24 = vsel %vm423_vm3, %v419_v21, %v425_v23 }
  0xf9   : > { %430 = vst.msk [vmem:[%s295_s8 + $0x8] sm:$0xff] %vm428_vm2, %v427_v24 }
  0xfa PF: > { %s15_s20 = sadd.s32 1, %s648_s20   ;;  %s735_s18 = smov %s644_s19 }
  0xfb   : > { %p12_p5 = scmp.ge.s32.totalorder %s15_s20, 10   ;;  %s736_s19 = smov %s738_s2 }
  0xfd   :  { %14 = sbr.rel (!%p12_p5) target bundleno = 2 (0x2), region = 76 }

// kernel: _lambda_.42
= control target key start
LH: loop header
LB: loop body
LE: loop exit
PB: predicated region body
PF: predicated region fallthrough
CT: control target
= control target key end

     0   :  { %s930_s21 = smov 0   ;;  %s932_s22 = smov 0   ;;  %s1024_s0 = inlined_call_operand.vmem [shape: bf16[32,256], index: 0, kind: input, shape index: {}]   ;;  %s1025_s1 = inlined_call_operand.vmem [shape: f32[32,1], index: 1, kind: input, shape index: {}]   ;;  %s1026_s2 = inlined_call_operand.vmem [shape: f32[8,32,1], index: 2, kind: input, shape index: {}]   ;;  %s1027_s3 = inlined_call_operand.vmem [shape: f32[8,32,1], index: 3, kind: input, shape index: {}]   ;;  %s1028_s4 = inlined_call_operand.vmem [shape: bf16[8,256,16], index: 4, kind: input, shape index: {}]   ;;  %s1029_s5 = inlined_call_operand.vmem [shape: f32[8,32,16], index: 5, kind: output, shape index: {0}]   ;;  %s1030_s6 = inlined_call_operand.vmem [shape: f32[8,32,1], index: 6, kind: output, shape index: {1}]  }
   0x1   :  { %s934_s23 = smov 0  }
   0x2 LB: > { %s29_s2 = sadd.s32 1, %s888_s22  ;;  %p745_p0 = scmp.ge.s32.totalorder %s892_s23, 1  ;;  %s892_s23 = sphi %s934_s23, %s17_s23   ;;  %s888_s22 = sphi %s932_s22, %s1032_s22   ;;  %s884_s21 = sphi %s930_s21, %s1031_s21  }
   0x3   : > { %p31_p1 = scmp.ge.s32.totalorder %s29_s2, 8  ;;  %p254_p2 = scmp.lt.s32.totalorder %s892_s23, 9 }
   0x5   : > { %s1034_s2 = smov (%p31_p1, %s29_s2), 0  ;;  %p255_p3 = pnand %p745_p0, %p254_p2 }
   0x6   : > { %p315_p4 = scmp.lt.s32.totalorder (!%p255_p3), %s884_s21, 7 }
   0x7   : > { %258 = sbr.rel (%p255_p3) target bundleno = 401 (0x191), region = 40 }
   0xc   : > { %v866_v0 = vld [vmem:[%s1024_s0 + $0x4] ss:$8 sps:$4 sm:$0xff]   ;;  %v894_v1 = vmov 0   ;;  %s1036_s21 = smov (!%p315_p4, %s884_s21), 7  ;;  %v869_v2 = vld [vmem:[%s1024_s0 + $0x14] ss:$8 sps:$4 sm:$0xff]  }
   0xd   : > { %846 = vset.pattern.permute.xlu0 %v894_v1  ;;  %847 = vset.pattern.permute.xlu1 %v894_v1  ;;  %v373_v3 = vld [vmem:[%s1025_s1] sm:$0xff]  ;;  %v375_v4 = vld [vmem:[%s1025_s1 + $0x10] sm:$0xff]  ;;  %s774_s7 = sshll.u32 %s1036_s21, 7  ;;  %v374_v5 = vld [vmem:[%s1025_s1 + $0x8] sm:$0xff]  ;;  %s775_s19 = sshll.u32 %s1036_s21, 5  ;;  %vm574_vm0 = vcmask 130048  }
   0xe   : > { %545 = vmatprep.mubr.bf16.mxu0 %v866_v0  ;;  %379 = vperm.xlu0 %846, %v373_v3   ;;  %s969_s12 = scalar_lea.vmem %s1028_s4, %s774_s7  ;;  %v376_v7 = vld [vmem:[%s1025_s1 + $0x18] sm:$0xff]  ;;  %v864_v23 = vld [vmem:[%s1024_s0] ss:$8 sps:$4 sm:$0xff]   ;;  %s330_s24 = scalar_lea.vmem %s1029_s5, %s775_s19  ;;  %vm596_vm5 = vcmask 7168  }
   0xf   : > { %553 = vmatprep.mubr.bf16.mxu1 %v869_v2  ;;  %389 = vperm.xlu1 %847, %v375_v4   ;;  %v848_v6 = vld [vmem:[%s969_s12 + $0x78] sm:$0xff]   ;;  %v850_v9 = vld [vmem:[%s969_s12 + $0x70] sm:$0xff]   ;;  %v852_v11 = vld [vmem:[%s969_s12 + $0x68] sm:$0xff]   ;;  %s335_s27 = scalar_lea.vmem %s1030_s6, %s775_s19 }
  0x10   : > { %v849_v8 = vld [vmem:[%s969_s12 + $0x38] sm:$0xff]   ;;  %777 = vmatprep.subr.bf16.mxu0 %v848_v6  ;;  %805 = vmatprep.subr.bf16.mxu1 %v848_v6  ;;  %v851_v10 = vld [vmem:[%s969_s12 + $0x30] sm:$0xff]   ;;  %v853_v12 = vld [vmem:[%s969_s12 + $0x28] sm:$0xff]  }
  0x11   : > { %778 = vmatpush3.bf16.msra.mxu0 %v849_v8  ;;  %813 = vmatpush3.bf16.msra.mxu1 %v849_v8  ;;  %v854_v13 = vld [vmem:[%s969_s12 + $0x60] sm:$0xff]   ;;  %v856_v15 = vld [vmem:[%s969_s12 + $0x58] sm:$0xff]   ;;  %v858_v17 = vld [vmem:[%s969_s12 + $0x50] sm:$0xff]  }
  0x12   : > { %384 = vperm.xlu0 %846, %v374_v5   ;;  %779 = vmatprep.subr.bf16.mxu0 %v850_v9  ;;  %v855_v14 = vld [vmem:[%s969_s12 + $0x20] sm:$0xff]   ;;  %v857_v16 = vld [vmem:[%s969_s12 + $0x18] sm:$0xff]   ;;  %v859_v18 = vld [vmem:[%s969_s12 + $0x10] sm:$0xff]  }
  0x13   : > { %806 = vmatprep.subr.bf16.mxu1 %v850_v9  ;;  %394 = vperm.xlu1 %847, %v376_v7   ;;  %v860_v19 = vld [vmem:[%s969_s12 + $0x48] sm:$0xff]   ;;  %v862_v21 = vld [vmem:[%s969_s12 + $0x40] sm:$0xff]   ;;  %v867_v24 = vld [vmem:[%s1024_s0 + $0x10] ss:$8 sps:$4 sm:$0xff]  }
  0x14   : > { %v861_v20 = vld [vmem:[%s969_s12 + $0x8] sm:$0xff]   ;;  %v863_v22 = vld [vmem:[%s969_s12] sm:$0xff]  }
  0x15   : > { %780 = vmatpush3.bf16.msra.mxu0 %v851_v10  ;;  %814 = vmatpush3.bf16.msra.mxu1 %v851_v10 }
  0x16   : > { %781 = vmatprep.subr.bf16.mxu0 %v852_v11  ;;  %807 = vmatprep.subr.bf16.mxu1 %v852_v11 }
  0x19   : > { %782 = vmatpush3.bf16.msra.mxu0 %v853_v12  ;;  %815 = vmatpush3.bf16.msra.mxu1 %v853_v12 }
  0x1a   : > { %783 = vmatprep.subr.bf16.mxu0 %v854_v13  ;;  %808 = vmatprep.subr.bf16.mxu1 %v854_v13 }
  0x1d   : > { %784 = vmatpush3.bf16.msra.mxu0 %v855_v14  ;;  %816 = vmatpush3.bf16.msra.mxu1 %v855_v14 }
  0x1e   : > { %785 = vmatprep.subr.bf16.mxu0 %v856_v15  ;;  %809 = vmatprep.subr.bf16.mxu1 %v856_v15 }
  0x21   : > { %786 = vmatpush3.bf16.msra.mxu0 %v857_v16  ;;  %817 = vmatpush3.bf16.msra.mxu1 %v857_v16 }
  0x22   : > { %787 = vmatprep.subr.bf16.mxu0 %v858_v17  ;;  %810 = vmatprep.subr.bf16.mxu1 %v858_v17 }
  0x25   : > { %788 = vmatpush3.bf16.msra.mxu0 %v859_v18  ;;  %818 = vmatpush3.bf16.msra.mxu1 %v859_v18 }
  0x26   : > { %789 = vmatprep.subr.bf16.mxu0 %v860_v19  ;;  %811 = vmatprep.subr.bf16.mxu1 %v860_v19 }
  0x29   : > { %790 = vmatpush3.bf16.msra.mxu0 %v861_v20  ;;  %819 = vmatpush3.bf16.msra.mxu1 %v861_v20 }
  0x2a   : > { %791 = vmatprep.subr.bf16.mxu0 %v862_v21  ;;  %812 = vmatprep.subr.bf16.mxu1 %v862_v21 }
  0x2d   : > { %792 = vmatpush3.bf16.msra.mxu0 %v863_v22  ;;  %820 = vmatpush3.bf16.msra.mxu1 %v863_v22 }
  0x30   : > { %546 = vmatmul.mubr.bf16.vlgmr.msra.gmra.mxu0 %v864_v23  ;;  %554 = vmatmul.mubr.bf16.vlgmr.msra.gmra.mxu1 %v867_v24 }
  0x89   : > { %v380_v28 = vpop.permute.xlu0 %379 }
  0x8a   : > { %v390_v25 = vpop.permute.xlu1 %389 }
  0x8d   : > { %v385_v43 = vpop.permute.xlu0 %384 }
  0x8e   : > { %v395_v37 = vpop.permute.xlu1 %394 }
  0xf0   : > { %v793_v26 = vpop.f32.mrf.mxu0  ;;  %v799_v27 = vpop.f32.mrf.mxu1 }
  0xf2   : > { %v794_v29 = vpop.f32.mrf.mxu0  ;;  %v800_v30 = vpop.f32.mrf.mxu1 }
  0xf3   : > { %v795_v31 = vadd.f32 %v794_v29, %v793_v26  ;;  %v801_v32 = vadd.f32 %v800_v30, %v799_v27 }
  0xf4   : > { %v796_v33 = vpop.f32.mrf.mxu0  ;;  %v802_v34 = vpop.f32.mrf.mxu1 }
  0xf5   : > { %v548_v35 = vadd.f32 %v795_v31, %v380_v28  ;;  %v556_v36 = vadd.f32 %v801_v32, %v390_v25 }
  0xf6   : > { %v797_v38 = vpop.f32.mrf.mxu0  ;;  %v803_v39 = vpop.f32.mrf.mxu1 }
  0xf7   : > { %v568_v40 = vmul.f32 0.2, %v556_v36  ;;  %v798_v41 = vadd.f32 %v797_v38, %v796_v33  ;;  %v804_v42 = vadd.f32 %v803_v39, %v802_v34  ;;  %vm562_vm1 = vcmp.ge.f32.partialorder %v548_v35, 0.0 }
  0xf8   : > { %v566_v44 = vmul.f32 0.2, %v548_v35  ;;  %vm564_vm2 = vcmp.ge.f32.partialorder %v556_v36, 0.0 }
  0xf9   : > { %v551_v45 = vadd.f32 %v798_v41, %v385_v43  ;;  %v559_v46 = vadd.f32 %v804_v42, %v395_v37  ;;  %v572_v47 = vsel %vm564_vm2, %v556_v36, %v568_v40 }
  0xfa   : > { %v570_v48 = vsel %vm562_vm1, %v548_v35, %v566_v44  ;;  %577 = vst.msk [vmem:[%s330_s24 + $0x10] sm:$0xff] %vm574_vm0, %v572_v47  ;;  %v585_v55 = vsel %vm574_vm0, %v572_v47, 0.0 }
  0xfb   : > { %v569_v49 = vmul.f32 0.2, %v559_v46  ;;  %v579_v50 = vsel %vm574_vm0, %v570_v48, 0.0  ;;  %575 = vst.msk [vmem:[%s330_s24] sm:$0xff] %vm574_vm0, %v570_v48  ;;  %vm563_vm3 = vcmp.ge.f32.partialorder %v551_v45, 0.0  ;;  %vm565_vm4 = vcmp.ge.f32.partialorder %v559_v46, 0.0 }
  0xfc   : > { %v567_v51 = vmul.f32 0.2, %v551_v45  ;;  %580 = vadd.xlane.f32.xlu0 %v579_v50 }
  0xfd   : > { %v573_v53 = vsel %vm565_vm4, %v559_v46, %v569_v49 }
  0xfe   : > { %v571_v52 = vsel %vm563_vm3, %v551_v45, %v567_v51  ;;  %578 = vst.msk [vmem:[%s330_s24 + $0x18] sm:$0xff] %vm574_vm0, %v573_v53  ;;  %v588_v56 = vsel %vm574_vm0, %v573_v53, 0.0 }
  0xff   : > { %v582_v54 = vsel %vm574_vm0, %v571_v52, 0.0  ;;  %576 = vst.msk [vmem:[%s330_s24 + $0x8] sm:$0xff] %vm574_vm0, %v571_v52 }
 0x100   : > { %583 = vadd.xlane.f32.xlu1 %v582_v54  ;;  %586 = vadd.xlane.f32.xlu0 %v585_v55 }
 0x104   : > { %589 = vadd.xlane.f32.xlu0 %v588_v56 }
 0x185   : > { %v581_v57 = vpop.xlane.xlu0 %580 }
 0x186   : > { %v592_v58 = vmul.f32 0.0625, %v581_v57 }
 0x188   : > { %597 = vst.msk [vmem:[%s335_s27] sm:$0xff] %vm596_vm5, %v592_v58 }
 0x189   : > { %v584_v59 = vpop.xlane.xlu1 %583  ;;  %v587_v61 = vpop.xlane.xlu0 %586 }
 0x18a   : > { %v593_v60 = vmul.f32 0.0625, %v584_v59  ;;  %v594_v62 = vmul.f32 0.0625, %v587_v61 }
 0x18c   : > { %598 = vst.msk [vmem:[%s335_s27 + $0x8] sm:$0xff] %vm596_vm5, %v593_v60  ;;  %599 = vst.msk [vmem:[%s335_s27 + $0x10] sm:$0xff] %vm596_vm5, %v594_v62 }
 0x18d   : > { %v590_v63 = vpop.xlane.xlu0 %589 }
 0x18e   : > { %v595_v0 = vmul.f32 0.0625, %v590_v63 }
 0x190   : > { %600 = vst.msk [vmem:[%s335_s27 + $0x18] sm:$0xff] %vm596_vm5, %v595_v0 }
 0x191 PF: > { %s17_s23 = sadd.s32 1, %s892_s23   ;;  %s1031_s21 = smov %s888_s22 }
 0x192   : > { %p14_p5 = scmp.ge.s32.totalorder %s17_s23, 10   ;;  %s1032_s22 = smov %s1034_s2 }
 0x194   :  { %16 = sbr.rel (!%p14_p5) target bundleno = 2 (0x2), region = 88 }

// kernel: _lambda_.46
= control target key start
LH: loop header
LB: loop body
LE: loop exit
PB: predicated region body
PF: predicated region fallthrough
CT: control target
= control target key end

     0   :  { %s97_s0 = inlined_call_operand.vmem [shape: f32[2,32], index: 0, kind: input, shape index: {}]   ;;  %s98_s1 = inlined_call_operand.vmem [shape: f32[2,32], index: 1, kind: input, shape index: {}]   ;;  %s99_s2 = inlined_call_operand.hbm [shape: f32[1,1], index: 2, kind: output, shape index: {}]  }
   0x1   :  { %v12_v0 = vld [vmem:[%s97_s0] sm:$0x3] }
   0x2   :  { %v13_v1 = vld [vmem:[%s98_s1] sm:$0x3] }
   0x3   :  { %v14_v2 = vsub.f32 %v12_v0, %v13_v1 }
   0x4   :  { %7 = vsyncpa [#allocation3], 0  ;;  %vm16_vm0 = vcmask 254976   ;;  %s72_s13 = smov [#allocation2]   ;;  %vm31_vm1 = vcmask 0  }
   0x5   :  { %v15_v3 = vand.u32 2147483647, %v14_v2  ;;  %s39_s0 = sshll.u32 %s72_s13, 4  ;;  %s40_s0 = int_to_ptr.vmem [resolvable:$true] %s39_s0 }
   0x6   :  { %s50_s1 = scalar_lea.vmem %s40_s0, 16  ;;  %s54_s16 = scalar_lea.vmem %s40_s0, 32 }
   0x7   :  { %v17_v4 = vsel %vm16_vm0, %v15_v3, 0.0  ;;  %p51_p0 = scmp.ne.s32.totalorder %s40_s0, %s50_s1  ;;  %p55_p1 = scmp.lt.s32.totalorder %s40_s0, %s40_s0 }
   0x8   :  { %18 = vadd.xlane.f32.xlu0 %v17_v4  ;;  %p56_p2 = scmp.lt.s32.totalorder %s54_s16, %s50_s1 }
   0xa   :  { %p57_p3 = por %p56_p2, %p55_p1 }
   0xc   :  { %p58_p4 = pnand %p57_p3, %p51_p0 }
  0x91   :  { %v19_v5 = vpop.xlane.xlu0 %18 }
  0x92   :  { %v20_v6 = vrot.slane %v19_v5, 4 }
  0x94   :  { %v21_v7 = vadd.f32 %v20_v6, %v19_v5 }
  0x96   :  { %v22_v8 = vrot.slane %v21_v7, 2 }
  0x98   :  { %v23_v9 = vadd.f32 %v22_v8, %v21_v7 }
  0x9a   :  { %v24_v10 = vrot.slane %v23_v9, 1 }
  0x9c   :  { %v25_v11 = vadd.f32 %v24_v10, %v23_v9 }
  0x9e   :  { %47 = vpush %v25_v11 }
  0xcf   :  { %s48_s14 = spop %47 }
  0xd0   :  { %s29_s15 = smul.f32 0.015625, %s48_s14 }
  0xd2   :  { %v30_v12 = vstv %s29_s15 }
  0xd3   :  { %32 = vst.msk [vmem:[#allocation2] sm:$0x1] %vm31_vm1, %v30_v12 }
  0xd4   :  { %61 = shalt.err (!%p58_p4)
}
  0xd5   :  { %42 = dma.vmem_to_hbm [thread:$0]  %s40_s0, 16, %s99_s2, [#allocation3]  }
  0xd6   :  { %70 = dma.done.wait [#allocation3], 16  }
  0xd7   :  { %71 = vsyncadd [#allocation3], 4294967280 }
  0xd8   :  { %46 = vsyncpa [#allocation3], 1 }

// kernel: _lambda_.43
= control target key start
LH: loop header
LB: loop body
LE: loop exit
PB: predicated region body
PF: predicated region fallthrough
CT: control target
= control target key end

     0   :  { %s571_s18 = smov 0   ;;  %s573_s19 = smov 0   ;;  %s610_s0 = inlined_call_operand.vmem [shape: bf16[4,32], index: 0, kind: input, shape index: {}]   ;;  %s611_s1 = inlined_call_operand.vmem [shape: f32[4,1], index: 1, kind: input, shape index: {}]   ;;  %s612_s2 = inlined_call_operand.vmem [shape: f32[8,4,1], index: 2, kind: input, shape index: {}]   ;;  %s613_s3 = inlined_call_operand.vmem [shape: f32[8,4,1], index: 3, kind: input, shape index: {}]   ;;  %s614_s4 = inlined_call_operand.vmem [shape: bf16[8,32,16], index: 4, kind: input, shape index: {}]   ;;  %s615_s5 = inlined_call_operand.vmem [shape: f32[8,4,16], index: 5, kind: output, shape index: {}]  }
   0x1   :  { %s575_s20 = smov 0  }
   0x2 LB: > { %s27_s2 = sadd.s32 1, %s532_s19  ;;  %p463_p0 = scmp.ge.s32.totalorder %s536_s20, 1  ;;  %s536_s20 = sphi %s575_s20, %s15_s20   ;;  %s532_s19 = sphi %s573_s19, %s617_s19   ;;  %s528_s18 = sphi %s571_s18, %s616_s18  }
   0x3   : > { %p29_p1 = scmp.ge.s32.totalorder %s27_s2, 8  ;;  %p224_p2 = scmp.lt.s32.totalorder %s536_s20, 9 }
   0x5   : > { %s619_s2 = smov (%p29_p1, %s27_s2), 0  ;;  %p225_p3 = pnand %p463_p0, %p224_p2 }
   0x6   : > { %p273_p4 = scmp.lt.s32.totalorder (!%p225_p3), %s528_s18, 7 }
   0x7   : > { %228 = sbr.rel (%p225_p3) target bundleno = 222 (0xde), region = 40 }
   0xc   : > { %v538_v0 = vmov 0.0   ;;  %vm539_vm0 = vmmov 0   ;;  %v294_v1 = vld [vmem:[%s611_s1] sm:$0xf]  ;;  %s621_s18 = smov (!%p273_p4, %s528_s18), 7  ;;  %v540_v2 = vmov 0  }
   0xd   : > { %476 = vmatprep.subr.bf16.mxu0 %v538_v0  ;;  %480 = vmatprep.mubr.msk.bf16.mxu0 %vm539_vm0, %v538_v0  ;;  %s472_s22 = sshll.u32 %s621_s18, 4  ;;  %v289_v5 = vld [vmem:[%s610_s0] sm:$0x3]  ;;  %vm312_vm1 = vcmask 261120   ;;  %s466_s28 = sshll.u32 %s621_s18, 2  ;;  %vm356_vm2 = vcmask 125952  }
   0xe   : > { %511 = vset.pattern.permute.xlu0 %v540_v2  ;;  %s280_s25 = scalar_lea.vmem %s614_s4, %s472_s22  ;;  %s287_s6 = scalar_lea.vmem %s615_s5, %s466_s28 }
   0xf   : > { %297 = vperm.xlu0 %511, %v294_v1   ;;  %v512_v3 = vld [vmem:[%s280_s25 + $0x8] sm:$0xff]   ;;  %v513_v4 = vld [vmem:[%s280_s25] sm:$0xff]  }
  0x10   : > { %477 = vmatpush3.bf16.msra.mxu0 %v512_v3 }
  0x11   : > { %478 = vmatprep.subr.bf16.mxu0 %v538_v0 }
  0x14   : > { %479 = vmatpush3.bf16.msra.mxu0 %v513_v4 }
  0x17   : > { %481 = vmatmul.mubr.msk.bf16.vlgmr.msra.gmra.mxu0 %vm312_vm1, %v289_v5 }
  0x8a   : > { %v298_v6 = vpop.permute.xlu0 %297 }
  0xd7   : > { %v350_v7 = vpop.f32.mrf.mxu0 }
  0xd8   : > { %v351_v8 = vadd.f32 %v350_v7, %v298_v6 }
  0xd9   : > { %v482_v9 = vpop.f32.mrf.mxu0 }
  0xda   : > { %357 = vst.msk [vmem:[%s287_s6] sm:$0xf] %vm356_vm2, %v351_v8 }
  0xdb   : > { %v353_v10 = vpop.f32.mrf.mxu0 }
  0xdd   : > { %v483_v11 = vpop.f32.mrf.mxu0 }
  0xde PF: > { %s15_s20 = sadd.s32 1, %s536_s20   ;;  %s616_s18 = smov %s532_s19 }
  0xdf   : > { %p12_p5 = scmp.ge.s32.totalorder %s15_s20, 10   ;;  %s617_s19 = smov %s619_s2 }
  0xe1   :  { %14 = sbr.rel (!%p12_p5) target bundleno = 2 (0x2), region = 76 }

// kernel: _lambda_.44
= control target key start
LH: loop header
LB: loop body
LE: loop exit
PB: predicated region body
PF: predicated region fallthrough
CT: control target
= control target key end

     0   :  { %8 = vsyncpa [#allocation3], 0  ;;  %vm13_vm0 = vcmask 125952   ;;  %s158_s0 = inlined_call_operand.vmem [shape: f32[4,16], index: 0, kind: input, shape index: {}]   ;;  %s159_s1 = inlined_call_operand.hbm [shape: f32[1,1], index: 1, kind: output, shape index: {0}]   ;;  %s160_s2 = inlined_call_operand.hbm [shape: f32[1,1], index: 2, kind: output, shape index: {1}]  }
   0x1   :  { %v12_v0 = vld [vmem:[%s158_s0] sm:$0xf] }
   0x2   :  { %9 = vsyncpa [#allocation5], 0  ;;  %v14_v1 = vsel %vm13_vm0, %v12_v0, 0.0  ;;  %vm31_vm1 = vcmp.ge.f32.partialorder %v12_v0, 0.0  ;;  %v129_v2 = vmov 0.0   ;;  %s130_s12 = smov [#allocation2]  }
   0x3   :  { %15 = vadd.xlane.f32.xlu0 %v14_v1  ;;  %v77_v3 = vsel %vm31_vm1, 1.0, %v129_v2  ;;  %s55_s13 = sshll.u32 %s130_s12, 4  ;;  %vm29_vm2 = vcmask 0   ;;  %s131_s15 = smov [#allocation4]   ;;  %s56_s13 = int_to_ptr.vmem [resolvable:$true] %s55_s13 }
   0x4   :  { %v34_v4 = vsel %vm13_vm0, %v77_v3, 0.0  ;;  %s65_s16 = sshll.u32 %s131_s15, 4  ;;  %s85_s19 = scalar_lea.vmem %s56_s13, 16  ;;  %s66_s16 = int_to_ptr.vmem [resolvable:$true] %s65_s16 }
   0x5   :  { %p86_p0 = scmp.ne.s32.totalorder %s56_s13, %s85_s19  ;;  %s89_s20 = scalar_lea.vmem %s56_s13, 32 }
   0x6   :  { %p90_p1 = scmp.lt.s32.totalorder %s56_s13, %s56_s13  ;;  %p91_p2 = scmp.lt.s32.totalorder %s89_s20, %s85_s19 }
   0x7   :  { %35 = vadd.xlane.f32.xlu0 %v34_v4 }
   0x8   :  { %p92_p3 = por %p91_p2, %p90_p1 }
   0xa   :  { %p93_p4 = pnand %p92_p3, %p86_p0 }
  0x8c   :  { %v16_v5 = vpop.xlane.xlu0 %15 }
  0x8d   :  { %v17_v6 = vrot.slane %v16_v5, 4 }
  0x8f   :  { %v18_v7 = vadd.f32 %v17_v6, %v16_v5 }
  0x90   :  { %v36_v8 = vpop.xlane.xlu0 %35 }
  0x91   :  { %v19_v9 = vrot.slane %v18_v7, 2  ;;  %v37_v10 = vrot.slane %v36_v8, 4 }
  0x93   :  { %v38_v11 = vadd.f32 %v37_v10, %v36_v8  ;;  %v20_v12 = vadd.f32 %v19_v9, %v18_v7 }
  0x95   :  { %v39_v13 = vrot.slane %v38_v11, 2  ;;  %v21_v14 = vrot.slane %v20_v12, 1 }
  0x97   :  { %v40_v15 = vadd.f32 %v39_v13, %v38_v11  ;;  %v22_v16 = vadd.f32 %v21_v14, %v20_v12 }
  0x99   :  { %78 = vpush %v22_v16  ;;  %v41_v17 = vrot.slane %v40_v15, 1 }
  0x9b   :  { %v42_v18 = vadd.f32 %v41_v17, %v40_v15 }
  0x9d   :  { %80 = vpush %v42_v18 }
  0xca   :  { %s79_s0 = spop %78 }
  0xcb   :  { %s26_s11 = smul.f32 0.015625, %s79_s0 }
  0xcd   :  { %s27_s14 = ssub.f32 0.0, %s26_s11 }
  0xce   :  { %s81_s17 = spop %80 }
  0xcf   :  { %s46_s18 = smul.f32 0.015625, %s81_s17  ;;  %v28_v19 = vstv %s27_s14 }
  0xd0   :  { %30 = vst.msk [vmem:[#allocation2] sm:$0x1] %vm29_vm2, %v28_v19 }
  0xd1   :  { %v47_v20 = vstv %s46_s18 }
  0xd2   :  { %96 = shalt.err (!%p93_p4)
}
  0xd3   :  { %58 = dma.vmem_to_hbm [thread:$0]  %s56_s13, 16, %s159_s1, [#allocation3]   ;;  %48 = vst.msk [vmem:[#allocation4] sm:$0x1] %vm29_vm2, %v47_v20 }
  0xd4   :  { %s105_s23 = scalar_lea.vmem %s66_s16, 16  ;;  %s109_s24 = scalar_lea.vmem %s66_s16, 32 }
  0xd5   :  { %p106_p5 = scmp.ne.s32.totalorder %s66_s16, %s105_s23  ;;  %p110_p6 = scmp.lt.s32.totalorder %s66_s16, %s66_s16 }
  0xd6   :  { %p111_p7 = scmp.lt.s32.totalorder %s109_s24, %s105_s23 }
  0xd8   :  { %p112_p8 = por %p111_p7, %p110_p6 }
  0xda   :  { %p113_p9 = pnand %p112_p8, %p106_p5 }
  0xdc   :  { %116 = shalt.err (!%p113_p9)
}
  0xdd   :  { %68 = dma.vmem_to_hbm [thread:$0]  %s66_s16, 16, %s160_s2, [#allocation5]  }
  0xde   :  { %125 = dma.done.wait [#allocation3], 16  }
  0xdf   :  { %126 = vsyncadd [#allocation3], 4294967280 }
  0xe0   :  { %127 = dma.done.wait [#allocation5], 16  }
  0xe1   :  { %128 = vsyncadd [#allocation5], 4294967280 }
  0xe2   :  { %75 = vsyncpa [#allocation3], 1 }
  0xe3   :  { %76 = vsyncpa [#allocation5], 1 }

// kernel: _lambda_.47
= control target key start
LH: loop header
LB: loop body
LE: loop exit
PB: predicated region body
PF: predicated region fallthrough
CT: control target
= control target key end

     0   :  { %v26_v3 = vlaneseq  ;;  %v120_v6 = vmov 1983009808   ;;  %s152_s0 = inlined_call_operand.vmem [shape: f32[2,768], index: 0, kind: input, shape index: {}]   ;;  %s153_s1 = inlined_call_operand.vmem [shape: f32[2,768], index: 1, kind: input, shape index: {}]   ;;  %s154_s2 = inlined_call_operand.hbm [shape: f32[1,1], index: 2, kind: output, shape index: {}]  }
   0x1   :  { %v12_v0 = vld [vmem:[%s152_s0] sm:$0xff]  ;;  %v13_v1 = vld [vmem:[%s152_s0 + $0x8] sm:$0xf]  ;;  %v24_v7 = vunpack.c.l.s4 %v120_v6 }
   0x2   :  { %v14_v2 = vld [vmem:[%s153_s1] sm:$0xff]  ;;  %v15_v4 = vld [vmem:[%s153_s1 + $0x8] sm:$0xf] }
   0x3   :  { %v16_v5 = vsub.f32 %v12_v0, %v14_v2 }
   0x4   :  { %7 = vsyncpa [#allocation3], 0  ;;  %v17_v8 = vsub.f32 %v13_v1, %v15_v4  ;;  %v27_v9 = vshrl.u32 %v26_v3, 7  ;;  %v25_v11 = vunpack.c.0.s8 %v24_v7  ;;  %vm53_vm0 = vcmask 1041408   ;;  %s121_s0 = smov [#allocation2]  }
   0x5   :  { %v18_v10 = vand.u32 2147483647, %v16_v5  ;;  %s86_s1 = sshll.u32 %s121_s0, 4  ;;  %vm78_vm1 = vcmask 0   ;;  %s87_s1 = int_to_ptr.vmem [resolvable:$true] %s86_s1 }
   0x6   :  { %v19_v12 = vand.u32 2147483647, %v17_v8  ;;  %v28_v14 = vsub.s32 %v25_v11, %v27_v9  ;;  %s98_s19 = scalar_lea.vmem %s87_s1, 16  ;;  %s102_s20 = scalar_lea.vmem %s87_s1, 32 }
   0x7   :  { %v22_v13 = vcombine.high %v18_v10, %v18_v10  ;;  %p99_p0 = scmp.ne.s32.totalorder %s87_s1, %s98_s19  ;;  %p103_p1 = scmp.lt.s32.totalorder %s87_s1, %s87_s1 }
   0x8   :  { %v29_v15 = vrot.slane %v18_v10, %v28_v14  ;;  %v45_v19 = vrot.slane %v19_v12, %v28_v14  ;;  %p104_p2 = scmp.lt.s32.totalorder %s102_s20, %s98_s19 }
   0x9   :  { %v36_v16 = vrot.slane %v22_v13, %v28_v14 }
   0xa   :  { %v37_v17 = vcombine.high %v29_v15, %v29_v15  ;;  %v54_v20 = vsel %vm53_vm0, %v29_v15, 0.0  ;;  %v46_v24 = vcombine.high %v45_v19, %v45_v19  ;;  %v61_v27 = vsel %vm53_vm0, %v45_v19, 0.0  ;;  %p105_p3 = por %p104_p2, %p103_p1 }
   0xb   :  { %v38_v18 = vcombine.high %v36_v16, %v36_v16  ;;  %v57_v22 = vsel %vm53_vm0, %v36_v16, 0.0 }
   0xc   :  { %v55_v21 = vsel %vm53_vm0, %v37_v17, 0.0  ;;  %v63_v29 = vsel %vm53_vm0, %v46_v24, 0.0  ;;  %p106_p4 = pnand %p105_p3, %p99_p0 }
   0xd   :  { %v56_v23 = vadd.f32 %v55_v21, %v54_v20  ;;  %v59_v25 = vsel %vm53_vm0, %v38_v18, 0.0 }
   0xf   :  { %v58_v26 = vadd.f32 %v57_v22, %v56_v23 }
  0x11   :  { %v60_v28 = vadd.f32 %v59_v25, %v58_v26 }
  0x13   :  { %v62_v30 = vadd.f32 %v61_v27, %v60_v28 }
  0x15   :  { %v64_v31 = vadd.f32 %v63_v29, %v62_v30 }
  0x17   :  { %65 = vadd.xlane.f32.xlu0 %v64_v31 }
  0xa0   :  { %v66_v32 = vpop.xlane.xlu0 %65 }
  0xa1   :  { %v67_v33 = vrot.slane %v66_v32, 4 }
  0xa3   :  { %v68_v34 = vadd.f32 %v67_v33, %v66_v32 }
  0xa5   :  { %v69_v35 = vrot.slane %v68_v34, 2 }
  0xa7   :  { %v70_v36 = vadd.f32 %v69_v35, %v68_v34 }
  0xa9   :  { %v71_v37 = vrot.slane %v70_v36, 1 }
  0xab   :  { %v72_v38 = vadd.f32 %v71_v37, %v70_v36 }
  0xad   :  { %94 = vpush %v72_v38 }
  0xde   :  { %s95_s17 = spop %94 }
  0xdf   :  { %s76_s18 = smul.f32 0.0006510417, %s95_s17 }
  0xe1   :  { %v77_v39 = vstv %s76_s18 }
  0xe2   :  { %79 = vst.msk [vmem:[#allocation2] sm:$0x1] %vm78_vm1, %v77_v39 }
  0xe3   :  { %109 = shalt.err (!%p106_p4)
}
  0xe4   :  { %89 = dma.vmem_to_hbm [thread:$0]  %s87_s1, 16, %s154_s2, [#allocation3]  }
  0xe5   :  { %118 = dma.done.wait [#allocation3], 16  }
  0xe6   :  { %119 = vsyncadd [#allocation3], 4294967280 }
  0xe7   :  { %93 = vsyncpa [#allocation3], 1 }

</bundles_post_ra>
